<compile_context>
chip_gen: v6e
topology: v6e:2x2x1
jax: 0.10.0
libtpu: 0.0.40
codegen_flags: <defaults>
</compile_context>

<pallas_src>
import functools

import jax
import jax.numpy as jnp
from jax import lax
from jax.experimental import pallas as pl
from jax.experimental.pallas import tpu as pltpu

_LANE = 128


def _round_up(x, m):
    return ((x + m - 1) // m) * m


def _largest_divisor_leq(n, cap):
    cap = max(1, min(n, cap))
    for d in range(cap, 0, -1):
        if n % d == 0:
            return d
    return 1


def _make_kernel(H, W, Cp, Pp, stride, has_shortcut_conv, th1, th2):
    """Cp/Pp are the lane-padded input/output channel counts."""
    Ho = (H - 1) // stride + 1
    Wo = (W - 1) // stride + 1
    nb1 = H // th1          # row blocks for conv1 (stride-1 output rows)
    nb2 = Ho // th2         # row blocks for conv2 output rows

    def kernel(*refs):
        if has_shortcut_conv:
            (x_ref, s1_ref, b1_ref, w1_ref, s2_ref, b2_ref, w2_ref,
             wsc_ref, o_ref, pad1, pad2) = refs
        else:
            (x_ref, s1_ref, b1_ref, w1_ref, s2_ref, b2_ref, w2_ref,
             o_ref, pad1, pad2) = refs
            wsc_ref = None

        # ---- zero only the 1-pixel halo border of the padded scratch buffers.
        # The interior is fully overwritten every step; re-zeroing the (small) border
        # each step keeps this correct under megacore grid sharding.
        pad1[0:1, :, :] = jnp.zeros((1, W + 2, Cp), jnp.bfloat16)
        pad1[H + 1:H + 2, :, :] = jnp.zeros((1, W + 2, Cp), jnp.bfloat16)
        pad1[:, 0:1, :] = jnp.zeros((H + 2, 1, Cp), jnp.bfloat16)
        pad1[:, W + 1:W + 2, :] = jnp.zeros((H + 2, 1, Cp), jnp.bfloat16)
        pad2[0:1, :, :] = jnp.zeros((1, W + 2, Pp), jnp.bfloat16)
        pad2[H + 1:H + 2, :, :] = jnp.zeros((1, W + 2, Pp), jnp.bfloat16)
        pad2[:, 0:1, :] = jnp.zeros((H + 2, 1, Pp), jnp.bfloat16)
        pad2[:, W + 1:W + 2, :] = jnp.zeros((H + 2, 1, Pp), jnp.bfloat16)

        s1 = s1_ref[...]          # (1, Cp) f32
        b1 = b1_ref[...]
        s2 = s2_ref[...]          # (1, Pp) f32
        b2 = b2_ref[...]

        # ---- stage 1: BN1 + ReLU (f32 on the VPU), cast to bf16 into pad1 interior
        def bn1_body(rb, carry):
            r0 = pl.multiple_of(rb * th1, th1)
            xblk = x_ref[0, pl.ds(r0, th1), :, :]                       # (th1, W, Cp) f32
            h = jnp.maximum(xblk * s1 + b1, 0.0)
            pad1[pl.ds(r0 + 1, th1), 1:W + 1, :] = h.astype(jnp.bfloat16)
            return carry

        lax.fori_loop(0, nb1, bn1_body, 0, unroll=(nb1 <= 4))

        # ---- stage 2: conv1 (3x3, stride 1) as 9 bf16 matmuls per row block,
        #      fused with BN2 + ReLU, result (bf16) -> pad2 interior.
        #      (dropout: eval-mode identity, see TODO above)
        def conv1_body(rb, carry):
            r0 = pl.multiple_of(rb * th1, th1)
            acc = jnp.zeros((th1 * W, Pp), jnp.float32)
            for dy in range(3):
                for dx in range(3):
                    patch = pad1[pl.ds(r0 + dy, th1), pl.ds(dx, W), :]   # (th1, W, Cp) bf16
                    acc = acc + jnp.dot(patch.reshape(th1 * W, Cp), w1_ref[dy, dx],
                                        preferred_element_type=jnp.float32)
            out1 = acc.reshape(th1, W, Pp)
            h2 = jnp.maximum(out1 * s2 + b2, 0.0)                        # f32 VPU
            pad2[pl.ds(r0 + 1, th1), 1:W + 1, :] = h2.astype(jnp.bfloat16)
            return carry

        lax.fori_loop(0, nb1, conv1_body, 0, unroll=(nb1 <= 4))

        # ---- stage 3: conv2 (3x3, stride s) computed only at strided output
        #      positions, plus shortcut, per output-row block.
        def conv2_body(rb, carry):
            r0 = pl.multiple_of(rb * th2, th2)
            row_span = (th2 - 1) * stride + 1
            col_span = (Wo - 1) * stride + 1
            acc = jnp.zeros((th2 * Wo, Pp), jnp.float32)
            for dy in range(3):
                for dx in range(3):
                    if stride == 1:
                        patch = pad2[pl.ds(r0 + dy, th2), pl.ds(dx, Wo), :]
                    else:
                        full = pad2[pl.ds(r0 * stride + dy, row_span),
                                    pl.ds(dx, col_span), :]
                        patch = full[::stride, ::stride, :]              # (th2, Wo, Pp)
                    acc = acc + jnp.dot(patch.reshape(th2 * Wo, Pp), w2_ref[dy, dx],
                                        preferred_element_type=jnp.float32)
            out2 = acc.reshape(th2, Wo, Pp)

            if has_shortcut_conv:
                if stride == 1:
                    xs = x_ref[0, pl.ds(r0, th2), :, :]                  # (th2, W, Cp)
                else:
                    xs = x_ref[0, pl.ds(r0 * stride, row_span), :, :]
                    xs = xs[::stride, ::stride, :]                       # (th2, Wo, Cp)
                short = jnp.dot(xs.astype(jnp.bfloat16).reshape(th2 * Wo, Cp),
                                wsc_ref[...],
                                preferred_element_type=jnp.float32
                                ).reshape(th2, Wo, Pp)
            else:
                # identity shortcut: Cp == Pp, stride == 1
                short = x_ref[0, pl.ds(r0, th2), :, :]

            o_ref[0, pl.ds(r0, th2), :, :] = (out2 + short).astype(o_ref.dtype)
            return carry

        lax.fori_loop(0, nb2, conv2_body, 0, unroll=(nb2 <= 4))

    return kernel, Ho, Wo


def wide_basic_forward(x_nchw, params, *, stride=1):
    """Forward pass of wide_basic. x_nchw: (B, Cin, H, W) float32, NCHW like PyTorch."""
    x_nhwc = jnp.transpose(x_nchw, (0, 2, 3, 1)).astype(jnp.float32)    # NCHW -> NHWC
    B, H, W, Cin = x_nhwc.shape
    planes = params["conv1_w"].shape[0]
    has_sc = (stride != 1) or (Cin != planes)
    eps = 1e-5

    # lane-dense channel padding (zeros in the padded channels are exact no-ops)
    Cp = _round_up(Cin, _LANE)
    Pp = _round_up(planes, _LANE)

    # Fold BatchNorm (eval mode, running stats) into per-channel scale/bias (f32).
    s1 = params["bn1_gamma"] / jnp.sqrt(params["bn1_var"] + eps)
    b1 = params["bn1_beta"] - params["bn1_mean"] * s1
    s2 = params["bn2_gamma"] / jnp.sqrt(params["bn2_var"] + eps)
    b2 = params["bn2_beta"] - params["bn2_mean"] * s2

    def padc(v, n):
        return jnp.pad(v, (0, n - v.shape[0])).reshape(1, n).astype(jnp.float32)

    x_p = jnp.pad(x_nhwc, ((0, 0), (0, 0), (0, 0), (0, Cp - Cin)))

    # Conv weights: PyTorch OIHW -> HWIO, zero-padded channels, bf16 for the MXU.
    w1 = jnp.transpose(params["conv1_w"], (2, 3, 1, 0))
    w1 = jnp.pad(w1, ((0, 0), (0, 0), (0, Cp - Cin), (0, Pp - planes))).astype(jnp.bfloat16)
    w2 = jnp.transpose(params["conv2_w"], (2, 3, 1, 0))
    w2 = jnp.pad(w2, ((0, 0), (0, 0), (0, Pp - planes), (0, Pp - planes))).astype(jnp.bfloat16)

    Ho = (H - 1) // stride + 1
    Wo = (W - 1) // stride + 1

    # Row-block sizes chosen so each f32 accumulator is <= ~64 KiB (fits in vregs).
    th1 = _largest_divisor_leq(H, max(1, (64 * 1024) // max(1, W * Pp * 4)))
    th2 = _largest_divisor_leq(Ho, max(1, (64 * 1024) // max(1, Wo * Pp * 4)))

    kernel, Ho, Wo = _make_kernel(H, W, Cp, Pp, stride, has_sc, th1, th2)

    in_specs = [
        pl.BlockSpec((1, H, W, Cp), lambda b: (b, 0, 0, 0)),           # x: one image / step
        pl.BlockSpec((1, Cp), lambda b: (0, 0)),                       # bn1 scale
        pl.BlockSpec((1, Cp), lambda b: (0, 0)),                       # bn1 bias
        pl.BlockSpec((3, 3, Cp, Pp), lambda b: (0, 0, 0, 0)),          # conv1 weights (bf16)
        pl.BlockSpec((1, Pp), lambda b: (0, 0)),                       # bn2 scale
        pl.BlockSpec((1, Pp), lambda b: (0, 0)),                       # bn2 bias
        pl.BlockSpec((3, 3, Pp, Pp), lambda b: (0, 0, 0, 0)),          # conv2 weights (bf16)
    ]
    args = [x_p, padc(s1, Cp), padc(b1, Cp), w1, padc(s2, Pp), padc(b2, Pp), w2]
    if has_sc:
        wsc = jnp.transpose(params["shortcut_w"], (2, 3, 1, 0)).reshape(Cin, planes)
        wsc = jnp.pad(wsc, ((0, Cp - Cin), (0, Pp - planes))).astype(jnp.bfloat16)
        in_specs.append(pl.BlockSpec((Cp, Pp), lambda b: (0, 0)))
        args.append(wsc)

    # Cost estimate (helps XLA schedule the custom call vs the boundary transposes).
    flops = B * (2 * H * W * 9 * Cp * Pp + 2 * Ho * Wo * 9 * Pp * Pp
                 + (2 * Ho * Wo * Cp * Pp if has_sc else 0))
    bytes_accessed = (x_p.size * 4 + w1.size * 2 + w2.size * 2
                      + (Cp * Pp * 2 if has_sc else 0)
                      + 2 * (Cp + Pp) * 4 + B * Ho * Wo * Pp * 4)

    # Explicit VMEM budget: double-buffered blocks + scratch, with headroom, clamped
    # so the request is safe even on v7x's 64 MiB VMEM.
    per_step = (2 * (H * W * Cp * 4) + 2 * (Ho * Wo * Pp * 4)
                + 2 * 2 * (9 * Cp * Pp + 9 * Pp * Pp + (Cp * Pp if has_sc else 0))
                + 2 * ((H + 2) * (W + 2) * (Cp + Pp)))
    vmem_limit = int(min(max(per_step * 2, 32 * 2 ** 20), 56 * 2 ** 20))

    out_nhwc = pl.pallas_call(
        kernel,
        out_shape=jax.ShapeDtypeStruct((B, Ho, Wo, Pp), jnp.float32),
        grid_spec=pltpu.PrefetchScalarGridSpec(
            num_scalar_prefetch=0,
            grid=(B,),
            in_specs=in_specs,
            out_specs=pl.BlockSpec((1, Ho, Wo, Pp), lambda b: (b, 0, 0, 0)),
            scratch_shapes=[
                pltpu.VMEM((H + 2, W + 2, Cp), jnp.bfloat16),   # padded BN1(x)
                pltpu.VMEM((H + 2, W + 2, Pp), jnp.bfloat16),   # padded BN2(conv1)
            ],
        ),
        compiler_params=pltpu.CompilerParams(
            dimension_semantics=("parallel",),
            vmem_limit_bytes=vmem_limit,
        ),
        cost_estimate=pl.CostEstimate(flops=flops, transcendentals=0,
                                      bytes_accessed=bytes_accessed),
    )(*args)

    out_nhwc = out_nhwc[..., :planes]                                   # drop lane padding
    return jnp.transpose(out_nhwc, (0, 3, 1, 2))                        # NHWC -> NCHW


# ---------------------------------------------------------------------------
# Pure-JAX reference (XLA convs, f32) for correctness checking.
# ---------------------------------------------------------------------------
def wide_basic_reference(x, params, *, stride=1):
    eps = 1e-5

    def bn(v, g, b, m, var):
        return (v - m[None, :, None, None]) / jnp.sqrt(var[None, :, None, None] + eps) \
               * g[None, :, None, None] + b[None, :, None, None]

    dn = ("NCHW", "OIHW", "NCHW")
    h = jax.nn.relu(bn(x, params["bn1_gamma"], params["bn1_beta"],
                       params["bn1_mean"], params["bn1_var"]))
    out = lax.conv_general_dilated(h, params["conv1_w"], (1, 1),
                                   ((1, 1), (1, 1)), dimension_numbers=dn)
    h2 = jax.nn.relu(bn(out, params["bn2_gamma"], params["bn2_beta"],
                        params["bn2_mean"], params["bn2_var"]))
    out = lax.conv_general_dilated(h2, params["conv2_w"], (stride, stride),
                                   ((1, 1), (1, 1)), dimension_numbers=dn)
    if (stride != 1) or (params["conv1_w"].shape[1] != params["conv1_w"].shape[0]):
        short = lax.conv_general_dilated(x, params["shortcut_w"], (stride, stride),
                                         ((0, 0), (0, 0)), dimension_numbers=dn)
    else:
        short = x
    return out + short


def init_params(key, in_planes, planes, has_shortcut):
    ks = jax.random.split(key, 8)
    p = {
        "bn1_gamma": 1.0 + 0.1 * jax.random.normal(ks[0], (in_planes,), jnp.float32),
        "bn1_beta": 0.1 * jax.random.normal(ks[1], (in_planes,), jnp.float32),
        "bn1_mean": 0.1 * jax.random.normal(ks[2], (in_planes,), jnp.float32),
        "bn1_var": 0.5 + jax.random.uniform(ks[3], (in_planes,), jnp.float32),
        "conv1_w": 0.24 * jax.random.normal(ks[4], (planes, in_planes, 3, 3), jnp.float32),
        "bn2_gamma": 1.0 + 0.1 * jax.random.normal(ks[5], (planes,), jnp.float32),
        "bn2_beta": 0.1 * jax.random.normal(ks[6], (planes,), jnp.float32),
        "bn2_mean": jnp.zeros((planes,), jnp.float32),
        "bn2_var": jnp.ones((planes,), jnp.float32),
        "conv2_w": 0.17 * jax.random.normal(ks[7], (planes, planes, 3, 3), jnp.float32),
    }
    if has_shortcut:
        p["shortcut_w"] = 0.5 * jax.random.normal(
            jax.random.fold_in(key, 99), (planes, in_planes, 1, 1), jnp.float32)
    return p


if __name__ == "__main__":
    # (B, in_planes, planes, H, W, stride) — covers 1x1-conv shortcut (stride 1),
    # identity shortcut, and the strided block with strided shortcut conv.
    configs = [
        (2, 4, 8, 16, 16, 1),
        (2, 8, 8, 16, 16, 1),
        (2, 8, 16, 16, 16, 2),
    ]
    key = jax.random.PRNGKey(0)
    for idx, (B, cin, planes, H, W, stride) in enumerate(configs):
        kx, kp = jax.random.split(jax.random.fold_in(key, idx))
        has_shortcut = (stride != 1) or (cin != planes)
        x = jax.random.normal(kx, (B, cin, H, W), jnp.float32)   # NCHW, like PyTorch
        params = init_params(kp, cin, planes, has_shortcut)

        fwd = jax.jit(functools.partial(wide_basic_forward, stride=stride))
        out = jax.block_until_ready(fwd(x, params))

        ref = wide_basic_reference(x, params, stride=stride)
        assert out.shape == ref.shape, (out.shape, ref.shape)
        err = float(jnp.max(jnp.abs(out - ref)))
        scale = float(jnp.max(jnp.abs(ref))) + 1e-6
        # bf16 MXU inputs with f32 accumulation: ~4e-2 relative-to-max tolerance.
        assert err / scale < 4e-2, \
            f"config {idx}: rel err {err / scale:.4f} (abs {err:.4f}, scale {scale:.3f})"

    print("KERNEL_OK")
</pallas_src>

<mosaic_0001>
module attributes {stable_mosaic.version = 11 : i64} {
  func.func @kernel(%arg0: i32, %arg1: memref<1x16x16x128xf32, #tpu.memory_space<vmem>>, %arg2: memref<1x128xf32, #tpu.memory_space<vmem>>, %arg3: memref<1x128xf32, #tpu.memory_space<vmem>>, %arg4: memref<3x3x128x128xbf16, #tpu.memory_space<vmem>>, %arg5: memref<1x128xf32, #tpu.memory_space<vmem>>, %arg6: memref<1x128xf32, #tpu.memory_space<vmem>>, %arg7: memref<3x3x128x128xbf16, #tpu.memory_space<vmem>>, %arg8: memref<128x128xbf16, #tpu.memory_space<vmem>>, %arg9: memref<1x16x16x128xf32, #tpu.memory_space<vmem>>, %arg10: memref<18x18x128xbf16, #tpu.memory_space<vmem>>, %arg11: memref<18x18x128xbf16, #tpu.memory_space<vmem>>) attributes {dimension_semantics = [#tpu.dimension_semantics<parallel>], iteration_bounds = array<i64: 2>, scalar_prefetch = 0 : i64, scratch_operands = 2 : i64, tpu.core_type = #tpu.core_type<tc>, window_params = [{transform_indices = @transform_0, window_bounds = array<i64: 1, 16, 16, 128>}, {pipeline_mode = #tpu.pipeline_mode<synchronous>, transform_indices = @transform_1, window_bounds = array<i64: 1, 128>}, {pipeline_mode = #tpu.pipeline_mode<synchronous>, transform_indices = @transform_2, window_bounds = array<i64: 1, 128>}, {pipeline_mode = #tpu.pipeline_mode<synchronous>, transform_indices = @transform_3, window_bounds = array<i64: 3, 3, 128, 128>}, {pipeline_mode = #tpu.pipeline_mode<synchronous>, transform_indices = @transform_4, window_bounds = array<i64: 1, 128>}, {pipeline_mode = #tpu.pipeline_mode<synchronous>, transform_indices = @transform_5, window_bounds = array<i64: 1, 128>}, {pipeline_mode = #tpu.pipeline_mode<synchronous>, transform_indices = @transform_6, window_bounds = array<i64: 3, 3, 128, 128>}, {pipeline_mode = #tpu.pipeline_mode<synchronous>, transform_indices = @transform_7, window_bounds = array<i64: 128, 128>}, {transform_indices = @transform_8, window_bounds = array<i64: 1, 16, 16, 128>}]} {
    %cst = arith.constant 0.000000e+00 : bf16
    %0 = vector.broadcast %cst : bf16 to vector<1x18x128xbf16>
    %c0 = arith.constant 0 : index
    %c0_0 = arith.constant 0 : index
    %c0_1 = arith.constant 0 : index
    %1 = vector.load %arg10[%c0, %c0_0, %c0_1] : memref<18x18x128xbf16, #tpu.memory_space<vmem>>, vector<1x18x128xbf16>
    tpu.vector_store %arg10[%c0, %c0_0, %c0_1], %0 {strides = array<i32>} : memref<18x18x128xbf16, #tpu.memory_space<vmem>>, vector<1x18x128xbf16>,
    %cst_2 = arith.constant 0.000000e+00 : bf16
    %2 = vector.broadcast %cst_2 : bf16 to vector<1x18x128xbf16>
    %c17 = arith.constant 17 : index
    %c0_3 = arith.constant 0 : index
    %c0_4 = arith.constant 0 : index
    %3 = vector.load %arg10[%c17, %c0_3, %c0_4] : memref<18x18x128xbf16, #tpu.memory_space<vmem>>, vector<1x18x128xbf16>
    tpu.vector_store %arg10[%c17, %c0_3, %c0_4], %2 {strides = array<i32>} : memref<18x18x128xbf16, #tpu.memory_space<vmem>>, vector<1x18x128xbf16>,
    %cst_5 = arith.constant 0.000000e+00 : bf16
    %4 = vector.broadcast %cst_5 : bf16 to vector<18x1x128xbf16>
    %c0_6 = arith.constant 0 : index
    %c0_7 = arith.constant 0 : index
    %c0_8 = arith.constant 0 : index
    %5 = vector.load %arg10[%c0_6, %c0_7, %c0_8] : memref<18x18x128xbf16, #tpu.memory_space<vmem>>, vector<18x1x128xbf16>
    tpu.vector_store %arg10[%c0_6, %c0_7, %c0_8], %4 {strides = array<i32>} : memref<18x18x128xbf16, #tpu.memory_space<vmem>>, vector<18x1x128xbf16>,
    %cst_9 = arith.constant 0.000000e+00 : bf16
    %6 = vector.broadcast %cst_9 : bf16 to vector<18x1x128xbf16>
    %c0_10 = arith.constant 0 : index
    %c17_11 = arith.constant 17 : index
    %c0_12 = arith.constant 0 : index
    %7 = vector.load %arg10[%c0_10, %c17_11, %c0_12] : memref<18x18x128xbf16, #tpu.memory_space<vmem>>, vector<18x1x128xbf16>
    tpu.vector_store %arg10[%c0_10, %c17_11, %c0_12], %6 {strides = array<i32>} : memref<18x18x128xbf16, #tpu.memory_space<vmem>>, vector<18x1x128xbf16>,
    %cst_13 = arith.constant 0.000000e+00 : bf16
    %8 = vector.broadcast %cst_13 : bf16 to vector<1x18x128xbf16>
    %c0_14 = arith.constant 0 : index
    %c0_15 = arith.constant 0 : index
    %c0_16 = arith.constant 0 : index
    %9 = vector.load %arg11[%c0_14, %c0_15, %c0_16] : memref<18x18x128xbf16, #tpu.memory_space<vmem>>, vector<1x18x128xbf16>
    tpu.vector_store %arg11[%c0_14, %c0_15, %c0_16], %8 {strides = array<i32>} : memref<18x18x128xbf16, #tpu.memory_space<vmem>>, vector<1x18x128xbf16>,
    %cst_17 = arith.constant 0.000000e+00 : bf16
    %10 = vector.broadcast %cst_17 : bf16 to vector<1x18x128xbf16>
    %c17_18 = arith.constant 17 : index
    %c0_19 = arith.constant 0 : index
    %c0_20 = arith.constant 0 : index
    %11 = vector.load %arg11[%c17_18, %c0_19, %c0_20] : memref<18x18x128xbf16, #tpu.memory_space<vmem>>, vector<1x18x128xbf16>
    tpu.vector_store %arg11[%c17_18, %c0_19, %c0_20], %10 {strides = array<i32>} : memref<18x18x128xbf16, #tpu.memory_space<vmem>>, vector<1x18x128xbf16>,
    %cst_21 = arith.constant 0.000000e+00 : bf16
    %12 = vector.broadcast %cst_21 : bf16 to vector<18x1x128xbf16>
    %c0_22 = arith.constant 0 : index
    %c0_23 = arith.constant 0 : index
    %c0_24 = arith.constant 0 : index
    %13 = vector.load %arg11[%c0_22, %c0_23, %c0_24] : memref<18x18x128xbf16, #tpu.memory_space<vmem>>, vector<18x1x128xbf16>
    tpu.vector_store %arg11[%c0_22, %c0_23, %c0_24], %12 {strides = array<i32>} : memref<18x18x128xbf16, #tpu.memory_space<vmem>>, vector<18x1x128xbf16>,
    %cst_25 = arith.constant 0.000000e+00 : bf16
    %14 = vector.broadcast %cst_25 : bf16 to vector<18x1x128xbf16>
    %c0_26 = arith.constant 0 : index
    %c17_27 = arith.constant 17 : index
    %c0_28 = arith.constant 0 : index
    %15 = vector.load %arg11[%c0_26, %c17_27, %c0_28] : memref<18x18x128xbf16, #tpu.memory_space<vmem>>, vector<18x1x128xbf16>
    tpu.vector_store %arg11[%c0_26, %c17_27, %c0_28], %14 {strides = array<i32>} : memref<18x18x128xbf16, #tpu.memory_space<vmem>>, vector<18x1x128xbf16>,
    %c0_29 = arith.constant 0 : index
    %c0_30 = arith.constant 0 : index
    %16 = vector.load %arg2[%c0_29, %c0_30] : memref<1x128xf32, #tpu.memory_space<vmem>>, vector<1x128xf32>
    %c0_31 = arith.constant 0 : index
    %c0_32 = arith.constant 0 : index
    %17 = vector.load %arg3[%c0_31, %c0_32] : memref<1x128xf32, #tpu.memory_space<vmem>>, vector<1x128xf32>
    %c0_33 = arith.constant 0 : index
    %c0_34 = arith.constant 0 : index
    %18 = vector.load %arg5[%c0_33, %c0_34] : memref<1x128xf32, #tpu.memory_space<vmem>>, vector<1x128xf32>
    %c0_35 = arith.constant 0 : index
    %c0_36 = arith.constant 0 : index
    %19 = vector.load %arg6[%c0_35, %c0_36] : memref<1x128xf32, #tpu.memory_space<vmem>>, vector<1x128xf32>
    %c0_i32 = arith.constant 0 : i32
    %c8_i32 = arith.constant 8 : i32
    %20 = arith.muli %c0_i32, %c8_i32 : i32
    %21 = tpu.assume_multiple %20, 8 : i32
    %c0_37 = arith.constant 0 : index
    %22 = arith.index_cast %21 : i32 to index
    %c0_38 = arith.constant 0 : index
    %c0_39 = arith.constant 0 : index
    %23 = vector.load %arg1[%c0_37, %22, %c0_38, %c0_39] : memref<1x16x16x128xf32, #tpu.memory_space<vmem>>, vector<1x8x16x128xf32>
    %24 = vector.shape_cast %23 : vector<1x8x16x128xf32> to vector<8x16x128xf32>
    %25 = vector.shape_cast %16 : vector<1x128xf32> to vector<1x1x128xf32>
    %26 = vector.broadcast %25 : vector<1x1x128xf32> to vector<8x16x128xf32>
    %27 = arith.mulf %24, %26 : vector<8x16x128xf32>
    %28 = vector.shape_cast %17 : vector<1x128xf32> to vector<1x1x128xf32>
    %29 = vector.broadcast %28 : vector<1x1x128xf32> to vector<8x16x128xf32>
    %30 = arith.addf %27, %29 : vector<8x16x128xf32>
    %cst_40 = arith.constant 0.000000e+00 : f32
    %31 = vector.broadcast %cst_40 : f32 to vector<8x16x128xf32>
    %32 = arith.maximumf %30, %31 : vector<8x16x128xf32>
    %33 = arith.truncf %32 : vector<8x16x128xf32> to vector<8x16x128xbf16>
    %c1_i32 = arith.constant 1 : i32
    %34 = arith.addi %21, %c1_i32 : i32
    %35 = arith.index_cast %34 : i32 to index
    %c1 = arith.constant 1 : index
    %c0_41 = arith.constant 0 : index
    %36 = vector.load %arg10[%35, %c1, %c0_41] : memref<18x18x128xbf16, #tpu.memory_space<vmem>>, vector<8x16x128xbf16>
    tpu.vector_store %arg10[%35, %c1, %c0_41], %33 {strides = array<i32>} : memref<18x18x128xbf16, #tpu.memory_space<vmem>>, vector<8x16x128xbf16>,
    %c1_i32_42 = arith.constant 1 : i32
    %c8_i32_43 = arith.constant 8 : i32
    %37 = arith.muli %c1_i32_42, %c8_i32_43 : i32
    %38 = tpu.assume_multiple %37, 8 : i32
    %c0_44 = arith.constant 0 : index
    %39 = arith.index_cast %38 : i32 to index
    %c0_45 = arith.constant 0 : index
    %c0_46 = arith.constant 0 : index
    %40 = vector.load %arg1[%c0_44, %39, %c0_45, %c0_46] : memref<1x16x16x128xf32, #tpu.memory_space<vmem>>, vector<1x8x16x128xf32>
    %41 = vector.shape_cast %40 : vector<1x8x16x128xf32> to vector<8x16x128xf32>
    %42 = vector.shape_cast %16 : vector<1x128xf32> to vector<1x1x128xf32>
    %43 = vector.broadcast %42 : vector<1x1x128xf32> to vector<8x16x128xf32>
    %44 = arith.mulf %41, %43 : vector<8x16x128xf32>
    %45 = vector.shape_cast %17 : vector<1x128xf32> to vector<1x1x128xf32>
    %46 = vector.broadcast %45 : vector<1x1x128xf32> to vector<8x16x128xf32>
    %47 = arith.addf %44, %46 : vector<8x16x128xf32>
    %cst_47 = arith.constant 0.000000e+00 : f32
    %48 = vector.broadcast %cst_47 : f32 to vector<8x16x128xf32>
    %49 = arith.maximumf %47, %48 : vector<8x16x128xf32>
    %50 = arith.truncf %49 : vector<8x16x128xf32> to vector<8x16x128xbf16>
    %c1_i32_48 = arith.constant 1 : i32
    %51 = arith.addi %38, %c1_i32_48 : i32
    %52 = arith.index_cast %51 : i32 to index
    %c1_49 = arith.constant 1 : index
    %c0_50 = arith.constant 0 : index
    %53 = vector.load %arg10[%52, %c1_49, %c0_50] : memref<18x18x128xbf16, #tpu.memory_space<vmem>>, vector<8x16x128xbf16>
    tpu.vector_store %arg10[%52, %c1_49, %c0_50], %50 {strides = array<i32>} : memref<18x18x128xbf16, #tpu.memory_space<vmem>>, vector<8x16x128xbf16>,
    %c2_i32 = arith.constant 2 : i32
    %c0_i32_51 = arith.constant 0 : i32
    %c8_i32_52 = arith.constant 8 : i32
    %54 = arith.muli %c0_i32_51, %c8_i32_52 : i32
    %55 = tpu.assume_multiple %54, 8 : i32
    %cst_53 = arith.constant 0.000000e+00 : f32
    %56 = vector.broadcast %cst_53 : f32 to vector<128x128xf32>
    %c0_i32_54 = arith.constant 0 : i32
    %57 = arith.addi %55, %c0_i32_54 : i32
    %58 = arith.index_cast %57 : i32 to index
    %c0_55 = arith.constant 0 : index
    %c0_56 = arith.constant 0 : index
    %59 = vector.load %arg10[%58, %c0_55, %c0_56] : memref<18x18x128xbf16, #tpu.memory_space<vmem>>, vector<8x16x128xbf16>
    %60 = vector.shape_cast %59 : vector<8x16x128xbf16> to vector<128x128xbf16>
    %c0_57 = arith.constant 0 : index
    %c0_58 = arith.constant 0 : index
    %c0_59 = arith.constant 0 : index
    %c0_60 = arith.constant 0 : index
    %61 = vector.load %arg4[%c0_57, %c0_58, %c0_59, %c0_60] : memref<3x3x128x128xbf16, #tpu.memory_space<vmem>>, vector<1x1x128x128xbf16>
    %62 = vector.shape_cast %61 : vector<1x1x128x128xbf16> to vector<128x128xbf16>
    %cst_61 = arith.constant dense<0.000000e+00> : vector<128x128xf32>
    %63 = tpu.matmul %60, %62, %cst_61 {dimension_numbers = #tpu.dot_dimension_numbers<[1], [0], [0], [1], [0, 0, 1, 1], [], []>} : vector<128x128xbf16>, vector<128x128xbf16>, vector<128x128xf32> -> vector<128x128xf32>
    %64 = arith.addf %56, %63 : vector<128x128xf32>
    %c0_i32_62 = arith.constant 0 : i32
    %65 = arith.addi %55, %c0_i32_62 : i32
    %66 = arith.index_cast %65 : i32 to index
    %c1_63 = arith.constant 1 : index
    %c0_64 = arith.constant 0 : index
    %67 = vector.load %arg10[%66, %c1_63, %c0_64] : memref<18x18x128xbf16, #tpu.memory_space<vmem>>, vector<8x16x128xbf16>
    %68 = vector.shape_cast %67 : vector<8x16x128xbf16> to vector<128x128xbf16>
    %c0_65 = arith.constant 0 : index
    %c1_66 = arith.constant 1 : index
    %c0_67 = arith.constant 0 : index
    %c0_68 = arith.constant 0 : index
    %69 = vector.load %arg4[%c0_65, %c1_66, %c0_67, %c0_68] : memref<3x3x128x128xbf16, #tpu.memory_space<vmem>>, vector<1x1x128x128xbf16>
    %70 = vector.shape_cast %69 : vector<1x1x128x128xbf16> to vector<128x128xbf16>
    %cst_69 = arith.constant dense<0.000000e+00> : vector<128x128xf32>
    %71 = tpu.matmul %68, %70, %cst_69 {dimension_numbers = #tpu.dot_dimension_numbers<[1], [0], [0], [1], [0, 0, 1, 1], [], []>} : vector<128x128xbf16>, vector<128x128xbf16>, vector<128x128xf32> -> vector<128x128xf32>
    %72 = arith.addf %64, %71 : vector<128x128xf32>
    %c0_i32_70 = arith.constant 0 : i32
    %73 = arith.addi %55, %c0_i32_70 : i32
    %74 = arith.index_cast %73 : i32 to index
    %c2 = arith.constant 2 : index
    %c0_71 = arith.constant 0 : index
    %75 = vector.load %arg10[%74, %c2, %c0_71] : memref<18x18x128xbf16, #tpu.memory_space<vmem>>, vector<8x16x128xbf16>
    %76 = vector.shape_cast %75 : vector<8x16x128xbf16> to vector<128x128xbf16>
    %c0_72 = arith.constant 0 : index
    %c2_73 = arith.constant 2 : index
    %c0_74 = arith.constant 0 : index
    %c0_75 = arith.constant 0 : index
    %77 = vector.load %arg4[%c0_72, %c2_73, %c0_74, %c0_75] : memref<3x3x128x128xbf16, #tpu.memory_space<vmem>>, vector<1x1x128x128xbf16>
    %78 = vector.shape_cast %77 : vector<1x1x128x128xbf16> to vector<128x128xbf16>
    %cst_76 = arith.constant dense<0.000000e+00> : vector<128x128xf32>
    %79 = tpu.matmul %76, %78, %cst_76 {dimension_numbers = #tpu.dot_dimension_numbers<[1], [0], [0], [1], [0, 0, 1, 1], [], []>} : vector<128x128xbf16>, vector<128x128xbf16>, vector<128x128xf32> -> vector<128x128xf32>
    %80 = arith.addf %72, %79 : vector<128x128xf32>
    %c1_i32_77 = arith.constant 1 : i32
    %81 = arith.addi %55, %c1_i32_77 : i32
    %82 = arith.index_cast %81 : i32 to index
    %c0_78 = arith.constant 0 : index
    %c0_79 = arith.constant 0 : index
    %83 = vector.load %arg10[%82, %c0_78, %c0_79] : memref<18x18x128xbf16, #tpu.memory_space<vmem>>, vector<8x16x128xbf16>
    %84 = vector.shape_cast %83 : vector<8x16x128xbf16> to vector<128x128xbf16>
    %c1_80 = arith.constant 1 : index
    %c0_81 = arith.constant 0 : index
    %c0_82 = arith.constant 0 : index
    %c0_83 = arith.constant 0 : index
    %85 = vector.load %arg4[%c1_80, %c0_81, %c0_82, %c0_83] : memref<3x3x128x128xbf16, #tpu.memory_space<vmem>>, vector<1x1x128x128xbf16>
    %86 = vector.shape_cast %85 : vector<1x1x128x128xbf16> to vector<128x128xbf16>
    %cst_84 = arith.constant dense<0.000000e+00> : vector<128x128xf32>
    %87 = tpu.matmul %84, %86, %cst_84 {dimension_numbers = #tpu.dot_dimension_numbers<[1], [0], [0], [1], [0, 0, 1, 1], [], []>} : vector<128x128xbf16>, vector<128x128xbf16>, vector<128x128xf32> -> vector<128x128xf32>
    %88 = arith.addf %80, %87 : vector<128x128xf32>
    %c1_i32_85 = arith.constant 1 : i32
    %89 = arith.addi %55, %c1_i32_85 : i32
    %90 = arith.index_cast %89 : i32 to index
    %c1_86 = arith.constant 1 : index
    %c0_87 = arith.constant 0 : index
    %91 = vector.load %arg10[%90, %c1_86, %c0_87] : memref<18x18x128xbf16, #tpu.memory_space<vmem>>, vector<8x16x128xbf16>
    %92 = vector.shape_cast %91 : vector<8x16x128xbf16> to vector<128x128xbf16>
    %c1_88 = arith.constant 1 : index
    %c1_89 = arith.constant 1 : index
    %c0_90 = arith.constant 0 : index
    %c0_91 = arith.constant 0 : index
    %93 = vector.load %arg4[%c1_88, %c1_89, %c0_90, %c0_91] : memref<3x3x128x128xbf16, #tpu.memory_space<vmem>>, vector<1x1x128x128xbf16>
    %94 = vector.shape_cast %93 : vector<1x1x128x128xbf16> to vector<128x128xbf16>
    %cst_92 = arith.constant dense<0.000000e+00> : vector<128x128xf32>
    %95 = tpu.matmul %92, %94, %cst_92 {dimension_numbers = #tpu.dot_dimension_numbers<[1], [0], [0], [1], [0, 0, 1, 1], [], []>} : vector<128x128xbf16>, vector<128x128xbf16>, vector<128x128xf32> -> vector<128x128xf32>
    %96 = arith.addf %88, %95 : vector<128x128xf32>
    %c1_i32_93 = arith.constant 1 : i32
    %97 = arith.addi %55, %c1_i32_93 : i32
    %98 = arith.index_cast %97 : i32 to index
    %c2_94 = arith.constant 2 : index
    %c0_95 = arith.constant 0 : index
    %99 = vector.load %arg10[%98, %c2_94, %c0_95] : memref<18x18x128xbf16, #tpu.memory_space<vmem>>, vector<8x16x128xbf16>
    %100 = vector.shape_cast %99 : vector<8x16x128xbf16> to vector<128x128xbf16>
    %c1_96 = arith.constant 1 : index
    %c2_97 = arith.constant 2 : index
    %c0_98 = arith.constant 0 : index
    %c0_99 = arith.constant 0 : index
    %101 = vector.load %arg4[%c1_96, %c2_97, %c0_98, %c0_99] : memref<3x3x128x128xbf16, #tpu.memory_space<vmem>>, vector<1x1x128x128xbf16>
    %102 = vector.shape_cast %101 : vector<1x1x128x128xbf16> to vector<128x128xbf16>
    %cst_100 = arith.constant dense<0.000000e+00> : vector<128x128xf32>
    %103 = tpu.matmul %100, %102, %cst_100 {dimension_numbers = #tpu.dot_dimension_numbers<[1], [0], [0], [1], [0, 0, 1, 1], [], []>} : vector<128x128xbf16>, vector<128x128xbf16>, vector<128x128xf32> -> vector<128x128xf32>
    %104 = arith.addf %96, %103 : vector<128x128xf32>
    %c2_i32_101 = arith.constant 2 : i32
    %105 = arith.addi %55, %c2_i32_101 : i32
    %106 = arith.index_cast %105 : i32 to index
    %c0_102 = arith.constant 0 : index
    %c0_103 = arith.constant 0 : index
    %107 = vector.load %arg10[%106, %c0_102, %c0_103] : memref<18x18x128xbf16, #tpu.memory_space<vmem>>, vector<8x16x128xbf16>
    %108 = vector.shape_cast %107 : vector<8x16x128xbf16> to vector<128x128xbf16>
    %c2_104 = arith.constant 2 : index
    %c0_105 = arith.constant 0 : index
    %c0_106 = arith.constant 0 : index
    %c0_107 = arith.constant 0 : index
    %109 = vector.load %arg4[%c2_104, %c0_105, %c0_106, %c0_107] : memref<3x3x128x128xbf16, #tpu.memory_space<vmem>>, vector<1x1x128x128xbf16>
    %110 = vector.shape_cast %109 : vector<1x1x128x128xbf16> to vector<128x128xbf16>
    %cst_108 = arith.constant dense<0.000000e+00> : vector<128x128xf32>
    %111 = tpu.matmul %108, %110, %cst_108 {dimension_numbers = #tpu.dot_dimension_numbers<[1], [0], [0], [1], [0, 0, 1, 1], [], []>} : vector<128x128xbf16>, vector<128x128xbf16>, vector<128x128xf32> -> vector<128x128xf32>
    %112 = arith.addf %104, %111 : vector<128x128xf32>
    %c2_i32_109 = arith.constant 2 : i32
    %113 = arith.addi %55, %c2_i32_109 : i32
    %114 = arith.index_cast %113 : i32 to index
    %c1_110 = arith.constant 1 : index
    %c0_111 = arith.constant 0 : index
    %115 = vector.load %arg10[%114, %c1_110, %c0_111] : memref<18x18x128xbf16, #tpu.memory_space<vmem>>, vector<8x16x128xbf16>
    %116 = vector.shape_cast %115 : vector<8x16x128xbf16> to vector<128x128xbf16>
    %c2_112 = arith.constant 2 : index
    %c1_113 = arith.constant 1 : index
    %c0_114 = arith.constant 0 : index
    %c0_115 = arith.constant 0 : index
    %117 = vector.load %arg4[%c2_112, %c1_113, %c0_114, %c0_115] : memref<3x3x128x128xbf16, #tpu.memory_space<vmem>>, vector<1x1x128x128xbf16>
    %118 = vector.shape_cast %117 : vector<1x1x128x128xbf16> to vector<128x128xbf16>
    %cst_116 = arith.constant dense<0.000000e+00> : vector<128x128xf32>
    %119 = tpu.matmul %116, %118, %cst_116 {dimension_numbers = #tpu.dot_dimension_numbers<[1], [0], [0], [1], [0, 0, 1, 1], [], []>} : vector<128x128xbf16>, vector<128x128xbf16>, vector<128x128xf32> -> vector<128x128xf32>
    %120 = arith.addf %112, %119 : vector<128x128xf32>
    %c2_i32_117 = arith.constant 2 : i32
    %121 = arith.addi %55, %c2_i32_117 : i32
    %122 = arith.index_cast %121 : i32 to index
    %c2_118 = arith.constant 2 : index
    %c0_119 = arith.constant 0 : index
    %123 = vector.load %arg10[%122, %c2_118, %c0_119] : memref<18x18x128xbf16, #tpu.memory_space<vmem>>, vector<8x16x128xbf16>
    %124 = vector.shape_cast %123 : vector<8x16x128xbf16> to vector<128x128xbf16>
    %c2_120 = arith.constant 2 : index
    %c2_121 = arith.constant 2 : index
    %c0_122 = arith.constant 0 : index
    %c0_123 = arith.constant 0 : index
    %125 = vector.load %arg4[%c2_120, %c2_121, %c0_122, %c0_123] : memref<3x3x128x128xbf16, #tpu.memory_space<vmem>>, vector<1x1x128x128xbf16>
    %126 = vector.shape_cast %125 : vector<1x1x128x128xbf16> to vector<128x128xbf16>
    %cst_124 = arith.constant dense<0.000000e+00> : vector<128x128xf32>
    %127 = tpu.matmul %124, %126, %cst_124 {dimension_numbers = #tpu.dot_dimension_numbers<[1], [0], [0], [1], [0, 0, 1, 1], [], []>} : vector<128x128xbf16>, vector<128x128xbf16>, vector<128x128xf32> -> vector<128x128xf32>
    %128 = arith.addf %120, %127 : vector<128x128xf32>
    %129 = vector.shape_cast %128 : vector<128x128xf32> to vector<8x16x128xf32>
    %130 = vector.shape_cast %18 : vector<1x128xf32> to vector<1x1x128xf32>
    %131 = vector.broadcast %130 : vector<1x1x128xf32> to vector<8x16x128xf32>
    %132 = arith.mulf %129, %131 : vector<8x16x128xf32>
    %133 = vector.shape_cast %19 : vector<1x128xf32> to vector<1x1x128xf32>
    %134 = vector.broadcast %133 : vector<1x1x128xf32> to vector<8x16x128xf32>
    %135 = arith.addf %132, %134 : vector<8x16x128xf32>
    %cst_125 = arith.constant 0.000000e+00 : f32
    %136 = vector.broadcast %cst_125 : f32 to vector<8x16x128xf32>
    %137 = arith.maximumf %135, %136 : vector<8x16x128xf32>
    %138 = arith.truncf %137 : vector<8x16x128xf32> to vector<8x16x128xbf16>
    %c1_i32_126 = arith.constant 1 : i32
    %139 = arith.addi %55, %c1_i32_126 : i32
    %140 = arith.index_cast %139 : i32 to index
    %c1_127 = arith.constant 1 : index
    %c0_128 = arith.constant 0 : index
    %141 = vector.load %arg11[%140, %c1_127, %c0_128] : memref<18x18x128xbf16, #tpu.memory_space<vmem>>, vector<8x16x128xbf16>
    tpu.vector_store %arg11[%140, %c1_127, %c0_128], %138 {strides = array<i32>} : memref<18x18x128xbf16, #tpu.memory_space<vmem>>, vector<8x16x128xbf16>,
    %c1_i32_129 = arith.constant 1 : i32
    %c8_i32_130 = arith.constant 8 : i32
    %142 = arith.muli %c1_i32_129, %c8_i32_130 : i32
    %143 = tpu.assume_multiple %142, 8 : i32
    %cst_131 = arith.constant 0.000000e+00 : f32
    %144 = vector.broadcast %cst_131 : f32 to vector<128x128xf32>
    %c0_i32_132 = arith.constant 0 : i32
    %145 = arith.addi %143, %c0_i32_132 : i32
    %146 = arith.index_cast %145 : i32 to index
    %c0_133 = arith.constant 0 : index
    %c0_134 = arith.constant 0 : index
    %147 = vector.load %arg10[%146, %c0_133, %c0_134] : memref<18x18x128xbf16, #tpu.memory_space<vmem>>, vector<8x16x128xbf16>
    %148 = vector.shape_cast %147 : vector<8x16x128xbf16> to vector<128x128xbf16>
    %c0_135 = arith.constant 0 : index
    %c0_136 = arith.constant 0 : index
    %c0_137 = arith.constant 0 : index
    %c0_138 = arith.constant 0 : index
    %149 = vector.load %arg4[%c0_135, %c0_136, %c0_137, %c0_138] : memref<3x3x128x128xbf16, #tpu.memory_space<vmem>>, vector<1x1x128x128xbf16>
    %150 = vector.shape_cast %149 : vector<1x1x128x128xbf16> to vector<128x128xbf16>
    %cst_139 = arith.constant dense<0.000000e+00> : vector<128x128xf32>
    %151 = tpu.matmul %148, %150, %cst_139 {dimension_numbers = #tpu.dot_dimension_numbers<[1], [0], [0], [1], [0, 0, 1, 1], [], []>} : vector<128x128xbf16>, vector<128x128xbf16>, vector<128x128xf32> -> vector<128x128xf32>
    %152 = arith.addf %144, %151 : vector<128x128xf32>
    %c0_i32_140 = arith.constant 0 : i32
    %153 = arith.addi %143, %c0_i32_140 : i32
    %154 = arith.index_cast %153 : i32 to index
    %c1_141 = arith.constant 1 : index
    %c0_142 = arith.constant 0 : index
    %155 = vector.load %arg10[%154, %c1_141, %c0_142] : memref<18x18x128xbf16, #tpu.memory_space<vmem>>, vector<8x16x128xbf16>
    %156 = vector.shape_cast %155 : vector<8x16x128xbf16> to vector<128x128xbf16>
    %c0_143 = arith.constant 0 : index
    %c1_144 = arith.constant 1 : index
    %c0_145 = arith.constant 0 : index
    %c0_146 = arith.constant 0 : index
    %157 = vector.load %arg4[%c0_143, %c1_144, %c0_145, %c0_146] : memref<3x3x128x128xbf16, #tpu.memory_space<vmem>>, vector<1x1x128x128xbf16>
    %158 = vector.shape_cast %157 : vector<1x1x128x128xbf16> to vector<128x128xbf16>
    %cst_147 = arith.constant dense<0.000000e+00> : vector<128x128xf32>
    %159 = tpu.matmul %156, %158, %cst_147 {dimension_numbers = #tpu.dot_dimension_numbers<[1], [0], [0], [1], [0, 0, 1, 1], [], []>} : vector<128x128xbf16>, vector<128x128xbf16>, vector<128x128xf32> -> vector<128x128xf32>
    %160 = arith.addf %152, %159 : vector<128x128xf32>
    %c0_i32_148 = arith.constant 0 : i32
    %161 = arith.addi %143, %c0_i32_148 : i32
    %162 = arith.index_cast %161 : i32 to index
    %c2_149 = arith.constant 2 : index
    %c0_150 = arith.constant 0 : index
    %163 = vector.load %arg10[%162, %c2_149, %c0_150] : memref<18x18x128xbf16, #tpu.memory_space<vmem>>, vector<8x16x128xbf16>
    %164 = vector.shape_cast %163 : vector<8x16x128xbf16> to vector<128x128xbf16>
    %c0_151 = arith.constant 0 : index
    %c2_152 = arith.constant 2 : index
    %c0_153 = arith.constant 0 : index
    %c0_154 = arith.constant 0 : index
    %165 = vector.load %arg4[%c0_151, %c2_152, %c0_153, %c0_154] : memref<3x3x128x128xbf16, #tpu.memory_space<vmem>>, vector<1x1x128x128xbf16>
    %166 = vector.shape_cast %165 : vector<1x1x128x128xbf16> to vector<128x128xbf16>
    %cst_155 = arith.constant dense<0.000000e+00> : vector<128x128xf32>
    %167 = tpu.matmul %164, %166, %cst_155 {dimension_numbers = #tpu.dot_dimension_numbers<[1], [0], [0], [1], [0, 0, 1, 1], [], []>} : vector<128x128xbf16>, vector<128x128xbf16>, vector<128x128xf32> -> vector<128x128xf32>
    %168 = arith.addf %160, %167 : vector<128x128xf32>
    %c1_i32_156 = arith.constant 1 : i32
    %169 = arith.addi %143, %c1_i32_156 : i32
    %170 = arith.index_cast %169 : i32 to index
    %c0_157 = arith.constant 0 : index
    %c0_158 = arith.constant 0 : index
    %171 = vector.load %arg10[%170, %c0_157, %c0_158] : memref<18x18x128xbf16, #tpu.memory_space<vmem>>, vector<8x16x128xbf16>
    %172 = vector.shape_cast %171 : vector<8x16x128xbf16> to vector<128x128xbf16>
    %c1_159 = arith.constant 1 : index
    %c0_160 = arith.constant 0 : index
    %c0_161 = arith.constant 0 : index
    %c0_162 = arith.constant 0 : index
    %173 = vector.load %arg4[%c1_159, %c0_160, %c0_161, %c0_162] : memref<3x3x128x128xbf16, #tpu.memory_space<vmem>>, vector<1x1x128x128xbf16>
    %174 = vector.shape_cast %173 : vector<1x1x128x128xbf16> to vector<128x128xbf16>
    %cst_163 = arith.constant dense<0.000000e+00> : vector<128x128xf32>
    %175 = tpu.matmul %172, %174, %cst_163 {dimension_numbers = #tpu.dot_dimension_numbers<[1], [0], [0], [1], [0, 0, 1, 1], [], []>} : vector<128x128xbf16>, vector<128x128xbf16>, vector<128x128xf32> -> vector<128x128xf32>
    %176 = arith.addf %168, %175 : vector<128x128xf32>
    %c1_i32_164 = arith.constant 1 : i32
    %177 = arith.addi %143, %c1_i32_164 : i32
    %178 = arith.index_cast %177 : i32 to index
    %c1_165 = arith.constant 1 : index
    %c0_166 = arith.constant 0 : index
    %179 = vector.load %arg10[%178, %c1_165, %c0_166] : memref<18x18x128xbf16, #tpu.memory_space<vmem>>, vector<8x16x128xbf16>
    %180 = vector.shape_cast %179 : vector<8x16x128xbf16> to vector<128x128xbf16>
    %c1_167 = arith.constant 1 : index
    %c1_168 = arith.constant 1 : index
    %c0_169 = arith.constant 0 : index
    %c0_170 = arith.constant 0 : index
    %181 = vector.load %arg4[%c1_167, %c1_168, %c0_169, %c0_170] : memref<3x3x128x128xbf16, #tpu.memory_space<vmem>>, vector<1x1x128x128xbf16>
    %182 = vector.shape_cast %181 : vector<1x1x128x128xbf16> to vector<128x128xbf16>
    %cst_171 = arith.constant dense<0.000000e+00> : vector<128x128xf32>
    %183 = tpu.matmul %180, %182, %cst_171 {dimension_numbers = #tpu.dot_dimension_numbers<[1], [0], [0], [1], [0, 0, 1, 1], [], []>} : vector<128x128xbf16>, vector<128x128xbf16>, vector<128x128xf32> -> vector<128x128xf32>
    %184 = arith.addf %176, %183 : vector<128x128xf32>
    %c1_i32_172 = arith.constant 1 : i32
    %185 = arith.addi %143, %c1_i32_172 : i32
    %186 = arith.index_cast %185 : i32 to index
    %c2_173 = arith.constant 2 : index
    %c0_174 = arith.constant 0 : index
    %187 = vector.load %arg10[%186, %c2_173, %c0_174] : memref<18x18x128xbf16, #tpu.memory_space<vmem>>, vector<8x16x128xbf16>
    %188 = vector.shape_cast %187 : vector<8x16x128xbf16> to vector<128x128xbf16>
    %c1_175 = arith.constant 1 : index
    %c2_176 = arith.constant 2 : index
    %c0_177 = arith.constant 0 : index
    %c0_178 = arith.constant 0 : index
    %189 = vector.load %arg4[%c1_175, %c2_176, %c0_177, %c0_178] : memref<3x3x128x128xbf16, #tpu.memory_space<vmem>>, vector<1x1x128x128xbf16>
    %190 = vector.shape_cast %189 : vector<1x1x128x128xbf16> to vector<128x128xbf16>
    %cst_179 = arith.constant dense<0.000000e+00> : vector<128x128xf32>
    %191 = tpu.matmul %188, %190, %cst_179 {dimension_numbers = #tpu.dot_dimension_numbers<[1], [0], [0], [1], [0, 0, 1, 1], [], []>} : vector<128x128xbf16>, vector<128x128xbf16>, vector<128x128xf32> -> vector<128x128xf32>
    %192 = arith.addf %184, %191 : vector<128x128xf32>
    %c2_i32_180 = arith.constant 2 : i32
    %193 = arith.addi %143, %c2_i32_180 : i32
    %194 = arith.index_cast %193 : i32 to index
    %c0_181 = arith.constant 0 : index
    %c0_182 = arith.constant 0 : index
    %195 = vector.load %arg10[%194, %c0_181, %c0_182] : memref<18x18x128xbf16, #tpu.memory_space<vmem>>, vector<8x16x128xbf16>
    %196 = vector.shape_cast %195 : vector<8x16x128xbf16> to vector<128x128xbf16>
    %c2_183 = arith.constant 2 : index
    %c0_184 = arith.constant 0 : index
    %c0_185 = arith.constant 0 : index
    %c0_186 = arith.constant 0 : index
    %197 = vector.load %arg4[%c2_183, %c0_184, %c0_185, %c0_186] : memref<3x3x128x128xbf16, #tpu.memory_space<vmem>>, vector<1x1x128x128xbf16>
    %198 = vector.shape_cast %197 : vector<1x1x128x128xbf16> to vector<128x128xbf16>
    %cst_187 = arith.constant dense<0.000000e+00> : vector<128x128xf32>
    %199 = tpu.matmul %196, %198, %cst_187 {dimension_numbers = #tpu.dot_dimension_numbers<[1], [0], [0], [1], [0, 0, 1, 1], [], []>} : vector<128x128xbf16>, vector<128x128xbf16>, vector<128x128xf32> -> vector<128x128xf32>
    %200 = arith.addf %192, %199 : vector<128x128xf32>
    %c2_i32_188 = arith.constant 2 : i32
    %201 = arith.addi %143, %c2_i32_188 : i32
    %202 = arith.index_cast %201 : i32 to index
    %c1_189 = arith.constant 1 : index
    %c0_190 = arith.constant 0 : index
    %203 = vector.load %arg10[%202, %c1_189, %c0_190] : memref<18x18x128xbf16, #tpu.memory_space<vmem>>, vector<8x16x128xbf16>
    %204 = vector.shape_cast %203 : vector<8x16x128xbf16> to vector<128x128xbf16>
    %c2_191 = arith.constant 2 : index
    %c1_192 = arith.constant 1 : index
    %c0_193 = arith.constant 0 : index
    %c0_194 = arith.constant 0 : index
    %205 = vector.load %arg4[%c2_191, %c1_192, %c0_193, %c0_194] : memref<3x3x128x128xbf16, #tpu.memory_space<vmem>>, vector<1x1x128x128xbf16>
    %206 = vector.shape_cast %205 : vector<1x1x128x128xbf16> to vector<128x128xbf16>
    %cst_195 = arith.constant dense<0.000000e+00> : vector<128x128xf32>
    %207 = tpu.matmul %204, %206, %cst_195 {dimension_numbers = #tpu.dot_dimension_numbers<[1], [0], [0], [1], [0, 0, 1, 1], [], []>} : vector<128x128xbf16>, vector<128x128xbf16>, vector<128x128xf32> -> vector<128x128xf32>
    %208 = arith.addf %200, %207 : vector<128x128xf32>
    %c2_i32_196 = arith.constant 2 : i32
    %209 = arith.addi %143, %c2_i32_196 : i32
    %210 = arith.index_cast %209 : i32 to index
    %c2_197 = arith.constant 2 : index
    %c0_198 = arith.constant 0 : index
    %211 = vector.load %arg10[%210, %c2_197, %c0_198] : memref<18x18x128xbf16, #tpu.memory_space<vmem>>, vector<8x16x128xbf16>
    %212 = vector.shape_cast %211 : vector<8x16x128xbf16> to vector<128x128xbf16>
    %c2_199 = arith.constant 2 : index
    %c2_200 = arith.constant 2 : index
    %c0_201 = arith.constant 0 : index
    %c0_202 = arith.constant 0 : index
    %213 = vector.load %arg4[%c2_199, %c2_200, %c0_201, %c0_202] : memref<3x3x128x128xbf16, #tpu.memory_space<vmem>>, vector<1x1x128x128xbf16>
    %214 = vector.shape_cast %213 : vector<1x1x128x128xbf16> to vector<128x128xbf16>
    %cst_203 = arith.constant dense<0.000000e+00> : vector<128x128xf32>
    %215 = tpu.matmul %212, %214, %cst_203 {dimension_numbers = #tpu.dot_dimension_numbers<[1], [0], [0], [1], [0, 0, 1, 1], [], []>} : vector<128x128xbf16>, vector<128x128xbf16>, vector<128x128xf32> -> vector<128x128xf32>
    %216 = arith.addf %208, %215 : vector<128x128xf32>
    %217 = vector.shape_cast %216 : vector<128x128xf32> to vector<8x16x128xf32>
    %218 = vector.shape_cast %18 : vector<1x128xf32> to vector<1x1x128xf32>
    %219 = vector.broadcast %218 : vector<1x1x128xf32> to vector<8x16x128xf32>
    %220 = arith.mulf %217, %219 : vector<8x16x128xf32>
    %221 = vector.shape_cast %19 : vector<1x128xf32> to vector<1x1x128xf32>
    %222 = vector.broadcast %221 : vector<1x1x128xf32> to vector<8x16x128xf32>
    %223 = arith.addf %220, %222 : vector<8x16x128xf32>
    %cst_204 = arith.constant 0.000000e+00 : f32
    %224 = vector.broadcast %cst_204 : f32 to vector<8x16x128xf32>
    %225 = arith.maximumf %223, %224 : vector<8x16x128xf32>
    %226 = arith.truncf %225 : vector<8x16x128xf32> to vector<8x16x128xbf16>
    %c1_i32_205 = arith.constant 1 : i32
    %227 = arith.addi %143, %c1_i32_205 : i32
    %228 = arith.index_cast %227 : i32 to index
    %c1_206 = arith.constant 1 : index
    %c0_207 = arith.constant 0 : index
    %229 = vector.load %arg11[%228, %c1_206, %c0_207] : memref<18x18x128xbf16, #tpu.memory_space<vmem>>, vector<8x16x128xbf16>
    tpu.vector_store %arg11[%228, %c1_206, %c0_207], %226 {strides = array<i32>} : memref<18x18x128xbf16, #tpu.memory_space<vmem>>, vector<8x16x128xbf16>,
    %c2_i32_208 = arith.constant 2 : i32
    %c0_i32_209 = arith.constant 0 : i32
    %c8_i32_210 = arith.constant 8 : i32
    %230 = arith.muli %c0_i32_209, %c8_i32_210 : i32
    %231 = tpu.assume_multiple %230, 8 : i32
    %cst_211 = arith.constant 0.000000e+00 : f32
    %232 = vector.broadcast %cst_211 : f32 to vector<128x128xf32>
    %c0_i32_212 = arith.constant 0 : i32
    %233 = arith.addi %231, %c0_i32_212 : i32
    %234 = arith.index_cast %233 : i32 to index
    %c0_213 = arith.constant 0 : index
    %c0_214 = arith.constant 0 : index
    %235 = vector.load %arg11[%234, %c0_213, %c0_214] : memref<18x18x128xbf16, #tpu.memory_space<vmem>>, vector<8x16x128xbf16>
    %236 = vector.shape_cast %235 : vector<8x16x128xbf16> to vector<128x128xbf16>
    %c0_215 = arith.constant 0 : index
    %c0_216 = arith.constant 0 : index
    %c0_217 = arith.constant 0 : index
    %c0_218 = arith.constant 0 : index
    %237 = vector.load %arg7[%c0_215, %c0_216, %c0_217, %c0_218] : memref<3x3x128x128xbf16, #tpu.memory_space<vmem>>, vector<1x1x128x128xbf16>
    %238 = vector.shape_cast %237 : vector<1x1x128x128xbf16> to vector<128x128xbf16>
    %cst_219 = arith.constant dense<0.000000e+00> : vector<128x128xf32>
    %239 = tpu.matmul %236, %238, %cst_219 {dimension_numbers = #tpu.dot_dimension_numbers<[1], [0], [0], [1], [0, 0, 1, 1], [], []>} : vector<128x128xbf16>, vector<128x128xbf16>, vector<128x128xf32> -> vector<128x128xf32>
    %240 = arith.addf %232, %239 : vector<128x128xf32>
    %c0_i32_220 = arith.constant 0 : i32
    %241 = arith.addi %231, %c0_i32_220 : i32
    %242 = arith.index_cast %241 : i32 to index
    %c1_221 = arith.constant 1 : index
    %c0_222 = arith.constant 0 : index
    %243 = vector.load %arg11[%242, %c1_221, %c0_222] : memref<18x18x128xbf16, #tpu.memory_space<vmem>>, vector<8x16x128xbf16>
    %244 = vector.shape_cast %243 : vector<8x16x128xbf16> to vector<128x128xbf16>
    %c0_223 = arith.constant 0 : index
    %c1_224 = arith.constant 1 : index
    %c0_225 = arith.constant 0 : index
    %c0_226 = arith.constant 0 : index
    %245 = vector.load %arg7[%c0_223, %c1_224, %c0_225, %c0_226] : memref<3x3x128x128xbf16, #tpu.memory_space<vmem>>, vector<1x1x128x128xbf16>
    %246 = vector.shape_cast %245 : vector<1x1x128x128xbf16> to vector<128x128xbf16>
    %cst_227 = arith.constant dense<0.000000e+00> : vector<128x128xf32>
    %247 = tpu.matmul %244, %246, %cst_227 {dimension_numbers = #tpu.dot_dimension_numbers<[1], [0], [0], [1], [0, 0, 1, 1], [], []>} : vector<128x128xbf16>, vector<128x128xbf16>, vector<128x128xf32> -> vector<128x128xf32>
    %248 = arith.addf %240, %247 : vector<128x128xf32>
    %c0_i32_228 = arith.constant 0 : i32
    %249 = arith.addi %231, %c0_i32_228 : i32
    %250 = arith.index_cast %249 : i32 to index
    %c2_229 = arith.constant 2 : index
    %c0_230 = arith.constant 0 : index
    %251 = vector.load %arg11[%250, %c2_229, %c0_230] : memref<18x18x128xbf16, #tpu.memory_space<vmem>>, vector<8x16x128xbf16>
    %252 = vector.shape_cast %251 : vector<8x16x128xbf16> to vector<128x128xbf16>
    %c0_231 = arith.constant 0 : index
    %c2_232 = arith.constant 2 : index
    %c0_233 = arith.constant 0 : index
    %c0_234 = arith.constant 0 : index
    %253 = vector.load %arg7[%c0_231, %c2_232, %c0_233, %c0_234] : memref<3x3x128x128xbf16, #tpu.memory_space<vmem>>, vector<1x1x128x128xbf16>
    %254 = vector.shape_cast %253 : vector<1x1x128x128xbf16> to vector<128x128xbf16>
    %cst_235 = arith.constant dense<0.000000e+00> : vector<128x128xf32>
    %255 = tpu.matmul %252, %254, %cst_235 {dimension_numbers = #tpu.dot_dimension_numbers<[1], [0], [0], [1], [0, 0, 1, 1], [], []>} : vector<128x128xbf16>, vector<128x128xbf16>, vector<128x128xf32> -> vector<128x128xf32>
    %256 = arith.addf %248, %255 : vector<128x128xf32>
    %c1_i32_236 = arith.constant 1 : i32
    %257 = arith.addi %231, %c1_i32_236 : i32
    %258 = arith.index_cast %257 : i32 to index
    %c0_237 = arith.constant 0 : index
    %c0_238 = arith.constant 0 : index
    %259 = vector.load %arg11[%258, %c0_237, %c0_238] : memref<18x18x128xbf16, #tpu.memory_space<vmem>>, vector<8x16x128xbf16>
    %260 = vector.shape_cast %259 : vector<8x16x128xbf16> to vector<128x128xbf16>
    %c1_239 = arith.constant 1 : index
    %c0_240 = arith.constant 0 : index
    %c0_241 = arith.constant 0 : index
    %c0_242 = arith.constant 0 : index
    %261 = vector.load %arg7[%c1_239, %c0_240, %c0_241, %c0_242] : memref<3x3x128x128xbf16, #tpu.memory_space<vmem>>, vector<1x1x128x128xbf16>
    %262 = vector.shape_cast %261 : vector<1x1x128x128xbf16> to vector<128x128xbf16>
    %cst_243 = arith.constant dense<0.000000e+00> : vector<128x128xf32>
    %263 = tpu.matmul %260, %262, %cst_243 {dimension_numbers = #tpu.dot_dimension_numbers<[1], [0], [0], [1], [0, 0, 1, 1], [], []>} : vector<128x128xbf16>, vector<128x128xbf16>, vector<128x128xf32> -> vector<128x128xf32>
    %264 = arith.addf %256, %263 : vector<128x128xf32>
    %c1_i32_244 = arith.constant 1 : i32
    %265 = arith.addi %231, %c1_i32_244 : i32
    %266 = arith.index_cast %265 : i32 to index
    %c1_245 = arith.constant 1 : index
    %c0_246 = arith.constant 0 : index
    %267 = vector.load %arg11[%266, %c1_245, %c0_246] : memref<18x18x128xbf16, #tpu.memory_space<vmem>>, vector<8x16x128xbf16>
    %268 = vector.shape_cast %267 : vector<8x16x128xbf16> to vector<128x128xbf16>
    %c1_247 = arith.constant 1 : index
    %c1_248 = arith.constant 1 : index
    %c0_249 = arith.constant 0 : index
    %c0_250 = arith.constant 0 : index
    %269 = vector.load %arg7[%c1_247, %c1_248, %c0_249, %c0_250] : memref<3x3x128x128xbf16, #tpu.memory_space<vmem>>, vector<1x1x128x128xbf16>
    %270 = vector.shape_cast %269 : vector<1x1x128x128xbf16> to vector<128x128xbf16>
    %cst_251 = arith.constant dense<0.000000e+00> : vector<128x128xf32>
    %271 = tpu.matmul %268, %270, %cst_251 {dimension_numbers = #tpu.dot_dimension_numbers<[1], [0], [0], [1], [0, 0, 1, 1], [], []>} : vector<128x128xbf16>, vector<128x128xbf16>, vector<128x128xf32> -> vector<128x128xf32>
    %272 = arith.addf %264, %271 : vector<128x128xf32>
    %c1_i32_252 = arith.constant 1 : i32
    %273 = arith.addi %231, %c1_i32_252 : i32
    %274 = arith.index_cast %273 : i32 to index
    %c2_253 = arith.constant 2 : index
    %c0_254 = arith.constant 0 : index
    %275 = vector.load %arg11[%274, %c2_253, %c0_254] : memref<18x18x128xbf16, #tpu.memory_space<vmem>>, vector<8x16x128xbf16>
    %276 = vector.shape_cast %275 : vector<8x16x128xbf16> to vector<128x128xbf16>
    %c1_255 = arith.constant 1 : index
    %c2_256 = arith.constant 2 : index
    %c0_257 = arith.constant 0 : index
    %c0_258 = arith.constant 0 : index
    %277 = vector.load %arg7[%c1_255, %c2_256, %c0_257, %c0_258] : memref<3x3x128x128xbf16, #tpu.memory_space<vmem>>, vector<1x1x128x128xbf16>
    %278 = vector.shape_cast %277 : vector<1x1x128x128xbf16> to vector<128x128xbf16>
    %cst_259 = arith.constant dense<0.000000e+00> : vector<128x128xf32>
    %279 = tpu.matmul %276, %278, %cst_259 {dimension_numbers = #tpu.dot_dimension_numbers<[1], [0], [0], [1], [0, 0, 1, 1], [], []>} : vector<128x128xbf16>, vector<128x128xbf16>, vector<128x128xf32> -> vector<128x128xf32>
    %280 = arith.addf %272, %279 : vector<128x128xf32>
    %c2_i32_260 = arith.constant 2 : i32
    %281 = arith.addi %231, %c2_i32_260 : i32
    %282 = arith.index_cast %281 : i32 to index
    %c0_261 = arith.constant 0 : index
    %c0_262 = arith.constant 0 : index
    %283 = vector.load %arg11[%282, %c0_261, %c0_262] : memref<18x18x128xbf16, #tpu.memory_space<vmem>>, vector<8x16x128xbf16>
    %284 = vector.shape_cast %283 : vector<8x16x128xbf16> to vector<128x128xbf16>
    %c2_263 = arith.constant 2 : index
    %c0_264 = arith.constant 0 : index
    %c0_265 = arith.constant 0 : index
    %c0_266 = arith.constant 0 : index
    %285 = vector.load %arg7[%c2_263, %c0_264, %c0_265, %c0_266] : memref<3x3x128x128xbf16, #tpu.memory_space<vmem>>, vector<1x1x128x128xbf16>
    %286 = vector.shape_cast %285 : vector<1x1x128x128xbf16> to vector<128x128xbf16>
    %cst_267 = arith.constant dense<0.000000e+00> : vector<128x128xf32>
    %287 = tpu.matmul %284, %286, %cst_267 {dimension_numbers = #tpu.dot_dimension_numbers<[1], [0], [0], [1], [0, 0, 1, 1], [], []>} : vector<128x128xbf16>, vector<128x128xbf16>, vector<128x128xf32> -> vector<128x128xf32>
    %288 = arith.addf %280, %287 : vector<128x128xf32>
    %c2_i32_268 = arith.constant 2 : i32
    %289 = arith.addi %231, %c2_i32_268 : i32
    %290 = arith.index_cast %289 : i32 to index
    %c1_269 = arith.constant 1 : index
    %c0_270 = arith.constant 0 : index
    %291 = vector.load %arg11[%290, %c1_269, %c0_270] : memref<18x18x128xbf16, #tpu.memory_space<vmem>>, vector<8x16x128xbf16>
    %292 = vector.shape_cast %291 : vector<8x16x128xbf16> to vector<128x128xbf16>
    %c2_271 = arith.constant 2 : index
    %c1_272 = arith.constant 1 : index
    %c0_273 = arith.constant 0 : index
    %c0_274 = arith.constant 0 : index
    %293 = vector.load %arg7[%c2_271, %c1_272, %c0_273, %c0_274] : memref<3x3x128x128xbf16, #tpu.memory_space<vmem>>, vector<1x1x128x128xbf16>
    %294 = vector.shape_cast %293 : vector<1x1x128x128xbf16> to vector<128x128xbf16>
    %cst_275 = arith.constant dense<0.000000e+00> : vector<128x128xf32>
    %295 = tpu.matmul %292, %294, %cst_275 {dimension_numbers = #tpu.dot_dimension_numbers<[1], [0], [0], [1], [0, 0, 1, 1], [], []>} : vector<128x128xbf16>, vector<128x128xbf16>, vector<128x128xf32> -> vector<128x128xf32>
    %296 = arith.addf %288, %295 : vector<128x128xf32>
    %c2_i32_276 = arith.constant 2 : i32
    %297 = arith.addi %231, %c2_i32_276 : i32
    %298 = arith.index_cast %297 : i32 to index
    %c2_277 = arith.constant 2 : index
    %c0_278 = arith.constant 0 : index
    %299 = vector.load %arg11[%298, %c2_277, %c0_278] : memref<18x18x128xbf16, #tpu.memory_space<vmem>>, vector<8x16x128xbf16>
    %300 = vector.shape_cast %299 : vector<8x16x128xbf16> to vector<128x128xbf16>
    %c2_279 = arith.constant 2 : index
    %c2_280 = arith.constant 2 : index
    %c0_281 = arith.constant 0 : index
    %c0_282 = arith.constant 0 : index
    %301 = vector.load %arg7[%c2_279, %c2_280, %c0_281, %c0_282] : memref<3x3x128x128xbf16, #tpu.memory_space<vmem>>, vector<1x1x128x128xbf16>
    %302 = vector.shape_cast %301 : vector<1x1x128x128xbf16> to vector<128x128xbf16>
    %cst_283 = arith.constant dense<0.000000e+00> : vector<128x128xf32>
    %303 = tpu.matmul %300, %302, %cst_283 {dimension_numbers = #tpu.dot_dimension_numbers<[1], [0], [0], [1], [0, 0, 1, 1], [], []>} : vector<128x128xbf16>, vector<128x128xbf16>, vector<128x128xf32> -> vector<128x128xf32>
    %304 = arith.addf %296, %303 : vector<128x128xf32>
    %305 = vector.shape_cast %304 : vector<128x128xf32> to vector<8x16x128xf32>
    %c0_284 = arith.constant 0 : index
    %306 = arith.index_cast %231 : i32 to index
    %c0_285 = arith.constant 0 : index
    %c0_286 = arith.constant 0 : index
    %307 = vector.load %arg1[%c0_284, %306, %c0_285, %c0_286] : memref<1x16x16x128xf32, #tpu.memory_space<vmem>>, vector<1x8x16x128xf32>
    %308 = vector.shape_cast %307 : vector<1x8x16x128xf32> to vector<8x16x128xf32>
    %309 = arith.truncf %308 : vector<8x16x128xf32> to vector<8x16x128xbf16>
    %310 = vector.shape_cast %309 : vector<8x16x128xbf16> to vector<128x128xbf16>
    %c0_287 = arith.constant 0 : index
    %c0_288 = arith.constant 0 : index
    %311 = vector.load %arg8[%c0_287, %c0_288] : memref<128x128xbf16, #tpu.memory_space<vmem>>, vector<128x128xbf16>
    %cst_289 = arith.constant dense<0.000000e+00> : vector<128x128xf32>
    %312 = tpu.matmul %310, %311, %cst_289 {dimension_numbers = #tpu.dot_dimension_numbers<[1], [0], [0], [1], [0, 0, 1, 1], [], []>} : vector<128x128xbf16>, vector<128x128xbf16>, vector<128x128xf32> -> vector<128x128xf32>
    %313 = vector.shape_cast %312 : vector<128x128xf32> to vector<8x16x128xf32>
    %314 = arith.addf %305, %313 : vector<8x16x128xf32>
    %c0_290 = arith.constant 0 : index
    %315 = arith.index_cast %231 : i32 to index
    %c0_291 = arith.constant 0 : index
    %c0_292 = arith.constant 0 : index
    %316 = vector.load %arg9[%c0_290, %315, %c0_291, %c0_292] : memref<1x16x16x128xf32, #tpu.memory_space<vmem>>, vector<1x8x16x128xf32>
    %317 = vector.shape_cast %316 : vector<1x8x16x128xf32> to vector<8x16x128xf32>
    %318 = vector.shape_cast %314 : vector<8x16x128xf32> to vector<1x8x16x128xf32>
    tpu.vector_store %arg9[%c0_290, %315, %c0_291, %c0_292], %318 {strides = array<i32>} : memref<1x16x16x128xf32, #tpu.memory_space<vmem>>, vector<1x8x16x128xf32>,
    %c1_i32_293 = arith.constant 1 : i32
    %c8_i32_294 = arith.constant 8 : i32
    %319 = arith.muli %c1_i32_293, %c8_i32_294 : i32
    %320 = tpu.assume_multiple %319, 8 : i32
    %cst_295 = arith.constant 0.000000e+00 : f32
    %321 = vector.broadcast %cst_295 : f32 to vector<128x128xf32>
    %c0_i32_296 = arith.constant 0 : i32
    %322 = arith.addi %320, %c0_i32_296 : i32
    %323 = arith.index_cast %322 : i32 to index
    %c0_297 = arith.constant 0 : index
    %c0_298 = arith.constant 0 : index
    %324 = vector.load %arg11[%323, %c0_297, %c0_298] : memref<18x18x128xbf16, #tpu.memory_space<vmem>>, vector<8x16x128xbf16>
    %325 = vector.shape_cast %324 : vector<8x16x128xbf16> to vector<128x128xbf16>
    %c0_299 = arith.constant 0 : index
    %c0_300 = arith.constant 0 : index
    %c0_301 = arith.constant 0 : index
    %c0_302 = arith.constant 0 : index
    %326 = vector.load %arg7[%c0_299, %c0_300, %c0_301, %c0_302] : memref<3x3x128x128xbf16, #tpu.memory_space<vmem>>, vector<1x1x128x128xbf16>
    %327 = vector.shape_cast %326 : vector<1x1x128x128xbf16> to vector<128x128xbf16>
    %cst_303 = arith.constant dense<0.000000e+00> : vector<128x128xf32>
    %328 = tpu.matmul %325, %327, %cst_303 {dimension_numbers = #tpu.dot_dimension_numbers<[1], [0], [0], [1], [0, 0, 1, 1], [], []>} : vector<128x128xbf16>, vector<128x128xbf16>, vector<128x128xf32> -> vector<128x128xf32>
    %329 = arith.addf %321, %328 : vector<128x128xf32>
    %c0_i32_304 = arith.constant 0 : i32
    %330 = arith.addi %320, %c0_i32_304 : i32
    %331 = arith.index_cast %330 : i32 to index
    %c1_305 = arith.constant 1 : index
    %c0_306 = arith.constant 0 : index
    %332 = vector.load %arg11[%331, %c1_305, %c0_306] : memref<18x18x128xbf16, #tpu.memory_space<vmem>>, vector<8x16x128xbf16>
    %333 = vector.shape_cast %332 : vector<8x16x128xbf16> to vector<128x128xbf16>
    %c0_307 = arith.constant 0 : index
    %c1_308 = arith.constant 1 : index
    %c0_309 = arith.constant 0 : index
    %c0_310 = arith.constant 0 : index
    %334 = vector.load %arg7[%c0_307, %c1_308, %c0_309, %c0_310] : memref<3x3x128x128xbf16, #tpu.memory_space<vmem>>, vector<1x1x128x128xbf16>
    %335 = vector.shape_cast %334 : vector<1x1x128x128xbf16> to vector<128x128xbf16>
    %cst_311 = arith.constant dense<0.000000e+00> : vector<128x128xf32>
    %336 = tpu.matmul %333, %335, %cst_311 {dimension_numbers = #tpu.dot_dimension_numbers<[1], [0], [0], [1], [0, 0, 1, 1], [], []>} : vector<128x128xbf16>, vector<128x128xbf16>, vector<128x128xf32> -> vector<128x128xf32>
    %337 = arith.addf %329, %336 : vector<128x128xf32>
    %c0_i32_312 = arith.constant 0 : i32
    %338 = arith.addi %320, %c0_i32_312 : i32
    %339 = arith.index_cast %338 : i32 to index
    %c2_313 = arith.constant 2 : index
    %c0_314 = arith.constant 0 : index
    %340 = vector.load %arg11[%339, %c2_313, %c0_314] : memref<18x18x128xbf16, #tpu.memory_space<vmem>>, vector<8x16x128xbf16>
    %341 = vector.shape_cast %340 : vector<8x16x128xbf16> to vector<128x128xbf16>
    %c0_315 = arith.constant 0 : index
    %c2_316 = arith.constant 2 : index
    %c0_317 = arith.constant 0 : index
    %c0_318 = arith.constant 0 : index
    %342 = vector.load %arg7[%c0_315, %c2_316, %c0_317, %c0_318] : memref<3x3x128x128xbf16, #tpu.memory_space<vmem>>, vector<1x1x128x128xbf16>
    %343 = vector.shape_cast %342 : vector<1x1x128x128xbf16> to vector<128x128xbf16>
    %cst_319 = arith.constant dense<0.000000e+00> : vector<128x128xf32>
    %344 = tpu.matmul %341, %343, %cst_319 {dimension_numbers = #tpu.dot_dimension_numbers<[1], [0], [0], [1], [0, 0, 1, 1], [], []>} : vector<128x128xbf16>, vector<128x128xbf16>, vector<128x128xf32> -> vector<128x128xf32>
    %345 = arith.addf %337, %344 : vector<128x128xf32>
    %c1_i32_320 = arith.constant 1 : i32
    %346 = arith.addi %320, %c1_i32_320 : i32
    %347 = arith.index_cast %346 : i32 to index
    %c0_321 = arith.constant 0 : index
    %c0_322 = arith.constant 0 : index
    %348 = vector.load %arg11[%347, %c0_321, %c0_322] : memref<18x18x128xbf16, #tpu.memory_space<vmem>>, vector<8x16x128xbf16>
    %349 = vector.shape_cast %348 : vector<8x16x128xbf16> to vector<128x128xbf16>
    %c1_323 = arith.constant 1 : index
    %c0_324 = arith.constant 0 : index
    %c0_325 = arith.constant 0 : index
    %c0_326 = arith.constant 0 : index
    %350 = vector.load %arg7[%c1_323, %c0_324, %c0_325, %c0_326] : memref<3x3x128x128xbf16, #tpu.memory_space<vmem>>, vector<1x1x128x128xbf16>
    %351 = vector.shape_cast %350 : vector<1x1x128x128xbf16> to vector<128x128xbf16>
    %cst_327 = arith.constant dense<0.000000e+00> : vector<128x128xf32>
    %352 = tpu.matmul %349, %351, %cst_327 {dimension_numbers = #tpu.dot_dimension_numbers<[1], [0], [0], [1], [0, 0, 1, 1], [], []>} : vector<128x128xbf16>, vector<128x128xbf16>, vector<128x128xf32> -> vector<128x128xf32>
    %353 = arith.addf %345, %352 : vector<128x128xf32>
    %c1_i32_328 = arith.constant 1 : i32
    %354 = arith.addi %320, %c1_i32_328 : i32
    %355 = arith.index_cast %354 : i32 to index
    %c1_329 = arith.constant 1 : index
    %c0_330 = arith.constant 0 : index
    %356 = vector.load %arg11[%355, %c1_329, %c0_330] : memref<18x18x128xbf16, #tpu.memory_space<vmem>>, vector<8x16x128xbf16>
    %357 = vector.shape_cast %356 : vector<8x16x128xbf16> to vector<128x128xbf16>
    %c1_331 = arith.constant 1 : index
    %c1_332 = arith.constant 1 : index
    %c0_333 = arith.constant 0 : index
    %c0_334 = arith.constant 0 : index
    %358 = vector.load %arg7[%c1_331, %c1_332, %c0_333, %c0_334] : memref<3x3x128x128xbf16, #tpu.memory_space<vmem>>, vector<1x1x128x128xbf16>
    %359 = vector.shape_cast %358 : vector<1x1x128x128xbf16> to vector<128x128xbf16>
    %cst_335 = arith.constant dense<0.000000e+00> : vector<128x128xf32>
    %360 = tpu.matmul %357, %359, %cst_335 {dimension_numbers = #tpu.dot_dimension_numbers<[1], [0], [0], [1], [0, 0, 1, 1], [], []>} : vector<128x128xbf16>, vector<128x128xbf16>, vector<128x128xf32> -> vector<128x128xf32>
    %361 = arith.addf %353, %360 : vector<128x128xf32>
    %c1_i32_336 = arith.constant 1 : i32
    %362 = arith.addi %320, %c1_i32_336 : i32
    %363 = arith.index_cast %362 : i32 to index
    %c2_337 = arith.constant 2 : index
    %c0_338 = arith.constant 0 : index
    %364 = vector.load %arg11[%363, %c2_337, %c0_338] : memref<18x18x128xbf16, #tpu.memory_space<vmem>>, vector<8x16x128xbf16>
    %365 = vector.shape_cast %364 : vector<8x16x128xbf16> to vector<128x128xbf16>
    %c1_339 = arith.constant 1 : index
    %c2_340 = arith.constant 2 : index
    %c0_341 = arith.constant 0 : index
    %c0_342 = arith.constant 0 : index
    %366 = vector.load %arg7[%c1_339, %c2_340, %c0_341, %c0_342] : memref<3x3x128x128xbf16, #tpu.memory_space<vmem>>, vector<1x1x128x128xbf16>
    %367 = vector.shape_cast %366 : vector<1x1x128x128xbf16> to vector<128x128xbf16>
    %cst_343 = arith.constant dense<0.000000e+00> : vector<128x128xf32>
    %368 = tpu.matmul %365, %367, %cst_343 {dimension_numbers = #tpu.dot_dimension_numbers<[1], [0], [0], [1], [0, 0, 1, 1], [], []>} : vector<128x128xbf16>, vector<128x128xbf16>, vector<128x128xf32> -> vector<128x128xf32>
    %369 = arith.addf %361, %368 : vector<128x128xf32>
    %c2_i32_344 = arith.constant 2 : i32
    %370 = arith.addi %320, %c2_i32_344 : i32
    %371 = arith.index_cast %370 : i32 to index
    %c0_345 = arith.constant 0 : index
    %c0_346 = arith.constant 0 : index
    %372 = vector.load %arg11[%371, %c0_345, %c0_346] : memref<18x18x128xbf16, #tpu.memory_space<vmem>>, vector<8x16x128xbf16>
    %373 = vector.shape_cast %372 : vector<8x16x128xbf16> to vector<128x128xbf16>
    %c2_347 = arith.constant 2 : index
    %c0_348 = arith.constant 0 : index
    %c0_349 = arith.constant 0 : index
    %c0_350 = arith.constant 0 : index
    %374 = vector.load %arg7[%c2_347, %c0_348, %c0_349, %c0_350] : memref<3x3x128x128xbf16, #tpu.memory_space<vmem>>, vector<1x1x128x128xbf16>
    %375 = vector.shape_cast %374 : vector<1x1x128x128xbf16> to vector<128x128xbf16>
    %cst_351 = arith.constant dense<0.000000e+00> : vector<128x128xf32>
    %376 = tpu.matmul %373, %375, %cst_351 {dimension_numbers = #tpu.dot_dimension_numbers<[1], [0], [0], [1], [0, 0, 1, 1], [], []>} : vector<128x128xbf16>, vector<128x128xbf16>, vector<128x128xf32> -> vector<128x128xf32>
    %377 = arith.addf %369, %376 : vector<128x128xf32>
    %c2_i32_352 = arith.constant 2 : i32
    %378 = arith.addi %320, %c2_i32_352 : i32
    %379 = arith.index_cast %378 : i32 to index
    %c1_353 = arith.constant 1 : index
    %c0_354 = arith.constant 0 : index
    %380 = vector.load %arg11[%379, %c1_353, %c0_354] : memref<18x18x128xbf16, #tpu.memory_space<vmem>>, vector<8x16x128xbf16>
    %381 = vector.shape_cast %380 : vector<8x16x128xbf16> to vector<128x128xbf16>
    %c2_355 = arith.constant 2 : index
    %c1_356 = arith.constant 1 : index
    %c0_357 = arith.constant 0 : index
    %c0_358 = arith.constant 0 : index
    %382 = vector.load %arg7[%c2_355, %c1_356, %c0_357, %c0_358] : memref<3x3x128x128xbf16, #tpu.memory_space<vmem>>, vector<1x1x128x128xbf16>
    %383 = vector.shape_cast %382 : vector<1x1x128x128xbf16> to vector<128x128xbf16>
    %cst_359 = arith.constant dense<0.000000e+00> : vector<128x128xf32>
    %384 = tpu.matmul %381, %383, %cst_359 {dimension_numbers = #tpu.dot_dimension_numbers<[1], [0], [0], [1], [0, 0, 1, 1], [], []>} : vector<128x128xbf16>, vector<128x128xbf16>, vector<128x128xf32> -> vector<128x128xf32>
    %385 = arith.addf %377, %384 : vector<128x128xf32>
    %c2_i32_360 = arith.constant 2 : i32
    %386 = arith.addi %320, %c2_i32_360 : i32
    %387 = arith.index_cast %386 : i32 to index
    %c2_361 = arith.constant 2 : index
    %c0_362 = arith.constant 0 : index
    %388 = vector.load %arg11[%387, %c2_361, %c0_362] : memref<18x18x128xbf16, #tpu.memory_space<vmem>>, vector<8x16x128xbf16>
    %389 = vector.shape_cast %388 : vector<8x16x128xbf16> to vector<128x128xbf16>
    %c2_363 = arith.constant 2 : index
    %c2_364 = arith.constant 2 : index
    %c0_365 = arith.constant 0 : index
    %c0_366 = arith.constant 0 : index
    %390 = vector.load %arg7[%c2_363, %c2_364, %c0_365, %c0_366] : memref<3x3x128x128xbf16, #tpu.memory_space<vmem>>, vector<1x1x128x128xbf16>
    %391 = vector.shape_cast %390 : vector<1x1x128x128xbf16> to vector<128x128xbf16>
    %cst_367 = arith.constant dense<0.000000e+00> : vector<128x128xf32>
    %392 = tpu.matmul %389, %391, %cst_367 {dimension_numbers = #tpu.dot_dimension_numbers<[1], [0], [0], [1], [0, 0, 1, 1], [], []>} : vector<128x128xbf16>, vector<128x128xbf16>, vector<128x128xf32> -> vector<128x128xf32>
    %393 = arith.addf %385, %392 : vector<128x128xf32>
    %394 = vector.shape_cast %393 : vector<128x128xf32> to vector<8x16x128xf32>
    %c0_368 = arith.constant 0 : index
    %395 = arith.index_cast %320 : i32 to index
    %c0_369 = arith.constant 0 : index
    %c0_370 = arith.constant 0 : index
    %396 = vector.load %arg1[%c0_368, %395, %c0_369, %c0_370] : memref<1x16x16x128xf32, #tpu.memory_space<vmem>>, vector<1x8x16x128xf32>
    %397 = vector.shape_cast %396 : vector<1x8x16x128xf32> to vector<8x16x128xf32>
    %398 = arith.truncf %397 : vector<8x16x128xf32> to vector<8x16x128xbf16>
    %399 = vector.shape_cast %398 : vector<8x16x128xbf16> to vector<128x128xbf16>
    %c0_371 = arith.constant 0 : index
    %c0_372 = arith.constant 0 : index
    %400 = vector.load %arg8[%c0_371, %c0_372] : memref<128x128xbf16, #tpu.memory_space<vmem>>, vector<128x128xbf16>
    %cst_373 = arith.constant dense<0.000000e+00> : vector<128x128xf32>
    %401 = tpu.matmul %399, %400, %cst_373 {dimension_numbers = #tpu.dot_dimension_numbers<[1], [0], [0], [1], [0, 0, 1, 1], [], []>} : vector<128x128xbf16>, vector<128x128xbf16>, vector<128x128xf32> -> vector<128x128xf32>
    %402 = vector.shape_cast %401 : vector<128x128xf32> to vector<8x16x128xf32>
    %403 = arith.addf %394, %402 : vector<8x16x128xf32>
    %c0_374 = arith.constant 0 : index
    %404 = arith.index_cast %320 : i32 to index
    %c0_375 = arith.constant 0 : index
    %c0_376 = arith.constant 0 : index
    %405 = vector.load %arg9[%c0_374, %404, %c0_375, %c0_376] : memref<1x16x16x128xf32, #tpu.memory_space<vmem>>, vector<1x8x16x128xf32>
    %406 = vector.shape_cast %405 : vector<1x8x16x128xf32> to vector<8x16x128xf32>
    %407 = vector.shape_cast %403 : vector<8x16x128xf32> to vector<1x8x16x128xf32>
    tpu.vector_store %arg9[%c0_374, %404, %c0_375, %c0_376], %407 {strides = array<i32>} : memref<1x16x16x128xf32, #tpu.memory_space<vmem>>, vector<1x8x16x128xf32>,
    %c2_i32_377 = arith.constant 2 : i32
    return
  }
  func.func @transform_0(%arg0: i32) -> (i32, i32, i32, i32) {
    %c0_i32 = arith.constant 0 : i32
    %c0_i32_0 = arith.constant 0 : i32
    %c0_i32_1 = arith.constant 0 : i32
    %c0_i32_2 = arith.constant 0 : i32
    return %arg0, %c0_i32, %c0_i32_0, %c0_i32_1 : i32, i32, i32, i32
  }
  func.func @transform_1(%arg0: i32) -> (i32, i32) {
    %c0_i32 = arith.constant 0 : i32
    %c0_i32_0 = arith.constant 0 : i32
    %c0_i32_1 = arith.constant 0 : i32
    return %c0_i32, %c0_i32_0 : i32, i32
  }
  func.func @transform_2(%arg0: i32) -> (i32, i32) {
    %c0_i32 = arith.constant 0 : i32
    %c0_i32_0 = arith.constant 0 : i32
    %c0_i32_1 = arith.constant 0 : i32
    return %c0_i32, %c0_i32_0 : i32, i32
  }
  func.func @transform_3(%arg0: i32) -> (i32, i32, i32, i32) {
    %c0_i32 = arith.constant 0 : i32
    %c0_i32_0 = arith.constant 0 : i32
    %c0_i32_1 = arith.constant 0 : i32
    %c0_i32_2 = arith.constant 0 : i32
    %c0_i32_3 = arith.constant 0 : i32
    return %c0_i32, %c0_i32_0, %c0_i32_1, %c0_i32_2 : i32, i32, i32, i32
  }
  func.func @transform_4(%arg0: i32) -> (i32, i32) {
    %c0_i32 = arith.constant 0 : i32
    %c0_i32_0 = arith.constant 0 : i32
    %c0_i32_1 = arith.constant 0 : i32
    return %c0_i32, %c0_i32_0 : i32, i32
  }
  func.func @transform_5(%arg0: i32) -> (i32, i32) {
    %c0_i32 = arith.constant 0 : i32
    %c0_i32_0 = arith.constant 0 : i32
    %c0_i32_1 = arith.constant 0 : i32
    return %c0_i32, %c0_i32_0 : i32, i32
  }
  func.func @transform_6(%arg0: i32) -> (i32, i32, i32, i32) {
    %c0_i32 = arith.constant 0 : i32
    %c0_i32_0 = arith.constant 0 : i32
    %c0_i32_1 = arith.constant 0 : i32
    %c0_i32_2 = arith.constant 0 : i32
    %c0_i32_3 = arith.constant 0 : i32
    return %c0_i32, %c0_i32_0, %c0_i32_1, %c0_i32_2 : i32, i32, i32, i32
  }
  func.func @transform_7(%arg0: i32) -> (i32, i32) {
    %c0_i32 = arith.constant 0 : i32
    %c0_i32_0 = arith.constant 0 : i32
    %c0_i32_1 = arith.constant 0 : i32
    return %c0_i32, %c0_i32_0 : i32, i32
  }
  func.func @transform_8(%arg0: i32) -> (i32, i32, i32, i32) {
    %c0_i32 = arith.constant 0 : i32
    %c0_i32_0 = arith.constant 0 : i32
    %c0_i32_1 = arith.constant 0 : i32
    %c0_i32_2 = arith.constant 0 : i32
    return %arg0, %c0_i32, %c0_i32_0, %c0_i32_1 : i32, i32, i32, i32
  }
}

</mosaic_0001>

<bundles_post_ra>
// kernel: wide_basic_forward.1
= control target key start
LH: loop header
LB: loop body
LE: loop exit
PB: predicated region body
PF: predicated region fallthrough
CT: control target
= control target key end

     0   :  { %s17457_s27 = smov 0   ;;  %s23672_s0 = inlined_call_operand.vmem [shape: f32[2,16,16,128], index: 0, kind: input, shape index: {}]   ;;  %s23673_s1 = inlined_call_operand.vmem [shape: f32[1,128], index: 1, kind: input, shape index: {}]   ;;  %s23674_s2 = inlined_call_operand.vmem [shape: f32[1,128], index: 2, kind: input, shape index: {}]   ;;  %s23675_s3 = inlined_call_operand.vmem [shape: bf16[3,3,128,128], index: 3, kind: input, shape index: {}]   ;;  %s23676_s4 = inlined_call_operand.vmem [shape: f32[1,128], index: 4, kind: input, shape index: {}]   ;;  %s23677_s5 = inlined_call_operand.vmem [shape: f32[1,128], index: 5, kind: input, shape index: {}]   ;;  %s23678_s6 = inlined_call_operand.vmem [shape: bf16[3,3,128,128], index: 6, kind: input, shape index: {}]   ;;  %s23679_s7 = inlined_call_operand.vmem [shape: bf16[128,128], index: 7, kind: input, shape index: {}]   ;;  %s23680_s8 = inlined_call_operand.vmem [shape: f32[2,16,16,128], index: 8, kind: output, shape index: {}]  }
   0x1 LB: > { %s13749_s28 = sadd.s32 4294967295, %s17409_s27   ;;  %p13753_p0 = scmp.ge.s32.totalorder %s17409_s27, 1  ;;  %s17409_s27 = sphi %s17457_s27, %s18_s27  }
   0x2   : > { %p262_p1 = scmp.lt.s32.totalorder %s17409_s27, 3 }
   0x4   : > { %p263_p2 = pnand %p13753_p0, %p262_p1 }
   0x6   : > { %266 = sbr.rel (%p263_p2) target bundleno = 1125 (0x465), region = 52 }
   0xb   : > { %v16975_v0 = vld [vmem:[%s23675_s3 + $0x38] sm:$0xff]   ;;  %v17411_v2 = vmov 0   ;;  %v16977_v3 = vld [vmem:[%s23675_s3 + $0x30] sm:$0xff]   ;;  %v16979_v5 = vld [vmem:[%s23675_s3 + $0x28] sm:$0xff]   ;;  %p296_p3 = scmp.lt.s32.totalorder %s13749_s28, 1  ;;  %vm314_vm0 = vcmask 1040384  }
   0xc   : > { %v16976_v1 = vld [vmem:[%s23675_s3 + $0x78] sm:$0xff]   ;;  %307 = vst [vmem:[#allocation2] sm:$0xf] %v17411_v2  ;;  %308 = vst [vmem:[#allocation2 + $0x4] sm:$0xf] %v17411_v2  ;;  %15782 = vmatprep.subr.bf16.mxu1 %v16975_v0  ;;  %v16978_v4 = vld [vmem:[%s23675_s3 + $0x70] sm:$0xff]  }
   0xd   : > { %309 = vst [vmem:[#allocation2 + $0x8] sm:$0x1] %v17411_v2  ;;  %311 = vst [vmem:[#allocation2 + $0xcc] sm:$0xf] %v17411_v2  ;;  %15783 = vmatpush3.bf16.msra.mxu1 %v16975_v0  ;;  %15750 = vmatprep.subr.bf16.mxu0 %v16976_v1  ;;  %v16980_v6 = vld [vmem:[%s23675_s3 + $0x68] sm:$0xff]   ;;  %v16981_v7 = vld [vmem:[%s23675_s3 + $0x20] sm:$0xff]  }
   0xe   : > { %312 = vst [vmem:[#allocation2 + $0xd0] sm:$0xf] %v17411_v2  ;;  %313 = vst [vmem:[#allocation2 + $0xd4] sm:$0x1] %v17411_v2  ;;  %15751 = vmatpush3.bf16.msra.mxu0 %v16976_v1  ;;  %15784 = vmatprep.subr.bf16.mxu1 %v16977_v3  ;;  %v16982_v8 = vld [vmem:[%s23675_s3 + $0x60] sm:$0xff]   ;;  %s24192_s28 = smov (!%p296_p3, %s13749_s28), 1 }
   0xf   : > { %427 = vst [vmem:[#allocation3] sm:$0xf] %v17411_v2  ;;  %428 = vst [vmem:[#allocation3 + $0x4] sm:$0xf] %v17411_v2  ;;  %15752 = vmatprep.subr.bf16.mxu0 %v16978_v4  ;;  %v16983_v9 = vld [vmem:[%s23675_s3 + $0x18] sm:$0xff]   ;;  %s15076_s29 = sshll.u32 %s24192_s28, 8 }
  0x10   : > { %429 = vst [vmem:[#allocation3 + $0x8] sm:$0x1] %v17411_v2  ;;  %431 = vst [vmem:[#allocation3 + $0xcc] sm:$0xf] %v17411_v2  ;;  %v16984_v10 = vld [vmem:[%s23675_s3 + $0x58] sm:$0xff]   ;;  %v16985_v11 = vld [vmem:[%s23675_s3 + $0x10] sm:$0xff]   ;;  %s17512_s12 = scalar_lea.vmem %s23672_s0, %s15076_s29  ;;  %s23335_s20 = scalar_lea.vmem %s23680_s8, %s15076_s29 }
  0x11   : > { %432 = vst [vmem:[#allocation3 + $0xd0] sm:$0xf] %v17411_v2  ;;  %433 = vst [vmem:[#allocation3 + $0xd4] sm:$0x1] %v17411_v2  ;;  %15785 = vmatpush3.bf16.msra.mxu1 %v16977_v3  ;;  %vm315_vm1 = vsmask.f32 256 }
  0x12   : > { %15753 = vmatpush3.bf16.msra.mxu0 %v16978_v4  ;;  %15786 = vmatprep.subr.bf16.mxu1 %v16979_v5  ;;  %v16986_v14 = vld [vmem:[%s23675_s3 + $0x50] sm:$0xff]   ;;  %vm17519_vm2 = vmand %vm314_vm0, %vm315_vm1  ;;  %v23715_v15 = vmov 0  ;;  %v320_v17 = vld [vmem:[#allocation2 + $0xc] sm:$0x1]  ;;  %vm371_vm3 = vsmask.f32 7938 }
  0x13   : > { %15754 = vmatprep.subr.bf16.mxu0 %v16980_v6  ;;  %v317_v12 = vld [vmem:[#allocation2] sm:$0x1]  ;;  %v17505_v13 = vld [vmem:[#allocation2 + $0x4] sm:$0xf]  ;;  %v23716_v15 = vsel %vm17519_vm2, 4294967295, %v23715_v15  ;;  %v16987_v18 = vld [vmem:[%s23675_s3 + $0x8] sm:$0xff]  }
  0x14   : > { %23717 = vst [vmem:[#allocation4_spill] sm:$0xff] %v23716_v15  ;;  %v1290_v16 = vshrl.u32 %v17505_v13, 16  ;;  %v318_v19 = vsel %vm17519_vm2, 0, %v317_v12  ;;  %v321_v20 = vsel %vm17519_vm2, 0, %v320_v17  ;;  %v17534_v21 = vld [vmem:[%s23673_s1] ss:$0 sm:$0xff]  ;;  %vm17551_vm6 = vmand %vm314_vm0, %vm371_vm3 }
  0x15   : > { %15787 = vmatpush3.bf16.msra.mxu1 %v16979_v5  ;;  %v16988_v22 = vld [vmem:[%s23675_s3 + $0x48] sm:$0xff]   ;;  %319 = vst [vmem:[#allocation2] sm:$0x1] %v318_v19  ;;  %v1884_v23 = vrot.slane %v17505_v13, 5  ;;  %322 = vst [vmem:[#allocation2 + $0xc] sm:$0x1] %v321_v20 }
  0x16   : > { %15755 = vmatpush3.bf16.msra.mxu0 %v16980_v6  ;;  %15788 = vmatprep.subr.bf16.mxu1 %v16981_v7  ;;  %v17543_v24 = vld [vmem:[%s23674_s2] ss:$0 sm:$0xff]  ;;  %v549_v26 = vld [vmem:[%s17512_s12 + $0x8] sm:$0xff]  ;;  %vm838_vm4 = vcmask 1043456   ;;  %vm673_vm5 = vsmask.f32 4368 }
  0x17   : > { %15756 = vmatprep.subr.bf16.mxu0 %v16982_v8  ;;  %v548_v25 = vld [vmem:[%s17512_s12] sm:$0xff]  ;;  %v571_v28 = vmul.f32 %v17534_v21, %v549_v26  ;;  %v23718_v29 = vmov 0  ;;  %v373_v30 = vld [vmem:[#allocation2 + $0x8] sm:$0x1]  ;;  %vm1273_vm7 = vsmask.f32 3328  ;;  %vm17597_vm11 = vmand %vm838_vm4, %vm371_vm3 }
  0x18   : > { %v570_v27 = vmul.f32 %v17534_v21, %v548_v25  ;;  %v23719_v29 = vsel %vm17551_vm6, 4294967295, %v23718_v29  ;;  %vm1274_vm8 = vsmask.f32 7440  ;;  %v1286_v31 = vshll.u32 %v17505_v13, 16  ;;  %v16989_v33 = vld [vmem:[%s23675_s3] sm:$0xff]   ;;  %v550_v43 = vld [vmem:[%s17512_s12 + $0x10] sm:$0xff]  ;;  %vm17608_vm12 = vmor %vm315_vm1, %vm673_vm5 }
  0x19   : > { %15789 = vmatpush3.bf16.msra.mxu1 %v16981_v7  ;;  %23720 = vst [vmem:[#allocation5_spill] sm:$0xff] %v23719_v29  ;;  %v1292_v32 = vrot.slane %v1290_v16, 4  ;;  %v593_v35 = vadd.f32 %v17543_v24, %v571_v28  ;;  %v374_v36 = vsel %vm17551_vm6, 0, %v373_v30  ;;  %v16990_v37 = vld [vmem:[%s23675_s3 + $0x40] sm:$0xff]   ;;  %v376_v39 = vld [vmem:[#allocation2 + $0x14] sm:$0x1]  ;;  %v572_v47 = vmul.f32 %v17534_v21, %v550_v43  ;;  %vm17618_vm13 = vmor %vm1273_vm7, %vm1274_vm8 }
  0x1a   : > { %15757 = vmatpush3.bf16.msra.mxu0 %v16982_v8  ;;  %15790 = vmatprep.subr.bf16.mxu1 %v16983_v9  ;;  %v592_v34 = vadd.f32 %v17543_v24, %v570_v27  ;;  %375 = vst [vmem:[#allocation2 + $0x8] sm:$0x1] %v374_v36  ;;  %v17566_v38 = vrot.slane %v1286_v31, 5  ;;  %v377_v42 = vsel %vm17551_vm6, 0, %v376_v39  ;;  %v323_v45 = vld [vmem:[#allocation2 + $0x18] sm:$0x1] }
  0x1b   : > { %15758 = vmatprep.subr.bf16.mxu0 %v16984_v10  ;;  %v609_v41 = vmax.f32 %v593_v35, 0.0  ;;  %378 = vst [vmem:[#allocation2 + $0x14] sm:$0x1] %v377_v42  ;;  %v551_v46 = vld [vmem:[%s17512_s12 + $0x18] sm:$0xff]  ;;  %v17576_v48 = vrot.slane %v1884_v23, 4  ;;  %v324_v53 = vsel %vm17519_vm2, 0, %v323_v45  ;;  %v594_v5 = vadd.f32 %v17543_v24, %v572_v47 }
  0x1c   : > { %v608_v40 = vmax.f32 %v592_v34, 0.0  ;;  %v1293_v44 = vor.u32 %v1292_v32, %v17566_v38  ;;  %v1233_v49 = vld [vmem:[#allocation2] sm:$0xf]  ;;  %v17581_v52 = vld [vmem:[%s23675_s3 + $0xf8] sm:$0xff]   ;;  %v573_v54 = vmul.f32 %v17534_v21, %v551_v46  ;;  %325 = vst [vmem:[#allocation2 + $0x18] sm:$0x1] %v324_v53 }
  0x1d   : > { %15791 = vmatpush3.bf16.msra.mxu1 %v16983_v9  ;;  %v15079_v51 = vpack.c.bf16 %v609_v41, %v609_v41  ;;  %v1277_v55 = vshrl.u32 %v1233_v49, 16  ;;  %v1280_v56 = vshll.u32 %v1233_v49, 16  ;;  %v13840_v57 = vcombine.low %v1233_v49, %v17505_v13  ;;  %v17590_v59 = vld [vmem:[%s23675_s3 + $0xb8] sm:$0xff]   ;;  %v552_v60 = vld [vmem:[%s17512_s12 + $0x20] sm:$0xff]  ;;  %v840_v4 = vld [vmem:[#allocation2 + $0xc] sm:$0xf] }
  0x1e   : > { %15759 = vmatpush3.bf16.msra.mxu0 %v16984_v10  ;;  %15792 = vmatprep.subr.bf16.mxu1 %v16985_v11  ;;  %v15078_v50 = vpack.c.bf16 %v608_v40, %v608_v40  ;;  %v1294_v58 = vrot.slane %v1293_v44, 4  ;;  %vm1879_vm9 = vcmask 1042432   ;;  %vm1880_vm10 = vcmask 1046532   ;;  %v326_v1 = vld [vmem:[#allocation2 + $0x24] sm:$0x1]  ;;  %v553_v20 = vld [vmem:[%s17512_s12 + $0x28] sm:$0xff] }
  0x1f   : > { %15760 = vmatprep.subr.bf16.mxu0 %v16986_v14  ;;  %v684_v63 = vshrl.u32 %v15079_v51, 16  ;;  %v687_v0 = vshll.u32 %v15079_v51, 16  ;;  %v1279_v2 = vrot.slane %v1277_v55, 4  ;;  %v1282_v3 = vrot.slane %v1280_v56, 5  ;;  %15798 = vmatprep.mubr.bf16.mxu1 %v13840_v57  ;;  %v379_v40 = vld [vmem:[#allocation2 + $0x20] sm:$0x1]  ;;  %vm17647_vm14 = vmor %vm1879_vm9, %vm1880_vm10 }
  0x20   : > { %v676_v61 = vshrl.u32 %v15078_v50, 16  ;;  %v679_v62 = vshll.u32 %v15078_v50, 16  ;;  %v595_v6 = vadd.f32 %v17543_v24, %v573_v54  ;;  %v23721_v9 = vmov 0  ;;  %v382_v41 = vld [vmem:[#allocation2 + $0x2c] sm:$0x1]  ;;  %v554_v46 = vld [vmem:[%s17512_s12 + $0x30] sm:$0xff] }
  0x21   : > { %15793 = vmatpush3.bf16.msra.mxu1 %v16985_v11  ;;  %v686_v8 = vrot.slane %v684_v63, 7  ;;  %v23722_v9 = vsel %vm17597_vm11, 4294967295, %v23721_v9  ;;  %v17601_v10 = vld [vmem:[#allocation2 + $0x8] sm:$0x1]  ;;  %v327_v11 = vsel %vm17519_vm2, 0, %v326_v1  ;;  %v574_v12 = vmul.f32 %v17534_v21, %v552_v60  ;;  %v555_v54 = vld [vmem:[%s17512_s12 + $0x38] sm:$0xff] }
  0x22   : > { %15761 = vmatpush3.bf16.msra.mxu0 %v16986_v14  ;;  %15794 = vmatprep.subr.bf16.mxu1 %v16987_v18  ;;  %v678_v7 = vrot.slane %v676_v61, 7  ;;  %23723 = vst [vmem:[#allocation6_spill] sm:$0xff] %v23722_v9  ;;  %v23724_v14 = vmov 0  ;;  %v1283_v16 = vor.u32 %v1282_v3, %v1279_v2  ;;  %v1296_v17 = vshll.u32 %v17601_v10, 16  ;;  %328 = vst [vmem:[#allocation2 + $0x24] sm:$0x1] %v327_v11 }
  0x23   : > { %15762 = vmatprep.subr.bf16.mxu0 %v16988_v22  ;;  %v23725_v14 = vsel %vm17608_vm12, 4294967295, %v23724_v14  ;;  %v610_v19 = vmax.f32 %v594_v5, 0.0  ;;  %v689_v26 = vor.u32 %v687_v0, %v686_v8  ;;  %v691_v27 = vrot.slane %v686_v8, 4  ;;  %v844_v30 = vld [vmem:[#allocation2 + $0x14] sm:$0x1] }
  0x24   : > { %23726 = vst [vmem:[#allocation7_spill] sm:$0xff] %v23725_v14  ;;  %v682_v25 = vrot.slane %v678_v7, 4  ;;  %v1284_v31 = vrot.slane %v1283_v16, 4  ;;  %v1298_v32 = vrot.slane %v1296_v17, 5  ;;  %v575_v39 = vmul.f32 %v17534_v21, %v553_v20  ;;  %v329_v53 = vld [vmem:[#allocation2 + $0x30] sm:$0x1] }
  0x25   : > { %15795 = vmatpush3.bf16.msra.mxu1 %v16987_v18  ;;  %v1887_v18 = vrot.slane %v17601_v10, 5  ;;  %v15080_v34 = vpack.c.bf16 %v610_v19, %v610_v19  ;;  %v596_v50 = vadd.f32 %v17543_v24, %v574_v12  ;;  %v330_v63 = vsel %vm17519_vm2, 0, %v329_v53  ;;  %v332_v5 = vld [vmem:[#allocation2 + $0x3c] sm:$0x1] }
  0x26   : > { %15763 = vmatpush3.bf16.msra.mxu0 %v16988_v22  ;;  %15796 = vmatprep.subr.bf16.mxu1 %v16989_v33  ;;  %v681_v22 = vor.u32 %v679_v62, %v678_v7  ;;  %v690_v35 = vsel %vm17608_vm12, %v682_v25, %v689_v26  ;;  %v1289_v42 = vsel %vm17618_vm13, %v1284_v31, %v17566_v38  ;;  %v380_v38 = vsel %vm17551_vm6, 0, %v379_v40  ;;  %v557_v7 = vld [vmem:[%s17512_s12 + $0x48] sm:$0xff] }
  0x27   : > { %15764 = vmatprep.subr.bf16.mxu0 %v16990_v37  ;;  %843 = vst [vmem:[#allocation2 + $0x10] sm:$0xf] %v690_v35  ;;  %v1299_v43 = vsel %vm17618_vm13, %v1294_v58, %v1298_v32  ;;  %v693_v45 = vshrl.u32 %v15080_v34, 16  ;;  %v696_v49 = vshll.u32 %v15080_v34, 16  ;;  %v597_v51 = vadd.f32 %v17543_v24, %v575_v39  ;;  %v847_v58 = vld [vmem:[#allocation2 + $0x18] sm:$0xf] }
  0x28   : > { %v841_v36 = vsel %vm17597_vm11, %v681_v22, %v840_v4  ;;  %v13824_v47 = vcombine.low %v1289_v42, %v1299_v43  ;;  %v612_v60 = vmax.f32 %v596_v50, 0.0  ;;  %381 = vst [vmem:[#allocation2 + $0x20] sm:$0x1] %v380_v38  ;;  %v383_v62 = vsel %vm17551_vm6, 0, %v382_v41  ;;  %331 = vst [vmem:[#allocation2 + $0x30] sm:$0x1] %v330_v63 }
  0x29   : > { %15797 = vmatpush3.bf16.msra.mxu1 %v16989_v33  ;;  %v611_v33 = vmax.f32 %v595_v6, 0.0  ;;  %842 = vst [vmem:[#allocation2 + $0xc] sm:$0xf] %v841_v36  ;;  %v695_v55 = vrot.slane %v693_v45, 7  ;;  %v613_v61 = vmax.f32 %v597_v51, 0.0  ;;  %v23729_v0 = vmov 0 }
  0x2a   : > { %15765 = vmatpush3.bf16.msra.mxu0 %v16990_v37  ;;  %15846 = vmatprep.subr.bf16.mxu1 %v17581_v52  ;;  %v845_v37 = vsel %vm17519_vm2, %v691_v27, %v844_v30  ;;  %v23730_v0 = vsel %vm17647_vm14, 4294967295, %v23729_v0  ;;  %384 = vst [vmem:[#allocation2 + $0x2c] sm:$0x1] %v383_v62  ;;  %v576_v4 = vmul.f32 %v17534_v21, %v554_v46  ;;  %v556_v6 = vld [vmem:[%s17512_s12 + $0x40] sm:$0xff]  ;;  %v333_v16 = vsel %vm17519_vm2, 0, %v332_v5  ;;  %v16995_v39 = vld [vmem:[%s23675_s3 + $0xf0] sm:$0xff]  }
  0x2b   : > { %15814 = vmatprep.subr.bf16.mxu0 %v17590_v59  ;;  %846 = vst [vmem:[#allocation2 + $0x14] sm:$0x1] %v845_v37  ;;  %v15081_v44 = vpack.c.bf16 %v611_v33, %v611_v33  ;;  %15766 = vmatprep.mubr.bf16.mxu0 %v13824_v47  ;;  %23731 = vst [vmem:[#allocation8_spill] sm:$0xff] %v23730_v0  ;;  %v698_v1 = vor.u32 %v696_v49, %v695_v55  ;;  %v699_v2 = vrot.slane %v695_v55, 4 }
  0x2c   : > { %v15082_v8 = vpack.c.bf16 %v612_v60, %v612_v60  ;;  %v17654_v11 = vpack.c.bf16 %v613_v61, %v613_v61  ;;  %v577_v12 = vmul.f32 %v17534_v21, %v555_v54  ;;  %v17662_v22 = vadd.f32 %v17543_v24, %v576_v4  ;;  %334 = vst [vmem:[#allocation2 + $0x3c] sm:$0x1] %v333_v16 }
  0x2d   : > { %v701_v56 = vshrl.u32 %v15081_v44, 16  ;;  %v704_v57 = vshll.u32 %v15081_v44, 16  ;;  %v848_v20 = vsel %vm17597_vm11, %v698_v1, %v847_v58  ;;  %v578_v31 = vmul.f32 %v17534_v21, %v556_v6 }
  0x2e   : > { %v17664_v26 = vld [vmem:[#allocation2 + $0x10] sm:$0xf]  ;;  %849 = vst [vmem:[#allocation2 + $0x18] sm:$0xf] %v848_v20  ;;  %v17669_v30 = vadd.f32 %v17543_v24, %v577_v12  ;;  %v17673_v32 = vmul.f32 %v17534_v21, %v557_v7  ;;  %v17680_v33 = vsel %vm17647_vm14, %v17576_v48, %v1887_v18  ;;  %v710_v50 = vshrl.u32 %v15082_v8, 16 }
  0x2f   : > { %v703_v3 = vrot.slane %v701_v56, 7  ;;  %v1314_v36 = vshrl.u32 %v17664_v26, 16  ;;  %v1891_v40 = vrot.slane %v17664_v26, 5  ;;  %v1310_v41 = vshll.u32 %v17664_v26, 16  ;;  %v851_v45 = vld [vmem:[#allocation2 + $0x20] sm:$0x1] }
  0x30   : > { %v1235_v25 = vld [vmem:[#allocation2 + $0xc] sm:$0xf]  ;;  %v713_v53 = vshll.u32 %v15082_v8, 16  ;;  %v718_v54 = vshrl.u32 %v17654_v11, 16  ;;  %v721_v55 = vshll.u32 %v17654_v11, 16  ;;  %v712_v58 = vrot.slane %v710_v50, 7 }
  0x31   : > { %v706_v17 = vor.u32 %v704_v57, %v703_v3  ;;  %v708_v19 = vrot.slane %v703_v3, 4  ;;  %v1301_v34 = vshrl.u32 %v1235_v25, 16  ;;  %v1304_v35 = vshll.u32 %v1235_v25, 16  ;;  %v854_v56 = vld [vmem:[#allocation2 + $0x24] sm:$0xf]  ;;  %v16999_v57 = vld [vmem:[%s23675_s3 + $0xe8] sm:$0xff]  }
  0x32   : > { %v17666_v27 = vld [vmem:[#allocation2 + $0x14] sm:$0x1]  ;;  %v13841_v37 = vcombine.low %v1235_v25, %v17664_v26  ;;  %v1316_v43 = vrot.slane %v1314_v36, 4  ;;  %v17695_v46 = vrot.slane %v1891_v40, 4  ;;  %v1312_v47 = vrot.slane %v1310_v41, 5 }
  0x33   : > { %v1320_v10 = vshll.u32 %v17666_v27, 16  ;;  %v1894_v42 = vrot.slane %v17666_v27, 5  ;;  %v1303_v48 = vrot.slane %v1301_v34, 4  ;;  %v1306_v18 = vrot.slane %v1304_v35, 5  ;;  %v858_v60 = vld [vmem:[#allocation2 + $0x2c] sm:$0x1] }
  0x34   : > { %15799 = vmatmul.mubr.bf16.vlgmr.msra.gmra.mxu1 %v13841_v37  ;;  %v707_v44 = vsel %vm17608_vm12, %v699_v2, %v706_v17  ;;  %v1317_v38 = vor.u32 %v1316_v43, %v1312_v47  ;;  %v614_v61 = vmax.f32 %v17662_v22, 0.0  ;;  %v720_v1 = vrot.slane %v718_v54, 7  ;;  %v17001_v17 = vld [vmem:[%s23675_s3 + $0xe0] sm:$0xff]   ;;  %v16997_v34 = vld [vmem:[%s23675_s3 + $0xb0] sm:$0xff]  }
  0x35   : > { %15847 = vmatpush3.bf16.msra.mxu1 %v17581_v52  ;;  %v1322_v49 = vrot.slane %v1320_v10, 5  ;;  %850 = vst [vmem:[#allocation2 + $0x1c] sm:$0xf] %v707_v44  ;;  %v1307_v51 = vor.u32 %v1306_v18, %v1303_v48  ;;  %v852_v52 = vsel %vm17519_vm2, %v708_v19, %v851_v45  ;;  %v1237_v63 = vld [vmem:[#allocation2 + $0x18] sm:$0xf]  ;;  %v615_v2 = vmax.f32 %v17669_v30, 0.0 }
  0x36   : > { %15848 = vmatprep.subr.bf16.mxu1 %v16995_v39  ;;  %853 = vst [vmem:[#allocation2 + $0x20] sm:$0x1] %v852_v52  ;;  %v600_v3 = vadd.f32 %v17543_v24, %v578_v31  ;;  %v1318_v4 = vrot.slane %v1317_v38, 4  ;;  %v1325_v5 = vshrl.u32 %v1237_v63, 16  ;;  %v1328_v6 = vshll.u32 %v1237_v63, 16  ;;  %v17732_v18 = vld [vmem:[%s23675_s3 + $0xa8] sm:$0xff]  }
  0x37   : > { %v1308_v62 = vrot.slane %v1307_v51, 4  ;;  %v715_v7 = vor.u32 %v713_v53, %v712_v58  ;;  %v716_v11 = vrot.slane %v712_v58, 4  ;;  %v723_v12 = vor.u32 %v721_v55, %v720_v1 }
  0x38   : > { %v725_v16 = vrot.slane %v720_v1, 4  ;;  %v1323_v19 = vsel %vm17618_vm13, %v1318_v4, %v1322_v49  ;;  %v1327_v20 = vrot.slane %v1325_v5, 4  ;;  %v1330_v22 = vrot.slane %v1328_v6, 5  ;;  %v17005_v49 = vld [vmem:[%s23675_s3 + $0xd8] sm:$0xff]   ;;  %v17003_v6 = vld [vmem:[%s23675_s3 + $0xa0] sm:$0xff]  }
  0x39   : > { %15849 = vmatpush3.bf16.msra.mxu1 %v16995_v39  ;;  %v1313_v8 = vsel %vm17618_vm13, %v1308_v62, %v1312_v47  ;;  %v855_v25 = vsel %vm17597_vm11, %v715_v7, %v854_v56  ;;  %v724_v35 = vsel %vm17608_vm12, %v716_v11, %v723_v12  ;;  %v15084_v37 = vpack.c.bf16 %v614_v61, %v614_v61 }
  0x3a   : > { %15850 = vmatprep.subr.bf16.mxu1 %v16999_v57  ;;  %v13825_v30 = vcombine.low %v1313_v8, %v1323_v19  ;;  %856 = vst [vmem:[#allocation2 + $0x24] sm:$0xf] %v855_v25  ;;  %v859_v36 = vsel %vm17519_vm2, %v725_v16, %v858_v60  ;;  %857 = vst [vmem:[#allocation2 + $0x28] sm:$0xf] %v724_v35  ;;  %v1331_v10 = vor.u32 %v1330_v22, %v1327_v20  ;;  %v861_v60 = vld [vmem:[#allocation2 + $0x30] sm:$0xf] }
  0x3b   : > { %860 = vst [vmem:[#allocation2 + $0x2c] sm:$0x1] %v859_v36  ;;  %v15085_v43 = vpack.c.bf16 %v615_v2, %v615_v2  ;;  %v727_v44 = vshrl.u32 %v15084_v37, 16  ;;  %v730_v45 = vshll.u32 %v15084_v37, 16  ;;  %v601_v47 = vadd.f32 %v17543_v24, %v17673_v32  ;;  %v385_v25 = vld [vmem:[#allocation2 + $0x38] sm:$0x1] }
  0x3c   : > { %v17717_v31 = vld [vmem:[#allocation2 + $0x1c] sm:$0xf]  ;;  %15767 = vmatmul.mubr.bf16.vlgmr.msra.gmra.mxu0 %v13825_v30  ;;  %v1332_v51 = vrot.slane %v1331_v10, 4  ;;  %v616_v55 = vmax.f32 %v600_v3, 0.0  ;;  %v17007_v3 = vld [vmem:[%s23675_s3 + $0xd0] sm:$0xff]  }
  0x3d   : > { %v1338_v39 = vshrl.u32 %v17717_v31, 16  ;;  %v13842_v41 = vcombine.low %v1237_v63, %v17717_v31  ;;  %15851 = vmatpush3.bf16.msra.mxu1 %v16999_v57  ;;  %v1334_v48 = vshll.u32 %v17717_v31, 16  ;;  %15815 = vmatpush3.bf16.msra.mxu0 %v17590_v59  ;;  %v17740_v50 = vld [vmem:[#allocation2 + $0x20] sm:$0x1]  ;;  %v729_v57 = vrot.slane %v727_v44, 7 }
  0x3e   : > { %15852 = vmatprep.subr.bf16.mxu1 %v17001_v17  ;;  %15816 = vmatprep.subr.bf16.mxu0 %v16997_v34  ;;  %v1344_v56 = vshll.u32 %v17740_v50, 16  ;;  %v735_v38 = vshrl.u32 %v15085_v43, 16  ;;  %v738_v58 = vshll.u32 %v15085_v43, 16  ;;  %v617_v59 = vmax.f32 %v601_v47, 0.0  ;;  %v388_v30 = vld [vmem:[#allocation2 + $0x44] sm:$0x1] }
  0x3f   : > { %15802 = vmatprep.mubr.bf16.mxu1 %v13842_v41  ;;  %v1336_v53 = vrot.slane %v1334_v48, 5  ;;  %v1340_v54 = vrot.slane %v1338_v39, 4  ;;  %v15086_v61 = vpack.c.bf16 %v616_v55, %v616_v55  ;;  %v732_v63 = vor.u32 %v730_v45, %v729_v57  ;;  %v17772_v43 = vld [vmem:[%s23675_s3 + $0x98] sm:$0xff]   ;;  %v335_v44 = vld [vmem:[#allocation2 + $0x48] sm:$0x1]  ;;  %v558_v55 = vld [vmem:[%s17512_s12 + $0x50] sm:$0xff] }
  0x40   : > { %v1346_v62 = vrot.slane %v1344_v56, 5  ;;  %v733_v1 = vrot.slane %v729_v57, 4  ;;  %v17745_v2 = vrot.slane %v735_v38, 7  ;;  %v17753_v7 = vpack.c.bf16 %v617_v59, %v617_v59  ;;  %v17011_v45 = vld [vmem:[%s23675_s3 + $0xc8] sm:$0xff]  }
  0x41   : > { %v1337_v32 = vsel %vm17618_vm13, %v1332_v51, %v1336_v53  ;;  %v1341_v52 = vor.u32 %v1340_v54, %v1336_v53  ;;  %15853 = vmatpush3.bf16.msra.mxu1 %v17001_v17  ;;  %v1239_v4 = vld [vmem:[#allocation2 + $0x24] sm:$0xf]  ;;  %15817 = vmatpush3.bf16.msra.mxu0 %v16997_v34  ;;  %v744_v8 = vshrl.u32 %v15086_v61, 16  ;;  %v747_v11 = vshll.u32 %v15086_v61, 16  ;;  %v17755_v12 = vld [vmem:[#allocation2 + $0x28] sm:$0xf] }
  0x42   : > { %15854 = vmatprep.subr.bf16.mxu1 %v17005_v49  ;;  %v1349_v16 = vshrl.u32 %v1239_v4, 16  ;;  %v1352_v17 = vshll.u32 %v1239_v4, 16  ;;  %15818 = vmatprep.subr.bf16.mxu0 %v17732_v18  ;;  %v17758_v19 = vld [vmem:[#allocation2 + $0x2c] sm:$0x1]  ;;  %v740_v20 = vor.u32 %v738_v58, %v17745_v2  ;;  %v862_v22 = vsel %vm17597_vm11, %v732_v63, %v861_v60  ;;  %v868_v54 = vld [vmem:[#allocation2 + $0x3c] sm:$0xf] }
  0x43   : > { %v1342_v5 = vrot.slane %v1341_v52, 4  ;;  %v1362_v34 = vshrl.u32 %v17755_v12, 16  ;;  %v13843_v35 = vcombine.low %v1239_v4, %v17755_v12  ;;  %v1358_v37 = vshll.u32 %v17755_v12, 16  ;;  %863 = vst [vmem:[#allocation2 + $0x30] sm:$0xf] %v862_v22  ;;  %v17792_v4 = vld [vmem:[%s23675_s3 + $0x90] sm:$0xff]  }
  0x44   : > { %v1351_v39 = vrot.slane %v1349_v16, 4  ;;  %v1354_v41 = vrot.slane %v1352_v17, 5  ;;  %v1368_v48 = vshll.u32 %v17758_v19, 16  ;;  %v741_v51 = vsel %vm17608_vm12, %v733_v1, %v740_v20  ;;  %v338_v16 = vld [vmem:[#allocation2 + $0x54] sm:$0x1] }
  0x45   : > { %v1347_v36 = vsel %vm17618_vm13, %v1342_v5, %v1346_v62  ;;  %15855 = vmatpush3.bf16.msra.mxu1 %v17005_v49  ;;  %v1360_v47 = vrot.slane %v1358_v37, 5  ;;  %v1364_v49 = vrot.slane %v1362_v34, 4  ;;  %15819 = vmatpush3.bf16.msra.mxu0 %v17732_v18  ;;  %v742_v53 = vrot.slane %v17745_v2, 4  ;;  %864 = vst [vmem:[#allocation2 + $0x34] sm:$0xf] %v741_v51  ;;  %v17013_v5 = vld [vmem:[%s23675_s3 + $0xc0] sm:$0xff]  }
  0x46   : > { %v13826_v10 = vcombine.low %v1337_v32, %v1347_v36  ;;  %15856 = vmatprep.subr.bf16.mxu1 %v17007_v3  ;;  %15803 = vmatmul.mubr.bf16.gmra.mxu1 %v13843_v35  ;;  %v1355_v56 = vor.u32 %v1354_v41, %v1351_v39  ;;  %v1370_v57 = vrot.slane %v1368_v48, 5  ;;  %v746_v38 = vrot.slane %v744_v8, 7  ;;  %v559_v32 = vld [vmem:[%s17512_s12 + $0x58] sm:$0xff]  ;;  %v561_v39 = vld [vmem:[%s17512_s12 + $0x68] sm:$0xff]  ;;  %v17014_v2 = vld [vmem:[%s23675_s3 + $0x80] sm:$0xff]  }
  0x47   : > { %15820 = vmatprep.subr.bf16.mxu0 %v17003_v6  ;;  %v752_v58 = vshrl.u32 %v17753_v7, 16  ;;  %v1365_v52 = vor.u32 %v1364_v49, %v1360_v47  ;;  %v755_v60 = vshll.u32 %v17753_v7, 16  ;;  %v386_v18 = vsel %vm17551_vm6, 0, %v385_v25 }
  0x48   : > { %15770 = vmatprep.mubr.bf16.mxu0 %v13826_v10  ;;  %v389_v59 = vsel %vm17551_vm6, 0, %v388_v30  ;;  %v1356_v61 = vrot.slane %v1355_v56, 4  ;;  %v749_v62 = vor.u32 %v747_v11, %v746_v38  ;;  %v750_v63 = vrot.slane %v746_v38, 4  ;;  %387 = vst [vmem:[#allocation2 + $0x38] sm:$0x1] %v386_v18 }
  0x49   : > { %15857 = vmatpush3.bf16.msra.mxu1 %v17007_v3  ;;  %v754_v1 = vrot.slane %v752_v58, 7  ;;  %390 = vst [vmem:[#allocation2 + $0x44] sm:$0x1] %v389_v59  ;;  %v1366_v7 = vrot.slane %v1365_v52, 4  ;;  %15821 = vmatpush3.bf16.msra.mxu0 %v17003_v6  ;;  %v336_v3 = vsel %vm17519_vm2, 0, %v335_v44  ;;  %v580_v8 = vmul.f32 %v17534_v21, %v558_v55  ;;  %v560_v6 = vld [vmem:[%s17512_s12 + $0x60] sm:$0xff] }
  0x4a   : > { %15858 = vmatprep.subr.bf16.mxu1 %v17011_v45  ;;  %v581_v11 = vmul.f32 %v17534_v21, %v559_v32  ;;  %v1361_v17 = vsel %vm17618_vm13, %v1356_v61, %v1360_v47  ;;  %v1241_v20 = vld [vmem:[#allocation2 + $0x30] sm:$0xf]  ;;  %v869_v30 = vsel %vm17597_vm11, %v749_v62, %v868_v54  ;;  %15822 = vmatprep.subr.bf16.mxu0 %v17772_v43  ;;  %v339_v44 = vsel %vm17519_vm2, 0, %v338_v16  ;;  %v17819_v47 = vld [vmem:[%s23675_s3 + $0x178] sm:$0xff]   ;;  %v17012_v52 = vld [vmem:[%s23675_s3 + $0x88] sm:$0xff]  }
  0x4b   : > { %v757_v22 = vor.u32 %v755_v60, %v754_v1  ;;  %v759_v25 = vrot.slane %v754_v1, 4  ;;  %337 = vst [vmem:[#allocation2 + $0x48] sm:$0x1] %v336_v3  ;;  %v1371_v34 = vsel %vm17618_vm13, %v1366_v7, %v1370_v57  ;;  %v1373_v35 = vshrl.u32 %v1241_v20, 16  ;;  %870 = vst [vmem:[#allocation2 + $0x3c] sm:$0xf] %v869_v30 }
  0x4c   : > { %v1376_v36 = vshll.u32 %v1241_v20, 16  ;;  %v602_v37 = vadd.f32 %v17543_v24, %v580_v8  ;;  %v13827_v41 = vcombine.low %v1361_v17, %v1371_v34  ;;  %v603_v48 = vadd.f32 %v17543_v24, %v581_v11  ;;  %v17821_v49 = vld [vmem:[#allocation2 + $0x34] sm:$0xf]  ;;  %340 = vst [vmem:[#allocation2 + $0x54] sm:$0x1] %v339_v44 }
  0x4d   : > { %15859 = vmatpush3.bf16.msra.mxu1 %v17011_v45  ;;  %v758_v10 = vsel %vm17608_vm12, %v750_v63, %v757_v22  ;;  %v1375_v51 = vrot.slane %v1373_v35, 4  ;;  %15823 = vmatpush3.bf16.msra.mxu0 %v17772_v43  ;;  %v582_v55 = vmul.f32 %v17534_v21, %v560_v6  ;;  %v391_v56 = vld [vmem:[#allocation2 + $0x50] sm:$0x1]  ;;  %v1386_v57 = vshrl.u32 %v17821_v49, 16 }
  0x4e   : > { %15860 = vmatprep.subr.bf16.mxu1 %v17013_v5  ;;  %v1378_v54 = vrot.slane %v1376_v36, 5  ;;  %871 = vst [vmem:[#allocation2 + $0x40] sm:$0xf] %v758_v10  ;;  %v618_v45 = vmax.f32 %v602_v37, 0.0  ;;  %15771 = vmatmul.mubr.bf16.gmra.mxu0 %v13827_v41  ;;  %v13844_v38 = vcombine.low %v1241_v20, %v17821_v49  ;;  %v1382_v58 = vshll.u32 %v17821_v49, 16 }
  0x4f   : > { %v619_v32 = vmax.f32 %v603_v48, 0.0  ;;  %15824 = vmatprep.subr.bf16.mxu0 %v17792_v4  ;;  %v865_v43 = vld [vmem:[#allocation2 + $0x38] sm:$0x1]  ;;  %v583_v61 = vmul.f32 %v17534_v21, %v561_v39  ;;  %v604_v62 = vadd.f32 %v17543_v24, %v582_v55  ;;  %v1388_v7 = vrot.slane %v1386_v57, 4 }
  0x50   : > { %v1379_v60 = vor.u32 %v1378_v54, %v1375_v51  ;;  %v872_v18 = vld [vmem:[#allocation2 + $0x44] sm:$0x1]  ;;  %v15088_v59 = vpack.c.bf16 %v618_v45, %v618_v45  ;;  %15806 = vmatprep.mubr.bf16.mxu1 %v13844_v38  ;;  %v866_v63 = vsel %vm17519_vm2, %v742_v53, %v865_v43  ;;  %v17838_v1 = vrot.slane %v1382_v58, 5 }
  0x51   : > { %15861 = vmatpush3.bf16.msra.mxu1 %v17013_v5  ;;  %v873_v3 = vsel %vm17519_vm2, %v759_v25, %v872_v18  ;;  %867 = vst [vmem:[#allocation2 + $0x38] sm:$0x1] %v866_v63  ;;  %v15089_v21 = vpack.c.bf16 %v619_v32, %v619_v32  ;;  %15825 = vmatpush3.bf16.msra.mxu0 %v17792_v4  ;;  %v620_v20 = vmax.f32 %v604_v62, 0.0  ;;  %v392_v22 = vsel %vm17551_vm6, 0, %v391_v56  ;;  %v17865_v56 = vld [vmem:[%s23675_s3 + $0x138] sm:$0xff]  }
  0x52   : > { %15910 = vmatprep.subr.bf16.mxu1 %v17819_v47  ;;  %v17843_v8 = vrot.slane %v1379_v60, 4  ;;  %874 = vst [vmem:[#allocation2 + $0x44] sm:$0x1] %v873_v3  ;;  %v761_v5 = vshrl.u32 %v15088_v59, 16  ;;  %v764_v11 = vshll.u32 %v15088_v59, 16  ;;  %v1389_v16 = vor.u32 %v1388_v7, %v17838_v1  ;;  %15826 = vmatprep.subr.bf16.mxu0 %v17012_v52 }
  0x53   : > { %v1243_v53 = vld [vmem:[#allocation2 + $0x3c] sm:$0xf]  ;;  %v605_v17 = vadd.f32 %v17543_v24, %v583_v61  ;;  %393 = vst [vmem:[#allocation2 + $0x50] sm:$0x1] %v392_v22  ;;  %v769_v36 = vshrl.u32 %v15089_v21, 16  ;;  %v772_v37 = vshll.u32 %v15089_v21, 16  ;;  %v15090_v58 = vpack.c.bf16 %v620_v20, %v620_v20 }
  0x54   : > { %v1397_v25 = vshrl.u32 %v1243_v53, 16  ;;  %v1400_v30 = vshll.u32 %v1243_v53, 16  ;;  %v1385_v4 = vsel %vm17618_vm13, %v17843_v8, %v17838_v1  ;;  %v763_v6 = vrot.slane %v761_v5, 7  ;;  %v875_v44 = vld [vmem:[#allocation2 + $0x48] sm:$0xf] }
  0x55   : > { %v17857_v34 = vld [vmem:[#allocation2 + $0x40] sm:$0xf]  ;;  %v1390_v35 = vrot.slane %v1389_v16, 4  ;;  %v621_v24 = vmax.f32 %v605_v17, 0.0  ;;  %15827 = vmatpush3.bf16.msra.mxu0 %v17012_v52  ;;  %v771_v55 = vrot.slane %v769_v36, 7  ;;  %v778_v3 = vshrl.u32 %v15090_v58, 16 }
  0x56   : > { %v1399_v39 = vrot.slane %v1397_v25, 4  ;;  %v1402_v41 = vrot.slane %v1400_v30, 5  ;;  %v1410_v10 = vshrl.u32 %v17857_v34, 16  ;;  %v13845_v48 = vcombine.low %v1243_v53, %v17857_v34  ;;  %15828 = vmatprep.subr.bf16.mxu0 %v17014_v2  ;;  %v394_v62 = vld [vmem:[#allocation2 + $0x5c] sm:$0x1] }
  0x57   : > { %v1406_v51 = vshll.u32 %v17857_v34, 16  ;;  %v766_v54 = vor.u32 %v764_v11, %v763_v6  ;;  %v767_v45 = vrot.slane %v763_v6, 4  ;;  %v15091_v32 = vpack.c.bf16 %v621_v24, %v621_v24  ;;  %v1855_v16 = vld [vmem:[#allocation2] sm:$0xe]  ;;  %v1856_v17 = vld [vmem:[#allocation2 + $0xc] sm:$0xe] }
  0x58   : > { %15807 = vmatmul.mubr.bf16.gmra.mxu1 %v13845_v48  ;;  %v1403_v57 = vor.u32 %v1402_v41, %v1399_v39  ;;  %v1412_v38 = vrot.slane %v1410_v10, 4  ;;  %v17867_v43 = vld [vmem:[#allocation2 + $0x38] sm:$0x1]  ;;  %v774_v18 = vor.u32 %v772_v37, %v771_v55  ;;  %v776_v59 = vrot.slane %v771_v55, 4  ;;  %v882_v6 = vld [vmem:[#allocation2 + $0x54] sm:$0xf] }
  0x59   : > { %v17869_v60 = vld [vmem:[#allocation2 + $0x44] sm:$0x1]  ;;  %v1408_v52 = vrot.slane %v1406_v51, 5  ;;  %v876_v61 = vsel %vm17597_vm11, %v766_v54, %v875_v44  ;;  %v1392_v63 = vshll.u32 %v17867_v43, 16  ;;  %15829 = vmatpush3.bf16.msra.mxu0 %v17014_v2  ;;  %v781_v5 = vshll.u32 %v15090_v58, 16 }
  0x5a   : > { %v1404_v1 = vrot.slane %v1403_v57, 4  ;;  %v1416_v7 = vshll.u32 %v17869_v60, 16  ;;  %877 = vst [vmem:[#allocation2 + $0x48] sm:$0xf] %v876_v61  ;;  %v775_v21 = vsel %vm17608_vm12, %v767_v45, %v774_v18  ;;  %v786_v11 = vshrl.u32 %v15091_v32, 16  ;;  %15878 = vmatprep.subr.bf16.mxu0 %v17865_v56 }
  0x5b   : > { %v1413_v8 = vor.u32 %v1412_v38, %v1408_v52  ;;  %v879_v53 = vld [vmem:[#allocation2 + $0x50] sm:$0x1]  ;;  %v1394_v20 = vrot.slane %v1392_v63, 5  ;;  %878 = vst [vmem:[#allocation2 + $0x4c] sm:$0xf] %v775_v21  ;;  %v780_v30 = vrot.slane %v778_v3, 7 }
  0x5c   : > { %v1409_v22 = vsel %vm17618_vm13, %v1404_v1, %v1408_v52  ;;  %v1418_v25 = vrot.slane %v1416_v7, 5  ;;  %v788_v36 = vrot.slane %v786_v11, 7  ;;  %v789_v37 = vshll.u32 %v15091_v32, 16  ;;  %v1857_v45 = vld [vmem:[#allocation2 + $0x18] sm:$0xe] }
  0x5d   : > { %v1414_v2 = vrot.slane %v1413_v8, 4  ;;  %v880_v24 = vsel %vm17519_vm2, %v776_v59, %v879_v53  ;;  %v1395_v39 = vsel %vm17618_vm13, %v1390_v35, %v1394_v20  ;;  %v783_v41 = vor.u32 %v781_v5, %v780_v30  ;;  %v1859_v8 = vld [vmem:[#allocation2 + $0x30] sm:$0xe] }
  0x5e   : > { %v784_v10 = vrot.slane %v780_v30, 4  ;;  %881 = vst [vmem:[#allocation2 + $0x50] sm:$0x1] %v880_v24  ;;  %v395_v48 = vsel %vm17551_vm6, 0, %v394_v62  ;;  %v13828_v44 = vcombine.low %v1385_v4, %v1395_v39  ;;  %v791_v54 = vor.u32 %v789_v37, %v788_v36 }
  0x5f   : > { %v1419_v51 = vsel %vm17618_vm13, %v1414_v2, %v1418_v25  ;;  %396 = vst [vmem:[#allocation2 + $0x5c] sm:$0x1] %v395_v48  ;;  %v883_v57 = vsel %vm17597_vm11, %v783_v41, %v882_v6  ;;  %v13856_v38 = vrot.slane %v1855_v16, 9  ;;  %v13857_v58 = vrot.slane %v1856_v17, 9 }
  0x60   : > { %v13829_v55 = vcombine.low %v1409_v22, %v1419_v51  ;;  %15774 = vmatprep.mubr.bf16.mxu0 %v13828_v44  ;;  %v792_v32 = vsel %vm17608_vm12, %v784_v10, %v791_v54  ;;  %v793_v52 = vrot.slane %v788_v36, 4  ;;  %884 = vst [vmem:[#allocation2 + $0x54] sm:$0xf] %v883_v57  ;;  %v17897_v4 = vsel %vm17647_vm14, %v17695_v46, %v1894_v42  ;;  %v1858_v42 = vld [vmem:[#allocation2 + $0x24] sm:$0xe]  ;;  %v17015_v44 = vld [vmem:[#allocation2 + $0xc] sm:$0xff]  }
  0x61   : > { %v1245_v35 = vld [vmem:[#allocation2 + $0x48] sm:$0xf]  ;;  %v1898_v18 = vrot.slane %v17717_v31, 5  ;;  %885 = vst [vmem:[#allocation2 + $0x58] sm:$0xf] %v792_v32  ;;  %v17904_v62 = vsel %vm17647_vm14, %v13856_v38, %v1884_v23  ;;  %v17910_v27 = vsel %vm17647_vm14, %v13857_v58, %v1891_v40  ;;  %v13858_v13 = vrot.slane %v1857_v45, 9 }
  0x62   : > { %15775 = vmatmul.mubr.bf16.gmra.mxu0 %v13829_v55  ;;  %v1421_v59 = vshrl.u32 %v1245_v35, 16  ;;  %v1424_v61 = vshll.u32 %v1245_v35, 16  ;;  %v17912_v46 = vld [vmem:[#allocation2 + $0x4c] sm:$0xf]  ;;  %v13880_v31 = vcombine.low %v17904_v62, %v17680_v33  ;;  %v13881_v63 = vcombine.low %v17910_v27, %v17897_v4  ;;  %v1860_v54 = vld [vmem:[#allocation2 + $0x3c] sm:$0xe] }
  0x63   : > { %v1900_v1 = vrot.slane %v1898_v18, 4  ;;  %v1434_v3 = vshrl.u32 %v17912_v46, 16  ;;  %v13846_v26 = vcombine.low %v1245_v35, %v17912_v46  ;;  %v1430_v21 = vshll.u32 %v17912_v46, 16  ;;  %v18089_v4 = vld [vmem:[%s23675_s3 + $0x150] sm:$0xff]  }
  0x64   : > { %v1423_v7 = vrot.slane %v1421_v59, 4  ;;  %v1426_v23 = vrot.slane %v1424_v61, 5  ;;  %v1901_v5 = vrot.slane %v17740_v50, 5  ;;  %v1905_v11 = vrot.slane %v17755_v12, 5 }
  0x65   : > { %v17920_v40 = vld [vmem:[#allocation2 + $0x50] sm:$0x1]  ;;  %15810 = vmatprep.mubr.bf16.mxu1 %v13846_v26  ;;  %v1436_v16 = vrot.slane %v1434_v3, 4  ;;  %v13859_v22 = vrot.slane %v1858_v42, 9  ;;  %v1432_v25 = vrot.slane %v1430_v21, 5  ;;  %v17930_v6 = vsel %vm17647_vm14, %v13858_v13, %v1898_v18 }
  0x66   : > { %v1427_v53 = vor.u32 %v1426_v23, %v1423_v7  ;;  %v1440_v17 = vshll.u32 %v17920_v40, 16  ;;  %v886_v20 = vld [vmem:[#allocation2 + $0x5c] sm:$0x1]  ;;  %v1908_v2 = vrot.slane %v17758_v19, 5  ;;  %v17935_v37 = vsel %vm17647_vm14, %v1900_v1, %v1901_v5  ;;  %v562_v23 = vld [vmem:[%s17512_s12 + $0x70] sm:$0xff] }
  0x67   : > { %v887_v30 = vsel %vm17519_vm2, %v793_v52, %v886_v20  ;;  %v1247_v50 = vld [vmem:[#allocation2 + $0x54] sm:$0xf]  ;;  %v1907_v24 = vrot.slane %v1905_v11, 4  ;;  %v1437_v48 = vor.u32 %v1436_v16, %v1432_v25  ;;  %v13860_v51 = vrot.slane %v1859_v8, 9  ;;  %v17016_v8 = vld [vmem:[#allocation2 + $0x18] sm:$0xff]   ;;  %v17020_v16 = vld [vmem:[#allocation2 + $0x24] sm:$0xff]  }
  0x68   : > { %v1428_v36 = vrot.slane %v1427_v53, 4  ;;  %v1442_v12 = vrot.slane %v1440_v17, 5  ;;  %888 = vst [vmem:[#allocation2 + $0x5c] sm:$0x1] %v887_v30  ;;  %v17937_v39 = vld [vmem:[#allocation2 + $0x58] sm:$0xf]  ;;  %v17944_v57 = vsel %vm17647_vm14, %v13859_v22, %v1905_v11  ;;  %v13882_v59 = vcombine.low %v17930_v6, %v17935_v37 }
  0x69   : > { %v1445_v41 = vshrl.u32 %v1247_v50, 16  ;;  %v1448_v10 = vshll.u32 %v1247_v50, 16  ;;  %v1458_v45 = vshrl.u32 %v17937_v39, 16  ;;  %v13847_v19 = vcombine.low %v1247_v50, %v17937_v39  ;;  %v341_v11 = vld [vmem:[#allocation2 + $0x60] sm:$0x1]  ;;  %v563_v22 = vld [vmem:[%s17512_s12 + $0x78] sm:$0xff] }
  0x6a   : > { %v1454_v55 = vshll.u32 %v17937_v39, 16  ;;  %v1433_v35 = vsel %vm17618_vm13, %v1428_v36, %v1432_v25  ;;  %v1438_v32 = vrot.slane %v1437_v48, 4  ;;  %v1912_v61 = vrot.slane %v17821_v49, 5  ;;  %v17375_v50 = vld [vmem:[%s23673_s1] ss:$0 sm:$0xff]  ;;  %v17032_v37 = vld [vmem:[#allocation2 + $0x54] sm:$0xff]  }
  0x6b   : > { %v1447_v38 = vrot.slane %v1445_v41, 4  ;;  %v1450_v58 = vrot.slane %v1448_v10, 5  ;;  %15811 = vmatmul.mubr.bf16.gmra.mxu1 %v13847_v19  ;;  %v1460_v18 = vrot.slane %v1458_v45, 4  ;;  %v17955_v1 = vsel %vm17647_vm14, %v1907_v24, %v1908_v2  ;;  %v17376_v45 = vld [vmem:[%s23674_s2] ss:$0 sm:$0xff] }
  0x6c   : > { %v1456_v52 = vrot.slane %v1454_v55, 5  ;;  %v1443_v42 = vsel %vm17618_vm13, %v1438_v32, %v1442_v12  ;;  %15862 = vmatprep.mubr.bf16.mxu1 %v17015_v44  ;;  %v1915_v7 = vrot.slane %v17867_v43, 5  ;;  %v1914_v21 = vrot.slane %v1912_v61, 4  ;;  %v1861_v12 = vld [vmem:[#allocation2 + $0x48] sm:$0xe]  ;;  %v17019_v44 = vld [vmem:[%s23675_s3 + $0x170] sm:$0xff]  }
  0x6d   : > { %v1451_v13 = vor.u32 %v1450_v58, %v1447_v38  ;;  %v13830_v3 = vcombine.low %v1433_v35, %v1443_v42  ;;  %v13861_v5 = vrot.slane %v1860_v54, 9  ;;  %v17963_v17 = vsel %vm17647_vm14, %v13860_v51, %v1912_v61  ;;  %v1862_v55 = vld [vmem:[#allocation2 + $0x54] sm:$0xe]  ;;  %v2818_v6 = vld [vmem:[#allocation2 + $0x24] sm:$0xe] }
  0x6e   : > { %v1461_v26 = vor.u32 %v1460_v18, %v1456_v52  ;;  %v1919_v20 = vrot.slane %v17857_v34, 5  ;;  %v342_v43 = vsel %vm17519_vm2, 0, %v341_v11  ;;  %v17972_v2 = vsel %vm17647_vm14, %v1914_v21, %v1915_v7  ;;  %v2816_v21 = vld [vmem:[#allocation2 + $0xc] sm:$0xe]  ;;  %v17022_v11 = vld [vmem:[#allocation2 + $0x30] sm:$0xff]  }
  0x6f   : > { %v17959_v49 = vld [vmem:[#allocation2 + $0x5c] sm:$0x1]  ;;  %v1452_v53 = vrot.slane %v1451_v13, 4  ;;  %15778 = vmatprep.mubr.bf16.mxu0 %v13830_v3  ;;  %343 = vst [vmem:[#allocation2 + $0x60] sm:$0x1] %v342_v43  ;;  %v584_v36 = vmul.f32 %v17375_v50, %v562_v23  ;;  %v13883_v24 = vcombine.low %v17944_v57, %v17955_v1  ;;  %v1922_v10 = vrot.slane %v17869_v60, 5 }
  0x70   : > { %v1462_v25 = vrot.slane %v1461_v26, 4  ;;  %v1464_v30 = vshll.u32 %v17959_v49, 16  ;;  %v1921_v41 = vrot.slane %v1919_v20, 4  ;;  %v13884_v51 = vcombine.low %v17963_v17, %v17972_v2  ;;  %v18004_v23 = vld [vmem:[#allocation2 + $0x10] sm:$0xf]  ;;  %v17023_v3 = vld [vmem:[%s23675_s3 + $0x168] sm:$0xff]  }
  0x71   : > { %v1457_v34 = vsel %vm17618_vm13, %v1452_v53, %v1456_v52  ;;  %v585_v54 = vmul.f32 %v17375_v50, %v563_v22  ;;  %v606_v19 = vadd.f32 %v17376_v45, %v584_v36  ;;  %v17992_v38 = vsel %vm17647_vm14, %v13861_v5, %v1919_v20  ;;  %v17026_v53 = vld [vmem:[#allocation2 + $0x3c] sm:$0xff]  }
  0x72   : > { %v1466_v48 = vrot.slane %v1464_v30, 5  ;;  %v13862_v60 = vrot.slane %v1861_v12, 9  ;;  %v1926_v58 = vrot.slane %v17912_v46, 5  ;;  %v1929_v35 = vrot.slane %v17920_v40, 5  ;;  %v18006_v40 = vld [vmem:[#allocation2 + $0x14] sm:$0x1] }
  0x73   : > { %15863 = vmatmul.mubr.bf16.vlgmr.msra.gmra.mxu1 %v17016_v8  ;;  %v607_v52 = vadd.f32 %v17376_v45, %v585_v54  ;;  %v622_v18 = vmax.f32 %v606_v19, 0.0  ;;  %v13863_v61 = vrot.slane %v1862_v55, 9  ;;  %v18001_v13 = vsel %vm17647_vm14, %v1921_v41, %v1922_v10  ;;  %v18021_v22 = vld [vmem:[#allocation2 + $0x1c] sm:$0xf]  ;;  %v18030_v36 = vld [vmem:[#allocation2 + $0x20] sm:$0x1] }
  0x74   : > { %v1467_v32 = vsel %vm17618_vm13, %v1462_v25, %v1466_v48  ;;  %15911 = vmatpush3.bf16.msra.mxu1 %v17819_v47  ;;  %15866 = vmatprep.mubr.bf16.mxu1 %v17020_v16  ;;  %v1928_v7 = vrot.slane %v1926_v58, 4  ;;  %v1933_v46 = vrot.slane %v17937_v39, 5  ;;  %v1936_v47 = vrot.slane %v17959_v49, 5  ;;  %v2817_v12 = vld [vmem:[#allocation2 + $0x18] sm:$0xe]  ;;  %v17037_v1 = vld [vmem:[%s23675_s3 + $0x140] sm:$0xff]  }
  0x75   : > { %v13831_v42 = vcombine.low %v1457_v34, %v1467_v32  ;;  %15912 = vmatprep.subr.bf16.mxu1 %v17019_v44  ;;  %v623_v26 = vmax.f32 %v607_v52, 0.0  ;;  %v15092_v8 = vpack.c.bf16 %v622_v18, %v622_v18  ;;  %v2850_v5 = vrot.slane %v18004_v23, 5  ;;  %v2390_v45 = vld [vmem:[#allocation2 + $0xc] sm:$0xf] }
  0x76   : > { %v18015_v39 = vsel %vm17647_vm14, %v13862_v60, %v1926_v58  ;;  %v18019_v16 = vsel %vm17647_vm14, %v1928_v7, %v1929_v35  ;;  %v1935_v20 = vrot.slane %v1933_v46, 4  ;;  %v13960_v43 = vrot.slane %v2816_v21, 9  ;;  %v889_v19 = vld [vmem:[#allocation2 + $0x60] sm:$0xf] }
  0x77   : > { %15779 = vmatmul.mubr.bf16.gmra.mxu0 %v13831_v42  ;;  %v15093_v49 = vpack.c.bf16 %v623_v26, %v623_v26  ;;  %v795_v25 = vshrl.u32 %v15092_v8, 16  ;;  %v798_v30 = vshll.u32 %v15092_v8, 16  ;;  %v18028_v50 = vsel %vm17647_vm14, %v13863_v61, %v1933_v46  ;;  %v17021_v42 = vld [vmem:[%s23675_s3 + $0x130] sm:$0xff]  }
  0x78   : > { %15830 = vmatprep.mubr.bf16.mxu0 %v13880_v31  ;;  %15913 = vmatpush3.bf16.msra.mxu1 %v17019_v44  ;;  %v13885_v34 = vcombine.low %v17992_v38, %v18001_v13  ;;  %v18036_v41 = vsel %vm17647_vm14, %v1935_v20, %v1936_v47  ;;  %v2852_v33 = vrot.slane %v2850_v5, 4  ;;  %v2853_v62 = vrot.slane %v18006_v40, 5  ;;  %v17025_v31 = vld [vmem:[%s23675_s3 + $0x160] sm:$0xff]   ;;  %v17029_v47 = vld [vmem:[%s23675_s3 + $0x158] sm:$0xff]   ;;  %v18078_v20 = vld [vmem:[%s23675_s3 + $0x128] sm:$0xff]  }
  0x79   : > { %15914 = vmatprep.subr.bf16.mxu1 %v17023_v3  ;;  %v797_v10 = vrot.slane %v795_v25, 7  ;;  %v803_v48 = vshrl.u32 %v15093_v49, 16  ;;  %v806_v54 = vshll.u32 %v15093_v49, 16  ;;  %v13886_v44 = vcombine.low %v18015_v39, %v18019_v16  ;;  %v2821_v16 = vld [vmem:[#allocation2 + $0x48] sm:$0xe] }
  0x7a   : > { %v13887_v55 = vcombine.low %v18028_v50, %v18036_v41  ;;  %v18048_v60 = vsel %vm17647_vm14, %v13960_v43, %v2850_v5  ;;  %v13961_v58 = vrot.slane %v2817_v12, 9  ;;  %v2857_v35 = vrot.slane %v18021_v22, 5  ;;  %v17028_v43 = vld [vmem:[#allocation2 + $0x48] sm:$0xff]  }
  0x7b   : > { %15867 = vmatmul.mubr.bf16.gmra.mxu1 %v17022_v11  ;;  %v800_v32 = vor.u32 %v798_v30, %v797_v10  ;;  %v801_v52 = vrot.slane %v797_v10, 4  ;;  %v18051_v18 = vrot.slane %v803_v48, 7  ;;  %v2860_v61 = vrot.slane %v18030_v36, 5 }
  0x7c   : > { %15915 = vmatpush3.bf16.msra.mxu1 %v17023_v3  ;;  %15870 = vmatprep.mubr.bf16.mxu1 %v17026_v53  ;;  %v18059_v7 = vsel %vm17647_vm14, %v2852_v33, %v2853_v62  ;;  %v2859_v46 = vrot.slane %v2857_v35, 4  ;;  %v2415_v26 = vshrl.u32 %v2390_v45, 16  ;;  %v2418_v8 = vshll.u32 %v2390_v45, 16  ;;  %v2393_v53 = vld [vmem:[#allocation2 + $0x18] sm:$0xf] }
  0x7d   : > { %15916 = vmatprep.subr.bf16.mxu1 %v17025_v31  ;;  %v808_v21 = vor.u32 %v806_v54, %v18051_v18  ;;  %v890_v5 = vsel %vm17597_vm11, %v800_v32, %v889_v19  ;;  %v18069_v3 = vsel %vm17647_vm14, %v13961_v58, %v2857_v35  ;;  %v2424_v11 = vshll.u32 %v18004_v23, 16 }
  0x7e   : > { %v810_v49 = vrot.slane %v18051_v18, 4  ;;  %891 = vst [vmem:[#allocation2 + $0x60] sm:$0xf] %v890_v5  ;;  %v2417_v25 = vrot.slane %v2415_v26, 4  ;;  %v2420_v30 = vrot.slane %v2418_v8, 5  ;;  %v2428_v12 = vshrl.u32 %v18004_v23, 16 }
  0x7f   : > { %15831 = vmatmul.mubr.bf16.vlgmr.msra.gmra.mxu0 %v13881_v63  ;;  %v809_v27 = vsel %vm17608_vm12, %v801_v52, %v808_v21  ;;  %v18095_v63 = vsel %vm17647_vm14, %v2859_v46, %v2860_v61  ;;  %v18097_v33 = vrot.slane %v2424_v11, 5  ;;  %v18100_v23 = vld [vmem:[#allocation2 + $0x28] sm:$0xf]  ;;  %v2439_v10 = vshrl.u32 %v2393_v53, 16  ;;  %v18111_v46 = vld [vmem:[#allocation2 + $0x34] sm:$0xf] }
  0x80   : > { %15879 = vmatpush3.bf16.msra.mxu0 %v17865_v56  ;;  %15834 = vmatprep.mubr.bf16.mxu0 %v13882_v59  ;;  %v2434_v56 = vshll.u32 %v18006_v40, 16  ;;  %892 = vst [vmem:[#allocation2 + $0x64] sm:$0xf] %v809_v27  ;;  %v2421_v59 = vor.u32 %v2420_v30, %v2417_v25  ;;  %v2430_v62 = vrot.slane %v2428_v12, 4  ;;  %v2442_v48 = vshll.u32 %v2393_v53, 16 }
  0x81   : > { %15880 = vmatprep.subr.bf16.mxu0 %v17021_v42  ;;  %15917 = vmatpush3.bf16.msra.mxu1 %v17025_v31  ;;  %v2448_v45 = vshll.u32 %v18021_v22, 16  ;;  %v2452_v19 = vshrl.u32 %v18021_v22, 16  ;;  %v2458_v58 = vshll.u32 %v18030_v36, 16  ;;  %v18105_v40 = vld [vmem:[#allocation2 + $0x2c] sm:$0x1]  ;;  %v17027_v31 = vld [vmem:[%s23675_s3 + $0x120] sm:$0xff]  }
  0x82   : > { %15918 = vmatprep.subr.bf16.mxu1 %v17029_v47  ;;  %v2436_v54 = vrot.slane %v2434_v56, 5  ;;  %v2422_v35 = vrot.slane %v2421_v59, 4  ;;  %v2431_v32 = vor.u32 %v2430_v62, %v18097_v33  ;;  %v2441_v52 = vrot.slane %v2439_v10, 4  ;;  %v18117_v21 = vld [vmem:[#allocation2 + $0x38] sm:$0x1] }
  0x83   : > { %v2444_v61 = vrot.slane %v2442_v48, 5  ;;  %15871 = vmatmul.mubr.bf16.gmra.mxu1 %v17028_v43  ;;  %v18113_v26 = vrot.slane %v2448_v45, 5  ;;  %v2454_v22 = vrot.slane %v2452_v19, 4  ;;  %v18115_v8 = vrot.slane %v2458_v58, 5  ;;  %v2819_v5 = vld [vmem:[#allocation2 + $0x30] sm:$0xe] }
  0x84   : > { %15881 = vmatpush3.bf16.msra.mxu0 %v17021_v42  ;;  %v13962_v36 = vrot.slane %v2818_v6, 9  ;;  %v2427_v11 = vsel %vm17618_vm13, %v2422_v35, %v18097_v33  ;;  %v2432_v53 = vrot.slane %v2431_v32, 4  ;;  %v2864_v42 = vrot.slane %v18100_v23, 5  ;;  %15874 = vmatprep.mubr.bf16.mxu1 %v17032_v37  ;;  %v17035_v43 = vld [vmem:[%s23675_s3 + $0x148] sm:$0xff]   ;;  %v17030_v33 = vld [vmem:[%s23675_s3 + $0x118] sm:$0xff]  }
  0x85   : > { %15882 = vmatprep.subr.bf16.mxu0 %v18078_v20  ;;  %15919 = vmatpush3.bf16.msra.mxu1 %v17029_v47  ;;  %v2445_v25 = vor.u32 %v2444_v61, %v2441_v52  ;;  %v2455_v30 = vor.u32 %v2454_v22, %v18113_v26  ;;  %v2867_v12 = vrot.slane %v18105_v40, 5  ;;  %v13963_v47 = vrot.slane %v2819_v5, 9  ;;  %v2396_v62 = vld [vmem:[#allocation2 + $0x24] sm:$0xf]  ;;  %v2399_v48 = vld [vmem:[#allocation2 + $0x30] sm:$0xf] }
  0x86   : > { %15920 = vmatprep.subr.bf16.mxu1 %v18089_v4  ;;  %v2871_v27 = vrot.slane %v18111_v46, 5  ;;  %v13984_v56 = vcombine.low %v18048_v60, %v18059_v7  ;;  %v2437_v6 = vsel %vm17618_vm13, %v2432_v53, %v2436_v54  ;;  %v2866_v59 = vrot.slane %v2864_v42, 4  ;;  %v17033_v61 = vld [vmem:[%s23675_s3 + $0x110] sm:$0xff]   ;;  %v18190_v5 = vld [vmem:[#allocation2 + $0x40] sm:$0xf] }
  0x87   : > { %15835 = vmatmul.mubr.bf16.gmra.mxu0 %v13883_v24  ;;  %v18141_v37 = vrot.slane %v2445_v25, 4  ;;  %v17034_v57 = vld [vmem:[#allocation2 + $0x60] sm:$0xff]   ;;  %v13985_v24 = vcombine.low %v18069_v3, %v18095_v63  ;;  %v18152_v60 = vrot.slane %v2455_v30, 4  ;;  %v18156_v7 = vsel %vm17647_vm14, %v13962_v36, %v2864_v42  ;;  %v2820_v53 = vld [vmem:[#allocation2 + $0x3c] sm:$0xe] }
  0x88   : > { %15883 = vmatpush3.bf16.msra.mxu0 %v18078_v20  ;;  %15838 = vmatprep.mubr.bf16.mxu0 %v13884_v51  ;;  %v2873_v10 = vrot.slane %v2871_v27, 4  ;;  %v18159_v17 = vcombine.low %v2427_v11, %v2437_v6  ;;  %v18163_v2 = vsel %vm17647_vm14, %v2866_v59, %v2867_v12  ;;  %v2874_v51 = vrot.slane %v18117_v21, 5  ;;  %v18192_v11 = vld [vmem:[#allocation2 + $0x44] sm:$0x1]  ;;  %v17039_v30 = vld [vmem:[%s23675_s3 + $0x1f8] sm:$0xff]  }
  0x89   : > { %15884 = vmatprep.subr.bf16.mxu0 %v17027_v31  ;;  %15921 = vmatpush3.bf16.msra.mxu1 %v18089_v4  ;;  %v2463_v20 = vshrl.u32 %v2396_v62, 16  ;;  %v2451_v54 = vsel %vm17618_vm13, %v18141_v37, %v18113_v26  ;;  %v18172_v45 = vsel %vm17647_vm14, %v13963_v47, %v2871_v27  ;;  %v2466_v4 = vshll.u32 %v2396_v62, 16  ;;  %v18208_v62 = vld [vmem:[#allocation2 + $0x4c] sm:$0xf] }
  0x8a   : > { %15922 = vmatprep.subr.bf16.mxu1 %v17035_v43  ;;  %v2472_v19 = vshll.u32 %v18100_v23, 16  ;;  %v2461_v58 = vsel %vm17618_vm13, %v18152_v60, %v18115_v8  ;;  %v13986_v35 = vcombine.low %v18156_v7, %v18163_v2  ;;  %v2476_v52 = vshrl.u32 %v18100_v23, 16 }
  0x8b   : > { %v2465_v32 = vrot.slane %v2463_v20, 4  ;;  %15875 = vmatmul.mubr.bf16.gmra.mxu1 %v17034_v57  ;;  %v18187_v26 = vsel %vm17647_vm14, %v2873_v10, %v2874_v51  ;;  %v2468_v22 = vrot.slane %v2466_v4, 5  ;;  %v2482_v8 = vshll.u32 %v18105_v40, 16  ;;  %v17041_v57 = vld [vmem:[%s23675_s3 + $0x1f0] sm:$0xff]  }
  0x8c   : > { %15885 = vmatpush3.bf16.msra.mxu0 %v17027_v31  ;;  %v2474_v36 = vrot.slane %v2472_v19, 5  ;;  %v2478_v23 = vrot.slane %v2476_v52, 4  ;;  %v2487_v31 = vshrl.u32 %v2399_v48, 16  ;;  %v2490_v25 = vshll.u32 %v2399_v48, 16  ;;  %15926 = vmatprep.mubr.bf16.mxu1 %v13984_v56  ;;  %v2402_v52 = vld [vmem:[#allocation2 + $0x3c] sm:$0xf] }
  0x8d   : > { %15886 = vmatprep.subr.bf16.mxu0 %v17030_v33  ;;  %15923 = vmatpush3.bf16.msra.mxu1 %v17035_v43  ;;  %v2496_v42 = vshll.u32 %v18111_v46, 16  ;;  %v2469_v12 = vor.u32 %v2468_v22, %v2465_v32  ;;  %v2484_v40 = vrot.slane %v2482_v8, 5  ;;  %v2500_v47 = vshrl.u32 %v18111_v46, 16  ;;  %v17036_v43 = vld [vmem:[%s23675_s3 + $0x108] sm:$0xff]   ;;  %v17038_v22 = vld [vmem:[%s23675_s3 + $0x100] sm:$0xff]  }
  0x8e   : > { %15924 = vmatprep.subr.bf16.mxu1 %v17037_v1  ;;  %v2506_v27 = vshll.u32 %v18117_v21, 16  ;;  %v2479_v6 = vor.u32 %v2478_v23, %v2474_v36  ;;  %v2489_v56 = vrot.slane %v2487_v31, 4  ;;  %v2492_v37 = vrot.slane %v2490_v25, 5  ;;  %v2405_v25 = vld [vmem:[#allocation2 + $0x48] sm:$0xf] }
  0x8f   : > { %15839 = vmatmul.mubr.bf16.gmra.mxu0 %v13885_v34  ;;  %v18206_v59 = vrot.slane %v2496_v42, 5  ;;  %v2470_v46 = vrot.slane %v2469_v12, 4  ;;  %v2502_v21 = vrot.slane %v2500_v47, 4  ;;  %v13964_v13 = vrot.slane %v2820_v53, 9  ;;  %v18215_v34 = vld [vmem:[#allocation2 + $0x50] sm:$0x1] }
  0x90   : > { %15887 = vmatpush3.bf16.msra.mxu0 %v17030_v33  ;;  %15842 = vmatprep.mubr.bf16.mxu0 %v13886_v44  ;;  %v18213_v38 = vrot.slane %v2506_v27, 5  ;;  %v2480_v60 = vrot.slane %v2479_v6, 4  ;;  %v2493_v10 = vor.u32 %v2492_v37, %v2489_v56  ;;  %v2878_v33 = vrot.slane %v18190_v5, 5  ;;  %v18288_v47 = vld [vmem:[#allocation2 + $0x5c] sm:$0x1]  ;;  %v17045_v56 = vld [vmem:[%s23675_s3 + $0x1e0] sm:$0xff]  }
  0x91   : > { %15888 = vmatprep.subr.bf16.mxu0 %v17033_v61  ;;  %15925 = vmatpush3.bf16.msra.mxu1 %v17037_v1  ;;  %v2881_v39 = vrot.slane %v18192_v11, 5  ;;  %v2475_v44 = vsel %vm17618_vm13, %v2470_v46, %v2474_v36  ;;  %v2503_v51 = vor.u32 %v2502_v21, %v18206_v59  ;;  %v13965_v20 = vrot.slane %v2821_v16, 9  ;;  %v2822_v6 = vld [vmem:[#allocation2 + $0x54] sm:$0xe]  ;;  %v18301_v16 = vld [vmem:[#allocation2 + $0x60] sm:$0xe] }
  0x92   : > { %15974 = vmatprep.subr.bf16.mxu1 %v17039_v30  ;;  %v2885_v1 = vrot.slane %v18208_v62, 5  ;;  %v18226_v48 = vcombine.low %v2451_v54, %v2461_v58  ;;  %v2485_v4 = vsel %vm17618_vm13, %v2480_v60, %v2484_v40  ;;  %v18230_v19 = vrot.slane %v2493_v10, 4  ;;  %v18286_v40 = vld [vmem:[#allocation2 + $0x58] sm:$0xf] }
  0x93   : > { %v2880_v32 = vrot.slane %v2878_v33, 4  ;;  %v13987_v54 = vcombine.low %v18172_v45, %v18187_v26  ;;  %v18240_v58 = vrot.slane %v2503_v51, 4  ;;  %v18244_v36 = vsel %vm17647_vm14, %v13964_v13, %v2878_v33  ;;  %v397_v13 = vld [vmem:[#allocation2 + $0x68] sm:$0x1] }
  0x94   : > { %15889 = vmatpush3.bf16.msra.mxu0 %v17033_v61  ;;  %15927 = vmatmul.mubr.bf16.vlgmr.msra.gmra.mxu1 %v13985_v24  ;;  %v2887_v8 = vrot.slane %v2885_v1, 4  ;;  %v18246_v61 = vcombine.low %v2475_v44, %v2485_v4  ;;  %v2888_v3 = vrot.slane %v18215_v34, 5  ;;  %v2511_v63 = vshrl.u32 %v2402_v52, 16  ;;  %v17043_v24 = vld [vmem:[%s23675_s3 + $0x1e8] sm:$0xff]   ;;  %v17042_v44 = vld [vmem:[%s23675_s3 + $0x1b0] sm:$0xff]  }
  0x95   : > { %15890 = vmatprep.subr.bf16.mxu0 %v17036_v43  ;;  %15975 = vmatpush3.bf16.msra.mxu1 %v17039_v30  ;;  %v2882_v53 = vsel %vm17647_vm14, %v2880_v32, %v2881_v39  ;;  %v2499_v45 = vsel %vm17618_vm13, %v18230_v19, %v18206_v59  ;;  %v18263_v26 = vsel %vm17647_vm14, %v13965_v20, %v2885_v1  ;;  %v2514_v23 = vshll.u32 %v2402_v52, 16  ;;  %v17040_v30 = vld [vmem:[%s23675_s3 + $0x1b8] sm:$0xff]   ;;  %v18299_v39 = vld [vmem:[#allocation2 + $0x64] sm:$0xf]  ;;  %v17049_v59 = vld [vmem:[%s23675_s3 + $0x1d0] sm:$0xff]  }
  0x96   : > { %15976 = vmatprep.subr.bf16.mxu1 %v17041_v57  ;;  %15930 = vmatprep.mubr.bf16.mxu1 %v13986_v35  ;;  %v2520_v31 = vshll.u32 %v18190_v5, 16  ;;  %v2509_v7 = vsel %vm17618_vm13, %v18240_v58, %v18213_v38  ;;  %v13988_v2 = vcombine.low %v18244_v36, %v2882_v53  ;;  %v2513_v35 = vrot.slane %v2511_v63, 4  ;;  %v17047_v1 = vld [vmem:[%s23675_s3 + $0x1d8] sm:$0xff]   ;;  %v17044_v63 = vld [vmem:[%s23675_s3 + $0x1a8] sm:$0xff]  }
  0x97   : > { %15843 = vmatmul.mubr.bf16.gmra.mxu0 %v13887_v55  ;;  %v2524_v42 = vshrl.u32 %v18190_v5, 16  ;;  %v18281_v50 = vsel %vm17647_vm14, %v2887_v8, %v2888_v3  ;;  %v2516_v41 = vrot.slane %v2514_v23, 5  ;;  %v2530_v12 = vshll.u32 %v18192_v11, 16  ;;  %v2408_v3 = vld [vmem:[#allocation2 + $0x54] sm:$0xf] }
  0x98   : > { %15891 = vmatpush3.bf16.msra.mxu0 %v17036_v43  ;;  %15894 = vmatprep.mubr.bf16.mxu0 %v18159_v17  ;;  %v18283_v55 = vrot.slane %v2520_v31, 5  ;;  %v2535_v5 = vshrl.u32 %v2405_v25, 16  ;;  %v2538_v27 = vshll.u32 %v2405_v25, 16  ;;  %v2544_v43 = vshll.u32 %v18208_v62, 16  ;;  %v2411_v25 = vld [vmem:[#allocation2 + $0x60] sm:$0xf] }
  0x99   : > { %15892 = vmatprep.subr.bf16.mxu0 %v17038_v22  ;;  %15977 = vmatpush3.bf16.msra.mxu1 %v17041_v57  ;;  %v2526_v17 = vrot.slane %v2524_v42, 4  ;;  %v2517_v37 = vor.u32 %v2516_v41, %v2513_v35  ;;  %v2532_v46 = vrot.slane %v2530_v12, 5  ;;  %v2548_v11 = vshrl.u32 %v18208_v62, 16 }
  0x9a   : > { %15978 = vmatprep.subr.bf16.mxu1 %v17043_v24  ;;  %v2554_v21 = vshll.u32 %v18215_v34, 16  ;;  %v2537_v60 = vrot.slane %v2535_v5, 4  ;;  %v2540_v10 = vrot.slane %v2538_v27, 5  ;;  %v18297_v33 = vrot.slane %v2544_v43, 5  ;;  %v17046_v27 = vld [vmem:[%s23675_s3 + $0x1a0] sm:$0xff]  }
  0x9b   : > { %v2527_v57 = vor.u32 %v2526_v17, %v18283_v55  ;;  %v13989_v62 = vcombine.low %v18263_v26, %v18281_v50  ;;  %v2518_v34 = vrot.slane %v2517_v37, 4  ;;  %v2550_v51 = vrot.slane %v2548_v11, 4 }
  0x9c   : > { %15893 = vmatpush3.bf16.msra.mxu0 %v17038_v22  ;;  %15931 = vmatmul.mubr.bf16.gmra.mxu1 %v13987_v54  ;;  %v13966_v20 = vrot.slane %v2822_v6, 9  ;;  %v2541_v32 = vor.u32 %v2540_v10, %v2537_v60  ;;  %v2892_v52 = vrot.slane %v18286_v40, 5  ;;  %v2895_v22 = vrot.slane %v18288_v47, 5 }
  0x9d   : > { %15942 = vmatprep.subr.bf16.mxu0 %v17040_v30  ;;  %15979 = vmatpush3.bf16.msra.mxu1 %v17043_v24  ;;  %v2528_v4 = vrot.slane %v2527_v57, 4  ;;  %v2523_v54 = vsel %vm17618_vm13, %v2518_v34, %v18283_v55  ;;  %v2551_v36 = vor.u32 %v2550_v51, %v18297_v33  ;;  %v18317_v8 = vrot.slane %v2554_v21, 5  ;;  %v18373_v57 = vld [vmem:[#allocation2 + $0x1c] sm:$0xf] }
  0x9e   : > { %15980 = vmatprep.subr.bf16.mxu1 %v17045_v56  ;;  %15934 = vmatprep.mubr.bf16.mxu1 %v13988_v2  ;;  %v398_v53 = vsel %vm17551_vm6, 0, %v397_v13  ;;  %v18327_v26 = vrot.slane %v2541_v32, 4  ;;  %v2893_v23 = vsel %vm17647_vm14, %v13966_v20, %v2892_v52  ;;  %v2894_v31 = vrot.slane %v2892_v52, 4 }
  0x9f   : > { %15895 = vmatmul.mubr.bf16.vlgmr.msra.gmra.mxu0 %v18226_v48  ;;  %v2533_v24 = vsel %vm17618_vm13, %v2528_v4, %v2532_v46  ;;  %399 = vst [vmem:[#allocation2 + $0x68] sm:$0x1] %v398_v53  ;;  %v2552_v2 = vrot.slane %v2551_v36, 4  ;;  %v13967_v48 = vrot.slane %v18301_v16, 9  ;;  %v2899_v35 = vrot.slane %v18299_v39, 5  ;;  %v17051_v46 = vld [vmem:[%s23675_s3 + $0x1c8] sm:$0xff]  }
  0xa0   : > { %15943 = vmatpush3.bf16.msra.mxu0 %v17040_v30  ;;  %15898 = vmatprep.mubr.bf16.mxu0 %v18246_v61  ;;  %v2559_v42 = vshrl.u32 %v2408_v3, 16  ;;  %v13947_v30 = vcombine.low %v2499_v45, %v2509_v7  ;;  %v2896_v61 = vsel %vm17647_vm14, %v2894_v31, %v2895_v22  ;;  %v2562_v50 = vshll.u32 %v2408_v3, 16  ;;  %v3360_v45 = vld [vmem:[#allocation2 + $0x18] sm:$0xf]  ;;  %v18384_v4 = vld [vmem:[#allocation2 + $0x20] sm:$0x1] }
  0xa1   : > { %15944 = vmatprep.subr.bf16.mxu0 %v17042_v44  ;;  %15981 = vmatpush3.bf16.msra.mxu1 %v17045_v56  ;;  %v2568_v41 = vshll.u32 %v18286_v40, 16  ;;  %v13948_v55 = vcombine.low %v2523_v54, %v2533_v24  ;;  %v2547_v38 = vsel %vm17618_vm13, %v18327_v26, %v18297_v33  ;;  %v2557_v58 = vsel %vm17618_vm13, %v2552_v2, %v18317_v8  ;;  %v3363_v36 = vld [vmem:[#allocation2 + $0x24] sm:$0xf]  ;;  %v18390_v3 = vld [vmem:[#allocation2 + $0x28] sm:$0xf]  ;;  %v17050_v2 = vld [vmem:[%s23675_s3 + $0x190] sm:$0xff]  }
  0xa2   : > { %15982 = vmatprep.subr.bf16.mxu1 %v17047_v1  ;;  %v13990_v19 = vcombine.low %v2893_v23, %v2896_v61  ;;  %v18359_v7 = vrot.slane %v2899_v35, 4  ;;  %v2561_v12 = vrot.slane %v2559_v42, 4  ;;  %v2564_v17 = vrot.slane %v2562_v50, 5  ;;  %v17053_v23 = vld [vmem:[%s23675_s3 + $0x1c0] sm:$0xff]  }
  0xa3   : > { %v18361_v5 = vrot.slane %v2568_v41, 5  ;;  %v2572_v43 = vshrl.u32 %v18286_v40, 16  ;;  %v2578_v6 = vshll.u32 %v18288_v47, 16  ;;  %v2583_v56 = vshrl.u32 %v2411_v25, 16 }
  0xa4   : > { %15945 = vmatpush3.bf16.msra.mxu0 %v17042_v44  ;;  %15935 = vmatmul.mubr.bf16.gmra.mxu1 %v13989_v62  ;;  %v2586_v37 = vshll.u32 %v2411_v25, 16  ;;  %v2565_v11 = vor.u32 %v2564_v17, %v2561_v12  ;;  %v2592_v21 = vshll.u32 %v18299_v39, 16  ;;  %v2596_v13 = vshrl.u32 %v18299_v39, 16  ;;  %v17048_v62 = vld [vmem:[%s23675_s3 + $0x198] sm:$0xff]   ;;  %v17052_v39 = vld [vmem:[%s23675_s3 + $0x188] sm:$0xff]  }
  0xa5   : > { %15946 = vmatprep.subr.bf16.mxu0 %v17044_v63  ;;  %15983 = vmatpush3.bf16.msra.mxu1 %v17047_v1  ;;  %v3385_v60 = vshrl.u32 %v3360_v45, 16  ;;  %v2574_v47 = vrot.slane %v2572_v43, 4  ;;  %v2580_v10 = vrot.slane %v2578_v6, 5  ;;  %v2585_v33 = vrot.slane %v2583_v56, 4 }
  0xa6   : > { %15984 = vmatprep.subr.bf16.mxu1 %v17049_v59  ;;  %15938 = vmatprep.mubr.bf16.mxu1 %v13990_v19  ;;  %v893_v40 = vld [vmem:[#allocation2 + $0x68] sm:$0x1]  ;;  %v2588_v44 = vrot.slane %v2586_v37, 5  ;;  %v2566_v51 = vrot.slane %v2565_v11, 4  ;;  %v18382_v20 = vrot.slane %v2592_v21, 5  ;;  %v2598_v1 = vrot.slane %v2596_v13, 4 }
  0xa7   : > { %15899 = vmatmul.mubr.bf16.gmra.mxu0 %v13947_v30  ;;  %v894_v34 = vsel %vm17519_vm2, %v810_v49, %v893_v40  ;;  %v2575_v32 = vor.u32 %v2574_v47, %v18361_v5  ;;  %v3387_v22 = vrot.slane %v3385_v60, 4  ;;  %v3388_v54 = vshll.u32 %v3360_v45, 16  ;;  %v3366_v13 = vld [vmem:[#allocation2 + $0x30] sm:$0xf] }
  0xa8   : > { %15947 = vmatpush3.bf16.msra.mxu0 %v17044_v63  ;;  %15902 = vmatprep.mubr.bf16.mxu0 %v13948_v55  ;;  %895 = vst [vmem:[#allocation2 + $0x68] sm:$0x1] %v894_v34  ;;  %v2589_v52 = vor.u32 %v2588_v44, %v2585_v33  ;;  %v13949_v18 = vcombine.low %v2547_v38, %v2557_v58  ;;  %v3394_v8 = vshll.u32 %v18373_v57, 16  ;;  %v3398_v53 = vshrl.u32 %v18373_v57, 16  ;;  %v18392_v63 = vld [vmem:[#allocation2 + $0x2c] sm:$0x1] }
  0xa9   : > { %15948 = vmatprep.subr.bf16.mxu0 %v17046_v27  ;;  %15985 = vmatpush3.bf16.msra.mxu1 %v17049_v59  ;;  %v2599_v49 = vor.u32 %v2598_v1, %v18382_v20  ;;  %v2571_v24 = vsel %vm17618_vm13, %v2566_v51, %v18361_v5  ;;  %v2576_v26 = vrot.slane %v2575_v32, 4  ;;  %v3390_v31 = vrot.slane %v3388_v54, 5  ;;  %v18411_v59 = vld [vmem:[%s23675_s3 + $0x78] sm:$0xff]   ;;  %v18433_v44 = vld [vmem:[#allocation2 + $0x34] sm:$0xf] }
  0xaa   : > { %15986 = vmatprep.subr.bf16.mxu1 %v17051_v46  ;;  %v3404_v25 = vshll.u32 %v18384_v4, 16  ;;  %v18404_v42 = vrot.slane %v2589_v52, 4  ;;  %v3396_v30 = vrot.slane %v3394_v8, 5  ;;  %v3400_v61 = vrot.slane %v3398_v53, 4  ;;  %v17054_v52 = vld [vmem:[%s23675_s3 + $0x180] sm:$0xff]   ;;  %v17056_v8 = vld [vmem:[#allocation2 + $0x18] sm:$0xff]  }
  0xab   : > { %v3409_v50 = vshrl.u32 %v3363_v36, 16  ;;  %v2581_v41 = vsel %vm17618_vm13, %v2576_v26, %v2580_v10  ;;  %v2600_v55 = vrot.slane %v2599_v49, 4  ;;  %v3391_v38 = vor.u32 %v3390_v31, %v3387_v22  ;;  %v18444_v49 = vld [vmem:[#allocation2 + $0x40] sm:$0xf] }
  0xac   : > { %15949 = vmatpush3.bf16.msra.mxu0 %v17046_v27  ;;  %v3406_v58 = vrot.slane %v3404_v25, 5  ;;  %v13950_v19 = vcombine.low %v2571_v24, %v2581_v41  ;;  %v3401_v45 = vor.u32 %v3400_v61, %v3396_v30  ;;  %v3412_v17 = vshll.u32 %v3363_v36, 16 }
  0xad   : > { %15950 = vmatprep.subr.bf16.mxu0 %v17048_v62  ;;  %15987 = vmatpush3.bf16.msra.mxu1 %v17051_v46  ;;  %v3411_v12 = vrot.slane %v3409_v50, 4  ;;  %v3392_v5 = vrot.slane %v3391_v38, 4  ;;  %v3418_v27 = vshll.u32 %v18390_v3, 16  ;;  %v3422_v43 = vshrl.u32 %v18390_v3, 16  ;;  %v17057_v38 = vld [vmem:[%s23675_s3 + $0x238] sm:$0xff]  }
  0xae   : > { %15988 = vmatprep.subr.bf16.mxu1 %v17053_v23  ;;  %v3428_v6 = vshll.u32 %v18392_v63, 16  ;;  %v2900_v37 = vsel %vm17647_vm14, %v13967_v48, %v2899_v35  ;;  %v2595_v46 = vsel %vm17618_vm13, %v18404_v42, %v18382_v20  ;;  %v3402_v11 = vrot.slane %v3401_v45, 4  ;;  %v18439_v20 = vld [vmem:[#allocation2 + $0x38] sm:$0x1] }
  0xaf   : > { %15903 = vmatmul.mubr.bf16.gmra.mxu0 %v13949_v18  ;;  %v2413_v56 = vld [vmem:[#allocation2 + $0x68] sm:$0x1]  ;;  %v3414_v21 = vrot.slane %v3412_v17, 5  ;;  %v3397_v16 = vsel %vm17618_vm13, %v3392_v5, %v3396_v30  ;;  %v3420_v48 = vrot.slane %v3418_v27, 5  ;;  %v3424_v10 = vrot.slane %v3422_v43, 4 }
  0xb0   : > { %15951 = vmatpush3.bf16.msra.mxu0 %v17048_v62  ;;  %v2902_v60 = vrot.slane %v2413_v56, 5  ;;  %15906 = vmatprep.mubr.bf16.mxu0 %v13950_v19  ;;  %v2602_v40 = vshll.u32 %v2413_v56, 16  ;;  %v3407_v35 = vsel %vm17618_vm13, %v3402_v11, %v3406_v58  ;;  %v3430_v33 = vrot.slane %v3428_v6, 5  ;;  %v3369_v18 = vld [vmem:[#allocation2 + $0x3c] sm:$0xf]  ;;  %v17058_v43 = vld [vmem:[#allocation2 + $0x24] sm:$0xff]  }
  0xb1   : > { %15952 = vmatprep.subr.bf16.mxu0 %v17050_v2  ;;  %15989 = vmatpush3.bf16.msra.mxu1 %v17053_v23  ;;  %v3415_v47 = vor.u32 %v3414_v21, %v3411_v12  ;;  %v14048_v51 = vcombine.low %v3397_v16, %v3407_v35  ;;  %v3433_v1 = vshrl.u32 %v3366_v13, 16  ;;  %v3425_v54 = vor.u32 %v3424_v10, %v3420_v48  ;;  %v18452_v30 = vld [vmem:[#allocation2 + $0x44] sm:$0x1]  ;;  %v17059_v6 = vld [vmem:[%s23675_s3 + $0x70] sm:$0xff]   ;;  %v3373_v35 = vld [vmem:[#allocation2 + $0x4c] sm:$0xf] }
  0xb2   : > { %v2903_v62 = vsel %vm17647_vm14, %v18359_v7, %v2902_v60  ;;  %v2604_v34 = vrot.slane %v2602_v40, 5  ;;  %16038 = vmatprep.subr.bf16.mxu1 %v18411_v59  ;;  %v3436_v36 = vshll.u32 %v3366_v13, 16  ;;  %v3442_v24 = vshll.u32 %v18433_v44, 16  ;;  %v3372_v60 = vld [vmem:[#allocation2 + $0x48] sm:$0xf]  ;;  %v17060_v40 = vld [vmem:[%s23675_s3 + $0x230] sm:$0xff]  }
  0xb3   : > { %v13991_v32 = vcombine.low %v2900_v37, %v2903_v62  ;;  %v3416_v22 = vrot.slane %v3415_v47, 4  ;;  %v3435_v53 = vrot.slane %v3433_v1, 4  ;;  %v3446_v26 = vshrl.u32 %v18433_v44, 16  ;;  %v3374_v47 = vld [vmem:[#allocation2 + $0x50] sm:$0x1] }
  0xb4   : > { %15953 = vmatpush3.bf16.msra.mxu0 %v17050_v2  ;;  %v2605_v7 = vsel %vm17618_vm13, %v2600_v55, %v2604_v34  ;;  %v3426_v25 = vrot.slane %v3425_v54, 4  ;;  %v3438_v42 = vrot.slane %v3436_v36, 5  ;;  %v3444_v2 = vrot.slane %v3442_v24, 5  ;;  %v17062_v34 = vld [vmem:[#allocation2 + $0x30] sm:$0xff]   ;;  %v3376_v24 = vld [vmem:[#allocation2 + $0x58] sm:$0xf] }
  0xb5   : > { %15939 = vmatmul.mubr.bf16.gmra.mxu1 %v13991_v32  ;;  %15954 = vmatprep.subr.bf16.mxu0 %v17052_v39  ;;  %v13951_v23 = vcombine.low %v2595_v46, %v2605_v7  ;;  %v3421_v31 = vsel %vm17618_vm13, %v3416_v22, %v3420_v48  ;;  %v3448_v61 = vrot.slane %v3446_v26, 4  ;;  %v3452_v50 = vshll.u32 %v18439_v20, 16 }
  0xb6   : > { %15990 = vmatprep.mubr.bf16.mxu1 %v14048_v51  ;;  %v3457_v41 = vshrl.u32 %v3369_v18, 16  ;;  %v3431_v55 = vsel %vm17618_vm13, %v3426_v25, %v3430_v33  ;;  %v3439_v58 = vor.u32 %v3438_v42, %v3435_v53  ;;  %v3460_v19 = vshll.u32 %v3369_v18, 16  ;;  %v3375_v18 = vld [vmem:[#allocation2 + $0x54] sm:$0xf]  ;;  %v3377_v25 = vld [vmem:[#allocation2 + $0x5c] sm:$0x1] }
  0xb7   : > { %15907 = vmatmul.mubr.bf16.gmra.mxu0 %v13951_v23  ;;  %v3466_v45 = vshll.u32 %v18444_v49, 16  ;;  %v14049_v12 = vcombine.low %v3421_v31, %v3431_v55  ;;  %v3449_v17 = vor.u32 %v3448_v61, %v3444_v2  ;;  %v3454_v5 = vrot.slane %v3452_v50, 5  ;;  %v17061_v31 = vld [vmem:[%s23675_s3 + $0x68] sm:$0xff]  }
  0xb8   : > { %15955 = vmatpush3.bf16.msra.mxu0 %v17052_v39  ;;  %15958 = vmatprep.mubr.bf16.mxu0 %v17056_v8  ;;  %v3459_v27 = vrot.slane %v3457_v41, 4  ;;  %v3440_v56 = vrot.slane %v3439_v58, 4  ;;  %v3462_v37 = vrot.slane %v3460_v19, 5  ;;  %v3470_v11 = vshrl.u32 %v18444_v49, 16  ;;  %v17064_v19 = vld [vmem:[#allocation2 + $0x3c] sm:$0xff]  }
  0xb9   : > { %15956 = vmatprep.subr.bf16.mxu0 %v17054_v52  ;;  %v3468_v46 = vrot.slane %v3466_v45, 5  ;;  %v3450_v21 = vrot.slane %v3449_v17, 4  ;;  %v3476_v13 = vshll.u32 %v18452_v30, 16  ;;  %v3481_v10 = vshrl.u32 %v3372_v60, 16  ;;  %v17065_v45 = vld [vmem:[%s23675_s3 + $0x60] sm:$0xff]  }
  0xba   : > { %v3445_v39 = vsel %vm17618_vm13, %v3440_v56, %v3444_v2  ;;  %v3463_v16 = vor.u32 %v3462_v37, %v3459_v27  ;;  %v3472_v48 = vrot.slane %v3470_v11, 4  ;;  %v3484_v51 = vshll.u32 %v3372_v60, 16  ;;  %v17068_v37 = vld [vmem:[#allocation2 + $0x48] sm:$0xff]  }
  0xbb   : > { %v3455_v33 = vsel %vm17618_vm13, %v3450_v21, %v3454_v5  ;;  %v3478_v62 = vrot.slane %v3476_v13, 5  ;;  %v3490_v1 = vshll.u32 %v3373_v35, 16  ;;  %v3483_v36 = vrot.slane %v3481_v10, 4  ;;  %v18499_v10 = vld [vmem:[%s23673_s1] ss:$0 sm:$0xff] }
  0xbc   : > { %15957 = vmatpush3.bf16.msra.mxu0 %v17054_v52  ;;  %v14050_v32 = vcombine.low %v3445_v39, %v3455_v33  ;;  %v3464_v22 = vrot.slane %v3463_v16, 4  ;;  %v3473_v54 = vor.u32 %v3472_v48, %v3468_v46  ;;  %v3486_v7 = vrot.slane %v3484_v51, 5  ;;  %v13776_v16 = vld [vmem:[%s17512_s12 + $0x80] sm:$0xff]  ;;  %v3380_v51 = vld [vmem:[#allocation2 + $0x68] sm:$0x1] }
  0xbd   : > { %15991 = vmatmul.mubr.bf16.vlgmr.msra.gmra.mxu1 %v14049_v12  ;;  %16006 = vmatprep.subr.bf16.mxu0 %v17057_v38  ;;  %v3492_v8 = vrot.slane %v3490_v1, 5  ;;  %v3494_v53 = vshrl.u32 %v3373_v35, 16  ;;  %v3500_v52 = vshll.u32 %v3374_v47, 16  ;;  %v3505_v42 = vshrl.u32 %v3375_v18, 16  ;;  %v17067_v47 = vld [vmem:[%s23675_s3 + $0x58] sm:$0xff]  }
  0xbe   : > { %16039 = vmatpush3.bf16.msra.mxu1 %v18411_v59  ;;  %v3469_v26 = vsel %vm17618_vm13, %v3464_v22, %v3468_v46  ;;  %v3474_v23 = vrot.slane %v3473_v54, 4  ;;  %v3508_v2 = vshll.u32 %v3375_v18, 16  ;;  %15994 = vmatprep.mubr.bf16.mxu1 %v14050_v32  ;;  %v17063_v59 = vld [vmem:[%s23675_s3 + $0x228] sm:$0xff]   ;;  %v3487_v61 = vor.u32 %v3486_v7, %v3483_v36  ;;  %v17066_v46 = vld [vmem:[%s23675_s3 + $0x220] sm:$0xff]   ;;  %v17069_v54 = vld [vmem:[%s23675_s3 + $0x218] sm:$0xff]  }
  0xbf   : > { %15959 = vmatmul.mubr.bf16.vlgmr.msra.gmra.mxu0 %v17058_v43  ;;  %16040 = vmatprep.subr.bf16.mxu1 %v17059_v6  ;;  %v3496_v50 = vrot.slane %v3494_v53, 4  ;;  %v3502_v41 = vrot.slane %v3500_v52, 5  ;;  %v3514_v55 = vshll.u32 %v3376_v24, 16  ;;  %v3518_v17 = vshrl.u32 %v3376_v24, 16  ;;  %v344_v52 = vld [vmem:[#allocation2 + $0x6c] sm:$0x1] }
  0xc0   : > { %16007 = vmatpush3.bf16.msra.mxu0 %v17057_v38  ;;  %v3479_v58 = vsel %vm17618_vm13, %v3474_v23, %v3478_v62  ;;  %15962 = vmatprep.mubr.bf16.mxu0 %v17062_v34  ;;  %v3507_v38 = vrot.slane %v3505_v42, 4  ;;  %v3510_v12 = vrot.slane %v3508_v2, 5  ;;  %v3488_v27 = vrot.slane %v3487_v61, 4  ;;  %v3378_v62 = vld [vmem:[#allocation2 + $0x60] sm:$0xf]  ;;  %v13777_v42 = vld [vmem:[%s17512_s12 + $0x88] sm:$0xff] }
  0xc1   : > { %16008 = vmatprep.subr.bf16.mxu0 %v17060_v40  ;;  %v14051_v5 = vcombine.low %v3469_v26, %v3479_v58  ;;  %v3497_v43 = vor.u32 %v3496_v50, %v3492_v8  ;;  %v3516_v56 = vrot.slane %v3514_v55, 5  ;;  %v3520_v21 = vrot.slane %v3518_v17, 4  ;;  %v3379_v34 = vld [vmem:[#allocation2 + $0x64] sm:$0xf]  ;;  %v17070_v26 = vld [vmem:[#allocation2 + $0x54] sm:$0xff]  }
  0xc2   : > { %16041 = vmatpush3.bf16.msra.mxu1 %v17059_v6  ;;  %v3511_v11 = vor.u32 %v3510_v12, %v3507_v38  ;;  %v3524_v13 = vshll.u32 %v3377_v25, 16  ;;  %v3493_v60 = vsel %vm17618_vm13, %v3488_v27, %v3492_v8  ;;  %v3529_v36 = vshrl.u32 %v3378_v62, 16  ;;  %v400_v25 = vld [vmem:[#allocation2 + $0x74] sm:$0x1]  ;;  %v18517_v2 = vld [vmem:[%s23674_s2] ss:$0 sm:$0xff] }
  0xc3   : > { %16042 = vmatprep.subr.bf16.mxu1 %v17061_v31  ;;  %v3498_v39 = vrot.slane %v3497_v43, 4  ;;  %v3521_v48 = vor.u32 %v3520_v21, %v3516_v56  ;;  %v3532_v18 = vshll.u32 %v3378_v62, 16  ;;  %v3538_v7 = vshll.u32 %v3379_v34, 16  ;;  %v17071_v50 = vld [vmem:[%s23675_s3 + $0x50] sm:$0xff]  }
  0xc4   : > { %16009 = vmatpush3.bf16.msra.mxu0 %v17060_v40  ;;  %v3512_v6 = vrot.slane %v3511_v11, 4  ;;  %v3526_v35 = vrot.slane %v3524_v13, 5  ;;  %v914_v40 = vmul.f32 %v18499_v10, %v13776_v16  ;;  %v3542_v8 = vshrl.u32 %v3379_v34, 16  ;;  %v17072_v38 = vld [vmem:[%s23675_s3 + $0x210] sm:$0xff]   ;;  %v17073_v13 = vld [vmem:[%s23675_s3 + $0x48] sm:$0xff]  }
  0xc5   : > { %15995 = vmatmul.mubr.bf16.gmra.mxu1 %v14051_v5  ;;  %16010 = vmatprep.subr.bf16.mxu0 %v17063_v59  ;;  %v3503_v33 = vsel %vm17618_vm13, %v3498_v39, %v3502_v41  ;;  %v3522_v22 = vrot.slane %v3521_v48, 4  ;;  %v3548_v53 = vshll.u32 %v3380_v51, 16  ;;  %v3531_v23 = vrot.slane %v3529_v36, 4  ;;  %v17074_v5 = vld [vmem:[#allocation2 + $0x60] sm:$0xff]   ;;  %v17075_v16 = vld [vmem:[%s23675_s3 + $0x208] sm:$0xff]  }
  0xc6   : > { %16043 = vmatpush3.bf16.msra.mxu1 %v17061_v31  ;;  %v14052_v1 = vcombine.low %v3493_v60, %v3503_v33  ;;  %v3517_v32 = vsel %vm17618_vm13, %v3512_v6, %v3516_v56  ;;  %v345_v31 = vsel %vm17519_vm2, 0, %v344_v52  ;;  %v3534_v41 = vrot.slane %v3532_v18, 5  ;;  %v17077_v52 = vld [vmem:[%s23675_s3 + $0x40] sm:$0xff]  }
  0xc7   : > { %15963 = vmatmul.mubr.bf16.gmra.mxu0 %v17064_v19  ;;  %16044 = vmatprep.subr.bf16.mxu1 %v17065_v45  ;;  %v3527_v24 = vsel %vm17618_vm13, %v3522_v22, %v3526_v35  ;;  %v3540_v55 = vrot.slane %v3538_v7, 5  ;;  %v3544_v58 = vrot.slane %v3542_v8, 4  ;;  %346 = vst [vmem:[#allocation2 + $0x6c] sm:$0x1] %v345_v31  ;;  %v3550_v19 = vrot.slane %v3548_v53, 5 }
  0xc8   : > { %16011 = vmatpush3.bf16.msra.mxu0 %v17063_v59  ;;  %15966 = vmatprep.mubr.bf16.mxu0 %v17068_v37  ;;  %v930_v59 = vadd.f32 %v18517_v2, %v914_v40  ;;  %v14053_v61 = vcombine.low %v3517_v32, %v3527_v24  ;;  %v401_v12 = vsel %vm17551_vm6, 0, %v400_v25  ;;  %v3535_v27 = vor.u32 %v3534_v41, %v3531_v23  ;;  %v18540_v35 = vld [vmem:[#allocation2 + $0x60] sm:$0xf]  ;;  %v4445_v40 = vld [vmem:[#allocation2 + $0x68] sm:$0x1] }
  0xc9   : > { %15998 = vmatprep.mubr.bf16.mxu1 %v14052_v1  ;;  %16012 = vmatprep.subr.bf16.mxu0 %v17066_v46  ;;  %v3545_v43 = vor.u32 %v3544_v58, %v3540_v55  ;;  %402 = vst [vmem:[#allocation2 + $0x74] sm:$0x1] %v401_v12  ;;  %v4454_v1 = vshrl.u32 %v18540_v35, 16  ;;  %v4457_v32 = vshll.u32 %v18540_v35, 16  ;;  %v4473_v36 = vshll.u32 %v4445_v40, 16  ;;  %v17078_v24 = vld [vmem:[%s23675_s3 + $0x200] sm:$0xff]  }
  0xca   : > { %16045 = vmatpush3.bf16.msra.mxu1 %v17065_v45  ;;  %v915_v45 = vmul.f32 %v18499_v10, %v13777_v42  ;;  %v946_v17 = vmax.f32 %v930_v59, 0.0  ;;  %v3536_v11 = vrot.slane %v3535_v27, 4  ;;  %v3786_v59 = vld [vmem:[#allocation2 + $0x18] sm:$0xe]  ;;  %v3820_v12 = vrot.slane %v18373_v57, 5 }
  0xcb   : > { %16046 = vmatprep.subr.bf16.mxu1 %v17067_v47  ;;  %v3546_v21 = vrot.slane %v3545_v43, 4  ;;  %v4456_v23 = vrot.slane %v4454_v1, 4  ;;  %v4459_v31 = vrot.slane %v4457_v32, 5  ;;  %v4475_v41 = vrot.slane %v4473_v36, 5  ;;  %v18566_v43 = vld [vmem:[%s23675_s3 + $0x38] sm:$0xff]  }
  0xcc   : > { %16013 = vmatpush3.bf16.msra.mxu0 %v17066_v46  ;;  %v931_v56 = vadd.f32 %v18517_v2, %v915_v45  ;;  %v15094_v37 = vpack.c.bf16 %v946_v17, %v946_v17  ;;  %v3541_v6 = vsel %vm17618_vm13, %v3536_v11, %v3540_v55  ;;  %v18559_v55 = vld [vmem:[%s23675_s3 + $0xb8] sm:$0xff]   ;;  %v14064_v58 = vrot.slane %v3786_v59, 9  ;;  %v3787_v17 = vld [vmem:[#allocation2 + $0x24] sm:$0xe]  ;;  %v350_v32 = vld [vmem:[#allocation2 + $0x84] sm:$0x1] }
  0xcd   : > { %15999 = vmatmul.mubr.bf16.gmra.mxu1 %v14053_v61  ;;  %16014 = vmatprep.subr.bf16.mxu0 %v17069_v54  ;;  %v3551_v48 = vsel %vm17618_vm13, %v3546_v21, %v3550_v19  ;;  %v4460_v19 = vor.u32 %v4459_v31, %v4456_v23  ;;  %v3823_v45 = vrot.slane %v18384_v4, 5  ;;  %v3822_v57 = vrot.slane %v3820_v12, 4 }
  0xce   : > { %16047 = vmatpush3.bf16.msra.mxu1 %v17067_v47  ;;  %v947_v60 = vmax.f32 %v931_v56, 0.0  ;;  %v1012_v39 = vshrl.u32 %v15094_v37, 16  ;;  %v1015_v46 = vshll.u32 %v15094_v37, 16  ;;  %v18542_v47 = vld [vmem:[#allocation2 + $0x64] sm:$0xf]  ;;  %v14054_v33 = vcombine.low %v3541_v6, %v3551_v48  ;;  %v13779_v48 = vld [vmem:[%s17512_s12 + $0x98] sm:$0xff] }
  0xcf   : > { %15967 = vmatmul.mubr.bf16.gmra.mxu0 %v17070_v26  ;;  %16048 = vmatprep.subr.bf16.mxu1 %v17071_v50  ;;  %v1174_v51 = vld [vmem:[#allocation2 + $0x6c] sm:$0xf]  ;;  %v4463_v22 = vshll.u32 %v18542_v47, 16  ;;  %v14065_v56 = vrot.slane %v3787_v17, 9  ;;  %v3827_v37 = vrot.slane %v18390_v3, 5  ;;  %v4461_v11 = vrot.slane %v4460_v19, 4 }
  0xd0   : > { %16015 = vmatpush3.bf16.msra.mxu0 %v17069_v54  ;;  %15970 = vmatprep.mubr.bf16.mxu0 %v17074_v5  ;;  %v15095_v62 = vpack.c.bf16 %v947_v60, %v947_v60  ;;  %v1014_v34 = vrot.slane %v1012_v39, 7  ;;  %v4467_v54 = vshrl.u32 %v18542_v47, 16  ;;  %v1178_v26 = vld [vmem:[#allocation2 + $0x74] sm:$0x1]  ;;  %v403_v6 = vld [vmem:[#allocation2 + $0x80] sm:$0x1] }
  0xd1   : > { %16016 = vmatprep.subr.bf16.mxu0 %v17072_v38  ;;  %16002 = vmatprep.mubr.bf16.mxu1 %v14054_v33  ;;  %v4465_v25 = vrot.slane %v4463_v22, 5  ;;  %v3829_v39 = vrot.slane %v3827_v37, 4  ;;  %v3830_v40 = vrot.slane %v18392_v63, 5  ;;  %v13780_v33 = vld [vmem:[%s17512_s12 + $0xa0] sm:$0xff]  ;;  %v404_v1 = vsel %vm17551_vm6, 0, %v403_v6 }
  0xd2   : > { %16049 = vmatpush3.bf16.msra.mxu1 %v17071_v50  ;;  %v1017_v18 = vor.u32 %v1015_v46, %v1014_v34  ;;  %v1018_v7 = vrot.slane %v1014_v34, 4  ;;  %v1020_v8 = vshrl.u32 %v15095_v62, 16  ;;  %v1023_v53 = vshll.u32 %v15095_v62, 16  ;;  %v347_v46 = vld [vmem:[#allocation2 + $0x78] sm:$0x1] }
  0xd3   : > { %16050 = vmatprep.subr.bf16.mxu1 %v17073_v13  ;;  %v4469_v42 = vrot.slane %v4467_v54, 4  ;;  %v4466_v3 = vsel %vm17618_vm13, %v4461_v11, %v4465_v25  ;;  %v3821_v62 = vsel %vm17647_vm14, %v14064_v58, %v3820_v12  ;;  %v18586_v34 = vsel %vm17647_vm14, %v14065_v56, %v3827_v37  ;;  %v406_v22 = vld [vmem:[#allocation2 + $0x8c] sm:$0x1]  ;;  %405 = vst [vmem:[#allocation2 + $0x80] sm:$0x1] %v404_v1 }
  0xd4   : > { %16017 = vmatpush3.bf16.msra.mxu0 %v17072_v38  ;;  %v1022_v61 = vrot.slane %v1020_v8, 7  ;;  %v1175_v50 = vsel %vm17597_vm11, %v1017_v18, %v1174_v51  ;;  %v348_v51 = vsel %vm17519_vm2, 0, %v347_v46  ;;  %v3824_v63 = vsel %vm17647_vm14, %v3822_v57, %v3823_v45 }
  0xd5   : > { %16018 = vmatprep.subr.bf16.mxu0 %v17075_v16  ;;  %1176 = vst [vmem:[#allocation2 + $0x6c] sm:$0xf] %v1175_v50  ;;  %v4470_v38 = vor.u32 %v4469_v42, %v4465_v25  ;;  %v18596_v54 = vsel %vm17647_vm14, %v3829_v39, %v3830_v40  ;;  %349 = vst [vmem:[#allocation2 + $0x78] sm:$0x1] %v348_v51  ;;  %v351_v18 = vsel %vm17519_vm2, 0, %v350_v32  ;;  %v407_v58 = vsel %vm17551_vm6, 0, %v406_v22 }
  0xd6   : > { %16051 = vmatpush3.bf16.msra.mxu1 %v17073_v13  ;;  %v1025_v5 = vor.u32 %v1023_v53, %v1022_v61  ;;  %v1027_v27 = vrot.slane %v1022_v61, 4  ;;  %v13778_v13 = vld [vmem:[%s17512_s12 + $0x90] sm:$0xff]  ;;  %352 = vst [vmem:[#allocation2 + $0x84] sm:$0x1] %v351_v18  ;;  %v14088_v61 = vcombine.low %v3821_v62, %v3824_v63  ;;  %v14089_v50 = vcombine.low %v18586_v34, %v18596_v54 }
  0xd7   : > { %16052 = vmatprep.subr.bf16.mxu1 %v17077_v52  ;;  %v4471_v21 = vrot.slane %v4470_v38, 4  ;;  %v916_v36 = vmul.f32 %v18499_v10, %v13778_v13  ;;  %408 = vst [vmem:[#allocation2 + $0x8c] sm:$0x1] %v407_v58  ;;  %v353_v34 = vld [vmem:[#allocation2 + $0x90] sm:$0x1] }
  0xd8   : > { %16019 = vmatpush3.bf16.msra.mxu0 %v17075_v16  ;;  %v1026_v4 = vsel %vm17608_vm12, %v1018_v7, %v1025_v5  ;;  %v1179_v60 = vsel %vm17519_vm2, %v1027_v27, %v1178_v26  ;;  %v13781_v7 = vld [vmem:[%s17512_s12 + $0xa8] sm:$0xff]  ;;  %v918_v26 = vmul.f32 %v18499_v10, %v13780_v33 }
  0xd9   : > { %16020 = vmatprep.subr.bf16.mxu0 %v17078_v24  ;;  %1177 = vst [vmem:[#allocation2 + $0x70] sm:$0xf] %v1026_v4  ;;  %1180 = vst [vmem:[#allocation2 + $0x74] sm:$0x1] %v1179_v60  ;;  %v4476_v16 = vsel %vm17618_vm13, %v4471_v21, %v4475_v41  ;;  %v919_v23 = vmul.f32 %v18499_v10, %v13781_v7  ;;  %v932_v41 = vadd.f32 %v18517_v2, %v916_v36 }
  0xda   : > { %16053 = vmatpush3.bf16.msra.mxu1 %v17077_v52  ;;  %v18602_v53 = vcombine.low %v4466_v3, %v4476_v16  ;;  %v934_v56 = vadd.f32 %v18517_v2, %v918_v26 }
  0xdb   : > { %16102 = vmatprep.subr.bf16.mxu1 %v18559_v55  ;;  %v935_v37 = vadd.f32 %v18517_v2, %v919_v23  ;;  %v948_v16 = vmax.f32 %v932_v41, 0.0 }
  0xdc   : > { %16021 = vmatpush3.bf16.msra.mxu0 %v17078_v24  ;;  %v3381_v8 = vld [vmem:[#allocation2 + $0x6c] sm:$0xf]  ;;  %v917_v24 = vmul.f32 %v18499_v10, %v13779_v48 }
  0xdd   : > { %v18604_v52 = vld [vmem:[#allocation2 + $0x6c] sm:$0xf]  ;;  %16070 = vmatprep.subr.bf16.mxu0 %v18566_v43  ;;  %v3553_v31 = vshrl.u32 %v3381_v8, 16  ;;  %v3556_v25 = vshll.u32 %v3381_v8, 16  ;;  %v15096_v8 = vpack.c.bf16 %v948_v16, %v948_v16 }
  0xde   : > { %v4478_v42 = vshrl.u32 %v18604_v52, 16  ;;  %v4481_v59 = vshll.u32 %v18604_v52, 16  ;;  %v933_v27 = vadd.f32 %v18517_v2, %v917_v24  ;;  %v3788_v24 = vld [vmem:[#allocation2 + $0x30] sm:$0xe] }
  0xdf   : > { %v3555_v19 = vrot.slane %v3553_v31, 4  ;;  %v3558_v38 = vrot.slane %v3556_v25, 5  ;;  %v950_v25 = vmax.f32 %v934_v56, 0.0  ;;  %v1029_v41 = vshrl.u32 %v15096_v8, 16 }
  0xe0   : > { %v4480_v12 = vrot.slane %v4478_v42, 4  ;;  %v4483_v45 = vrot.slane %v4481_v59, 5  ;;  %v18617_v17 = vld [vmem:[#allocation2 + $0x70] sm:$0xf]  ;;  %v18619_v5 = vld [vmem:[#allocation2 + $0x74] sm:$0x1] }
  0xe1   : > { %v3559_v21 = vor.u32 %v3558_v38, %v3555_v19  ;;  %v3562_v57 = vshll.u32 %v18617_v17, 16  ;;  %v3566_v13 = vshrl.u32 %v18617_v17, 16  ;;  %v3572_v4 = vshll.u32 %v18619_v5, 16  ;;  %v17076_v60 = vld [vmem:[#allocation2 + $0x6c] sm:$0xff]   ;;  %v18631_v46 = vld [vmem:[#allocation2 + $0x74] sm:$0x1] }
  0xe2   : > { %v18629_v39 = vld [vmem:[#allocation2 + $0x70] sm:$0xf]  ;;  %v4484_v6 = vor.u32 %v4483_v45, %v4480_v12  ;;  %15971 = vmatmul.mubr.bf16.gmra.mxu0 %v17076_v60  ;;  %v4497_v63 = vshll.u32 %v18631_v46, 16  ;;  %v949_v7 = vmax.f32 %v933_v27, 0.0  ;;  %v1032_v58 = vshll.u32 %v15096_v8, 16 }
  0xe3   : > { %v4487_v48 = vshll.u32 %v18629_v39, 16  ;;  %v4491_v3 = vshrl.u32 %v18629_v39, 16  ;;  %v3560_v40 = vrot.slane %v3559_v21, 4  ;;  %v3564_v33 = vrot.slane %v3562_v57, 5  ;;  %16022 = vmatprep.mubr.bf16.mxu0 %v14088_v61 }
  0xe4   : > { %v3568_v62 = vrot.slane %v3566_v13, 4  ;;  %v3574_v51 = vrot.slane %v3572_v4, 5  ;;  %v4485_v1 = vrot.slane %v4484_v6, 4  ;;  %v4499_v31 = vrot.slane %v4497_v63, 5  ;;  %v1181_v13 = vld [vmem:[#allocation2 + $0x78] sm:$0xf] }
  0xe5   : > { %v4489_v32 = vrot.slane %v4487_v48, 5  ;;  %v4493_v22 = vrot.slane %v4491_v3, 4  ;;  %v3565_v36 = vsel %vm17618_vm13, %v3560_v40, %v3564_v33  ;;  %v15097_v59 = vpack.c.bf16 %v949_v7, %v949_v7  ;;  %v17082_v4 = vld [vmem:[%s23675_s3 + $0x30] sm:$0xff]   ;;  %v1185_v6 = vld [vmem:[#allocation2 + $0x80] sm:$0x1] }
  0xe6   : > { %v3569_v18 = vor.u32 %v3568_v62, %v3564_v33  ;;  %v951_v38 = vmax.f32 %v935_v37, 0.0  ;;  %v15098_v61 = vpack.c.bf16 %v950_v25, %v950_v25  ;;  %v14066_v12 = vrot.slane %v3788_v24, 9  ;;  %v1188_v62 = vld [vmem:[#allocation2 + $0x84] sm:$0xf]  ;;  %v1192_v7 = vld [vmem:[#allocation2 + $0x8c] sm:$0x1] }
  0xe7   : > { %v4490_v26 = vsel %vm17618_vm13, %v4485_v1, %v4489_v32  ;;  %v4494_v23 = vor.u32 %v4493_v22, %v4489_v32  ;;  %v1031_v27 = vrot.slane %v1029_v41, 7  ;;  %v1037_v21 = vshrl.u32 %v15097_v59, 16  ;;  %v3789_v1 = vld [vmem:[#allocation2 + $0x3c] sm:$0xe]  ;;  %v13782_v25 = vld [vmem:[%s17512_s12 + $0xb0] sm:$0xff] }
  0xe8   : > { %v3570_v42 = vrot.slane %v3569_v18, 4  ;;  %v1040_v57 = vshll.u32 %v15097_v59, 16  ;;  %v15099_v48 = vpack.c.bf16 %v951_v38, %v951_v38  ;;  %v1046_v37 = vshrl.u32 %v15098_v61, 16  ;;  %v18675_v38 = vld [vmem:[%s23675_s3 + $0xb0] sm:$0xff]  }
  0xe9   : > { %v4495_v19 = vrot.slane %v4494_v23, 4  ;;  %v1034_v16 = vor.u32 %v1032_v58, %v1031_v27  ;;  %v1035_v40 = vrot.slane %v1031_v27, 4  ;;  %v1039_v33 = vrot.slane %v1037_v21, 7 }
  0xea   : > { %v3575_v45 = vsel %vm17618_vm13, %v3570_v42, %v3574_v51  ;;  %16023 = vmatmul.mubr.bf16.vlgmr.msra.gmra.mxu0 %v14089_v50  ;;  %v18655_v51 = vld [vmem:[%s23675_s3 + $0x28] sm:$0xff]   ;;  %v1048_v32 = vrot.slane %v1046_v37, 7  ;;  %v1049_v22 = vshll.u32 %v15098_v61, 16  ;;  %v1054_v63 = vshrl.u32 %v15099_v48, 16  ;;  %v13783_v42 = vld [vmem:[%s17512_s12 + $0xb8] sm:$0xff] }
  0xeb   : > { %v14055_v56 = vcombine.low %v3565_v36, %v3575_v45  ;;  %v4500_v60 = vsel %vm17618_vm13, %v4495_v19, %v4499_v31  ;;  %16071 = vmatpush3.bf16.msra.mxu0 %v18566_v43  ;;  %v1057_v36 = vshll.u32 %v15099_v48, 16  ;;  %v1042_v54 = vor.u32 %v1040_v57, %v1039_v33  ;;  %v409_v43 = vld [vmem:[#allocation2 + $0x98] sm:$0x1]  ;;  %v13784_v19 = vld [vmem:[%s17512_s12 + $0xc0] sm:$0xff] }
  0xec   : > { %v18647_v3 = vcombine.low %v4490_v26, %v4500_v60  ;;  %v1044_v50 = vrot.slane %v1039_v33, 4  ;;  %v1182_v18 = vsel %vm17597_vm11, %v1034_v16, %v1181_v13  ;;  %16072 = vmatprep.subr.bf16.mxu0 %v17082_v4  ;;  %v3834_v8 = vrot.slane %v18433_v44, 5  ;;  %v356_v44 = vld [vmem:[#allocation2 + $0x9c] sm:$0x1]  ;;  %v13785_v60 = vld [vmem:[%s17512_s12 + $0xc8] sm:$0xff] }
  0xed   : > { %16003 = vmatmul.mubr.bf16.gmra.mxu1 %v14055_v56  ;;  %1183 = vst [vmem:[#allocation2 + $0x78] sm:$0xf] %v1182_v18  ;;  %v1051_v24 = vor.u32 %v1049_v22, %v1048_v32  ;;  %v1052_v26 = vrot.slane %v1048_v32, 4  ;;  %v1056_v23 = vrot.slane %v1054_v63, 7  ;;  %v3837_v31 = vrot.slane %v18439_v20, 5 }
  0xee   : > { %16054 = vmatprep.mubr.bf16.mxu1 %v18602_v53  ;;  %v1043_v53 = vsel %vm17608_vm12, %v1035_v40, %v1042_v54  ;;  %v1186_v59 = vsel %vm17519_vm2, %v1044_v50, %v1185_v6  ;;  %v3835_v41 = vsel %vm17647_vm14, %v14066_v12, %v3834_v8  ;;  %v3836_v58 = vrot.slane %v3834_v8, 4  ;;  %v412_v56 = vld [vmem:[#allocation2 + $0xa4] sm:$0x1]  ;;  %v17083_v8 = vld [vmem:[%s23675_s3 + $0xa8] sm:$0xff]  }
  0xef   : > { %1184 = vst [vmem:[#allocation2 + $0x7c] sm:$0xf] %v1043_v53  ;;  %1187 = vst [vmem:[#allocation2 + $0x80] sm:$0x1] %v1186_v59  ;;  %v1059_v20 = vor.u32 %v1057_v36, %v1056_v23  ;;  %v1061_v61 = vrot.slane %v1056_v23, 4  ;;  %v1189_v45 = vsel %vm17597_vm11, %v1051_v24, %v1188_v62  ;;  %16073 = vmatpush3.bf16.msra.mxu0 %v17082_v4  ;;  %v14067_v27 = vrot.slane %v3789_v1, 9 }
  0xf0   : > { %1190 = vst [vmem:[#allocation2 + $0x84] sm:$0xf] %v1189_v45  ;;  %v3838_v12 = vsel %vm17647_vm14, %v3836_v58, %v3837_v31  ;;  %16074 = vmatprep.subr.bf16.mxu0 %v18655_v51  ;;  %v3841_v21 = vrot.slane %v18444_v49, 5  ;;  %v3844_v57 = vrot.slane %v18452_v30, 5  ;;  %v354_v13 = vsel %vm17519_vm2, 0, %v353_v34  ;;  %v17086_v49 = vld [vmem:[%s23675_s3 + $0x20] sm:$0xff]  }
  0xf1   : > { %v1060_v6 = vsel %vm17608_vm12, %v1052_v26, %v1059_v20  ;;  %v1193_v4 = vsel %vm17519_vm2, %v1061_v61, %v1192_v7  ;;  %v14090_v48 = vcombine.low %v3835_v41, %v3838_v12  ;;  %355 = vst [vmem:[#allocation2 + $0x90] sm:$0x1] %v354_v13  ;;  %v410_v37 = vsel %vm17551_vm6, 0, %v409_v43  ;;  %v18696_v30 = vld [vmem:[#allocation2 + $0x48] sm:$0xe]  ;;  %v13786_v36 = vld [vmem:[%s17512_s12 + $0xd0] sm:$0xff] }
  0xf2   : > { %1191 = vst [vmem:[#allocation2 + $0x88] sm:$0xf] %v1060_v6  ;;  %1194 = vst [vmem:[#allocation2 + $0x8c] sm:$0x1] %v1193_v4  ;;  %v3842_v16 = vsel %vm17647_vm14, %v14067_v27, %v3841_v21  ;;  %v3843_v40 = vrot.slane %v3841_v21, 4  ;;  %v920_v33 = vmul.f32 %v18499_v10, %v13782_v25  ;;  %v921_v62 = vmul.f32 %v18499_v10, %v13783_v42  ;;  %v17088_v24 = vld [vmem:[%s23675_s3 + $0x18] sm:$0xff]  }
  0xf3   : > { %411 = vst [vmem:[#allocation2 + $0x98] sm:$0x1] %v410_v37  ;;  %16026 = vmatprep.mubr.bf16.mxu0 %v14090_v48  ;;  %v357_v1 = vsel %vm17519_vm2, 0, %v356_v44  ;;  %v413_v32 = vsel %vm17551_vm6, 0, %v412_v56  ;;  %v922_v22 = vmul.f32 %v18499_v10, %v13784_v19  ;;  %v923_v63 = vmul.f32 %v18499_v10, %v13785_v60  ;;  %16075 = vmatpush3.bf16.msra.mxu0 %v18655_v51  ;;  %v17085_v27 = vld [vmem:[%s23675_s3 + $0xa0] sm:$0xff]   ;;  %v17090_v21 = vld [vmem:[%s23675_s3 + $0x10] sm:$0xff]  }
  0xf4   : > { %v18711_v34 = vld [vmem:[#allocation2 + $0x78] sm:$0xf]  ;;  %v3845_v54 = vsel %vm17647_vm14, %v3843_v40, %v3844_v57  ;;  %v937_v50 = vadd.f32 %v18517_v2, %v921_v62  ;;  %358 = vst [vmem:[#allocation2 + $0x9c] sm:$0x1] %v357_v1  ;;  %414 = vst [vmem:[#allocation2 + $0xa4] sm:$0x1] %v413_v32  ;;  %16076 = vmatprep.subr.bf16.mxu0 %v17086_v49  ;;  %v18739_v53 = vmul.f32 %v18499_v10, %v13786_v36 }
  0xf5   : > { %16055 = vmatmul.mubr.bf16.vlgmr.msra.gmra.mxu1 %v18647_v3  ;;  %v936_v3 = vadd.f32 %v18517_v2, %v920_v33  ;;  %v14068_v18 = vrot.slane %v18696_v30, 9  ;;  %v4502_v7 = vshrl.u32 %v18711_v34, 16  ;;  %v14091_v43 = vcombine.low %v3842_v16, %v3845_v54  ;;  %v18762_v16 = vpop.f32.mrf.mxu1  ;;  %v17087_v54 = vld [vmem:[%s23675_s3 + $0x98] sm:$0xff]  }
  0xf6   : > { %16103 = vmatpush3.bf16.msra.mxu1 %v18559_v55  ;;  %v4505_v55 = vshll.u32 %v18711_v34, 16  ;;  %v18726_v51 = vadd.f32 %v18517_v2, %v922_v22  ;;  %v18731_v26 = vld [vmem:[#allocation2 + $0x7c] sm:$0xf]  ;;  %v18733_v23 = vld [vmem:[#allocation2 + $0x80] sm:$0x1]  ;;  %v953_v25 = vmax.f32 %v937_v50, 0.0  ;;  %v18736_v42 = vadd.f32 %v18517_v2, %v923_v63 }
  0xf7   : > { %16104 = vmatprep.subr.bf16.mxu1 %v18675_v38  ;;  %v952_v31 = vmax.f32 %v936_v3, 0.0  ;;  %v4504_v59 = vrot.slane %v4502_v7, 4  ;;  %v4511_v58 = vshll.u32 %v18731_v26, 16  ;;  %v4515_v44 = vshrl.u32 %v18731_v26, 16  ;;  %v18743_v19 = vld [vmem:[#allocation2 + $0x84] sm:$0xf]  ;;  %16027 = vmatmul.mubr.bf16.gmra.mxu0 %v14091_v43 }
  0xf8   : > { %v4507_v41 = vrot.slane %v4505_v55, 5  ;;  %v4521_v20 = vshll.u32 %v18733_v23, 16  ;;  %v4526_v61 = vshrl.u32 %v18743_v19, 16  ;;  %v4529_v45 = vshll.u32 %v18743_v19, 16  ;;  %16077 = vmatpush3.bf16.msra.mxu0 %v17086_v49  ;;  %v18771_v43 = vld [vmem:[#allocation2 + $0x54] sm:$0xe] }
  0xf9   : > { %v15100_v12 = vpack.c.bf16 %v952_v31, %v952_v31  ;;  %v4513_v13 = vrot.slane %v4511_v58, 5  ;;  %v4517_v56 = vrot.slane %v4515_v44, 4  ;;  %v18757_v60 = vld [vmem:[#allocation2 + $0x8c] sm:$0x1]  ;;  %v18759_v6 = vpack.c.bf16 %v953_v25, %v953_v25  ;;  %16078 = vmatprep.subr.bf16.mxu0 %v17088_v24  ;;  %v5567_v0 = vld [vmem:[#allocation2 + $0x84] sm:$0xf] }
  0xfa   : > { %16105 = vmatpush3.bf16.msra.mxu1 %v18675_v38  ;;  %v4508_v57 = vor.u32 %v4507_v41, %v4504_v59  ;;  %v18755_v38 = vld [vmem:[#allocation2 + $0x88] sm:$0xf]  ;;  %v4523_v4 = vrot.slane %v4521_v20, 5  ;;  %v4528_v48 = vrot.slane %v4526_v61, 4  ;;  %v4531_v37 = vrot.slane %v4529_v45, 5  ;;  %v18778_v41 = vpop.f32.mrf.mxu1 }
  0xfb   : > { %16106 = vmatprep.subr.bf16.mxu1 %v17083_v8  ;;  %v4535_v49 = vshll.u32 %v18755_v38, 16  ;;  %v4518_v33 = vor.u32 %v4517_v56, %v4513_v13  ;;  %v4539_v62 = vshrl.u32 %v18755_v38, 16  ;;  %v4545_v1 = vshll.u32 %v18757_v60, 16  ;;  %v1195_v20 = vld [vmem:[#allocation2 + $0x90] sm:$0xf] }
  0xfc   : > { %v4509_v40 = vrot.slane %v4508_v57, 4  ;;  %v4532_v32 = vor.u32 %v4531_v37, %v4528_v48  ;;  %v1063_v63 = vshrl.u32 %v15100_v12, 16  ;;  %v1066_v36 = vshll.u32 %v15100_v12, 16  ;;  %16079 = vmatpush3.bf16.msra.mxu0 %v17088_v24 }
  0xfd   : > { %v4537_v22 = vrot.slane %v4535_v49, 5  ;;  %v4519_v50 = vrot.slane %v4518_v33, 4  ;;  %v4541_v7 = vrot.slane %v4539_v62, 4  ;;  %v4547_v55 = vrot.slane %v4545_v1, 5  ;;  %16080 = vmatprep.subr.bf16.mxu0 %v17090_v21  ;;  %v17380_v33 = vld [vmem:[#allocation2 + $0x50] sm:$0x1] }
  0xfe   : > { %16107 = vmatpush3.bf16.msra.mxu1 %v17083_v8  ;;  %v4514_v3 = vsel %vm17618_vm13, %v4509_v40, %v4513_v13  ;;  %v17092_v8 = vld [vmem:[%s23675_s3 + $0x8] sm:$0xff]   ;;  %v4533_v31 = vrot.slane %v4532_v32, 4  ;;  %v1065_v25 = vrot.slane %v1063_v63, 7  ;;  %v1071_v59 = vshrl.u32 %v18759_v6, 16  ;;  %v18795_v63 = vpop.f32.mrf.mxu1 }
  0xff   : > { %16108 = vmatprep.subr.bf16.mxu1 %v17085_v27  ;;  %v1074_v24 = vshll.u32 %v18759_v6, 16  ;;  %v4524_v58 = vsel %vm17618_vm13, %v4519_v50, %v4523_v4  ;;  %v4542_v44 = vor.u32 %v4541_v7, %v4537_v22  ;;  %v954_v61 = vmax.f32 %v18726_v51, 0.0  ;;  %v17089_v4 = vld [vmem:[%s23675_s3 + $0x90] sm:$0xff]   ;;  %v17094_v51 = vld [vmem:[%s23675_s3] sm:$0xff]   ;;  %v359_v32 = vld [vmem:[#allocation2 + $0xa8] sm:$0x1] }
 0x100   : > { %v955_v45 = vmax.f32 %v18736_v42, 0.0  ;;  %v14140_v12 = vcombine.low %v4514_v3, %v4524_v58  ;;  %v4538_v57 = vsel %vm17618_vm13, %v4533_v31, %v4537_v22  ;;  %v1068_v13 = vor.u32 %v1066_v36, %v1065_v25  ;;  %16081 = vmatpush3.bf16.msra.mxu0 %v17090_v21  ;;  %v17379_v21 = vld [vmem:[#allocation2 + $0x4c] sm:$0xf]  ;;  %v415_v22 = vld [vmem:[#allocation2 + $0xb0] sm:$0x1] }
 0x101   : > { %v1069_v56 = vrot.slane %v1065_v25, 4  ;;  %v4543_v6 = vrot.slane %v4542_v44, 4  ;;  %v1073_v48 = vrot.slane %v1071_v59, 7  ;;  %v15102_v37 = vpack.c.bf16 %v954_v61, %v954_v61  ;;  %16082 = vmatprep.subr.bf16.mxu0 %v17092_v8  ;;  %v1202_v44 = vld [vmem:[#allocation2 + $0x9c] sm:$0xf] }
 0x102   : > { %16109 = vmatpush3.bf16.msra.mxu1 %v17085_v27  ;;  %v15103_v49 = vpack.c.bf16 %v955_v45, %v955_v45  ;;  %16058 = vmatprep.mubr.bf16.mxu1 %v14140_v12  ;;  %v1196_v42 = vsel %vm17597_vm11, %v1068_v13, %v1195_v20  ;;  %v1199_v27 = vld [vmem:[#allocation2 + $0x98] sm:$0x1]  ;;  %v3848_v40 = vrot.slane %v17379_v21, 5  ;;  %v3851_v62 = vrot.slane %v17380_v33, 5  ;;  %v418_v33 = vld [vmem:[#allocation2 + $0xbc] sm:$0x1] }
 0x103   : > { %16110 = vmatprep.subr.bf16.mxu1 %v17087_v54  ;;  %v14069_v1 = vrot.slane %v18771_v43, 9  ;;  %v4548_v36 = vsel %vm17618_vm13, %v4543_v6, %v4547_v55  ;;  %v1076_v3 = vor.u32 %v1074_v24, %v1073_v48  ;;  %v1078_v50 = vrot.slane %v1073_v48, 4  ;;  %1197 = vst [vmem:[#allocation2 + $0x90] sm:$0xf] %v1196_v42  ;;  %v13787_v20 = vld [vmem:[%s17512_s12 + $0xd8] sm:$0xff]  ;;  %v18803_v43 = vld [vmem:[%s23675_s3 + $0x88] sm:$0xff]  }
 0x104   : > { %v1080_v7 = vshrl.u32 %v15102_v37, 16  ;;  %v14141_v31 = vcombine.low %v4538_v57, %v4548_v36  ;;  %v1083_v25 = vshll.u32 %v15102_v37, 16  ;;  %v1088_v59 = vshrl.u32 %v15103_v49, 16  ;;  %16083 = vmatpush3.bf16.msra.mxu0 %v17092_v8  ;;  %v18816_v12 = vld [vmem:[%s23675_s3 + $0xf8] sm:$0xff]   ;;  %v18818_v8 = vpop.f32.mrf.mxu0  ;;  %v1206_v42 = vld [vmem:[#allocation2 + $0xa4] sm:$0x1] }
 0x105   : > { %v1091_v58 = vshll.u32 %v15103_v49, 16  ;;  %v1077_v55 = vsel %vm17608_vm12, %v1069_v56, %v1076_v3  ;;  %v1200_v24 = vsel %vm17519_vm2, %v1078_v50, %v1199_v27  ;;  %v3849_v45 = vsel %vm17647_vm14, %v14068_v18, %v3848_v40  ;;  %16084 = vmatprep.subr.bf16.mxu0 %v17094_v51  ;;  %v17381_v56 = vld [vmem:[#allocation2 + $0x58] sm:$0xf]  ;;  %v17382_v6 = vld [vmem:[#allocation2 + $0x5c] sm:$0x1]  ;;  %v18820_v18 = vpop.f32.mrf.mxu1 }
 0x106   : > { %16111 = vmatpush3.bf16.msra.mxu1 %v17087_v54  ;;  %v1082_v61 = vrot.slane %v1080_v7, 7  ;;  %v362_v54 = vld [vmem:[#allocation2 + $0xb4] sm:$0x1]  ;;  %1198 = vst [vmem:[#allocation2 + $0x94] sm:$0xf] %v1077_v55  ;;  %v1090_v57 = vrot.slane %v1088_v59, 7  ;;  %v940_v59 = vadd.f32 %v18517_v2, %v18739_v53 }
 0x107   : > { %16112 = vmatprep.subr.bf16.mxu1 %v17089_v4  ;;  %16059 = vmatmul.mubr.bf16.gmra.mxu1 %v14141_v31  ;;  %1201 = vst [vmem:[#allocation2 + $0x98] sm:$0x1] %v1200_v24  ;;  %v3850_v13 = vrot.slane %v3848_v40, 4  ;;  %v3855_v30 = vrot.slane %v17381_v56, 5  ;;  %v3858_v48 = vrot.slane %v17382_v6, 5  ;;  %23732 = vst [vmem:[#allocation9_spill] sm:$0xff] %v18820_v18 }
 0x108   : > { %v1085_v37 = vor.u32 %v1083_v25, %v1082_v61  ;;  %v1086_v49 = vrot.slane %v1082_v61, 4  ;;  %v360_v27 = vsel %vm17519_vm2, 0, %v359_v32  ;;  %v416_v21 = vsel %vm17551_vm6, 0, %v415_v22  ;;  %16085 = vmatpush3.bf16.msra.mxu0 %v17094_v51  ;;  %v13788_v25 = vld [vmem:[%s17512_s12 + $0xe0] sm:$0xff]  ;;  %v18862_v53 = vld [vmem:[%s23675_s3 + $0x138] sm:$0xff]  }
 0x109   : > { %v1093_v36 = vor.u32 %v1091_v58, %v1090_v57  ;;  %v1095_v3 = vrot.slane %v1090_v57, 4  ;;  %v3852_v40 = vsel %vm17647_vm14, %v3850_v13, %v3851_v62  ;;  %v3856_v50 = vsel %vm17647_vm14, %v14069_v1, %v3855_v30  ;;  %361 = vst [vmem:[#allocation2 + $0xa8] sm:$0x1] %v360_v27  ;;  %417 = vst [vmem:[#allocation2 + $0xb0] sm:$0x1] %v416_v21  ;;  %v17093_v62 = vld [vmem:[%s23675_s3 + $0x80] sm:$0xff]  }
 0x10a   : > { %16113 = vmatpush3.bf16.msra.mxu1 %v17089_v4  ;;  %v1203_v32 = vsel %vm17597_vm11, %v1085_v37, %v1202_v44  ;;  %v14092_v7 = vcombine.low %v3849_v45, %v3852_v40  ;;  %v3857_v31 = vrot.slane %v3855_v30, 4  ;;  %v925_v22 = vmul.f32 %v18499_v10, %v13787_v20  ;;  %16134 = vmatprep.subr.bf16.mxu0 %v18816_v12  ;;  %v18839_v4 = vpop.f32.mrf.mxu0  ;;  %v18841_v51 = vld [vmem:[#allocation2 + $0x90] sm:$0xf]  ;;  %v13789_v44 = vld [vmem:[%s17512_s12 + $0xe8] sm:$0xff]  ;;  %v18852_v20 = vpop.f32.mrf.mxu1  ;;  %v17383_v56 = vld [vmem:[%s23673_s1] ss:$0 sm:$0xff] }
 0x10b   : > { %16114 = vmatprep.subr.bf16.mxu1 %v18803_v43  ;;  %v1094_v1 = vsel %vm17608_vm12, %v1086_v49, %v1093_v36  ;;  %1204 = vst [vmem:[#allocation2 + $0x9c] sm:$0xf] %v1203_v32  ;;  %v1207_v10 = vsel %vm17519_vm2, %v1095_v3, %v1206_v42  ;;  %v363_v58 = vsel %vm17519_vm2, 0, %v362_v54  ;;  %23733 = vst [vmem:[#allocation10_spill] sm:$0xff] %v18852_v20  ;;  %v4550_v55 = vshrl.u32 %v18841_v51, 16 }
 0x10c   : > { %v4553_v24 = vshll.u32 %v18841_v51, 16  ;;  %1205 = vst [vmem:[#allocation2 + $0xa0] sm:$0xf] %v1094_v1  ;;  %1208 = vst [vmem:[#allocation2 + $0xa4] sm:$0x1] %v1207_v10  ;;  %16030 = vmatprep.mubr.bf16.mxu0 %v14092_v7  ;;  %v3859_v61 = vsel %vm17647_vm14, %v3857_v31, %v3858_v48  ;;  %v941_v45 = vadd.f32 %v18517_v2, %v925_v22  ;;  %v956_v57 = vmax.f32 %v940_v59, 0.0  ;;  %v18876_v27 = vpop.f32.mrf.mxu0  ;;  %v18881_v3 = vpop.f32.mrf.mxu1 }
 0x10d   : > { %364 = vst [vmem:[#allocation2 + $0xb4] sm:$0x1] %v363_v58  ;;  %v14093_v54 = vcombine.low %v3856_v50, %v3859_v61  ;;  %v419_v13 = vsel %vm17551_vm6, 0, %v418_v33  ;;  %v926_v30 = vmul.f32 %v17383_v56, %v13788_v25  ;;  %v18870_v6 = vld [vmem:[#allocation2 + $0x94] sm:$0xf]  ;;  %v4552_v48 = vrot.slane %v4550_v55, 4 }
 0x10e   : > { %16115 = vmatpush3.bf16.msra.mxu1 %v18803_v43  ;;  %v18872_v2 = vld [vmem:[#allocation2 + $0x98] sm:$0x1]  ;;  %v4555_v37 = vrot.slane %v4553_v24, 5  ;;  %420 = vst [vmem:[#allocation2 + $0xbc] sm:$0x1] %v419_v13  ;;  %v927_v49 = vmul.f32 %v17383_v56, %v13789_v44  ;;  %v4559_v21 = vshll.u32 %v18870_v6, 16  ;;  %v15104_v50 = vpack.c.bf16 %v956_v57, %v956_v57  ;;  %v18889_v61 = vpop.f32.mrf.mxu0 }
 0x10f   : > { %16116 = vmatprep.subr.bf16.mxu1 %v17093_v62  ;;  %v4563_v33 = vshrl.u32 %v18870_v6, 16  ;;  %v4569_v43 = vshll.u32 %v18872_v2, 16  ;;  %16031 = vmatmul.mubr.bf16.gmra.mxu0 %v14093_v54  ;;  %v957_v36 = vmax.f32 %v941_v45, 0.0  ;;  %23734 = vst [vmem:[#allocation11_spill] sm:$0xff] %v18881_v3  ;;  %v17384_v32 = vld [vmem:[%s23674_s2] ss:$0 sm:$0xff] }
 0x110   : > { %v4556_v40 = vor.u32 %v4555_v37, %v4552_v48  ;;  %v942_v7 = vadd.f32 %v17384_v32, %v926_v30  ;;  %v943_v31 = vadd.f32 %v17384_v32, %v927_v49  ;;  %v4561_v22 = vrot.slane %v4559_v21, 5  ;;  %23735 = vst [vmem:[#allocation12_spill] sm:$0xff] %v18889_v61  ;;  %v18899_v30 = vpop.f32.mrf.mxu1  ;;  %v1209_v42 = vld [vmem:[#allocation2 + $0xa8] sm:$0xf]  ;;  %v18906_v11 = vpop.f32.mrf.mxu0  ;;  %v1213_v3 = vld [vmem:[#allocation2 + $0xb0] sm:$0x1] }
 0x111   : > { %v4565_v25 = vrot.slane %v4563_v33, 4  ;;  %v4571_v1 = vrot.slane %v4569_v43, 5  ;;  %v15105_v10 = vpack.c.bf16 %v957_v36, %v957_v36  ;;  %v1097_v44 = vshrl.u32 %v15104_v50, 16  ;;  %23736 = vst [vmem:[#allocation13_spill] sm:$0xff] %v18899_v30  ;;  %23737 = vst [vmem:[#allocation14_spill] sm:$0xff] %v18906_v11 }
 0x112   : > { %16117 = vmatpush3.bf16.msra.mxu1 %v17093_v62  ;;  %v4557_v59 = vrot.slane %v4556_v40, 4  ;;  %v18886_v58 = vld [vmem:[#allocation2 + $0x9c] sm:$0xf]  ;;  %v1100_v55 = vshll.u32 %v15104_v50, 16  ;;  %v958_v24 = vmax.f32 %v942_v7, 0.0  ;;  %v18910_v20 = vpop.f32.mrf.mxu1 }
 0x113   : > { %16166 = vmatprep.subr.bf16.mxu1 %v18862_v53  ;;  %v4566_v45 = vor.u32 %v4565_v25, %v4561_v22  ;;  %v18891_v54 = vld [vmem:[#allocation2 + $0xa0] sm:$0xf]  ;;  %v18893_v57 = vld [vmem:[#allocation2 + $0xa4] sm:$0x1]  ;;  %v4574_v13 = vshrl.u32 %v18886_v58, 16  ;;  %v4577_v56 = vshll.u32 %v18886_v58, 16 }
 0x114   : > { %v4562_v48 = vsel %vm17618_vm13, %v4557_v59, %v4561_v22  ;;  %v4583_v37 = vshll.u32 %v18891_v54, 16  ;;  %v4587_v49 = vshrl.u32 %v18891_v54, 16  ;;  %v4593_v21 = vshll.u32 %v18893_v57, 16  ;;  %v3792_v50 = vld [vmem:[#allocation2 + $0x60] sm:$0xe] }
 0x115   : > { %v4567_v33 = vrot.slane %v4566_v45, 4  ;;  %v4576_v43 = vrot.slane %v4574_v13, 4  ;;  %v4579_v36 = vrot.slane %v4577_v56, 5  ;;  %v1099_v40 = vrot.slane %v1097_v44, 7  ;;  %v3793_v11 = vld [vmem:[#allocation2 + $0x6c] sm:$0xe] }
 0x116   : > { %v4585_v32 = vrot.slane %v4583_v37, 5  ;;  %v4589_v7 = vrot.slane %v4587_v49, 4  ;;  %v4595_v25 = vrot.slane %v4593_v21, 5  ;;  %v1105_v62 = vshrl.u32 %v15105_v10, 16 }
 0x117   : > { %v4572_v22 = vsel %vm17618_vm13, %v4567_v33, %v4571_v1  ;;  %v4580_v59 = vor.u32 %v4579_v36, %v4576_v43  ;;  %v1102_v29 = vor.u32 %v1100_v55, %v1099_v40  ;;  %v1103_v30 = vrot.slane %v1099_v40, 4  ;;  %v18914_v43 = vpop.f32.mrf.mxu0  ;;  %v5031_v40 = vld [vmem:[#allocation2 + $0x60] sm:$0xe] }
 0x118   : > { %v14142_v45 = vcombine.low %v4562_v48, %v4572_v22  ;;  %v4590_v13 = vor.u32 %v4589_v7, %v4585_v32  ;;  %v1107_v44 = vrot.slane %v1105_v62, 7  ;;  %v1108_v56 = vshll.u32 %v15105_v10, 16  ;;  %v18918_v7 = vpop.f32.mrf.mxu1 }
 0x119   : > { %v4581_v37 = vrot.slane %v4580_v59, 4  ;;  %v1210_v49 = vsel %vm17597_vm11, %v1102_v29, %v1209_v42  ;;  %v959_v21 = vmax.f32 %v943_v31, 0.0  ;;  %v15106_v18 = vpack.c.bf16 %v958_v24, %v958_v24  ;;  %v1216_v24 = vld [vmem:[#allocation2 + $0xb4] sm:$0xf] }
 0x11a   : > { %16062 = vmatprep.mubr.bf16.mxu1 %v14142_v45  ;;  %v4591_v61 = vrot.slane %v4590_v13, 4  ;;  %v1110_v1 = vor.u32 %v1108_v56, %v1107_v44  ;;  %v1112_v33 = vrot.slane %v1107_v44, 4  ;;  %1211 = vst [vmem:[#allocation2 + $0xa8] sm:$0xf] %v1210_v49  ;;  %v14070_v55 = vrot.slane %v3792_v50, 9 }
 0x11b   : > { %v4586_v48 = vsel %vm17618_vm13, %v4581_v37, %v4585_v32  ;;  %v15107_v62 = vpack.c.bf16 %v959_v21, %v959_v21  ;;  %v1114_v10 = vshrl.u32 %v15106_v18, 16  ;;  %v1117_v36 = vshll.u32 %v15106_v18, 16  ;;  %v17385_v50 = vld [vmem:[#allocation2 + $0x64] sm:$0xf]  ;;  %v1220_v13 = vld [vmem:[#allocation2 + $0xbc] sm:$0x1]  ;;  %v18928_v37 = vpop.f32.mrf.mxu0 }
 0x11c   : > { %v4596_v29 = vsel %vm17618_vm13, %v4591_v61, %v4595_v25  ;;  %v1111_v42 = vsel %vm17608_vm12, %v1103_v30, %v1110_v1  ;;  %v1214_v31 = vsel %vm17519_vm2, %v1112_v33, %v1213_v3  ;;  %v3862_v22 = vrot.slane %v17385_v50, 5  ;;  %v17386_v25 = vld [vmem:[#allocation2 + $0x68] sm:$0x1]  ;;  %v18931_v33 = vpop.f32.mrf.mxu1 }
 0x11d   : > { %v14143_v59 = vcombine.low %v4586_v48, %v4596_v29  ;;  %1212 = vst [vmem:[#allocation2 + $0xac] sm:$0xf] %v1111_v42  ;;  %1215 = vst [vmem:[#allocation2 + $0xb0] sm:$0x1] %v1214_v31  ;;  %v1116_v32 = vrot.slane %v1114_v10, 7  ;;  %v1122_v18 = vshrl.u32 %v15107_v62, 16 }
 0x11e   : > { %v1125_v45 = vshll.u32 %v15107_v62, 16  ;;  %v3863_v44 = vsel %vm17647_vm14, %v14070_v55, %v3862_v22  ;;  %v3864_v61 = vrot.slane %v3862_v22, 4  ;;  %v3865_v56 = vrot.slane %v17386_v25, 5  ;;  %23738 = vst [vmem:[#allocation15_spill] sm:$0xff] %v18931_v33  ;;  %v17387_v10 = vld [vmem:[#allocation2 + $0x64] sm:$0xf] }
 0x11f   : > { %v14071_v30 = vrot.slane %v3793_v11, 9  ;;  %16063 = vmatmul.mubr.bf16.gmra.mxu1 %v14143_v59  ;;  %v1119_v3 = vor.u32 %v1117_v36, %v1116_v32  ;;  %v1120_v49 = vrot.slane %v1116_v32, 4  ;;  %v1124_v21 = vrot.slane %v1122_v18, 7 }
 0x120   : > { %v3869_v1 = vrot.slane %v18617_v17, 5  ;;  %v3866_v48 = vsel %vm17647_vm14, %v3864_v61, %v3865_v56  ;;  %v3872_v62 = vrot.slane %v18619_v5, 5  ;;  %v14170_v55 = vrot.slane %v5031_v40, 9  ;;  %v18944_v40 = vpop.f32.mrf.mxu0  ;;  %v18954_v61 = vpop.f32.mrf.mxu1 }
 0x121   : > { %v5057_v29 = vrot.slane %v17387_v10, 5  ;;  %v18936_v42 = vld [vmem:[#allocation2 + $0xa8] sm:$0xf]  ;;  %v1127_v11 = vor.u32 %v1125_v45, %v1124_v21  ;;  %v1129_v31 = vrot.slane %v1124_v21, 4  ;;  %v1217_v36 = vsel %vm17597_vm11, %v1119_v3, %v1216_v24  ;;  %23739 = vst [vmem:[#allocation16_spill] sm:$0xff] %v18954_v61 }
 0x122   : > { %v14094_v50 = vcombine.low %v3863_v44, %v3866_v48  ;;  %v4598_v17 = vshrl.u32 %v18936_v42, 16  ;;  %v4601_v22 = vshll.u32 %v18936_v42, 16  ;;  %1218 = vst [vmem:[#allocation2 + $0xb4] sm:$0xf] %v1217_v36  ;;  %v3870_v59 = vsel %vm17647_vm14, %v14071_v30, %v3869_v1  ;;  %v5032_v44 = vld [vmem:[#allocation2 + $0x6c] sm:$0xe] }
 0x123   : > { %v3871_v5 = vrot.slane %v3869_v1, 4  ;;  %v1128_v32 = vsel %vm17608_vm12, %v1120_v49, %v1127_v11  ;;  %v1221_v18 = vsel %vm17519_vm2, %v1129_v31, %v1220_v13  ;;  %v18952_v24 = vsel %vm17647_vm14, %v14170_v55, %v5057_v29 }
 0x124   : > { %16034 = vmatprep.mubr.bf16.mxu0 %v14094_v50  ;;  %v5059_v45 = vrot.slane %v5057_v29, 4  ;;  %v18956_v25 = vld [vmem:[#allocation2 + $0xac] sm:$0xf]  ;;  %v18958_v56 = vld [vmem:[#allocation2 + $0xb0] sm:$0x1]  ;;  %v4600_v30 = vrot.slane %v4598_v17, 4  ;;  %v18968_v17 = vpop.f32.mrf.mxu0 }
 0x125   : > { %v4603_v3 = vrot.slane %v4601_v22, 5  ;;  %1219 = vst [vmem:[#allocation2 + $0xb8] sm:$0xf] %v1128_v32  ;;  %1222 = vst [vmem:[#allocation2 + $0xbc] sm:$0x1] %v1221_v18  ;;  %v3873_v13 = vsel %vm17647_vm14, %v3871_v5, %v3872_v62  ;;  %v4607_v21 = vshll.u32 %v18956_v25, 16  ;;  %v18971_v18 = vpop.f32.mrf.mxu1 }
 0x126   : > { %v4611_v1 = vshrl.u32 %v18956_v25, 16  ;;  %v4617_v48 = vshll.u32 %v18958_v56, 16  ;;  %v14095_v55 = vcombine.low %v3870_v59, %v3873_v13  ;;  %v17388_v29 = vld [vmem:[#allocation2 + $0x68] sm:$0x1]  ;;  %v14171_v31 = vrot.slane %v5032_v44, 9  ;;  %23740 = vst [vmem:[#allocation17_spill] sm:$0xff] %v18971_v18 }
 0x127   : > { %v4604_v10 = vor.u32 %v4603_v3, %v4600_v30  ;;  %v5060_v11 = vrot.slane %v17388_v29, 5  ;;  %v5064_v36 = vrot.slane %v18629_v39, 5  ;;  %v5033_v50 = vld [vmem:[#allocation2 + $0x78] sm:$0xe]  ;;  %v4609_v62 = vrot.slane %v4607_v21, 5 }
 0x128   : > { %v4613_v22 = vrot.slane %v4611_v1, 4  ;;  %v4619_v5 = vrot.slane %v4617_v48, 5  ;;  %16035 = vmatmul.mubr.bf16.gmra.mxu0 %v14095_v55  ;;  %v5067_v32 = vrot.slane %v18631_v46, 5  ;;  %v23741_v3 = vcombine.low %v18540_v35, %v18542_v47  ;;  %v18997_v47 = vpop.f32.mrf.mxu0  ;;  %v5036_v18 = vld [vmem:[#allocation2 + $0x9c] sm:$0xe] }
 0x129   : > { %v4605_v49 = vrot.slane %v4604_v10, 4  ;;  %v18975_v59 = vsel %vm17647_vm14, %v5059_v45, %v5060_v11  ;;  %v18979_v44 = vsel %vm17647_vm14, %v14171_v31, %v5064_v36  ;;  %v5066_v30 = vrot.slane %v5064_v36, 4  ;;  %v18984_v21 = vld [vmem:[#allocation2 + $0xb4] sm:$0xf]  ;;  %v5034_v45 = vld [vmem:[#allocation2 + $0x84] sm:$0xe] }
 0x12a   : > { %16086 = vmatprep.mubr.bf16.mxu0 %v23741_v3  ;;  %v4614_v13 = vor.u32 %v4613_v22, %v4609_v62  ;;  %v14172_v1 = vrot.slane %v5033_v50, 9  ;;  %v5071_v48 = vrot.slane %v18731_v26, 5  ;;  %v4622_v10 = vshrl.u32 %v18984_v21, 16  ;;  %23742 = vst [vmem:[#allocation18_spill] sm:$0xff] %v18997_v47  ;;  %v5035_v22 = vld [vmem:[#allocation2 + $0x90] sm:$0xe]  ;;  %v19022_v33 = vpop.f32.mrf.mxu0 }
 0x12b   : > { %v4610_v55 = vsel %vm17618_vm13, %v4605_v49, %v4609_v62  ;;  %v4625_v29 = vshll.u32 %v18984_v21, 16  ;;  %v18995_v35 = vsel %vm17647_vm14, %v5066_v30, %v5067_v32  ;;  %v19009_v3 = vpop.f32.mrf.mxu1  ;;  %v5074_v50 = vrot.slane %v18733_v23, 5 }
 0x12c   : > { %v4615_v11 = vrot.slane %v4614_v13, 4  ;;  %v18999_v31 = vld [vmem:[#allocation2 + $0xb8] sm:$0xf]  ;;  %v19001_v36 = vld [vmem:[#allocation2 + $0xbc] sm:$0x1]  ;;  %v19007_v49 = vsel %vm17647_vm14, %v14172_v1, %v5071_v48  ;;  %v5073_v62 = vrot.slane %v5071_v48, 4 }
 0x12d   : > { %23743 = vst [vmem:[#allocation19_spill] sm:$0xff] %v19009_v3  ;;  %v4624_v32 = vrot.slane %v4622_v10, 4  ;;  %v4627_v30 = vrot.slane %v4625_v29, 5  ;;  %v4631_v46 = vshll.u32 %v18999_v31, 16  ;;  %v4635_v13 = vshrl.u32 %v18999_v31, 16  ;;  %v17100_v1 = vld [vmem:[%s23675_s3 + $0xf0] sm:$0xff]   ;;  %v19020_v3 = vpop.f32.mrf.mxu1 }
 0x12e   : > { %v4620_v9 = vsel %vm17618_vm13, %v4615_v11, %v4619_v5  ;;  %v4641_v14 = vshll.u32 %v19001_v36, 16  ;;  %v14173_v48 = vrot.slane %v5034_v45, 9  ;;  %23744 = vst [vmem:[#allocation20_spill] sm:$0xff] %v19020_v3  ;;  %v23745_v5 = vcombine.low %v18604_v52, %v18629_v39 }
 0x12f   : > { %v14144_v10 = vcombine.low %v4610_v55, %v4620_v9  ;;  %v4628_v29 = vor.u32 %v4627_v30, %v4624_v32  ;;  %v4633_v15 = vrot.slane %v4631_v46, 5  ;;  %v4637_v61 = vrot.slane %v4635_v13, 4  ;;  %v19033_v3 = vpop.f32.mrf.mxu1 }
 0x130   : > { %v4643_v47 = vrot.slane %v4641_v14, 5  ;;  %16087 = vmatmul.mubr.bf16.vlgmr.msra.gmra.mxu0 %v23745_v5  ;;  %v19029_v23 = vsel %vm17647_vm14, %v5073_v62, %v5074_v50  ;;  %v5078_v45 = vrot.slane %v18755_v38, 5  ;;  %v5081_v11 = vrot.slane %v18757_v60, 5  ;;  %23746 = vst [vmem:[#allocation21_spill] sm:$0xff] %v19033_v3 }
 0x131   : > { %16066 = vmatprep.mubr.bf16.mxu1 %v14144_v10  ;;  %v4629_v9 = vrot.slane %v4628_v29, 4  ;;  %v4638_v46 = vor.u32 %v4637_v61, %v4633_v15  ;;  %16135 = vmatpush3.bf16.msra.mxu0 %v18816_v12  ;;  %v14174_v52 = vrot.slane %v5035_v22, 9  ;;  %v23747_v60 = vcombine.low %v18711_v34, %v18731_v26  ;;  %v17103_v61 = vld [vmem:[%s23675_s3 + $0xe8] sm:$0xff]   ;;  %v19050_v62 = vpop.f32.mrf.mxu1 }
 0x132   : > { %16136 = vmatprep.subr.bf16.mxu0 %v17100_v1  ;;  %v19040_v39 = vsel %vm17647_vm14, %v14173_v48, %v5078_v45  ;;  %v5080_v55 = vrot.slane %v5078_v45, 4  ;;  %v5085_v12 = vrot.slane %v18870_v6, 5  ;;  %v5088_v50 = vrot.slane %v18872_v2, 5  ;;  %23748 = vst [vmem:[#allocation22_spill] sm:$0xff] %v19050_v62  ;;  %v19055_v48 = vpop.f32.mrf.mxu0  ;;  %v5037_v29 = vld [vmem:[#allocation2 + $0xa8] sm:$0xe] }
 0x133   : > { %16090 = vmatprep.mubr.bf16.mxu0 %v23747_v60  ;;  %v4634_v22 = vsel %vm17618_vm13, %v4629_v9, %v4633_v15  ;;  %v4639_v32 = vrot.slane %v4638_v46, 4  ;;  %v14175_v30 = vrot.slane %v5036_v18, 9  ;;  %v5092_v13 = vrot.slane %v18891_v54, 5  ;;  %v19066_v5 = vpop.f32.mrf.mxu1  ;;  %v17106_v45 = vld [vmem:[%s23675_s3 + $0xe0] sm:$0xff]   ;;  %v19087_v60 = vld [vmem:[#allocation2 + $0x70] sm:$0xf] }
 0x134   : > { %v19059_v34 = vsel %vm17647_vm14, %v5080_v55, %v5081_v11  ;;  %v19063_v26 = vsel %vm17647_vm14, %v14174_v52, %v5085_v12  ;;  %v5087_v2 = vrot.slane %v5085_v12, 4  ;;  %v5095_v10 = vrot.slane %v18893_v57, 5  ;;  %23749 = vst [vmem:[#allocation23_spill] sm:$0xff] %v19066_v5  ;;  %v5038_v57 = vld [vmem:[#allocation2 + $0xb4] sm:$0xe]  ;;  %23750 = vst [vmem:[#allocation24_spill] sm:$0xff] %v19087_v60 }
 0x135   : > { %v4644_v15 = vsel %vm17618_vm13, %v4639_v32, %v4643_v47  ;;  %16137 = vmatpush3.bf16.msra.mxu0 %v17100_v1  ;;  %v19077_v11 = vsel %vm17647_vm14, %v14175_v30, %v5092_v13  ;;  %v5094_v9 = vrot.slane %v5092_v13, 4  ;;  %v14158_v47 = vcombine.low %v18841_v51, %v18870_v6  ;;  %v5561_v55 = vld [vmem:[#allocation2 + $0x6c] sm:$0xf]  ;;  %v19089_v12 = vpop.f32.mrf.mxu1  ;;  %v19098_v13 = vld [vmem:[#allocation2 + $0x74] sm:$0x1] }
 0x136   : > { %v14145_v46 = vcombine.low %v4634_v22, %v4644_v15  ;;  %16138 = vmatprep.subr.bf16.mxu0 %v17103_v61  ;;  %v19081_v52 = vsel %vm17647_vm14, %v5087_v2, %v5088_v50  ;;  %23751 = vst [vmem:[#allocation25_spill] sm:$0xff] %v19089_v12  ;;  %v14176_v50 = vrot.slane %v5037_v29, 9  ;;  %v5099_v30 = vrot.slane %v18956_v25, 5  ;;  %23752 = vst [vmem:[#allocation26_spill] sm:$0xff] %v19098_v13  ;;  %v19126_v2 = vld [vmem:[#allocation2 + $0x7c] sm:$0xf] }
 0x137   : > { %v19095_v22 = vsel %vm17647_vm14, %v5094_v9, %v5095_v10  ;;  %v19100_v51 = vpop.f32.mrf.mxu0  ;;  %v23753_v6 = vcombine.low %v18743_v19, %v18755_v38  ;;  %v19110_v10 = vld [vmem:[%s23675_s3 + $0xd8] sm:$0xff]   ;;  %v5102_v29 = vrot.slane %v18958_v56, 5  ;;  %v14177_v15 = vrot.slane %v5038_v57, 9  ;;  %v19114_v32 = vpop.f32.mrf.mxu1 }
 0x138   : > { %16067 = vmatmul.mubr.bf16.gmra.mxu1 %v14145_v46  ;;  %v5106_v9 = vrot.slane %v18999_v31, 5  ;;  %23754 = vst [vmem:[#allocation27_spill] sm:$0xff] %v19114_v32  ;;  %v23755_v46 = vcombine.low %v18952_v24, %v18975_v59  ;;  %v19121_v19 = vsel %vm17647_vm14, %v14176_v50, %v5099_v30  ;;  %v5101_v38 = vrot.slane %v5099_v30, 4  ;;  %v5564_v57 = vld [vmem:[#allocation2 + $0x78] sm:$0xf] }
 0x139   : > { %16091 = vmatmul.mubr.bf16.gmra.mxu0 %v23753_v6  ;;  %v5109_v6 = vrot.slane %v19001_v36, 5  ;;  %v19128_v18 = vpop.f32.mrf.mxu0  ;;  %v5586_v50 = vshrl.u32 %v5561_v55, 16  ;;  %v19136_v36 = vpop.f32.mrf.mxu1  ;;  %v5595_v56 = vshll.u32 %v19087_v60, 16  ;;  %v5605_v1 = vshll.u32 %v19098_v13, 16 }
 0x13a   : > { %16118 = vmatprep.mubr.bf16.mxu1 %v23755_v46  ;;  %16139 = vmatpush3.bf16.msra.mxu0 %v17103_v61  ;;  %v19132_v24 = vsel %vm17647_vm14, %v14177_v15, %v5106_v9  ;;  %v5108_v59 = vrot.slane %v5106_v9, 4  ;;  %23756 = vst [vmem:[#allocation28_spill] sm:$0xff] %v19136_v36  ;;  %v19140_v30 = vsel %vm17647_vm14, %v5101_v38, %v5102_v29  ;;  %v5589_v46 = vshll.u32 %v5561_v55, 16  ;;  %v19153_v36 = vld [vmem:[#allocation2 + $0x80] sm:$0x1]  ;;  %v17099_v55 = vld [vmem:[%s23675_s3 + $0x130] sm:$0xff]  }
 0x13b   : > { %16140 = vmatprep.subr.bf16.mxu0 %v17106_v45  ;;  %16094 = vmatprep.mubr.bf16.mxu0 %v14158_v47  ;;  %v5599_v47 = vshrl.u32 %v19087_v60, 16  ;;  %v19144_v14 = vpop.f32.mrf.mxu0  ;;  %v5588_v61 = vrot.slane %v5586_v50, 4  ;;  %v19155_v29 = vpop.f32.mrf.mxu1  ;;  %v19163_v38 = vld [vmem:[%s23675_s3 + $0xd0] sm:$0xff]   ;;  %v5597_v50 = vrot.slane %v5595_v56, 5  ;;  %v5610_v12 = vshrl.u32 %v5564_v57, 16 }
 0x13c   : > { %v19150_v9 = vsel %vm17647_vm14, %v5108_v59, %v5109_v6  ;;  %23757 = vst [vmem:[#allocation29_spill] sm:$0xff] %v19155_v29  ;;  %v5591_v59 = vrot.slane %v5589_v46, 5  ;;  %v5607_v29 = vrot.slane %v5605_v1, 5  ;;  %v5613_v5 = vshll.u32 %v5564_v57, 16 }
 0x13d   : > { %v5601_v15 = vrot.slane %v5599_v47, 4  ;;  %v19167_v32 = vpop.f32.mrf.mxu0  ;;  %v19171_v13 = vpop.f32.mrf.mxu1  ;;  %v5623_v3 = vshrl.u32 %v19126_v2, 16  ;;  %v5629_v46 = vshll.u32 %v19153_v36, 16  ;;  %v23760_v47 = vcombine.low %v18979_v44, %v18995_v35 }
 0x13e   : > { %16141 = vmatpush3.bf16.msra.mxu0 %v17106_v45  ;;  %23758 = vst [vmem:[#allocation30_spill] sm:$0xff] %v19167_v32  ;;  %v5619_v45 = vshll.u32 %v19126_v2, 16  ;;  %23759 = vst [vmem:[#allocation31_spill] sm:$0xff] %v19171_v13  ;;  %v5592_v60 = vor.u32 %v5591_v59, %v5588_v61  ;;  %v23761_v1 = vcombine.low %v18886_v58, %v18891_v54  ;;  %v5612_v57 = vrot.slane %v5610_v12, 4  ;;  %v19192_v54 = vld [vmem:[#allocation2 + $0x8c] sm:$0x1] }
 0x13f   : > { %16142 = vmatprep.subr.bf16.mxu0 %v19110_v10  ;;  %v5602_v62 = vor.u32 %v5601_v15, %v5597_v50  ;;  %v19175_v56 = vpop.f32.mrf.mxu0  ;;  %v5615_v6 = vrot.slane %v5613_v5, 5  ;;  %v19184_v15 = vld [vmem:[#allocation2 + $0x88] sm:$0xf]  ;;  %v19186_v59 = vpop.f32.mrf.mxu1  ;;  %v23763_v13 = vcombine.low %v19007_v49, %v19029_v23  ;;  %v5631_v58 = vrot.slane %v5629_v46, 5  ;;  %v5570_v23 = vld [vmem:[#allocation2 + $0x90] sm:$0xf] }
 0x140   : > { %16119 = vmatmul.mubr.bf16.vlgmr.msra.gmra.mxu1 %v23760_v47  ;;  %v5621_v32 = vrot.slane %v5619_v45, 5  ;;  %23762 = vst [vmem:[#allocation32_spill] sm:$0xff] %v19186_v59  ;;  %v5593_v44 = vrot.slane %v5592_v60, 4  ;;  %v5625_v47 = vrot.slane %v5623_v3, 4  ;;  %v17101_v12 = vld [vmem:[%s23675_s3 + $0x128] sm:$0xff]   ;;  %v19203_v49 = vadd.f32 %v18762_v16, %v18818_v8 }
 0x141   : > { %16095 = vmatmul.mubr.bf16.gmra.mxu0 %v23761_v1  ;;  %16167 = vmatpush3.bf16.msra.mxu1 %v18862_v53  ;;  %v5603_v35 = vrot.slane %v5602_v62, 4  ;;  %v19194_v5 = vpop.f32.mrf.mxu0  ;;  %v5616_v53 = vor.u32 %v5615_v6, %v5612_v57  ;;  %v19207_v3 = vadd.f32 %v18778_v41, %v18839_v4  ;;  %v19209_v62 = vpop.f32.mrf.mxu1  ;;  %v23765_v60 = vcombine.low %v18936_v42, %v18956_v25  ;;  %v19229_v42 = vld [vmem:[%s23675_s3 + $0x120] sm:$0xff]   ;;  %v19234_v57 = vld [vmem:[#allocation2 + $0x98] sm:$0x1]  ;;  %v17120_v61 = vld [vmem:[#allocation2 + $0x6c] sm:$0xff]  }
 0x142   : > { %16122 = vmatprep.mubr.bf16.mxu1 %v23763_v13  ;;  %16168 = vmatprep.subr.bf16.mxu1 %v17099_v55  ;;  %23764 = vst [vmem:[#allocation33_spill] sm:$0xff] %v19209_v62  ;;  %v17115_v13 = vld [vmem:[%s23675_s3 + $0xc8] sm:$0xff]   ;;  %v5598_v16 = vsel %vm17618_vm13, %v5593_v44, %v5597_v50  ;;  %v5626_v8 = vor.u32 %v5625_v47, %v5621_v32  ;;  %v5634_v4 = vshrl.u32 %v5567_v0, 16  ;;  %v5637_v1 = vshll.u32 %v5567_v0, 16  ;;  %v19241_v44 = vld [vmem:[%s23675_s3 + $0xc0] sm:$0xff]  }
 0x143   : > { %16143 = vmatpush3.bf16.msra.mxu0 %v19110_v10  ;;  %16098 = vmatprep.mubr.bf16.mxu0 %v23765_v60  ;;  %v5608_v41 = vsel %vm17618_vm13, %v5603_v35, %v5607_v29  ;;  %v19222_v10 = vld [vmem:[#allocation2 + $0x94] sm:$0xf]  ;;  %v19224_v6 = vpop.f32.mrf.mxu0  ;;  %v5617_v46 = vrot.slane %v5616_v53, 4  ;;  %v5643_v50 = vshll.u32 %v19184_v15, 16  ;;  %23766 = vst [vmem:[#allocation34_spill] sm:$0xff] %v19234_v57  ;;  %v19236_v29 = vpop.f32.mrf.mxu1  ;;  %v5647_v60 = vshrl.u32 %v19184_v15, 16 }
 0x144   : > { %16144 = vmatprep.subr.bf16.mxu0 %v19163_v38  ;;  %v19231_v25 = vcombine.low %v5598_v16, %v5608_v41  ;;  %23767 = vst [vmem:[#allocation35_spill] sm:$0xff] %v19236_v29  ;;  %v5627_v35 = vrot.slane %v5626_v8, 4  ;;  %v5636_v47 = vrot.slane %v5634_v4, 4  ;;  %v5653_v16 = vshll.u32 %v19192_v54, 16 }
 0x145   : > { %16169 = vmatpush3.bf16.msra.mxu1 %v17099_v55  ;;  %v19245_v53 = vpop.f32.mrf.mxu0  ;;  %v5622_v0 = vsel %vm17618_vm13, %v5617_v46, %v5621_v32  ;;  %v5639_v55 = vrot.slane %v5637_v1, 5  ;;  %v5645_v41 = vrot.slane %v5643_v50, 5  ;;  %v19252_v45 = vadd.f32 %v18795_v63, %v18876_v27  ;;  %v19254_v8 = vpop.f32.mrf.mxu1 }
 0x146   : > { %16170 = vmatprep.subr.bf16.mxu1 %v17101_v12  ;;  %23768 = vst [vmem:[#allocation36_spill] sm:$0xff] %v19254_v8  ;;  %v5632_v4 = vsel %vm17618_vm13, %v5627_v35, %v5631_v58  ;;  %v5649_v29 = vrot.slane %v5647_v60, 4  ;;  %v5655_v62 = vrot.slane %v5653_v16, 5  ;;  %v5658_v59 = vshrl.u32 %v5570_v23, 16 }
 0x147   : > { %16145 = vmatpush3.bf16.msra.mxu0 %v19163_v38  ;;  %v19258_v38 = vpop.f32.mrf.mxu0  ;;  %v23769_v32 = vcombine.low %v19040_v39, %v19059_v34  ;;  %v23770_v63 = vcombine.low %v18984_v21, %v18999_v31  ;;  %v19266_v27 = vcombine.low %v5622_v0, %v5632_v4  ;;  %v5640_v46 = vor.u32 %v5639_v55, %v5636_v47  ;;  %v19269_v50 = vpop.f32.mrf.mxu1  ;;  %v17107_v39 = vld [vmem:[%s23675_s3 + $0x118] sm:$0xff]   ;;  %v19283_v0 = vld [vmem:[#allocation2 + $0xa0] sm:$0xf] }
 0x148   : > { %16146 = vmatprep.subr.bf16.mxu0 %v17115_v13  ;;  %v5661_v1 = vshll.u32 %v5570_v23, 16  ;;  %v5667_v58 = vshll.u32 %v19222_v10, 16  ;;  %23771 = vst [vmem:[#allocation37_spill] sm:$0xff] %v19269_v50  ;;  %v23772_v35 = vcombine.low %v19063_v26, %v19081_v52  ;;  %v5650_v34 = vor.u32 %v5649_v29, %v5645_v41  ;;  %v5573_v23 = vld [vmem:[#allocation2 + $0x9c] sm:$0xf]  ;;  %23774 = vst [vmem:[#allocation39_spill] sm:$0xff] %v19283_v0 }
 0x149   : > { %16123 = vmatmul.mubr.bf16.gmra.mxu1 %v23769_v32  ;;  %16099 = vmatmul.mubr.bf16.gmra.mxu0 %v23770_v63  ;;  %v5660_v21 = vrot.slane %v5658_v59, 4  ;;  %v5671_v31 = vshrl.u32 %v19222_v10, 16  ;;  %v5677_v47 = vshll.u32 %v19234_v57, 16  ;;  %v19279_v60 = vpop.f32.mrf.mxu0  ;;  %v19285_v55 = vpop.f32.mrf.mxu1  ;;  %v17121_v59 = vld [vmem:[%s23675_s3 + $0x178] sm:$0xff]   ;;  %v5576_v50 = vld [vmem:[#allocation2 + $0xa8] sm:$0xf] }
 0x14a   : > { %16171 = vmatpush3.bf16.msra.mxu1 %v17101_v12  ;;  %16126 = vmatprep.mubr.bf16.mxu1 %v23772_v35  ;;  %23773 = vst [vmem:[#allocation38_spill] sm:$0xff] %v19279_v60  ;;  %v5641_v12 = vrot.slane %v5640_v46, 4  ;;  %v5663_v16 = vrot.slane %v5661_v1, 5  ;;  %v5669_v26 = vrot.slane %v5667_v58, 5  ;;  %23775 = vst [vmem:[#allocation40_spill] sm:$0xff] %v19285_v55  ;;  %v5651_v29 = vrot.slane %v5650_v34, 4 }
 0x14b   : > { %16172 = vmatprep.subr.bf16.mxu1 %v19229_v42  ;;  %16147 = vmatpush3.bf16.msra.mxu0 %v17115_v13  ;;  %v5673_v4 = vrot.slane %v5671_v31, 4  ;;  %v5679_v32 = vrot.slane %v5677_v47, 5  ;;  %v23776_v13 = vld [vmem:[#allocation12_spill] sm:$0xff]  ;;  %v23777_v63 = vld [vmem:[#allocation9_spill] sm:$0xff]  ;;  %v19295_v1 = vld [vmem:[#allocation2 + $0xa4] sm:$0x1]  ;;  %v19297_v58 = vpop.f32.mrf.mxu0  ;;  %v19314_v8 = vpop.f32.mrf.mxu1 }
 0x14c   : > { %16148 = vmatprep.subr.bf16.mxu0 %v19241_v44  ;;  %16150 = vmatprep.mubr.bf16.mxu0 %v17120_v61  ;;  %v19293_v46 = vadd.f32 %v23777_v63, %v23776_v13  ;;  %23778 = vst [vmem:[#allocation12_spill] sm:$0xff] %v19297_v58  ;;  %v19302_v35 = vld [vmem:[%s23675_s3 + $0x110] sm:$0xff]   ;;  %v17122_v61 = vld [vmem:[#allocation2 + $0x78] sm:$0xff]   ;;  %v5646_v52 = vsel %vm17618_vm13, %v5641_v12, %v5645_v41  ;;  %v23779_v31 = vld [vmem:[#allocation14_spill] sm:$0xff]  ;;  %v5682_v60 = vshrl.u32 %v5573_v23, 16  ;;  %v5685_v41 = vshll.u32 %v5573_v23, 16 }
 0x14d   : > { %v5664_v34 = vor.u32 %v5663_v16, %v5660_v21  ;;  %v23780_v47 = vld [vmem:[#allocation10_spill] sm:$0xff]  ;;  %v23781_v13 = vld [vmem:[#allocation11_spill] sm:$0xff]  ;;  %23783 = vst [vmem:[#allocation14_spill] sm:$0xff] %v19314_v8  ;;  %v5656_v58 = vsel %vm17618_vm13, %v5651_v29, %v5655_v62  ;;  %v5674_v57 = vor.u32 %v5673_v4, %v5669_v26  ;;  %v19321_v12 = vpop.f32.mrf.mxu0  ;;  %v19329_v16 = vld [vmem:[%s23675_s3 + $0x170] sm:$0xff]   ;;  %v5691_v62 = vshll.u32 %v19283_v0, 16  ;;  %v19335_v4 = vpop.f32.mrf.mxu1 }
 0x14e   : > { %v19308_v55 = vadd.f32 %v23780_v47, %v23779_v31  ;;  %v19312_v63 = vadd.f32 %v23781_v13, %v18914_v43  ;;  %16173 = vmatpush3.bf16.msra.mxu1 %v19229_v42  ;;  %v19319_v21 = vld [vmem:[#allocation2 + $0xac] sm:$0xf]  ;;  %23784 = vst [vmem:[#allocation10_spill] sm:$0xff] %v19321_v12  ;;  %v19324_v43 = vcombine.low %v5646_v52, %v5656_v58  ;;  %v17126_v31 = vld [vmem:[#allocation2 + $0x84] sm:$0xff]   ;;  %v5695_v23 = vshrl.u32 %v19283_v0, 16 }
 0x14f   : > { %16174 = vmatprep.subr.bf16.mxu1 %v17107_v39  ;;  %16149 = vmatpush3.bf16.msra.mxu0 %v19241_v44  ;;  %v5665_v42 = vrot.slane %v5664_v34, 4  ;;  %v19333_v29 = vld [vmem:[#allocation2 + $0xb0] sm:$0x1]  ;;  %23786 = vst [vmem:[#allocation41_spill] sm:$0xff] %v19335_v4  ;;  %v5675_v47 = vrot.slane %v5674_v57, 4  ;;  %v5684_v44 = vrot.slane %v5682_v60, 4  ;;  %v19338_v13 = vpop.f32.mrf.mxu0  ;;  %v23787_v34 = vcombine.low %v19077_v11, %v19095_v22  ;;  %v19349_v57 = vpop.f32.mrf.mxu1 }
 0x150   : > { %23782 = vst [vmem:[#allocation9_spill] sm:$0xff] %v19312_v63  ;;  %23785 = vst [vmem:[#allocation11_spill] sm:$0xff] %v19333_v29  ;;  %16198 = vmatprep.subr.bf16.mxu0 %v17121_v59  ;;  %v5687_v52 = vrot.slane %v5685_v41, 5  ;;  %v5701_v58 = vshll.u32 %v19295_v1, 16  ;;  %v5693_v0 = vrot.slane %v5691_v62, 5  ;;  %v5697_v12 = vrot.slane %v5695_v23, 4 }
 0x151   : > { %16127 = vmatmul.mubr.bf16.gmra.mxu1 %v23787_v34  ;;  %v5670_v8 = vsel %vm17618_vm13, %v5665_v42, %v5669_v26  ;;  %v23788_v63 = vld [vmem:[#allocation13_spill] sm:$0xff]  ;;  %v23790_v60 = vcombine.low %v19121_v19, %v19140_v30  ;;  %v17113_v11 = vld [vmem:[%s23675_s3 + $0x108] sm:$0xff]   ;;  %v5680_v22 = vsel %vm17618_vm13, %v5675_v47, %v5679_v32  ;;  %v5706_v42 = vshrl.u32 %v5576_v50, 16  ;;  %v19359_v62 = vpop.f32.mrf.mxu0  ;;  %v5579_v32 = vld [vmem:[#allocation2 + $0xb4] sm:$0xf]  ;;  %v19370_v23 = vpop.f32.mrf.mxu1 }
 0x152   : > { %v19347_v4 = vadd.f32 %v23788_v63, %v18928_v37  ;;  %23789 = vst [vmem:[#allocation13_spill] sm:$0xff] %v19349_v57  ;;  %16175 = vmatpush3.bf16.msra.mxu1 %v17107_v39  ;;  %v5688_v26 = vor.u32 %v5687_v52, %v5684_v44  ;;  %v5703_v41 = vrot.slane %v5701_v58, 5  ;;  %23791 = vst [vmem:[#allocation42_spill] sm:$0xff] %v19359_v62  ;;  %16151 = vmatmul.mubr.bf16.vlgmr.msra.gmra.mxu0 %v17122_v61  ;;  %v19367_v19 = vld [vmem:[%s23675_s3 + $0x168] sm:$0xff]   ;;  %v19374_v52 = vld [vmem:[#allocation2 + $0xb8] sm:$0xf] }
 0x153   : > { %16130 = vmatprep.mubr.bf16.mxu1 %v23790_v60  ;;  %16176 = vmatprep.subr.bf16.mxu1 %v19302_v35  ;;  %v19362_v37 = vcombine.low %v5670_v8, %v5680_v22  ;;  %v5698_v30 = vor.u32 %v5697_v12, %v5693_v0  ;;  %v5709_v39 = vshll.u32 %v5576_v50, 16  ;;  %v5715_v63 = vshll.u32 %v19319_v21, 16  ;;  %23792 = vst [vmem:[#allocation43_spill] sm:$0xff] %v19370_v23  ;;  %v19376_v58 = vpop.f32.mrf.mxu0  ;;  %v19381_v50 = vld [vmem:[%s23675_s3 + $0x100] sm:$0xff]   ;;  %v17128_v12 = vld [vmem:[#allocation2 + $0x90] sm:$0xff]  }
 0x154   : > { %16199 = vmatpush3.bf16.msra.mxu0 %v17121_v59  ;;  %16154 = vmatprep.mubr.bf16.mxu0 %v17126_v31  ;;  %v5689_v47 = vrot.slane %v5688_v26, 4  ;;  %v5708_v44 = vrot.slane %v5706_v42, 4  ;;  %v5719_v61 = vshrl.u32 %v19319_v21, 16  ;;  %v5725_v8 = vshll.u32 %v19333_v29, 16  ;;  %23793 = vst [vmem:[#allocation44_spill] sm:$0xff] %v19374_v52  ;;  %23794 = vst [vmem:[#allocation45_spill] sm:$0xff] %v19376_v58  ;;  %v19385_v22 = vpop.f32.mrf.mxu1 }
 0x155   : > { %16200 = vmatprep.subr.bf16.mxu0 %v19329_v16  ;;  %v5699_v59 = vrot.slane %v5698_v30, 4  ;;  %v5711_v31 = vrot.slane %v5709_v39, 5  ;;  %v5717_v34 = vrot.slane %v5715_v63, 5  ;;  %23795 = vst [vmem:[#allocation46_spill] sm:$0xff] %v19385_v22  ;;  %v19392_v57 = vadd.f32 %v18910_v20, %v18944_v40  ;;  %v17132_v58 = vld [vmem:[#allocation2 + $0x9c] sm:$0xff]   ;;  %v19396_v30 = vpop.f32.mrf.mxu0  ;;  %v23798_v40 = vld [vmem:[#allocation15_spill] sm:$0xff] }
 0x156   : > { %16177 = vmatpush3.bf16.msra.mxu1 %v19302_v35  ;;  %v5694_v26 = vsel %vm17618_vm13, %v5689_v47, %v5693_v0  ;;  %v5721_v42 = vrot.slane %v5719_v61, 4  ;;  %v5727_v23 = vrot.slane %v5725_v8, 5  ;;  %v19394_v62 = vld [vmem:[#allocation2 + $0xbc] sm:$0x1]  ;;  %v19403_v35 = vld [vmem:[%s23675_s3 + $0x160] sm:$0xff]   ;;  %v19407_v63 = vadd.f32 %v18918_v7, %v18968_v17  ;;  %v19413_v8 = vpop.f32.mrf.mxu1 }
 0x157   : > { %23796 = vst [vmem:[#allocation47_spill] sm:$0xff] %v19394_v62  ;;  %16178 = vmatprep.subr.bf16.mxu1 %v17113_v11  ;;  %v5704_v39 = vsel %vm17618_vm13, %v5699_v59, %v5703_v41  ;;  %v5712_v0 = vor.u32 %v5711_v31, %v5708_v44  ;;  %v23797_v20 = vld [vmem:[#allocation18_spill] sm:$0xff]  ;;  %v5730_v60 = vshrl.u32 %v5579_v32, 16  ;;  %v5733_v22 = vshll.u32 %v5579_v32, 16  ;;  %v421_v29 = vld [vmem:[#allocation2 + $0xc8] sm:$0x1]  ;;  %v19418_v44 = vpop.f32.mrf.mxu0 }
 0x158   : > { %v19411_v47 = vadd.f32 %v23798_v40, %v23797_v20  ;;  %v365_v61 = vld [vmem:[#allocation2 + $0xc0] sm:$0x1]  ;;  %23799 = vst [vmem:[#allocation18_spill] sm:$0xff] %v19413_v8  ;;  %16201 = vmatpush3.bf16.msra.mxu0 %v19329_v16  ;;  %v19416_v41 = vcombine.low %v5694_v26, %v5704_v39  ;;  %v5722_v59 = vor.u32 %v5721_v42, %v5717_v34  ;;  %v5739_v31 = vshll.u32 %v19374_v52, 16  ;;  %v19427_v42 = vpop.f32.mrf.mxu1  ;;  %v13790_v40 = vld [vmem:[%s17512_s12 + $0xf0] sm:$0xff] }
 0x159   : > { %v23800_v7 = vcombine.low %v19132_v24, %v19150_v9  ;;  %16202 = vmatprep.subr.bf16.mxu0 %v19367_v19  ;;  %v5713_v17 = vrot.slane %v5712_v0, 4  ;;  %v5743_v16 = vshrl.u32 %v19374_v52, 16  ;;  %v5749_v26 = vshll.u32 %v19394_v62, 16  ;;  %23801 = vst [vmem:[#allocation15_spill] sm:$0xff] %v19427_v42  ;;  %v19433_v24 = vld [vmem:[%s23675_s3 + $0x1b8] sm:$0xff]   ;;  %v23802_v0 = vld [vmem:[#allocation16_spill] sm:$0xff]  ;;  %v19441_v8 = vpop.f32.mrf.mxu0 }
 0x15a   : > { %16179 = vmatpush3.bf16.msra.mxu1 %v17113_v11  ;;  %v5723_v9 = vrot.slane %v5722_v59, 4  ;;  %v5732_v32 = vrot.slane %v5730_v60, 4  ;;  %v5735_v39 = vrot.slane %v5733_v22, 5  ;;  %v19437_v20 = vadd.f32 %v23802_v0, %v19022_v33  ;;  %23803 = vst [vmem:[#allocation16_spill] sm:$0xff] %v19441_v8  ;;  %16155 = vmatmul.mubr.bf16.gmra.mxu0 %v17128_v12  ;;  %v19449_v11 = vld [vmem:[%s23675_s3 + $0x158] sm:$0xff]   ;;  %v19451_v33 = vpop.f32.mrf.mxu1 }
 0x15b   : > { %16131 = vmatmul.mubr.bf16.gmra.mxu1 %v23800_v7  ;;  %v13791_v7 = vld [vmem:[%s17512_s12 + $0xf8] sm:$0xff]  ;;  %16180 = vmatprep.subr.bf16.mxu1 %v19381_v50  ;;  %v5741_v60 = vrot.slane %v5739_v31, 5  ;;  %v5745_v22 = vrot.slane %v5743_v16, 4  ;;  %v5751_v59 = vrot.slane %v5749_v26, 5  ;;  %23804 = vst [vmem:[#allocation48_spill] sm:$0xff] %v19451_v33  ;;  %v422_v62 = vsel %vm17551_vm6, 0, %v421_v29  ;;  %v19460_v52 = vpop.f32.mrf.mxu0 }
 0x15c   : > { %16182 = vmatprep.mubr.bf16.mxu1 %v19231_v25  ;;  %v5718_v25 = vsel %vm17618_vm13, %v5713_v17, %v5717_v34  ;;  %16203 = vmatpush3.bf16.msra.mxu0 %v19367_v19  ;;  %v5728_v0 = vsel %vm17618_vm13, %v5723_v9, %v5727_v23  ;;  %v5736_v12 = vor.u32 %v5735_v39, %v5732_v32  ;;  %v366_v34 = vsel %vm17519_vm2, 0, %v365_v61  ;;  %v5986_v8 = vld [vmem:[#allocation2 + $0x6c] sm:$0xe]  ;;  %v19465_v31 = vld [vmem:[%s23675_s3 + $0x1b0] sm:$0xff]   ;;  %v19473_v16 = vpop.f32.mrf.mxu1  ;;  %v23808_v32 = vld [vmem:[#allocation17_spill] sm:$0xff] }
 0x15d   : > { %16158 = vmatprep.mubr.bf16.mxu0 %v17132_v58  ;;  %16204 = vmatprep.subr.bf16.mxu0 %v19403_v35  ;;  %v19468_v19 = vcombine.low %v5718_v25, %v5728_v0  ;;  %v5746_v23 = vor.u32 %v5745_v22, %v5741_v60  ;;  %367 = vst [vmem:[#allocation2 + $0xc0] sm:$0x1] %v366_v34  ;;  %423 = vst [vmem:[#allocation2 + $0xc8] sm:$0x1] %v422_v62  ;;  %v17389_v58 = vld [vmem:[%s23673_s1] ss:$0 sm:$0xff] }
 0x15e   : > { %v928_v29 = vmul.f32 %v17389_v58, %v13790_v40  ;;  %v929_v61 = vmul.f32 %v17389_v58, %v13791_v7  ;;  %23807 = vst [vmem:[#allocation49_spill] sm:$0xff] %v19473_v16  ;;  %16181 = vmatpush3.bf16.msra.mxu1 %v19381_v50  ;;  %v17134_v26 = vld [vmem:[#allocation2 + $0xa8] sm:$0xff]   ;;  %v5737_v9 = vrot.slane %v5736_v12, 4  ;;  %v19478_v39 = vadd.f32 %v23808_v32, %v19055_v48  ;;  %v23810_v62 = vld [vmem:[#allocation20_spill] sm:$0xff]  ;;  %v19488_v40 = vpop.f32.mrf.mxu0  ;;  %v17390_v50 = vld [vmem:[%s23674_s2] ss:$0 sm:$0xff]  ;;  %v19498_v32 = vpop.f32.mrf.mxu1 }
 0x15f   : > { %v23809_v25 = vld [vmem:[#allocation19_spill] sm:$0xff]  ;;  %v19486_v0 = vadd.f32 %v23810_v62, %v19128_v18  ;;  %16230 = vmatprep.subr.bf16.mxu1 %v19433_v24  ;;  %v5747_v7 = vrot.slane %v5746_v23, 4  ;;  %v17138_v34 = vld [vmem:[#allocation2 + $0xb4] sm:$0xff]   ;;  %23812 = vst [vmem:[#allocation17_spill] sm:$0xff] %v19498_v32  ;;  %v23814_v23 = vld [vmem:[#allocation22_spill] sm:$0xff]  ;;  %v14274_v16 = vrot.slane %v5986_v8, 9 }
 0x160   : > { %v19482_v22 = vadd.f32 %v23809_v25, %v19100_v51  ;;  %v944_v12 = vadd.f32 %v17390_v50, %v928_v29  ;;  %v945_v48 = vadd.f32 %v17390_v50, %v929_v61  ;;  %v23811_v58 = vld [vmem:[#allocation21_spill] sm:$0xff]  ;;  %16205 = vmatpush3.bf16.msra.mxu0 %v19403_v35  ;;  %v5742_v18 = vsel %vm17618_vm13, %v5737_v9, %v5741_v60  ;;  %v23813_v25 = vld [vmem:[#allocation30_spill] sm:$0xff]  ;;  %v23815_v33 = vld [vmem:[#allocation24_spill] sm:$0xff]  ;;  %v19508_v50 = vpop.f32.mrf.mxu0 }
 0x161   : > { %v19496_v51 = vadd.f32 %v23811_v58, %v19144_v14  ;;  %v19505_v62 = vadd.f32 %v23814_v23, %v23813_v25  ;;  %v6020_v29 = vrot.slane %v23815_v33, 5  ;;  %v5987_v61 = vld [vmem:[#allocation2 + $0x78] sm:$0xe]  ;;  %16206 = vmatprep.subr.bf16.mxu0 %v19449_v11  ;;  %v5752_v14 = vsel %vm17618_vm13, %v5747_v7, %v5751_v59  ;;  %v17136_v35 = vld [vmem:[%s23675_s3 + $0x150] sm:$0xff]   ;;  %v23816_v58 = vld [vmem:[#allocation26_spill] sm:$0xff]  ;;  %v19518_v25 = vpop.f32.mrf.mxu1 }
 0x162   : > { %v960_v60 = vmax.f32 %v944_v12, 0.0  ;;  %v961_v9 = vmax.f32 %v945_v48, 0.0  ;;  %v6023_v8 = vrot.slane %v23816_v58, 5  ;;  %23817 = vst [vmem:[#allocation19_spill] sm:$0xff] %v19518_v25  ;;  %v19525_v33 = vcombine.low %v5742_v18, %v5752_v14  ;;  %v5988_v23 = vld [vmem:[#allocation2 + $0x84] sm:$0xe]  ;;  %v19535_v58 = vpop.f32.mrf.mxu0  ;;  %16159 = vmatmul.mubr.bf16.gmra.mxu0 %v17134_v26 }
 0x163   : > { %16183 = vmatmul.mubr.bf16.vlgmr.msra.gmra.mxu1 %v19266_v27  ;;  %v17125_v27 = vld [vmem:[%s23675_s3 + $0x1a8] sm:$0xff]   ;;  %v19529_v7 = vsel %vm17647_vm14, %v14274_v16, %v6020_v29  ;;  %v6022_v12 = vrot.slane %v6020_v29, 4  ;;  %v19533_v48 = vadd.f32 %v19175_v56, %v19203_v49  ;;  %v14275_v25 = vrot.slane %v5987_v61, 9  ;;  %16162 = vmatprep.mubr.bf16.mxu0 %v17138_v34  ;;  %v19558_v32 = vpop.f32.mrf.mxu1 }
 0x164   : > { %16231 = vmatpush3.bf16.msra.mxu1 %v19433_v24  ;;  %16186 = vmatprep.mubr.bf16.mxu1 %v19324_v43  ;;  %v15108_v43 = vpack.c.bf16 %v960_v60, %v960_v60  ;;  %v15109_v24 = vpack.c.bf16 %v961_v9, %v961_v9  ;;  %v23819_v18 = vrot.slane %v19126_v2, 5  ;;  %v17139_v56 = vld [vmem:[%s23675_s3 + $0x148] sm:$0xff]   ;;  %v19550_v16 = vadd.f32 %v19194_v5, %v19207_v3  ;;  %v19556_v61 = vpop.f32.mrf.mxu0 }
 0x165   : > { %16232 = vmatprep.subr.bf16.mxu1 %v19465_v31  ;;  %16207 = vmatpush3.bf16.msra.mxu0 %v19449_v11  ;;  %v19546_v49 = vsel %vm17647_vm14, %v6022_v12, %v6023_v8  ;;  %v19554_v26 = vadd.f32 %v19224_v6, %v19252_v45  ;;  %v14276_v29 = vrot.slane %v5988_v23, 9  ;;  %23820 = vst [vmem:[#allocation20_spill] sm:$0xff] %v19558_v32  ;;  %v1223_v8 = vld [vmem:[#allocation2 + $0xc0] sm:$0xf]  ;;  %v1227_v5 = vld [vmem:[#allocation2 + $0xc8] sm:$0x1]  ;;  %v19599_v32 = vpop.f32.mrf.mxu1 }
 0x166   : > { %v6029_v14 = vrot.slane %v23819_v18, 4  ;;  %16208 = vmatprep.subr.bf16.mxu0 %v17136_v35  ;;  %v1131_v11 = vshrl.u32 %v15108_v43, 16  ;;  %v1134_v34 = vshll.u32 %v15108_v43, 16  ;;  %v1139_v60 = vshrl.u32 %v15109_v24, 16  ;;  %v5989_v18 = vld [vmem:[#allocation2 + $0x90] sm:$0xe]  ;;  %v19579_v43 = vpop.f32.mrf.mxu0 }
 0x167   : > { %v1142_v9 = vshll.u32 %v15109_v24, 16  ;;  %v23821_v45 = vrot.slane %v19126_v2, 5  ;;  %v23822_v12 = vrot.slane %v19153_v36, 5  ;;  %v17129_v2 = vld [vmem:[%s23675_s3 + $0x1a0] sm:$0xff]   ;;  %23823 = vst [vmem:[#allocation21_spill] sm:$0xff] %v19599_v32 }
 0x168   : > { %16233 = vmatpush3.bf16.msra.mxu1 %v19465_v31  ;;  %v19577_v31 = vadd.f32 %v19245_v53, %v19293_v46  ;;  %v1133_v24 = vrot.slane %v1131_v11, 7  ;;  %v17142_v53 = vld [vmem:[%s23675_s3 + $0x140] sm:$0xff]   ;;  %v6037_v46 = vrot.slane %v19192_v54, 5  ;;  %v6041_v11 = vrot.slane %v19222_v10, 5 }
 0x169   : > { %v19567_v6 = vsel %vm17647_vm14, %v14275_v25, %v23821_v45  ;;  %v19573_v23 = vsel %vm17647_vm14, %v6029_v14, %v23822_v12  ;;  %16234 = vmatprep.subr.bf16.mxu1 %v17125_v27  ;;  %v1141_v25 = vrot.slane %v1139_v60, 7  ;;  %v6034_v45 = vrot.slane %v19184_v15, 5  ;;  %16209 = vmatpush3.bf16.msra.mxu0 %v17136_v35  ;;  %v19596_v60 = vpop.f32.mrf.mxu0 }
 0x16a   : > { %v19593_v14 = vadd.f32 %v19258_v38, %v19308_v55  ;;  %v14277_v12 = vrot.slane %v5989_v18, 9  ;;  %v1136_v36 = vor.u32 %v1134_v34, %v1133_v24  ;;  %v1137_v15 = vrot.slane %v1133_v24, 4  ;;  %16210 = vmatprep.subr.bf16.mxu0 %v17139_v56  ;;  %v17131_v34 = vld [vmem:[%s23675_s3 + $0x198] sm:$0xff]  }
 0x16b   : > { %16187 = vmatmul.mubr.bf16.gmra.mxu1 %v19362_v37  ;;  %v1144_v35 = vor.u32 %v1142_v9, %v1141_v25  ;;  %v1146_v3 = vrot.slane %v1141_v25, 4  ;;  %v19604_v54 = vsel %vm17647_vm14, %v14276_v29, %v6034_v45  ;;  %v6036_v38 = vrot.slane %v6034_v45, 4  ;;  %v19610_v37 = vpop.f32.mrf.mxu0  ;;  %v23826_v24 = vld [vmem:[#allocation9_spill] sm:$0xff]  ;;  %v23827_v25 = vld [vmem:[#allocation38_spill] sm:$0xff] }
 0x16c   : > { %16235 = vmatpush3.bf16.msra.mxu1 %v17125_v27  ;;  %16190 = vmatprep.mubr.bf16.mxu1 %v19416_v41  ;;  %v19608_v10 = vsel %vm17647_vm14, %v14277_v12, %v6041_v11  ;;  %v6043_v55 = vrot.slane %v6041_v11, 4  ;;  %v1224_v29 = vsel %vm17597_vm11, %v1136_v36, %v1223_v8  ;;  %v19623_v45 = vadd.f32 %v23827_v25, %v23826_v24  ;;  %v5990_v12 = vld [vmem:[#allocation2 + $0x9c] sm:$0xe]  ;;  %v23828_v36 = vld [vmem:[#allocation34_spill] sm:$0xff]  ;;  %v5991_v25 = vld [vmem:[#allocation2 + $0xa8] sm:$0xe] }
 0x16d   : > { %16236 = vmatprep.subr.bf16.mxu1 %v17129_v2  ;;  %v1145_v41 = vsel %vm17608_vm12, %v1137_v15, %v1144_v35  ;;  %v1228_v18 = vsel %vm17519_vm2, %v1146_v3, %v1227_v5  ;;  %1225 = vst [vmem:[#allocation2 + $0xc0] sm:$0xf] %v1224_v29  ;;  %16211 = vmatpush3.bf16.msra.mxu0 %v17139_v56  ;;  %v19628_v11 = vld [vmem:[%s23675_s3 + $0x1f8] sm:$0xff]   ;;  %v23829_v5 = vrot.slane %v23828_v36, 5  ;;  %v23830_v15 = vld [vmem:[#allocation12_spill] sm:$0xff]  ;;  %v23831_v56 = vld [vmem:[#allocation10_spill] sm:$0xff]  ;;  %v19648_v29 = vpop.f32.mrf.mxu0  ;;  %v19655_v36 = vpop.f32.mrf.mxu1 }
 0x16e   : > { %1226 = vst [vmem:[#allocation2 + $0xc4] sm:$0xf] %v1145_v41  ;;  %1229 = vst [vmem:[#allocation2 + $0xc8] sm:$0x1] %v1228_v18  ;;  %v19632_v8 = vsel %vm17647_vm14, %v6036_v38, %v6037_v46  ;;  %v19642_v35 = vadd.f32 %v23830_v15, %v19347_v4  ;;  %v19646_v41 = vadd.f32 %v23831_v56, %v19392_v57  ;;  %16212 = vmatprep.subr.bf16.mxu0 %v17142_v53  ;;  %v368_v46 = vld [vmem:[#allocation2 + $0xcc] sm:$0x1] }
 0x16f   : > { %v19638_v3 = vsel %vm17647_vm14, %v6043_v55, %v23829_v5  ;;  %v14278_v18 = vrot.slane %v5990_v12, 9  ;;  %v23832_v55 = vld [vmem:[#allocation39_spill] sm:$0xff]  ;;  %23833 = vst [vmem:[#allocation30_spill] sm:$0xff] %v19655_v36  ;;  %v6051_v4 = vrot.slane %v19295_v1, 5  ;;  %v19660_v57 = vadd.f32 %v19338_v13, %v19407_v63  ;;  %v19663_v56 = vpop.f32.mrf.mxu0  ;;  %v17135_v12 = vld [vmem:[%s23675_s3 + $0x190] sm:$0xff]   ;;  %v23834_v1 = vld [vmem:[#allocation42_spill] sm:$0xff] }
 0x170   : > { %v6048_v24 = vrot.slane %v23832_v55, 5  ;;  %16237 = vmatpush3.bf16.msra.mxu1 %v17129_v2  ;;  %v14279_v5 = vrot.slane %v5991_v25, 9  ;;  %v6055_v15 = vrot.slane %v19319_v21, 5  ;;  %v19674_v38 = vadd.f32 %v23834_v1, %v19411_v47  ;;  %v23835_v13 = vld [vmem:[#allocation45_spill] sm:$0xff]  ;;  %v23843_v1 = vld [vmem:[#allocation47_spill] sm:$0xff] }
 0x171   : > { %16238 = vmatprep.subr.bf16.mxu1 %v17131_v34  ;;  %v19678_v63 = vadd.f32 %v23835_v13, %v19437_v20  ;;  %16213 = vmatpush3.bf16.msra.mxu0 %v17142_v53  ;;  %v19692_v47 = vpop.f32.mrf.mxu0  ;;  %v369_v53 = vsel %vm17519_vm2, 0, %v368_v46  ;;  %v6065_v13 = vrot.slane %v23843_v1, 5  ;;  %v23847_v1 = vld [vmem:[#allocation25_spill] sm:$0xff] }
 0x172   : > { %v19670_v55 = vsel %vm17647_vm14, %v14278_v18, %v6048_v24  ;;  %v6050_v2 = vrot.slane %v6048_v24, 4  ;;  %v19682_v21 = vsel %vm17647_vm14, %v14279_v5, %v6055_v15  ;;  %v6057_v25 = vrot.slane %v6055_v15, 4  ;;  %16262 = vmatprep.subr.bf16.mxu0 %v19628_v11  ;;  %v23837_v5 = vld [vmem:[#allocation44_spill] sm:$0xff]  ;;  %370 = vst [vmem:[#allocation2 + $0xcc] sm:$0x1] %v369_v53  ;;  %v23846_v53 = vld [vmem:[#allocation23_spill] sm:$0xff] }
 0x173   : > { %v19686_v18 = vadd.f32 %v19396_v30, %v19478_v39  ;;  %v19690_v24 = vadd.f32 %v19418_v44, %v19482_v22  ;;  %16191 = vmatmul.mubr.bf16.gmra.mxu1 %v19468_v19  ;;  %v6062_v30 = vrot.slane %v23837_v5, 5  ;;  %v23838_v39 = vld [vmem:[#allocation16_spill] sm:$0xff]  ;;  %v19707_v44 = vpop.f32.mrf.mxu1  ;;  %v17137_v19 = vld [vmem:[%s23675_s3 + $0x188] sm:$0xff]  }
 0x174   : > { %v19698_v20 = vsel %vm17647_vm14, %v6050_v2, %v6051_v4  ;;  %v19705_v15 = vadd.f32 %v23838_v39, %v19486_v0  ;;  %23840 = vst [vmem:[#allocation26_spill] sm:$0xff] %v19707_v44  ;;  %16239 = vmatpush3.bf16.msra.mxu1 %v17131_v34  ;;  %16194 = vmatprep.mubr.bf16.mxu1 %v19525_v33  ;;  %v23841_v4 = vld [vmem:[#allocation11_spill] sm:$0xff]  ;;  %v5992_v0 = vld [vmem:[#allocation2 + $0xb4] sm:$0xe]  ;;  %v19726_v34 = vpop.f32.mrf.mxu0  ;;  %v5582_v5 = vld [vmem:[#allocation2 + $0xc0] sm:$0xf] }
 0x175   : > { %23836 = vst [vmem:[#allocation22_spill] sm:$0xff] %v19690_v24  ;;  %v23842_v46 = vrot.slane %v23841_v4, 5  ;;  %v19724_v33 = vadd.f32 %v19460_v52, %v19496_v51  ;;  %16240 = vmatprep.subr.bf16.mxu1 %v17135_v12  ;;  %v5583_v39 = vld [vmem:[#allocation2 + $0xc4] sm:$0xf]  ;;  %v5584_v22 = vld [vmem:[#allocation2 + $0xc8] sm:$0x1]  ;;  %v2374_v52 = vadd.f32 %v23847_v1, %v19550_v16  ;;  %v19749_v16 = vpop.f32.mrf.mxu1 }
 0x176   : > { %23839 = vst [vmem:[#allocation24_spill] sm:$0xff] %v19705_v15  ;;  %v5754_v51 = vshrl.u32 %v5582_v5, 16  ;;  %v5757_v27 = vshll.u32 %v5582_v5, 16  ;;  %v5763_v9 = vshll.u32 %v5583_v39, 16  ;;  %v5767_v42 = vshrl.u32 %v5583_v39, 16  ;;  %v19738_v44 = vpop.f32.mrf.mxu0  ;;  %23849 = vst [vmem:[#allocation12_spill] sm:$0xff] %v19749_v16 }
 0x177   : > { %v19719_v2 = vsel %vm17647_vm14, %v6057_v25, %v23842_v46  ;;  %23844 = vst [vmem:[#allocation9_spill] sm:$0xff] %v19724_v33  ;;  %v19732_v25 = vadd.f32 %v19488_v40, %v19505_v62  ;;  %v2376_v46 = vadd.f32 %v23846_v53, %v19533_v48  ;;  %v5773_v36 = vshll.u32 %v5584_v22, 16  ;;  %v17140_v33 = vld [vmem:[#allocation2 + $0xc0] sm:$0xff]  }
 0x178   : > { %v6072_v32 = vrot.slane %v5584_v22, 5  ;;  %v17141_v40 = vld [vmem:[%s23675_s3 + $0x180] sm:$0xff]   ;;  %v19747_v48 = vadd.f32 %v19535_v58, %v2374_v52  ;;  %16241 = vmatpush3.bf16.msra.mxu1 %v17135_v12  ;;  %v5756_v5 = vrot.slane %v5754_v51, 4  ;;  %v5759_v53 = vrot.slane %v5757_v27, 5  ;;  %16163 = vmatmul.mubr.bf16.gmra.mxu0 %v17140_v33  ;;  %v23851_v12 = vld [vmem:[#allocation27_spill] sm:$0xff] }
 0x179   : > { %23845 = vst [vmem:[#allocation38_spill] sm:$0xff] %v19732_v25  ;;  %v19744_v62 = vadd.f32 %v19508_v50, %v2376_v46  ;;  %v5765_v1 = vrot.slane %v5763_v9, 5  ;;  %v5769_v4 = vrot.slane %v5767_v42, 4  ;;  %v19751_v25 = vpop.f32.mrf.mxu0  ;;  %v5775_v22 = vrot.slane %v5773_v36, 5  ;;  %16242 = vmatprep.subr.bf16.mxu1 %v17137_v19  ;;  %v5993_v52 = vld [vmem:[#allocation2 + $0xc0] sm:$0xe] }
 0x17a   : > { %23848 = vst [vmem:[#allocation34_spill] sm:$0xff] %v19747_v48  ;;  %v14280_v15 = vrot.slane %v5992_v0, 9  ;;  %v6064_v17 = vrot.slane %v6062_v30, 4  ;;  %v6069_v24 = vrot.slane %v5583_v39, 5  ;;  %v5760_v50 = vor.u32 %v5759_v53, %v5756_v5  ;;  %v23852_v42 = vld [vmem:[#allocation28_spill] sm:$0xff]  ;;  %v23856_v53 = vld [vmem:[#allocation29_spill] sm:$0xff] }
 0x17b   : > { %v5770_v46 = vor.u32 %v5769_v4, %v5765_v1  ;;  %v23850_v58 = vcombine.low %v19529_v7, %v19546_v49  ;;  %v2377_v27 = vadd.f32 %v23851_v12, %v19554_v26  ;;  %v2375_v9 = vadd.f32 %v23852_v42, %v19577_v31  ;;  %v19760_v51 = vpop.f32.mrf.mxu0  ;;  %v19770_v49 = vpop.f32.mrf.mxu1  ;;  %v17143_v26 = vld [vmem:[#allocation2 + $0x78] sm:$0xff]  }
 0x17c   : > { %v19764_v36 = vsel %vm17647_vm14, %v14280_v15, %v6062_v30  ;;  %v19768_v0 = vsel %vm17647_vm14, %v6064_v17, %v6065_v13  ;;  %v14281_v33 = vrot.slane %v5993_v52, 9  ;;  %v6071_v7 = vrot.slane %v6069_v24, 4  ;;  %23853 = vst [vmem:[#allocation10_spill] sm:$0xff] %v19770_v49  ;;  %16243 = vmatpush3.bf16.msra.mxu1 %v17137_v19  ;;  %v19782_v17 = vld [vmem:[%s23675_s3 + $0x238] sm:$0xff]   ;;  %v6530_v52 = vld [vmem:[#allocation2 + $0x80] sm:$0x1] }
 0x17d   : > { %16214 = vmatprep.mubr.bf16.mxu0 %v23850_v58  ;;  %v5761_v39 = vrot.slane %v5760_v50, 4  ;;  %v5771_v4 = vrot.slane %v5770_v46, 4  ;;  %v19775_v5 = vadd.f32 %v19556_v61, %v2377_v27  ;;  %v19777_v30 = vpop.f32.mrf.mxu0  ;;  %16244 = vmatprep.subr.bf16.mxu1 %v17141_v40  ;;  %v6529_v13 = vld [vmem:[#allocation2 + $0x7c] sm:$0xf]  ;;  %v19793_v61 = vadd.f32 %v19579_v43, %v2375_v9  ;;  %v6953_v12 = vld [vmem:[#allocation2 + $0x78] sm:$0xe] }
 0x17e   : > { %v19786_v15 = vsel %vm17647_vm14, %v14281_v33, %v6069_v24  ;;  %v19790_v19 = vsel %vm17647_vm14, %v6071_v7, %v6072_v32  ;;  %v2380_v50 = vadd.f32 %v23856_v53, %v19593_v14  ;;  %v17149_v24 = vld [vmem:[%s23675_s3 + $0x1f0] sm:$0xff]   ;;  %v6987_v43 = vrot.slane %v6529_v13, 5  ;;  %v19808_v33 = vld [vmem:[#allocation2 + $0x88] sm:$0xf]  ;;  %v19815_v7 = vpop.f32.mrf.mxu1  ;;  %v19870_v48 = vld [vmem:[#allocation2 + $0x98] sm:$0x1] }
 0x17f   : > { %23854 = vst [vmem:[#allocation39_spill] sm:$0xff] %v19775_v5  ;;  %23855 = vst [vmem:[#allocation42_spill] sm:$0xff] %v19793_v61  ;;  %v5766_v46 = vsel %vm17618_vm13, %v5761_v39, %v5765_v1  ;;  %v5776_v58 = vsel %vm17618_vm13, %v5771_v4, %v5775_v22  ;;  %v19806_v27 = vpop.f32.mrf.mxu0  ;;  %v14378_v14 = vrot.slane %v6953_v12, 9  ;;  %v6990_v9 = vrot.slane %v6530_v52, 5  ;;  %v19810_v1 = vld [vmem:[#allocation2 + $0x8c] sm:$0x1] }
 0x180   : > { %v14265_v42 = vcombine.low %v5766_v46, %v5776_v58  ;;  %v19813_v22 = vadd.f32 %v19596_v60, %v2380_v50  ;;  %23858 = vst [vmem:[#allocation44_spill] sm:$0xff] %v19815_v7  ;;  %16245 = vmatpush3.bf16.msra.mxu1 %v17141_v40  ;;  %v6989_v39 = vrot.slane %v6987_v43, 4  ;;  %v6954_v4 = vld [vmem:[#allocation2 + $0x84] sm:$0xe]  ;;  %v6994_v53 = vrot.slane %v19808_v33, 5 }
 0x181   : > { %v6997_v32 = vrot.slane %v19810_v1, 5  ;;  %v6562_v31 = vshll.u32 %v6529_v13, 16  ;;  %v19819_v46 = vpop.f32.mrf.mxu0  ;;  %16294 = vmatprep.subr.bf16.mxu1 %v19782_v17  ;;  %v19824_v58 = vsel %vm17647_vm14, %v14378_v14, %v6987_v43  ;;  %v14379_v60 = vrot.slane %v6954_v4, 9  ;;  %v6528_v50 = vld [vmem:[#allocation2 + $0x78] sm:$0xf]  ;;  %v19845_v43 = vpop.f32.mrf.mxu1  ;;  %v17144_v4 = vld [vmem:[#allocation2 + $0x84] sm:$0xff]  }
 0x182   : > { %23857 = vst [vmem:[#allocation45_spill] sm:$0xff] %v19813_v22  ;;  %23859 = vst [vmem:[#allocation16_spill] sm:$0xff] %v19819_v46  ;;  %16195 = vmatmul.mubr.bf16.gmra.mxu1 %v14265_v42  ;;  %v6566_v12 = vshrl.u32 %v6529_v13, 16  ;;  %v6572_v40 = vshll.u32 %v6530_v52, 16  ;;  %v23860_v7 = vcombine.low %v19567_v6, %v19573_v23  ;;  %v19831_v49 = vsel %vm17647_vm14, %v6989_v39, %v6990_v9  ;;  %v6531_v46 = vld [vmem:[#allocation2 + $0x84] sm:$0xf] }
 0x183   : > { %16246 = vmatprep.mubr.bf16.mxu1 %v17143_v26  ;;  %v6996_v42 = vrot.slane %v6994_v53, 4  ;;  %v6553_v16 = vshrl.u32 %v6528_v50, 16  ;;  %v6556_v22 = vshll.u32 %v6528_v50, 16  ;;  %v19833_v61 = vpop.f32.mrf.mxu0  ;;  %v23862_v13 = vcombine.low %v19604_v54, %v19632_v8  ;;  %23863 = vst [vmem:[#allocation47_spill] sm:$0xff] %v19845_v43  ;;  %v19866_v43 = vld [vmem:[#allocation2 + $0x94] sm:$0xf] }
 0x184   : > { %16215 = vmatmul.mubr.bf16.vlgmr.msra.gmra.mxu0 %v23860_v7  ;;  %23861 = vst [vmem:[#allocation11_spill] sm:$0xff] %v19833_v61  ;;  %v19843_v23 = vsel %vm17647_vm14, %v14379_v60, %v6994_v53  ;;  %v6564_v26 = vrot.slane %v6562_v31, 5  ;;  %v6568_v52 = vrot.slane %v6566_v12, 4  ;;  %v6574_v9 = vrot.slane %v6572_v40, 5  ;;  %v6534_v7 = vld [vmem:[#allocation2 + $0x90] sm:$0xf] }
 0x185   : > { %16263 = vmatpush3.bf16.msra.mxu0 %v19628_v11  ;;  %16218 = vmatprep.mubr.bf16.mxu0 %v23862_v13  ;;  %v17152_v11 = vld [vmem:[%s23675_s3 + $0x1e8] sm:$0xff]   ;;  %v19852_v54 = vsel %vm17647_vm14, %v6996_v42, %v6997_v32  ;;  %v6555_v8 = vrot.slane %v6553_v16, 4  ;;  %v6558_v14 = vrot.slane %v6556_v22, 5  ;;  %v19854_v39 = vpop.f32.mrf.mxu0  ;;  %v6577_v60 = vshrl.u32 %v6531_v46, 16  ;;  %v17147_v12 = vld [vmem:[%s23675_s3 + $0x230] sm:$0xff]  }
 0x186   : > { %16264 = vmatprep.subr.bf16.mxu0 %v17149_v24  ;;  %23864 = vst [vmem:[#allocation23_spill] sm:$0xff] %v19854_v39  ;;  %v6569_v53 = vor.u32 %v6568_v52, %v6564_v26  ;;  %v6580_v50 = vshll.u32 %v6531_v46, 16  ;;  %v17148_v13 = vld [vmem:[#allocation2 + $0x90] sm:$0xff]   ;;  %v6586_v16 = vshll.u32 %v19808_v33, 16  ;;  %v6590_v22 = vshrl.u32 %v19808_v33, 16  ;;  %v19868_v39 = vpop.f32.mrf.mxu1 }
 0x187   : > { %v6559_v32 = vor.u32 %v6558_v14, %v6555_v8  ;;  %v6596_v40 = vshll.u32 %v19810_v1, 16  ;;  %v19864_v42 = vpop.f32.mrf.mxu0  ;;  %v6579_v31 = vrot.slane %v6577_v60, 4  ;;  %v6601_v46 = vshrl.u32 %v6534_v7, 16  ;;  %23865 = vst [vmem:[#allocation25_spill] sm:$0xff] %v19868_v39  ;;  %v6537_v39 = vld [vmem:[#allocation2 + $0x9c] sm:$0xf] }
 0x188   : > { %v6570_v6 = vrot.slane %v6569_v53, 4  ;;  %v6582_v52 = vrot.slane %v6580_v50, 5  ;;  %v6588_v8 = vrot.slane %v6586_v16, 5  ;;  %v6592_v14 = vrot.slane %v6590_v22, 4 }
 0x189   : > { %16265 = vmatpush3.bf16.msra.mxu0 %v17149_v24  ;;  %v6560_v61 = vrot.slane %v6559_v32, 4  ;;  %v6598_v5 = vrot.slane %v6596_v40, 5  ;;  %v19872_v33 = vpop.f32.mrf.mxu0  ;;  %v17155_v24 = vld [vmem:[%s23675_s3 + $0x1e0] sm:$0xff]   ;;  %v6603_v60 = vrot.slane %v6601_v46, 4  ;;  %v6604_v50 = vshll.u32 %v6534_v7, 16 }
 0x18a   : > { %16266 = vmatprep.subr.bf16.mxu0 %v17152_v11  ;;  %16247 = vmatmul.mubr.bf16.vlgmr.msra.gmra.mxu1 %v17144_v4  ;;  %v6575_v1 = vsel %vm17618_vm13, %v6570_v6, %v6574_v9  ;;  %v6583_v53 = vor.u32 %v6582_v52, %v6579_v31  ;;  %v6593_v16 = vor.u32 %v6592_v14, %v6588_v8  ;;  %v6610_v4 = vshll.u32 %v19866_v43, 16  ;;  %v17151_v6 = vld [vmem:[%s23675_s3 + $0x228] sm:$0xff]   ;;  %v19895_v31 = vld [vmem:[#allocation2 + $0xa0] sm:$0xf] }
 0x18b   : > { %16295 = vmatpush3.bf16.msra.mxu1 %v19782_v17  ;;  %16250 = vmatprep.mubr.bf16.mxu1 %v17148_v13  ;;  %v6565_v32 = vsel %vm17618_vm13, %v6560_v61, %v6564_v26  ;;  %v6614_v22 = vshrl.u32 %v19866_v43, 16  ;;  %v19884_v40 = vpop.f32.mrf.mxu0  ;;  %v23867_v9 = vcombine.low %v19608_v10, %v19638_v3  ;;  %v6606_v61 = vrot.slane %v6604_v50, 5  ;;  %v19897_v13 = vpop.f32.mrf.mxu1  ;;  %v17150_v52 = vld [vmem:[#allocation2 + $0x9c] sm:$0xff]  }
 0x18c   : > { %23866 = vst [vmem:[#allocation27_spill] sm:$0xff] %v19884_v40  ;;  %16296 = vmatprep.subr.bf16.mxu1 %v17147_v12  ;;  %v19892_v17 = vcombine.low %v6565_v32, %v6575_v1  ;;  %v6584_v7 = vrot.slane %v6583_v53, 4  ;;  %v6620_v26 = vshll.u32 %v19870_v48, 16  ;;  %23868 = vst [vmem:[#allocation28_spill] sm:$0xff] %v19897_v13  ;;  %v23869_v46 = vcombine.low %v19670_v55, %v19698_v20  ;;  %v17158_v10 = vld [vmem:[%s23675_s3 + $0x1d8] sm:$0xff]  }
 0x18d   : > { %16219 = vmatmul.mubr.bf16.gmra.mxu0 %v23867_v9  ;;  %v6594_v3 = vrot.slane %v6593_v16, 4  ;;  %v6612_v14 = vrot.slane %v6610_v4, 5  ;;  %v6616_v1 = vrot.slane %v6614_v22, 4  ;;  %v6625_v53 = vshrl.u32 %v6537_v39, 16  ;;  %v19905_v50 = vpop.f32.mrf.mxu0  ;;  %v19909_v13 = vld [vmem:[#allocation2 + $0xa4] sm:$0x1] }
 0x18e   : > { %16267 = vmatpush3.bf16.msra.mxu0 %v17152_v11  ;;  %16222 = vmatprep.mubr.bf16.mxu0 %v23869_v46  ;;  %23870 = vst [vmem:[#allocation29_spill] sm:$0xff] %v19905_v50  ;;  %v6589_v32 = vsel %vm17618_vm13, %v6584_v7, %v6588_v8  ;;  %v6607_v9 = vor.u32 %v6606_v61, %v6603_v60  ;;  %v6622_v11 = vrot.slane %v6620_v26, 5  ;;  %v6628_v55 = vshll.u32 %v6537_v39, 16  ;;  %v6955_v20 = vld [vmem:[#allocation2 + $0x90] sm:$0xe]  ;;  %v17154_v46 = vld [vmem:[#allocation2 + $0xa8] sm:$0xff]  }
 0x18f   : > { %16268 = vmatprep.subr.bf16.mxu0 %v17155_v24  ;;  %16297 = vmatpush3.bf16.msra.mxu1 %v17147_v12  ;;  %v6599_v16 = vsel %vm17618_vm13, %v6594_v3, %v6598_v5  ;;  %v6617_v4 = vor.u32 %v6616_v1, %v6612_v14  ;;  %v6627_v22 = vrot.slane %v6625_v53, 4  ;;  %v6634_v40 = vshll.u32 %v19895_v31, 16  ;;  %v17153_v8 = vld [vmem:[%s23675_s3 + $0x220] sm:$0xff]   ;;  %v19920_v12 = vpop.f32.mrf.mxu1  ;;  %v19922_v26 = vpop.f32.mrf.mxu0  ;;  %v17156_v50 = vld [vmem:[#allocation2 + $0xb4] sm:$0xff]  }
 0x190   : > { %16298 = vmatprep.subr.bf16.mxu1 %v17151_v6  ;;  %v19917_v60 = vcombine.low %v6589_v32, %v6599_v16  ;;  %v6608_v7 = vrot.slane %v6607_v9, 4  ;;  %v6630_v61 = vrot.slane %v6628_v55, 5  ;;  %v6638_v39 = vshrl.u32 %v19895_v31, 16  ;;  %23871 = vst [vmem:[#allocation50_spill] sm:$0xff] %v19920_v12  ;;  %23872 = vst [vmem:[#allocation51_spill] sm:$0xff] %v19922_v26  ;;  %v17161_v32 = vld [vmem:[%s23675_s3 + $0x1d0] sm:$0xff]  }
 0x191   : > { %v6618_v5 = vrot.slane %v6617_v4, 4  ;;  %v6636_v3 = vrot.slane %v6634_v40, 5  ;;  %v6644_v1 = vshll.u32 %v19909_v13, 16  ;;  %v14380_v53 = vrot.slane %v6955_v20, 9  ;;  %v6956_v26 = vld [vmem:[#allocation2 + $0x9c] sm:$0xe] }
 0x192   : > { %16269 = vmatpush3.bf16.msra.mxu0 %v17155_v24  ;;  %16251 = vmatmul.mubr.bf16.gmra.mxu1 %v17150_v52  ;;  %v6613_v9 = vsel %vm17618_vm13, %v6608_v7, %v6612_v14  ;;  %v6631_v55 = vor.u32 %v6630_v61, %v6627_v22  ;;  %v6640_v16 = vrot.slane %v6638_v39, 4  ;;  %v7001_v12 = vrot.slane %v19866_v43, 5  ;;  %v23873_v20 = vld [vmem:[#allocation31_spill] sm:$0xff]  ;;  %v17157_v14 = vld [vmem:[%s23675_s3 + $0x218] sm:$0xff]   ;;  %v19948_v22 = vpop.f32.mrf.mxu1 }
 0x193   : > { %16270 = vmatprep.subr.bf16.mxu0 %v17158_v10  ;;  %16299 = vmatpush3.bf16.msra.mxu1 %v17151_v6  ;;  %v6623_v24 = vsel %vm17618_vm13, %v6618_v5, %v6622_v11  ;;  %v6646_v40 = vrot.slane %v6644_v1, 5  ;;  %v7004_v52 = vrot.slane %v19870_v48, 5  ;;  %v2378_v4 = vadd.f32 %v23873_v20, %v19623_v45  ;;  %v19950_v45 = vpop.f32.mrf.mxu0  ;;  %v6540_v1 = vld [vmem:[#allocation2 + $0xa8] sm:$0xf] }
 0x194   : > { %16254 = vmatprep.mubr.bf16.mxu1 %v17154_v46  ;;  %16300 = vmatprep.subr.bf16.mxu1 %v17153_v8  ;;  %v23874_v43 = vcombine.low %v19682_v21, %v19719_v2  ;;  %v19942_v6 = vcombine.low %v6613_v9, %v6623_v24  ;;  %v6632_v46 = vrot.slane %v6631_v55, 4  ;;  %v6641_v11 = vor.u32 %v6640_v16, %v6636_v3  ;;  %v17164_v21 = vld [vmem:[%s23675_s3 + $0x1c8] sm:$0xff]  }
 0x195   : > { %v19946_v48 = vsel %vm17647_vm14, %v14380_v53, %v7001_v12  ;;  %v23875_v7 = vcombine.low %v19764_v36, %v19768_v0  ;;  %v7003_v2 = vrot.slane %v7001_v12, 4  ;;  %v19959_v61 = vadd.f32 %v19610_v37, %v2378_v4  ;;  %v23876_v0 = vld [vmem:[#allocation32_spill] sm:$0xff]  ;;  %v19967_v55 = vld [vmem:[#allocation2 + $0xac] sm:$0xf]  ;;  %v17160_v12 = vld [vmem:[#allocation2 + $0xc0] sm:$0xff]  }
 0x196   : > { %16223 = vmatmul.mubr.bf16.gmra.mxu0 %v23874_v43  ;;  %v14381_v39 = vrot.slane %v6956_v26, 9  ;;  %v7008_v5 = vrot.slane %v19895_v31, 5  ;;  %v6642_v53 = vrot.slane %v6641_v11, 4  ;;  %v7011_v36 = vrot.slane %v19909_v13, 5  ;;  %v19979_v13 = vld [vmem:[#allocation2 + $0xb0] sm:$0x1]  ;;  %v19991_v43 = vpop.f32.mrf.mxu1 }
 0x197   : > { %16271 = vmatpush3.bf16.msra.mxu0 %v17158_v10  ;;  %16226 = vmatprep.mubr.bf16.mxu0 %v23875_v7  ;;  %v6637_v10 = vsel %vm17618_vm13, %v6632_v46, %v6636_v3  ;;  %v2381_v9 = vadd.f32 %v23876_v0, %v19642_v35  ;;  %v19971_v37 = vsel %vm17647_vm14, %v7003_v2, %v7004_v52  ;;  %v23877_v3 = vld [vmem:[#allocation33_spill] sm:$0xff]  ;;  %v17159_v35 = vld [vmem:[%s23675_s3 + $0x210] sm:$0xff]   ;;  %v6649_v20 = vshrl.u32 %v6540_v1, 16  ;;  %v23878_v0 = vld [vmem:[#allocation35_spill] sm:$0xff] }
 0x198   : > { %16272 = vmatprep.subr.bf16.mxu0 %v17161_v32  ;;  %16301 = vmatpush3.bf16.msra.mxu1 %v17153_v8  ;;  %v19975_v31 = vsel %vm17647_vm14, %v14381_v39, %v7008_v5  ;;  %v7010_v26 = vrot.slane %v7008_v5, 4  ;;  %v2379_v16 = vadd.f32 %v23877_v3, %v19646_v41  ;;  %v6647_v8 = vsel %vm17618_vm13, %v6642_v53, %v6646_v40  ;;  %v6543_v4 = vld [vmem:[#allocation2 + $0xb4] sm:$0xf]  ;;  %v19993_v41 = vpop.f32.mrf.mxu0  ;;  %v20004_v2 = vld [vmem:[#allocation2 + $0xb8] sm:$0xf] }
 0x199   : > { %16302 = vmatprep.subr.bf16.mxu1 %v17157_v14  ;;  %v19989_v52 = vadd.f32 %v19648_v29, %v2381_v9  ;;  %v19995_v46 = vcombine.low %v6637_v10, %v6647_v8  ;;  %v6652_v7 = vshll.u32 %v6540_v1, 16  ;;  %v17166_v29 = vld [vmem:[%s23675_s3 + $0x1c0] sm:$0xff]   ;;  %v6651_v39 = vrot.slane %v6649_v20, 4  ;;  %v20013_v53 = vld [vmem:[#allocation2 + $0xbc] sm:$0x1]  ;;  %v20025_v20 = vpop.f32.mrf.mxu1 }
 0x19a   : > { %v19999_v11 = vsel %vm17647_vm14, %v7010_v26, %v7011_v36  ;;  %v20002_v40 = vadd.f32 %v19663_v56, %v2379_v16  ;;  %16255 = vmatmul.mubr.bf16.gmra.mxu1 %v17156_v50  ;;  %v6658_v5 = vshll.u32 %v19967_v55, 16  ;;  %v6662_v10 = vshrl.u32 %v19967_v55, 16  ;;  %v6957_v56 = vld [vmem:[#allocation2 + $0xa8] sm:$0xe]  ;;  %23880 = vst [vmem:[#allocation31_spill] sm:$0xff] %v20025_v20 }
 0x19b   : > { %16273 = vmatpush3.bf16.msra.mxu0 %v17161_v32  ;;  %16258 = vmatprep.mubr.bf16.mxu1 %v17160_v12  ;;  %v17163_v50 = vld [vmem:[%s23675_s3 + $0x208] sm:$0xff]   ;;  %v6654_v1 = vrot.slane %v6652_v7, 5  ;;  %v6668_v36 = vshll.u32 %v19979_v13, 16  ;;  %v2384_v9 = vadd.f32 %v23878_v0, %v19660_v57  ;;  %v6673_v26 = vshrl.u32 %v6543_v4, 16  ;;  %v20027_v32 = vpop.f32.mrf.mxu0 }
 0x19c   : > { %16274 = vmatprep.subr.bf16.mxu0 %v17164_v21  ;;  %16303 = vmatpush3.bf16.msra.mxu1 %v17157_v14  ;;  %v23879_v3 = vcombine.low %v19786_v15, %v19790_v19  ;;  %v6660_v16 = vrot.slane %v6658_v5, 5  ;;  %v6664_v8 = vrot.slane %v6662_v10, 4  ;;  %v6676_v14 = vshll.u32 %v6543_v4, 16  ;;  %v17162_v15 = vld [vmem:[#allocation2 + $0xcc] sm:$0xff]  }
 0x19d   : > { %16304 = vmatprep.subr.bf16.mxu1 %v17159_v35  ;;  %v6682_v12 = vshll.u32 %v20004_v2, 16  ;;  %v6655_v7 = vor.u32 %v6654_v1, %v6651_v39  ;;  %v6670_v57 = vrot.slane %v6668_v36, 5  ;;  %v20031_v0 = vadd.f32 %v19692_v47, %v2384_v9  ;;  %v6958_v36 = vld [vmem:[#allocation2 + $0xb4] sm:$0xe]  ;;  %v17165_v9 = vld [vmem:[%s23675_s3 + $0x200] sm:$0xff]  }
 0x19e   : > { %16227 = vmatmul.mubr.bf16.gmra.mxu0 %v23879_v3  ;;  %v6675_v24 = vrot.slane %v6673_v26, 4  ;;  %v6665_v19 = vor.u32 %v6664_v8, %v6660_v16  ;;  %v6678_v5 = vrot.slane %v6676_v14, 5  ;;  %v6686_v10 = vshrl.u32 %v20004_v2, 16 }
 0x19f   : > { %16275 = vmatpush3.bf16.msra.mxu0 %v17164_v21  ;;  %16278 = vmatprep.mubr.bf16.mxu0 %v19892_v17  ;;  %v20033_v4 = vrot.slane %v6682_v12, 5  ;;  %v17170_v21 = vld [vmem:[%s23678_s6 + $0x78] sm:$0xff]   ;;  %v6656_v17 = vrot.slane %v6655_v7, 4  ;;  %v6692_v39 = vshll.u32 %v20013_v53, 16  ;;  %v14382_v1 = vrot.slane %v6957_v56, 9  ;;  %v20045_v12 = vpop.f32.mrf.mxu1 }
 0x1a0   : > { %16276 = vmatprep.subr.bf16.mxu0 %v17166_v29  ;;  %16305 = vmatpush3.bf16.msra.mxu1 %v17159_v35  ;;  %v7015_v47 = vrot.slane %v19967_v55, 5  ;;  %v6666_v26 = vrot.slane %v6665_v19, 4  ;;  %v6679_v3 = vor.u32 %v6678_v5, %v6675_v24  ;;  %v6688_v8 = vrot.slane %v6686_v10, 4  ;;  %v20047_v35 = vpop.f32.mrf.mxu0  ;;  %v23881_v5 = vld [vmem:[#allocation36_spill] sm:$0xff] }
 0x1a1   : > { %16306 = vmatprep.subr.bf16.mxu1 %v17163_v50  ;;  %v7018_v14 = vrot.slane %v19979_v13, 5  ;;  %v6661_v56 = vsel %vm17618_vm13, %v6656_v17, %v6660_v16  ;;  %v6694_v55 = vrot.slane %v6692_v39, 5  ;;  %v2382_v10 = vadd.f32 %v23881_v5, %v19674_v38  ;;  %v17172_v16 = vld [vmem:[%s23678_s6 + $0x70] sm:$0xff]  }
 0x1a2   : > { %v20053_v7 = vsel %vm17647_vm14, %v14382_v1, %v7015_v47  ;;  %v7017_v20 = vrot.slane %v7015_v47, 4  ;;  %16259 = vmatmul.mubr.bf16.gmra.mxu1 %v17162_v15  ;;  %v6671_v24 = vsel %vm17618_vm13, %v6666_v26, %v6670_v57  ;;  %v6680_v19 = vrot.slane %v6679_v3, 4  ;;  %v20073_v1 = vld [vmem:[#allocation2 + $0xc4] sm:$0xf]  ;;  %v23883_v3 = vld [vmem:[#allocation37_spill] sm:$0xff] }
 0x1a3   : > { %16277 = vmatpush3.bf16.msra.mxu0 %v17166_v29  ;;  %v6689_v13 = vor.u32 %v6688_v8, %v20033_v4  ;;  %v6546_v29 = vld [vmem:[#allocation2 + $0xc0] sm:$0xf]  ;;  %v23882_v17 = vcombine.low %v19824_v58, %v19831_v49  ;;  %v20066_v15 = vcombine.low %v6661_v56, %v6671_v24  ;;  %v14383_v39 = vrot.slane %v6958_v36, 9  ;;  %v20086_v36 = vpop.f32.mrf.mxu1  ;;  %v6549_v56 = vld [vmem:[#allocation2 + $0xcc] sm:$0xf] }
 0x1a4   : > { %16326 = vmatprep.subr.bf16.mxu0 %v17170_v21  ;;  %16307 = vmatpush3.bf16.msra.mxu1 %v17163_v50  ;;  %v20070_v57 = vsel %vm17647_vm14, %v7017_v20, %v7018_v14  ;;  %v7022_v38 = vrot.slane %v20004_v2, 5  ;;  %v6685_v50 = vsel %vm17618_vm13, %v6680_v19, %v20033_v4  ;;  %v20082_v47 = vadd.f32 %v19726_v34, %v2382_v10  ;;  %v20084_v20 = vld [vmem:[#allocation2 + $0xc8] sm:$0x1]  ;;  %v20088_v2 = vpop.f32.mrf.mxu0  ;;  %v424_v14 = vld [vmem:[#allocation2 + $0xd4] sm:$0x1] }
 0x1a5   : > { %16310 = vmatprep.mubr.bf16.mxu1 %v23882_v17  ;;  %16308 = vmatprep.subr.bf16.mxu1 %v17165_v9  ;;  %v6690_v49 = vrot.slane %v6689_v13, 4  ;;  %v7025_v34 = vrot.slane %v20013_v53, 5  ;;  %v2385_v8 = vadd.f32 %v23883_v3, %v19678_v63  ;;  %v23884_v19 = vld [vmem:[#allocation40_spill] sm:$0xff]  ;;  %v6700_v5 = vshll.u32 %v6546_v29, 16  ;;  %v17174_v10 = vld [vmem:[%s23678_s6 + $0x68] sm:$0xff]   ;;  %v23886_v3 = vld [vmem:[#allocation22_spill] sm:$0xff] }
 0x1a6   : > { %16279 = vmatmul.mubr.bf16.vlgmr.msra.gmra.mxu0 %v19917_v60  ;;  %v17167_v60 = vld [vmem:[%s23678_s6 + $0x38] sm:$0xff]   ;;  %v20096_v4 = vsel %vm17647_vm14, %v14383_v39, %v7022_v38  ;;  %v7024_v26 = vrot.slane %v7022_v38, 4  ;;  %v2383_v13 = vadd.f32 %v23884_v19, %v19686_v18  ;;  %v17168_v18 = vld [vmem:[%s23678_s6 + $0x30] sm:$0xff]   ;;  %v23888_v19 = vcombine.low %v19843_v23, %v19852_v54 }
 0x1a7   : > { %16282 = vmatprep.mubr.bf16.mxu0 %v19942_v6  ;;  %16327 = vmatpush3.bf16.msra.mxu0 %v17170_v21  ;;  %v6695_v24 = vsel %vm17618_vm13, %v6690_v49, %v6694_v55  ;;  %v6697_v6 = vshrl.u32 %v6546_v29, 16  ;;  %v20115_v21 = vadd.f32 %v19738_v44, %v2385_v8  ;;  %v6706_v55 = vshll.u32 %v20073_v1, 16  ;;  %v20126_v38 = vld [vmem:[#allocation2 + $0xd0] sm:$0xf]  ;;  %v20130_v44 = vpop.f32.mrf.mxu0  ;;  %v23887_v8 = vld [vmem:[#allocation14_spill] sm:$0xff] }
 0x1a8   : > { %16328 = vmatprep.subr.bf16.mxu0 %v17172_v16  ;;  %16309 = vmatpush3.bf16.msra.mxu1 %v17165_v9  ;;  %v20108_v53 = vcombine.low %v6685_v50, %v6695_v24  ;;  %v20112_v63 = vsel %vm17647_vm14, %v7024_v26, %v7025_v34  ;;  %v20124_v9 = vadd.f32 %v19751_v25, %v2383_v13  ;;  %v6702_v39 = vrot.slane %v6700_v5, 5  ;;  %v20128_v50 = vpop.f32.mrf.mxu1  ;;  %v6959_v25 = vld [vmem:[#allocation2 + $0xc0] sm:$0xe] }
 0x1a9   : > { %v6699_v17 = vrot.slane %v6697_v6, 4  ;;  %23885 = vst [vmem:[#allocation32_spill] sm:$0xff] %v20128_v50  ;;  %16358 = vmatprep.subr.bf16.mxu1 %v17167_v60  ;;  %v20132_v49 = vrot.slane %v6706_v55, 5  ;;  %v6710_v26 = vshrl.u32 %v20073_v1, 16  ;;  %v6716_v34 = vshll.u32 %v20084_v20, 16  ;;  %v20143_v58 = vpop.f32.mrf.mxu0  ;;  %v17176_v50 = vld [vmem:[%s23678_s6 + $0x60] sm:$0xff]  }
 0x1aa   : > { %v2388_v24 = vadd.f32 %v23887_v8, %v23886_v3  ;;  %v425_v5 = vsel %vm17551_vm6, 0, %v424_v14  ;;  %v6721_v29 = vshrl.u32 %v6549_v56, 16  ;;  %v6724_v55 = vshll.u32 %v6549_v56, 16  ;;  %v6960_v56 = vld [vmem:[#allocation2 + $0xcc] sm:$0xe] }
 0x1ab   : > { %16329 = vmatpush3.bf16.msra.mxu0 %v17172_v16  ;;  %16311 = vmatmul.mubr.bf16.vlgmr.msra.gmra.mxu1 %v23888_v19  ;;  %v6703_v13 = vor.u32 %v6702_v39, %v6699_v17  ;;  %v23890_v16 = vcombine.low %v19946_v48, %v19971_v37  ;;  %v6712_v3 = vrot.slane %v6710_v26, 4  ;;  %v6718_v23 = vrot.slane %v6716_v34, 5  ;;  %426 = vst [vmem:[#allocation2 + $0xd4] sm:$0x1] %v425_v5  ;;  %v17169_v17 = vld [vmem:[%s23678_s6 + $0x28] sm:$0xff]   ;;  %v20160_v26 = vpop.f32.mrf.mxu1 }
 0x1ac   : > { %16330 = vmatprep.subr.bf16.mxu0 %v17174_v10  ;;  %v20152_v54 = vadd.f32 %v19760_v51, %v2388_v24  ;;  %v6730_v14 = vshll.u32 %v20126_v38, 16  ;;  %16359 = vmatpush3.bf16.msra.mxu1 %v17167_v60  ;;  %v6723_v8 = vrot.slane %v6721_v29, 4  ;;  %v6726_v48 = vrot.slane %v6724_v55, 5  ;;  %v20162_v51 = vpop.f32.mrf.mxu0 }
 0x1ad   : > { %16314 = vmatprep.mubr.bf16.mxu1 %v23890_v16  ;;  %v6704_v39 = vrot.slane %v6703_v13, 4  ;;  %v6734_v37 = vshrl.u32 %v20126_v38, 16  ;;  %16360 = vmatprep.subr.bf16.mxu1 %v17168_v18  ;;  %v6713_v60 = vor.u32 %v6712_v3, %v20132_v49  ;;  %v14384_v24 = vrot.slane %v6959_v25, 9  ;;  %v23891_v25 = vld [vmem:[#allocation24_spill] sm:$0xff]  ;;  %v23892_v3 = vld [vmem:[#allocation41_spill] sm:$0xff] }
 0x1ae   : > { %16283 = vmatmul.mubr.bf16.gmra.mxu0 %v19995_v46  ;;  %v20166_v34 = vrot.slane %v6730_v14, 5  ;;  %v7029_v19 = vrot.slane %v20073_v1, 5  ;;  %v6727_v29 = vor.u32 %v6726_v48, %v6723_v8  ;;  %v7032_v5 = vrot.slane %v20084_v20, 5  ;;  %v20173_v55 = vpop.f32.mrf.mxu0  ;;  %v20186_v48 = vpop.f32.mrf.mxu1 }
 0x1af   : > { %16286 = vmatprep.mubr.bf16.mxu0 %v20066_v15  ;;  %16331 = vmatpush3.bf16.msra.mxu0 %v17174_v10  ;;  %v6709_v46 = vsel %vm17618_vm13, %v6704_v39, %v20132_v49  ;;  %v6736_v13 = vrot.slane %v6734_v37, 4  ;;  %v17178_v15 = vld [vmem:[%s23678_s6 + $0x58] sm:$0xff]   ;;  %v6714_v16 = vrot.slane %v6713_v60, 4  ;;  %v2386_v49 = vadd.f32 %v23892_v3, %v23891_v25 }
 0x1b0   : > { %16332 = vmatprep.subr.bf16.mxu0 %v17176_v50  ;;  %v20180_v1 = vsel %vm17647_vm14, %v14384_v24, %v7029_v19  ;;  %v7031_v10 = vrot.slane %v7029_v19, 4  ;;  %16361 = vmatpush3.bf16.msra.mxu1 %v17168_v18  ;;  %v6728_v14 = vrot.slane %v6727_v29, 4  ;;  %v14385_v39 = vrot.slane %v6960_v56, 9  ;;  %v20188_v37 = vpop.f32.mrf.mxu0  ;;  %v23893_v19 = vld [vmem:[#allocation9_spill] sm:$0xff] }
 0x1b1   : > { %v6737_v20 = vor.u32 %v6736_v13, %v20166_v34  ;;  %v7036_v8 = vrot.slane %v20126_v38, 5  ;;  %16362 = vmatprep.subr.bf16.mxu1 %v17169_v17  ;;  %v6719_v60 = vsel %vm17618_vm13, %v6714_v16, %v6718_v23  ;;  %v20197_v18 = vadd.f32 %v19777_v30, %v2386_v49  ;;  %v23894_v29 = vld [vmem:[#allocation13_spill] sm:$0xff]  ;;  %v17171_v38 = vld [vmem:[%s23678_s6 + $0x20] sm:$0xff]  }
 0x1b2   : > { %v20194_v24 = vsel %vm17647_vm14, %v7031_v10, %v7032_v5  ;;  %v2389_v56 = vadd.f32 %v23894_v29, %v23893_v19  ;;  %v23895_v13 = vcombine.low %v19975_v31, %v19999_v11  ;;  %v14368_v23 = vcombine.low %v6709_v46, %v6719_v60  ;;  %v6551_v16 = vld [vmem:[#allocation2 + $0xd4] sm:$0x1]  ;;  %v20212_v25 = vpop.f32.mrf.mxu0  ;;  %v23897_v49 = vld [vmem:[#allocation38_spill] sm:$0xff]  ;;  %v23903_v29 = vld [vmem:[#allocation15_spill] sm:$0xff] }
 0x1b3   : > { %16333 = vmatpush3.bf16.msra.mxu0 %v17176_v50  ;;  %v6733_v5 = vsel %vm17618_vm13, %v6728_v14, %v20166_v34  ;;  %v6738_v30 = vrot.slane %v6737_v20, 4  ;;  %v14408_v10 = vcombine.low %v20180_v1, %v20194_v24  ;;  %v23896_v50 = vcombine.low %v20053_v7, %v20070_v57  ;;  %v20224_v34 = vld [vmem:[%s23678_s6 + $0x18] sm:$0xff]   ;;  %v23898_v7 = vld [vmem:[#allocation43_spill] sm:$0xff]  ;;  %v23899_v14 = vld [vmem:[#allocation46_spill] sm:$0xff]  ;;  %v20234_v24 = vpop.f32.mrf.mxu1 }
 0x1b4   : > { %16315 = vmatmul.mubr.bf16.gmra.mxu1 %v23895_v13  ;;  %16334 = vmatprep.subr.bf16.mxu0 %v17178_v15  ;;  %v6740_v3 = vshll.u32 %v6551_v16, 16  ;;  %v20219_v31 = vsel %vm17647_vm14, %v14385_v39, %v7036_v8  ;;  %v7038_v11 = vrot.slane %v7036_v8, 4  ;;  %v7039_v46 = vrot.slane %v6551_v16, 5  ;;  %v23900_v39 = vld [vmem:[#allocation34_spill] sm:$0xff]  ;;  %v23905_v13 = vld [vmem:[#allocation48_spill] sm:$0xff] }
 0x1b5   : > { %16318 = vmatprep.mubr.bf16.mxu1 %v23896_v50  ;;  %16363 = vmatpush3.bf16.msra.mxu1 %v17169_v17  ;;  %v2815_v1 = vadd.f32 %v19806_v27, %v2389_v56  ;;  %v2387_v57 = vadd.f32 %v23898_v7, %v23897_v49  ;;  %v3100_v20 = vadd.f32 %v23899_v14, %v19744_v62  ;;  %v23901_v60 = vld [vmem:[#allocation18_spill] sm:$0xff]  ;;  %v20244_v50 = vpop.f32.mrf.mxu0  ;;  %v17180_v62 = vld [vmem:[%s23678_s6 + $0x50] sm:$0xff]   ;;  %v23908_v7 = vld [vmem:[#allocation23_spill] sm:$0xff] }
 0x1b6   : > { %16287 = vmatmul.mubr.bf16.gmra.mxu0 %v20108_v53  ;;  %v3098_v8 = vadd.f32 %v23901_v60, %v23900_v39  ;;  %v6742_v17 = vrot.slane %v6740_v3, 5  ;;  %v20238_v19 = vsel %vm17647_vm14, %v7038_v11, %v7039_v46  ;;  %v23902_v53 = vld [vmem:[#allocation39_spill] sm:$0xff]  ;;  %v23904_v56 = vld [vmem:[#allocation42_spill] sm:$0xff]  ;;  %16364 = vmatprep.subr.bf16.mxu1 %v17171_v38  ;;  %v23906_v3 = vld [vmem:[#allocation16_spill] sm:$0xff] }
 0x1b7   : > { %16290 = vmatprep.mubr.bf16.mxu0 %v14368_v23  ;;  %v3101_v27 = vadd.f32 %v23903_v29, %v23902_v53  ;;  %v3099_v16 = vadd.f32 %v23905_v13, %v23904_v56  ;;  %v2813_v49 = vadd.f32 %v23906_v3, %v2387_v57  ;;  %v23907_v11 = vld [vmem:[#allocation11_spill] sm:$0xff]  ;;  %16335 = vmatpush3.bf16.msra.mxu0 %v17178_v15  ;;  %v23909_v29 = vld [vmem:[#allocation45_spill] sm:$0xff]  ;;  %v23913_v15 = vld [vmem:[#allocation20_spill] sm:$0xff] }
 0x1b8   : > { %v3346_v46 = vadd.f32 %v23907_v11, %v3100_v20  ;;  %v3344_v14 = vadd.f32 %v23908_v7, %v3098_v8  ;;  %v6743_v39 = vsel %vm17618_vm13, %v6738_v30, %v6742_v17  ;;  %v23910_v56 = vld [vmem:[#allocation49_spill] sm:$0xff]  ;;  %v23912_v20 = vld [vmem:[#allocation19_spill] sm:$0xff]  ;;  %v3103_v11 = vadd.f32 %v23913_v15, %v20002_v40  ;;  %v20268_v30 = vpop.f32.mrf.mxu1  ;;  %v437_v17 = vld [vmem:[#allocation3 + $0xc] sm:$0x1]  ;;  %16336 = vmatprep.subr.bf16.mxu0 %v17180_v62 }
 0x1b9   : > { %v3347_v60 = vadd.f32 %v19864_v42, %v3101_v27  ;;  %v20258_v53 = vadd.f32 %v19872_v33, %v3099_v16  ;;  %v3104_v13 = vadd.f32 %v23910_v56, %v23909_v29  ;;  %16365 = vmatpush3.bf16.msra.mxu1 %v17171_v38  ;;  %v14369_v23 = vcombine.low %v6733_v5, %v6743_v39  ;;  %v23911_v57 = vld [vmem:[#allocation17_spill] sm:$0xff]  ;;  %v440_v42 = vld [vmem:[#allocation3 + $0x18] sm:$0x1]  ;;  %v23914_v38 = vld [vmem:[#allocation27_spill] sm:$0xff]  ;;  %v20283_v39 = vpop.f32.mrf.mxu0 }
 0x1ba   : > { %v3102_v3 = vadd.f32 %v23911_v57, %v19959_v61  ;;  %v3105_v8 = vadd.f32 %v23912_v20, %v19989_v52  ;;  %16366 = vmatprep.subr.bf16.mxu1 %v20224_v34  ;;  %v20274_v33 = vld [vmem:[%s23678_s6 + $0x10] sm:$0xff]   ;;  %v23915_v61 = vld [vmem:[#allocation21_spill] sm:$0xff]  ;;  %v23916_v52 = vld [vmem:[#allocation30_spill] sm:$0xff]  ;;  %v23918_v56 = vcombine.low %v20096_v4, %v20112_v63 }
 0x1bb   : > { %v3350_v5 = vadd.f32 %v23914_v38, %v3104_v13  ;;  %v3108_v27 = vadd.f32 %v23915_v61, %v20031_v0  ;;  %v3106_v16 = vadd.f32 %v23916_v52, %v20082_v47  ;;  %v23917_v40 = vld [vmem:[#allocation26_spill] sm:$0xff]  ;;  %v17184_v29 = vld [vmem:[%s23678_s6 + $0x48] sm:$0xff]   ;;  %v23919_v13 = vld [vmem:[#allocation29_spill] sm:$0xff]  ;;  %v20296_v47 = vadd.f32 %v19950_v45, %v3103_v11  ;;  %v20311_v11 = vpop.f32.mrf.mxu1  ;;  %16337 = vmatpush3.bf16.msra.mxu0 %v17180_v62 }
 0x1bc   : > { %v3109_v7 = vadd.f32 %v23917_v40, %v20115_v21  ;;  %16319 = vmatmul.mubr.bf16.gmra.mxu1 %v23918_v56  ;;  %v3348_v57 = vadd.f32 %v23919_v13, %v3102_v3  ;;  %v23920_v0 = vld [vmem:[#allocation51_spill] sm:$0xff]  ;;  %v23921_v21 = vld [vmem:[#allocation12_spill] sm:$0xff]  ;;  %v494_v38 = vld [vmem:[#allocation3 + $0x20] sm:$0x1]  ;;  %v16028_v13 = vpop.f32.mrf.mxu0  ;;  %16338 = vmatprep.subr.bf16.mxu0 %v17184_v29 }
 0x1bd   : > { %v20293_v20 = vadd.f32 %v23920_v0, %v3105_v8  ;;  %v3107_v15 = vadd.f32 %v23921_v21, %v20124_v9  ;;  %v491_v61 = vld [vmem:[#allocation3 + $0x14] sm:$0x1]  ;;  %16322 = vmatprep.mubr.bf16.mxu1 %v14408_v10  ;;  %v20301_v52 = vadd.f32 %v19993_v41, %v3108_v27  ;;  %v20304_v4 = vadd.f32 %v20027_v32, %v3106_v16  ;;  %v23922_v3 = vld [vmem:[#allocation10_spill] sm:$0xff]  ;;  %v446_v45 = vld [vmem:[#allocation3 + $0x30] sm:$0x1] }
 0x1be   : > { %v20307_v63 = vadd.f32 %v20047_v35, %v3109_v7  ;;  %v3112_v8 = vadd.f32 %v23922_v3, %v20152_v54  ;;  %16291 = vmatmul.mubr.bf16.gmra.mxu0 %v14369_v23  ;;  %v23923_v10 = vld [vmem:[#allocation44_spill] sm:$0xff]  ;;  %v23924_v27 = vld [vmem:[#allocation47_spill] sm:$0xff]  ;;  %v23925_v32 = vld [vmem:[#allocation25_spill] sm:$0xff]  ;;  %16367 = vmatpush3.bf16.msra.mxu1 %v20224_v34  ;;  %v3773_v34 = vadd.f32 %v19948_v22, %v3347_v60  ;;  %v4021_v62 = vpop.f32.mrf.mxu0  ;;  %v447_v22 = vsel %vm17519_vm2, 0, %v446_v45 }
 0x1bf   : > { %v20314_v9 = vadd.f32 %v20088_v2, %v3107_v15  ;;  %v3110_v41 = vadd.f32 %v23923_v10, %v20197_v18  ;;  %v3113_v40 = vadd.f32 %v23924_v27, %v2815_v1  ;;  %v3111_v16 = vadd.f32 %v23925_v32, %v2813_v49  ;;  %v20323_v35 = vld [vmem:[%s23676_s4] ss:$0 sm:$0xff]  ;;  %v443_v54 = vld [vmem:[#allocation3 + $0x24] sm:$0x1]  ;;  %v20328_v23 = vld [vmem:[%s23678_s6 + $0x8] sm:$0xff]   ;;  %16368 = vmatprep.subr.bf16.mxu1 %v20274_v33 }
 0x1c0   : > { %v20331_v2 = vadd.f32 %v20130_v44, %v3112_v8  ;;  %v441_v18 = vsel %vm17519_vm2, 0, %v440_v42  ;;  %v23927_v1 = vld [vmem:[#allocation28_spill] sm:$0xff]  ;;  %v438_v49 = vsel %vm17519_vm2, 0, %v437_v17  ;;  %v23928_v42 = vld [vmem:[#allocation50_spill] sm:$0xff]  ;;  %v23929_v60 = vld [vmem:[#allocation31_spill] sm:$0xff]  ;;  %v444_v27 = vsel %vm17519_vm2, 0, %v443_v54  ;;  %16339 = vmatpush3.bf16.msra.mxu0 %v17184_v29 }
 0x1c1   : > { %v3772_v56 = vadd.f32 %v23927_v1, %v3346_v46  ;;  %v500_v0 = vld [vmem:[#allocation3 + $0x38] sm:$0x1]  ;;  %v20340_v21 = vadd.f32 %v20143_v58, %v3110_v41  ;;  %v20343_v15 = vadd.f32 %v20162_v51, %v3113_v40  ;;  %v20346_v44 = vadd.f32 %v20173_v55, %v3111_v16  ;;  %442 = vst [vmem:[#allocation3 + $0x18] sm:$0x1] %v441_v18  ;;  %v20351_v46 = vld [vmem:[%s23677_s5] ss:$0 sm:$0xff]  ;;  %v16029_v40 = vpop.f32.mrf.mxu0 }
 0x1c2   : > { %439 = vst [vmem:[#allocation3 + $0xc] sm:$0x1] %v438_v49  ;;  %v3770_v17 = vadd.f32 %v23928_v42, %v3344_v14  ;;  %v495_v51 = vsel %vm17551_vm6, 0, %v494_v38  ;;  %v492_v55 = vsel %vm17551_vm6, 0, %v491_v61  ;;  %v497_v3 = vld [vmem:[#allocation3 + $0x2c] sm:$0x1]  ;;  %v20364_v14 = vpop.f32.mrf.mxu1  ;;  %v3776_v38 = vadd.f32 %v23929_v60, %v3350_v5  ;;  %16369 = vmatpush3.bf16.msra.mxu1 %v20274_v33 }
 0x1c3   : > { %v4070_v58 = vadd.f32 %v20188_v37, %v3772_v56  ;;  %v17187_v8 = vld [vmem:[%s23678_s6 + $0x40] sm:$0xff]   ;;  %496 = vst [vmem:[#allocation3 + $0x20] sm:$0x1] %v495_v51  ;;  %493 = vst [vmem:[#allocation3 + $0x14] sm:$0x1] %v492_v55  ;;  %v3771_v37 = vadd.f32 %v19991_v43, %v20258_v53  ;;  %v4071_v41 = vadd.f32 %v20244_v50, %v3773_v34  ;;  %16370 = vmatprep.subr.bf16.mxu1 %v20328_v23  ;;  %v20392_v33 = vld [vmem:[%s23678_s6 + $0xb8] sm:$0xff]  }
 0x1c4   : > { %v4068_v10 = vadd.f32 %v20212_v25, %v3770_v17  ;;  %448 = vst [vmem:[#allocation3 + $0x30] sm:$0x1] %v447_v22  ;;  %v3774_v25 = vadd.f32 %v20045_v12, %v3348_v57  ;;  %v17179_v43 = vld [vmem:[%s23678_s6] sm:$0xff]   ;;  %v23930_v53 = vcombine.low %v20219_v31, %v20238_v19  ;;  %v4074_v45 = vadd.f32 %v16028_v13, %v3776_v38  ;;  %v20398_v57 = vpop.f32.mrf.mxu1  ;;  %v23931_v17 = vld [vmem:[#allocation32_spill] sm:$0xff]  ;;  %v20415_v51 = vld [vmem:[%s23678_s6 + $0xf8] sm:$0xff]  }
 0x1c5   : > { %v4092_v61 = vmul.f32 %v20323_v35, %v4070_v58  ;;  %v4069_v5 = vadd.f32 %v20283_v39, %v3771_v37  ;;  %445 = vst [vmem:[#allocation3 + $0x24] sm:$0x1] %v444_v27  ;;  %v501_v12 = vsel %vm17551_vm6, 0, %v500_v0  ;;  %v4093_v31 = vmul.f32 %v20323_v35, %v4071_v41  ;;  %16340 = vmatprep.subr.bf16.mxu0 %v17187_v8 }
 0x1c6   : > { %16323 = vmatmul.mubr.bf16.gmra.mxu1 %v23930_v53  ;;  %v4090_v50 = vmul.f32 %v20323_v35, %v4068_v10  ;;  %v4072_v19 = vadd.f32 %v4021_v62, %v3774_v25  ;;  %502 = vst [vmem:[#allocation3 + $0x38] sm:$0x1] %v501_v12  ;;  %v3777_v39 = vadd.f32 %v20086_v36, %v20293_v20  ;;  %v498_v18 = vsel %vm17551_vm6, 0, %v497_v3  ;;  %v4024_v36 = vpop.f32.mrf.mxu0  ;;  %v20422_v3 = vpop.f32.mrf.mxu1 }
 0x1c7   : > { %v4114_v29 = vadd.f32 %v20351_v46, %v4092_v61  ;;  %v4091_v16 = vmul.f32 %v20323_v35, %v4069_v5  ;;  %v4096_v54 = vmul.f32 %v20323_v35, %v4074_v45  ;;  %v4115_v56 = vadd.f32 %v20351_v46, %v4093_v31  ;;  %499 = vst [vmem:[#allocation3 + $0x2c] sm:$0x1] %v498_v18 }
 0x1c8   : > { %v4112_v32 = vadd.f32 %v20351_v46, %v4090_v50  ;;  %v4094_v49 = vmul.f32 %v20323_v35, %v4072_v19  ;;  %v4075_v13 = vadd.f32 %v16029_v40, %v3777_v39  ;;  %16371 = vmatpush3.bf16.msra.mxu1 %v20328_v23  ;;  %16341 = vmatpush3.bf16.msra.mxu0 %v17187_v8  ;;  %v4361_v41 = vld [vmem:[#allocation3 + $0x18] sm:$0xf]  ;;  %v20427_v31 = vpop.f32.mrf.mxu1 }
 0x1c9   : > { %v4130_v1 = vmax.f32 %v4114_v29, 0.0  ;;  %v4113_v0 = vadd.f32 %v20351_v46, %v4091_v16  ;;  %v4118_v42 = vadd.f32 %v20351_v46, %v4096_v54  ;;  %v3775_v58 = vadd.f32 %v23931_v17, %v20296_v47  ;;  %16372 = vmatprep.subr.bf16.mxu1 %v17179_v43  ;;  %16390 = vmatprep.subr.bf16.mxu0 %v20392_v33  ;;  %v4354_v5 = vld [vmem:[#allocation3 + $0xc] sm:$0xf]  ;;  %v452_v17 = vld [vmem:[#allocation3 + $0x48] sm:$0x1] }
 0x1ca   : > { %v4128_v20 = vmax.f32 %v4112_v32, 0.0  ;;  %v4131_v55 = vmax.f32 %v4115_v56, 0.0  ;;  %v4116_v23 = vadd.f32 %v20351_v46, %v4094_v49  ;;  %v20420_v62 = vmul.f32 %v20323_v35, %v4075_v13  ;;  %v4365_v39 = vld [vmem:[#allocation3 + $0x20] sm:$0x1]  ;;  %v4358_v56 = vld [vmem:[#allocation3 + $0x14] sm:$0x1] }
 0x1cb   : > { %v15112_v34 = vpack.c.bf16 %v4130_v1, %v4130_v1  ;;  %v4129_v10 = vmax.f32 %v4113_v0, 0.0  ;;  %v4134_v47 = vmax.f32 %v4118_v42, 0.0  ;;  %v20424_v37 = vadd.f32 %v4024_v36, %v3775_v58  ;;  %v4375_v13 = vld [vmem:[#allocation3 + $0x30] sm:$0xf] }
 0x1cc   : > { %v15110_v8 = vpack.c.bf16 %v4128_v20, %v4128_v20  ;;  %v15113_v38 = vpack.c.bf16 %v4131_v55, %v4131_v55  ;;  %v4132_v61 = vmax.f32 %v4116_v23, 0.0  ;;  %16373 = vmatpush3.bf16.msra.mxu1 %v17179_v43 }
 0x1cd   : > { %v4210_v22 = vshrl.u32 %v15112_v34, 16  ;;  %v4213_v60 = vshll.u32 %v15112_v34, 16  ;;  %v15111_v40 = vpack.c.bf16 %v4129_v10, %v4129_v10  ;;  %v15116_v53 = vpack.c.bf16 %v4134_v47, %v4134_v47  ;;  %16422 = vmatprep.subr.bf16.mxu1 %v20415_v51  ;;  %v449_v10 = vld [vmem:[#allocation3 + $0x3c] sm:$0x1]  ;;  %v20433_v47 = vpop.f32.mrf.mxu1 }
 0x1ce   : > { %v4193_v27 = vshrl.u32 %v15110_v8, 16  ;;  %v4196_v25 = vshll.u32 %v15110_v8, 16  ;;  %v4218_v45 = vshrl.u32 %v15113_v38, 16  ;;  %v4221_v12 = vshll.u32 %v15113_v38, 16 }
 0x1cf   : > { %v4212_v50 = vrot.slane %v4210_v22, 7  ;;  %v15114_v29 = vpack.c.bf16 %v4132_v61, %v4132_v61  ;;  %v4201_v32 = vshrl.u32 %v15111_v40, 16  ;;  %v4204_v16 = vshll.u32 %v15111_v40, 16 }
 0x1d0   : > { %v4195_v19 = vrot.slane %v4193_v27, 7  ;;  %v4244_v54 = vshrl.u32 %v15116_v53, 16  ;;  %v4220_v1 = vrot.slane %v4218_v45, 7  ;;  %v4247_v49 = vshll.u32 %v15116_v53, 16  ;;  %v506_v27 = vld [vmem:[#allocation3 + $0x50] sm:$0x1] }
 0x1d1   : > { %v4215_v43 = vor.u32 %v4213_v60, %v4212_v50  ;;  %v4216_v18 = vrot.slane %v4212_v50, 4  ;;  %v4203_v0 = vrot.slane %v4201_v32, 7  ;;  %v4227_v8 = vshrl.u32 %v15114_v29, 16  ;;  %v4368_v45 = vld [vmem:[#allocation3 + $0x24] sm:$0xf] }
 0x1d2   : > { %v4198_v36 = vor.u32 %v4196_v25, %v4195_v19  ;;  %v4199_v20 = vrot.slane %v4195_v19, 4  ;;  %v20429_v42 = vrot.slane %v4244_v54, 7  ;;  %v4223_v55 = vor.u32 %v4221_v12, %v4220_v1  ;;  %v503_v12 = vld [vmem:[#allocation3 + $0x44] sm:$0x1]  ;;  %v458_v54 = vld [vmem:[#allocation3 + $0x60] sm:$0x1] }
 0x1d3   : > { %v4362_v34 = vsel %vm17597_vm11, %v4215_v43, %v4361_v41  ;;  %v4225_v23 = vrot.slane %v4220_v1, 4  ;;  %v4206_v60 = vor.u32 %v4204_v16, %v4203_v0  ;;  %v4208_v38 = vrot.slane %v4203_v0, 4 }
 0x1d4   : > { %4363 = vst [vmem:[#allocation3 + $0x18] sm:$0xf] %v4362_v34  ;;  %v4355_v22 = vsel %vm17597_vm11, %v4198_v36, %v4354_v5  ;;  %v4249_v61 = vor.u32 %v4247_v49, %v20429_v42  ;;  %v4224_v40 = vsel %vm17608_vm12, %v4216_v18, %v4223_v55  ;;  %v4250_v53 = vrot.slane %v20429_v42, 4  ;;  %v20458_v49 = vpop.f32.mrf.mxu1  ;;  %v16032_v36 = vpop.f32.mrf.mxu0 }
 0x1d5   : > { %4356 = vst [vmem:[#allocation3 + $0xc] sm:$0xf] %v4355_v22  ;;  %v4366_v41 = vsel %vm17519_vm2, %v4225_v23, %v4365_v39  ;;  %v20443_v50 = vrot.slane %v4227_v8, 7  ;;  %4364 = vst [vmem:[#allocation3 + $0x1c] sm:$0xf] %v4224_v40  ;;  %v4207_v5 = vsel %vm17608_vm12, %v4199_v20, %v4206_v60  ;;  %v4359_v19 = vsel %vm17519_vm2, %v4208_v38, %v4358_v56 }
 0x1d6   : > { %4367 = vst [vmem:[#allocation3 + $0x20] sm:$0x1] %v4366_v41  ;;  %v4376_v32 = vsel %vm17597_vm11, %v4249_v61, %v4375_v13  ;;  %v4230_v16 = vshll.u32 %v15114_v29, 16  ;;  %4357 = vst [vmem:[#allocation3 + $0x10] sm:$0xf] %v4207_v5  ;;  %v4119_v43 = vadd.f32 %v20351_v46, %v20420_v62  ;;  %v4095_v18 = vmul.f32 %v20323_v35, %v20424_v37  ;;  %v4037_v55 = vpop.f32.mrf.mxu0  ;;  %v20480_v22 = vpop.f32.mrf.mxu1 }
 0x1d7   : > { %4360 = vst [vmem:[#allocation3 + $0x14] sm:$0x1] %v4359_v19  ;;  %4377 = vst [vmem:[#allocation3 + $0x30] sm:$0xf] %v4376_v32  ;;  %v4233_v39 = vrot.slane %v20443_v50, 4  ;;  %v453_v1 = vsel %vm17519_vm2, 0, %v452_v17  ;;  %v3780_v13 = vadd.f32 %v20160_v26, %v20301_v52  ;;  %v3778_v62 = vadd.f32 %v20186_v48, %v20304_v4 }
 0x1d8   : > { %v455_v56 = vld [vmem:[#allocation3 + $0x54] sm:$0x1]  ;;  %v4232_v29 = vor.u32 %v4230_v16, %v20443_v50  ;;  %454 = vst [vmem:[#allocation3 + $0x48] sm:$0x1] %v453_v1  ;;  %v450_v20 = vsel %vm17519_vm2, 0, %v449_v10  ;;  %v4135_v37 = vmax.f32 %v4119_v43, 0.0  ;;  %v4117_v0 = vadd.f32 %v20351_v46, %v4095_v18  ;;  %v16033_v38 = vpop.f32.mrf.mxu0  ;;  %v20502_v43 = vpop.f32.mrf.mxu1 }
 0x1d9   : > { %451 = vst [vmem:[#allocation3 + $0x3c] sm:$0x1] %v450_v20  ;;  %v507_v17 = vsel %vm17551_vm6, 0, %v506_v27  ;;  %v3781_v34 = vadd.f32 %v20234_v24, %v20307_v63  ;;  %v4078_v52 = vadd.f32 %v16032_v36, %v3780_v13  ;;  %v504_v23 = vsel %vm17551_vm6, 0, %v503_v12  ;;  %v512_v63 = vld [vmem:[#allocation3 + $0x68] sm:$0x1] }
 0x1da   : > { %v4369_v26 = vsel %vm17597_vm11, %v4232_v29, %v4368_v45  ;;  %508 = vst [vmem:[#allocation3 + $0x50] sm:$0x1] %v507_v17  ;;  %v3779_v48 = vadd.f32 %v20268_v30, %v20314_v9  ;;  %v15117_v4 = vpack.c.bf16 %v4135_v37, %v4135_v37  ;;  %v4133_v8 = vmax.f32 %v4117_v0, 0.0  ;;  %505 = vst [vmem:[#allocation3 + $0x44] sm:$0x1] %v504_v23  ;;  %v4040_v32 = vpop.f32.mrf.mxu0 }
 0x1db   : > { %4370 = vst [vmem:[#allocation3 + $0x24] sm:$0xf] %v4369_v26  ;;  %v4076_v10 = vadd.f32 %v4037_v55, %v3778_v62  ;;  %v459_v24 = vsel %vm17519_vm2, 0, %v458_v54  ;;  %v4100_v60 = vmul.f32 %v20323_v35, %v4078_v52  ;;  %v20485_v61 = vadd.f32 %v20311_v11, %v20331_v2  ;;  %v509_v12 = vld [vmem:[#allocation3 + $0x5c] sm:$0x1] }
 0x1dc   : > { %460 = vst [vmem:[#allocation3 + $0x60] sm:$0x1] %v459_v24  ;;  %v456_v30 = vsel %vm17519_vm2, 0, %v455_v56  ;;  %v20491_v9 = vadd.f32 %v20364_v14, %v20340_v21  ;;  %v4252_v27 = vshrl.u32 %v15117_v4, 16  ;;  %v4255_v40 = vshll.u32 %v15117_v4, 16 }
 0x1dd   : > { %v15115_v41 = vpack.c.bf16 %v4133_v8, %v4133_v8  ;;  %v4098_v45 = vmul.f32 %v20323_v35, %v4076_v10  ;;  %457 = vst [vmem:[#allocation3 + $0x54] sm:$0x1] %v456_v30  ;;  %v4122_v5 = vadd.f32 %v20351_v46, %v4100_v60  ;;  %v4079_v19 = vadd.f32 %v16033_v38, %v3781_v34  ;;  %v4379_v18 = vld [vmem:[#allocation3 + $0x38] sm:$0x1]  ;;  %v4372_v62 = vld [vmem:[#allocation3 + $0x2c] sm:$0x1]  ;;  %v20521_v8 = vpop.f32.mrf.mxu1 }
 0x1de   : > { %v513_v11 = vsel %vm17551_vm6, 0, %v512_v63  ;;  %v20499_v2 = vadd.f32 %v20398_v57, %v20343_v15  ;;  %v4254_v21 = vrot.slane %v4252_v27, 7  ;;  %v4077_v29 = vadd.f32 %v4040_v32, %v3779_v48  ;;  %v434_v26 = vld [vmem:[#allocation3] sm:$0x1]  ;;  %v20519_v4 = vld [vmem:[#allocation3 + $0x4] sm:$0xf] }
 0x1df   : > { %v4235_v14 = vshrl.u32 %v15115_v41, 16  ;;  %v4238_v16 = vshll.u32 %v15115_v41, 16  ;;  %v4120_v54 = vadd.f32 %v20351_v46, %v4098_v45  ;;  %514 = vst [vmem:[#allocation3 + $0x68] sm:$0x1] %v513_v11  ;;  %v4138_v1 = vmax.f32 %v4122_v5, 0.0  ;;  %v20539_v32 = vpop.f32.mrf.mxu1 }
 0x1e0   : > { %v4101_v56 = vmul.f32 %v20323_v35, %v4079_v19  ;;  %v510_v13 = vsel %vm17551_vm6, 0, %v509_v12  ;;  %v4257_v36 = vor.u32 %v4255_v40, %v4254_v21  ;;  %v4259_v20 = vrot.slane %v4254_v21, 4  ;;  %v20523_v63 = vld [vmem:[#allocation3 + $0xc] sm:$0xf]  ;;  %v4389_v45 = vld [vmem:[#allocation3 + $0x48] sm:$0xf] }
 0x1e1   : > { %v4237_v15 = vrot.slane %v4235_v14, 7  ;;  %v4136_v57 = vmax.f32 %v4120_v54, 0.0  ;;  %511 = vst [vmem:[#allocation3 + $0x5c] sm:$0x1] %v510_v13  ;;  %v15120_v37 = vpack.c.bf16 %v4138_v1, %v4138_v1  ;;  %v4099_v17 = vmul.f32 %v20323_v35, %v4077_v29  ;;  %v20537_v19 = vld [vmem:[#allocation3 + $0x18] sm:$0xf] }
 0x1e2   : > { %v4123_v0 = vadd.f32 %v20351_v46, %v4101_v56  ;;  %v20511_v34 = vadd.f32 %v20422_v3, %v20346_v44  ;;  %v4258_v52 = vsel %vm17608_vm12, %v4250_v53, %v4257_v36  ;;  %v4380_v55 = vsel %vm17519_vm2, %v4259_v20, %v4379_v18  ;;  %v20541_v54 = vld [vmem:[#allocation3 + $0x10] sm:$0xf]  ;;  %v4382_v18 = vld [vmem:[#allocation3 + $0x3c] sm:$0xf] }
 0x1e3   : > { %v4240_v23 = vor.u32 %v4238_v16, %v4237_v15  ;;  %v4242_v48 = vrot.slane %v4237_v15, 4  ;;  %4378 = vst [vmem:[#allocation3 + $0x34] sm:$0xf] %v4258_v52  ;;  %4381 = vst [vmem:[#allocation3 + $0x38] sm:$0x1] %v4380_v55  ;;  %v4278_v10 = vshrl.u32 %v15120_v37, 16  ;;  %v15118_v3 = vpack.c.bf16 %v4136_v57, %v4136_v57  ;;  %v20554_v55 = vpop.f32.mrf.mxu1 }
 0x1e4   : > { %v4281_v44 = vshll.u32 %v15120_v37, 16  ;;  %v4139_v24 = vmax.f32 %v4123_v0, 0.0  ;;  %v4121_v60 = vadd.f32 %v20351_v46, %v4099_v17  ;;  %v435_v38 = vsel %vm17519_vm2, 0, %v434_v26  ;;  %v4393_v37 = vld [vmem:[#allocation3 + $0x50] sm:$0x1] }
 0x1e5   : > { %v4241_v42 = vsel %vm17608_vm12, %v4233_v39, %v4240_v23  ;;  %v4373_v53 = vsel %vm17519_vm2, %v4242_v48, %v4372_v62  ;;  %v4280_v30 = vrot.slane %v4278_v10, 7  ;;  %v4261_v27 = vshrl.u32 %v15118_v3, 16  ;;  %436 = vst [vmem:[#allocation3] sm:$0x1] %v435_v38  ;;  %v20549_v62 = vld [vmem:[#allocation3 + $0x1c] sm:$0xf] }
 0x1e6   : > { %4371 = vst [vmem:[#allocation3 + $0x28] sm:$0xf] %v4241_v42  ;;  %4374 = vst [vmem:[#allocation3 + $0x2c] sm:$0x1] %v4373_v53  ;;  %v4264_v40 = vshll.u32 %v15118_v3, 16  ;;  %v15121_v41 = vpack.c.bf16 %v4139_v24, %v4139_v24  ;;  %v4137_v50 = vmax.f32 %v4121_v60, 0.0  ;;  %v14467_v52 = vcombine.low %v20523_v63, %v20541_v54 }
 0x1e7   : > { %v7620_v12 = vshrl.u32 %v20519_v4, 16  ;;  %v7631_v39 = vshrl.u32 %v20523_v63, 16  ;;  %v7634_v5 = vshll.u32 %v20523_v63, 16  ;;  %v4283_v11 = vor.u32 %v4281_v44, %v4280_v30  ;;  %v488_v3 = vld [vmem:[#allocation3 + $0x8] sm:$0x1] }
 0x1e8   : > { %v4284_v21 = vrot.slane %v4280_v30, 4  ;;  %v4263_v14 = vrot.slane %v4261_v27, 7  ;;  %v4286_v16 = vshrl.u32 %v15121_v41, 16  ;;  %v4289_v1 = vshll.u32 %v15121_v41, 16  ;;  %v4386_v27 = vld [vmem:[#allocation3 + $0x44] sm:$0x1] }
 0x1e9   : > { %v15119_v56 = vpack.c.bf16 %v4137_v50, %v4137_v50  ;;  %v20543_v29 = vrot.slane %v7631_v39, 4  ;;  %v20545_v13 = vrot.slane %v7634_v5, 5  ;;  %v4390_v36 = vsel %vm17597_vm11, %v4283_v11, %v4389_v45  ;;  %v17186_v45 = vld [vmem:[%s23678_s6 + $0xf0] sm:$0xff]   ;;  %v20573_v11 = vld [vmem:[#allocation3 + $0x24] sm:$0xf] }
 0x1ea   : > { %v4266_v20 = vor.u32 %v4264_v40, %v4263_v14  ;;  %v4267_v15 = vrot.slane %v4263_v14, 4  ;;  %v4288_v57 = vrot.slane %v4286_v16, 7  ;;  %4391 = vst [vmem:[#allocation3 + $0x48] sm:$0xf] %v4390_v36  ;;  %v7644_v26 = vshrl.u32 %v20541_v54, 16  ;;  %v16036_v14 = vpop.f32.mrf.mxu0 }
 0x1eb   : > { %v4269_v0 = vshrl.u32 %v15119_v56, 16  ;;  %v4272_v17 = vshll.u32 %v15119_v56, 16  ;;  %v7655_v44 = vshrl.u32 %v20537_v19, 16  ;;  %v7658_v53 = vshll.u32 %v20537_v19, 16 }
 0x1ec   : > { %v4383_v23 = vsel %vm17597_vm11, %v4266_v20, %v4382_v18  ;;  %v4291_v48 = vor.u32 %v4289_v1, %v4288_v57  ;;  %v4293_v10 = vrot.slane %v4288_v57, 4  ;;  %v7566_v42 = vld [vmem:[#allocation3] sm:$0xf]  ;;  %v7668_v60 = vshrl.u32 %v20549_v62, 16 }
 0x1ed   : > { %4384 = vst [vmem:[#allocation3 + $0x3c] sm:$0xf] %v4383_v23  ;;  %v4271_v24 = vrot.slane %v4269_v0, 7  ;;  %v14468_v63 = vcombine.low %v20537_v19, %v20549_v62  ;;  %v7607_v40 = vshrl.u32 %v7566_v42, 16  ;;  %v7610_v41 = vshll.u32 %v7566_v42, 16 }
 0x1ee   : > { %v4292_v38 = vsel %vm17608_vm12, %v4284_v21, %v4291_v48  ;;  %v4394_v30 = vsel %vm17519_vm2, %v4293_v10, %v4393_v37  ;;  %v14466_v5 = vcombine.low %v7566_v42, %v20519_v4  ;;  %v20571_v19 = vrot.slane %v7655_v44, 4  ;;  %v20575_v21 = vpop.f32.mrf.mxu1  ;;  %v20581_v36 = vld [vmem:[#allocation3 + $0x28] sm:$0xf] }
 0x1ef   : > { %4392 = vst [vmem:[#allocation3 + $0x4c] sm:$0xf] %v4292_v38  ;;  %4395 = vst [vmem:[#allocation3 + $0x50] sm:$0x1] %v4394_v30  ;;  %v4274_v50 = vor.u32 %v4272_v17, %v4271_v24  ;;  %v4276_v39 = vrot.slane %v4271_v24, 4  ;;  %v7609_v16 = vrot.slane %v7607_v40, 4  ;;  %v4082_v37 = vadd.f32 %v16036_v14, %v20485_v61  ;;  %v4053_v17 = vpop.f32.mrf.mxu0 }
 0x1f0   : > { %v7612_v18 = vrot.slane %v7610_v41, 5  ;;  %v20577_v1 = vrot.slane %v7658_v53, 5  ;;  %v489_v56 = vsel %vm17551_vm6, 0, %v488_v3  ;;  %16374 = vmatprep.mubr.bf16.mxu1 %v14466_v5  ;;  %v7616_v0 = vshll.u32 %v20519_v4, 16  ;;  %v20616_v41 = vld [vmem:[#allocation3 + $0x14] sm:$0x1] }
 0x1f1   : > { %v4275_v20 = vsel %vm17608_vm12, %v4267_v15, %v4274_v50  ;;  %v4387_v57 = vsel %vm17519_vm2, %v4276_v39, %v4386_v27  ;;  %490 = vst [vmem:[#allocation3 + $0x8] sm:$0x1] %v489_v56  ;;  %16375 = vmatmul.mubr.bf16.vlgmr.msra.gmra.mxu1 %v14467_v52  ;;  %v7622_v48 = vrot.slane %v7620_v12, 4  ;;  %v7679_v10 = vshrl.u32 %v20573_v11, 16  ;;  %v20599_v52 = vpop.f32.mrf.mxu1  ;;  %v16037_v42 = vpop.f32.mrf.mxu0 }
 0x1f2   : > { %4385 = vst [vmem:[#allocation3 + $0x40] sm:$0xf] %v4275_v20  ;;  %4388 = vst [vmem:[#allocation3 + $0x44] sm:$0x1] %v4387_v57  ;;  %v7613_v23 = vor.u32 %v7612_v18, %v7609_v16  ;;  %v7682_v15 = vshll.u32 %v20573_v11, 16  ;;  %v4104_v44 = vmul.f32 %v20323_v35, %v4082_v37  ;;  %v4080_v61 = vadd.f32 %v4053_v17, %v20491_v9  ;;  %v17192_v20 = vld [vmem:[%s23678_s6 + $0xe0] sm:$0xff]  }
 0x1f3   : > { %16378 = vmatprep.mubr.bf16.mxu1 %v14468_v63  ;;  %16423 = vmatpush3.bf16.msra.mxu1 %v20415_v51  ;;  %v20596_v3 = vrot.slane %v7616_v0, 5  ;;  %v7692_v24 = vshrl.u32 %v20581_v36, 16  ;;  %v20603_v53 = vrot.slane %v7679_v10, 4  ;;  %v14469_v9 = vcombine.low %v20573_v11, %v20581_v36  ;;  %v17189_v51 = vld [vmem:[%s23678_s6 + $0xe8] sm:$0xff]   ;;  %v4056_v50 = vpop.f32.mrf.mxu0  ;;  %v20633_v57 = vpop.f32.mrf.mxu1 }
 0x1f4   : > { %16424 = vmatprep.subr.bf16.mxu1 %v17186_v45  ;;  %v20601_v12 = vrot.slane %v7613_v23, 4  ;;  %v20605_v38 = vrot.slane %v7682_v15, 5  ;;  %v4126_v63 = vadd.f32 %v20351_v46, %v4104_v44  ;;  %v4102_v30 = vmul.f32 %v20323_v35, %v4080_v61 }
 0x1f5   : > { %v4083_v27 = vadd.f32 %v16037_v42, %v20499_v2  ;;  %v7623_v40 = vor.u32 %v7622_v48, %v20596_v3  ;;  %v7637_v5 = vor.u32 %v20545_v13, %v20543_v29  ;;  %v7640_v11 = vshll.u32 %v20541_v54, 16  ;;  %v16088_v29 = vpop.f32.mrf.mxu0 }
 0x1f6   : > { %v7619_v39 = vsel %vm17618_vm13, %v20601_v12, %v20596_v3  ;;  %v7646_v14 = vrot.slane %v7644_v26, 4  ;;  %v4142_v16 = vmax.f32 %v4126_v63, 0.0  ;;  %v4124_v2 = vadd.f32 %v20351_v46, %v4102_v30 }
 0x1f7   : > { %v4105_v18 = vmul.f32 %v20323_v35, %v4083_v27  ;;  %v4081_v56 = vadd.f32 %v4056_v50, %v20511_v34  ;;  %16425 = vmatpush3.bf16.msra.mxu1 %v17186_v45  ;;  %v7624_v37 = vrot.slane %v7623_v40, 4  ;;  %v20637_v26 = vrot.slane %v7637_v5, 4  ;;  %v4968_v15 = vpop.f32.mrf.mxu0  ;;  %v17195_v5 = vld [vmem:[%s23678_s6 + $0xd8] sm:$0xff]  }
 0x1f8   : > { %v20635_v13 = vld [vmem:[#allocation3 + $0x8] sm:$0x1]  ;;  %16426 = vmatprep.subr.bf16.mxu1 %v17189_v51  ;;  %v20639_v0 = vrot.slane %v7640_v11, 5  ;;  %v7650_v17 = vshll.u32 %v20616_v41, 16  ;;  %v15124_v23 = vpack.c.bf16 %v4142_v16, %v4142_v16  ;;  %v4140_v34 = vmax.f32 %v4124_v2, 0.0 }
 0x1f9   : > { %v4127_v45 = vadd.f32 %v20351_v46, %v4105_v18  ;;  %v4103_v48 = vmul.f32 %v20323_v35, %v4081_v56  ;;  %v20645_v10 = vadd.f32 %v16088_v29, %v20427_v31  ;;  %v7626_v44 = vshll.u32 %v20635_v13, 16  ;;  %16379 = vmatmul.mubr.bf16.gmra.mxu1 %v14469_v9  ;;  %v20653_v35 = vpop.f32.mrf.mxu1  ;;  %v16089_v9 = vpop.f32.mrf.mxu0  ;;  %v4396_v18 = vld [vmem:[#allocation3 + $0x54] sm:$0xf] }
 0x1fa   : > { %v7643_v61 = vsel %vm17618_vm13, %v20637_v26, %v20639_v0  ;;  %v7647_v3 = vor.u32 %v7646_v14, %v20639_v0  ;;  %v4312_v42 = vshrl.u32 %v15124_v23, 16  ;;  %v4315_v12 = vshll.u32 %v15124_v23, 16 }
 0x1fb   : > { %v15122_v63 = vpack.c.bf16 %v4140_v34, %v4140_v34  ;;  %v4143_v30 = vmax.f32 %v4127_v45, 0.0  ;;  %16427 = vmatpush3.bf16.msra.mxu1 %v17189_v51  ;;  %v4125_v31 = vadd.f32 %v20351_v46, %v4103_v48  ;;  %v20657_v27 = vadd.f32 %v4968_v15, %v20433_v47  ;;  %v4403_v51 = vld [vmem:[#allocation3 + $0x60] sm:$0xf]  ;;  %v4971_v47 = vpop.f32.mrf.mxu0  ;;  %v20669_v48 = vpop.f32.mrf.mxu1 }
 0x1fc   : > { %v7628_v40 = vrot.slane %v7626_v44, 5  ;;  %v7648_v50 = vrot.slane %v7647_v3, 4  ;;  %16428 = vmatprep.subr.bf16.mxu1 %v17192_v20  ;;  %v4314_v11 = vrot.slane %v4312_v42, 7  ;;  %v20663_v46 = vadd.f32 %v16089_v9, %v20458_v49 }
 0x1fd   : > { %v4295_v14 = vshrl.u32 %v15122_v63, 16  ;;  %v4298_v16 = vshll.u32 %v15122_v63, 16  ;;  %v15125_v2 = vpack.c.bf16 %v4143_v30, %v4143_v30  ;;  %v4141_v56 = vmax.f32 %v4125_v31, 0.0  ;;  %v16092_v49 = vpop.f32.mrf.mxu0  ;;  %v7574_v30 = vld [vmem:[#allocation3 + $0x30] sm:$0xf]  ;;  %v20683_v31 = vpop.f32.mrf.mxu1 }
 0x1fe   : > { %v7629_v29 = vsel %vm17618_vm13, %v7624_v37, %v7628_v40  ;;  %v7652_v26 = vrot.slane %v7650_v17, 5  ;;  %v4317_v0 = vor.u32 %v4315_v12, %v4314_v11  ;;  %v4318_v23 = vrot.slane %v4314_v11, 4  ;;  %v20677_v37 = vld [vmem:[%s23678_s6 + $0xd0] sm:$0xff]  }
 0x1ff   : > { %v20667_v34 = vrot.slane %v4295_v14, 7  ;;  %v4320_v45 = vshrl.u32 %v15125_v2, 16  ;;  %16429 = vmatpush3.bf16.msra.mxu1 %v17192_v20  ;;  %v4323_v15 = vshll.u32 %v15125_v2, 16  ;;  %v15123_v44 = vpack.c.bf16 %v4141_v56, %v4141_v56  ;;  %v4984_v11 = vpop.f32.mrf.mxu0  ;;  %v20690_v2 = vld [vmem:[#allocation3 + $0x34] sm:$0xf] }
 0x200   : > { %v20672_v3 = vadd.f32 %v4971_v47, %v20480_v22  ;;  %v14450_v42 = vcombine.low %v7619_v39, %v7629_v29  ;;  %16430 = vmatprep.subr.bf16.mxu1 %v17195_v5  ;;  %v4404_v17 = vsel %vm17597_vm11, %v4317_v0, %v4403_v51  ;;  %v4407_v22 = vld [vmem:[#allocation3 + $0x68] sm:$0x1]  ;;  %v20686_v40 = vadd.f32 %v16092_v49, %v20502_v43  ;;  %v20697_v29 = vpop.f32.mrf.mxu1  ;;  %v7576_v49 = vld [vmem:[#allocation3 + $0x3c] sm:$0xf] }
 0x201   : > { %v4300_v20 = vor.u32 %v4298_v16, %v20667_v34  ;;  %v4301_v12 = vrot.slane %v20667_v34, 4  ;;  %v4322_v63 = vrot.slane %v4320_v45, 7  ;;  %4405 = vst [vmem:[#allocation3 + $0x60] sm:$0xf] %v4404_v17  ;;  %v4303_v39 = vshrl.u32 %v15123_v44, 16 }
 0x202   : > { %v4306_v9 = vshll.u32 %v15123_v44, 16  ;;  %16342 = vmatprep.mubr.bf16.mxu0 %v14450_v42  ;;  %v7653_v14 = vsel %vm17618_vm13, %v7648_v50, %v7652_v26  ;;  %v20695_v47 = vadd.f32 %v4984_v11, %v20521_v8  ;;  %v7703_v34 = vshrl.u32 %v7574_v30, 16  ;;  %v16093_v44 = vpop.f32.mrf.mxu0  ;;  %v20699_v50 = vld [vmem:[#allocation3 + $0x20] sm:$0x1]  ;;  %v4400_v26 = vld [vmem:[#allocation3 + $0x5c] sm:$0x1]  ;;  %v20714_v17 = vpop.f32.mrf.mxu1 }
 0x203   : > { %v4397_v16 = vsel %vm17597_vm11, %v4300_v20, %v4396_v18  ;;  %v4325_v51 = vor.u32 %v4323_v15, %v4322_v63  ;;  %v4327_v56 = vrot.slane %v4322_v63, 4  ;;  %16431 = vmatpush3.bf16.msra.mxu1 %v17195_v5  ;;  %v4305_v43 = vrot.slane %v4303_v39, 7  ;;  %v17193_v18 = vld [vmem:[%s23678_s6 + $0xb0] sm:$0xff]   ;;  %v17201_v42 = vld [vmem:[%s23678_s6 + $0xc8] sm:$0xff]   ;;  %v20720_v11 = vld [vmem:[#allocation3 + $0x40] sm:$0xf] }
 0x204   : > { %4398 = vst [vmem:[#allocation3 + $0x54] sm:$0xf] %v4397_v16  ;;  %v14451_v0 = vcombine.low %v7643_v61, %v7653_v14  ;;  %v7706_v45 = vshll.u32 %v7574_v30, 16  ;;  %16432 = vmatprep.subr.bf16.mxu1 %v20677_v37  ;;  %v14470_v15 = vcombine.low %v7574_v30, %v20690_v2  ;;  %v4987_v39 = vpop.f32.mrf.mxu0  ;;  %23934 = vst [vmem:[#allocation33_spill] sm:$0xff] %v20720_v11  ;;  %v7664_v16 = vshll.u32 %v20549_v62, 16 }
 0x205   : > { %v4326_v8 = vsel %vm17608_vm12, %v4318_v23, %v4325_v51  ;;  %v4408_v5 = vsel %vm17519_vm2, %v4327_v56, %v4407_v22  ;;  %v4308_v20 = vor.u32 %v4306_v9, %v4305_v43  ;;  %v4310_v63 = vrot.slane %v4305_v43, 4  ;;  %v20731_v51 = vpop.f32.mrf.mxu1 }
 0x206   : > { %4406 = vst [vmem:[#allocation3 + $0x64] sm:$0xf] %v4326_v8  ;;  %4409 = vst [vmem:[#allocation3 + $0x68] sm:$0x1] %v4408_v5  ;;  %16343 = vmatmul.mubr.bf16.vlgmr.msra.gmra.mxu0 %v14451_v0  ;;  %v20716_v23 = vrot.slane %v7703_v34, 4  ;;  %v20718_v22 = vrot.slane %v7706_v45, 5  ;;  %16382 = vmatprep.mubr.bf16.mxu1 %v14470_v15  ;;  %v20723_v30 = vadd.f32 %v16093_v44, %v20539_v32 }
 0x207   : > { %v7661_v14 = vor.u32 %v20577_v1, %v20571_v19  ;;  %v7670_v9 = vrot.slane %v7668_v60, 4  ;;  %16391 = vmatpush3.bf16.msra.mxu0 %v20392_v33  ;;  %v4309_v56 = vsel %vm17608_vm12, %v4301_v12, %v4308_v20  ;;  %v4401_v43 = vsel %vm17519_vm2, %v4310_v63, %v4400_v26  ;;  %v16096_v19 = vpop.f32.mrf.mxu0  ;;  %v20741_v1 = vld [vmem:[#allocation3 + $0x2c] sm:$0x1]  ;;  %v7578_v60 = vld [vmem:[#allocation3 + $0x48] sm:$0xf]  ;;  %v17197_v33 = vld [vmem:[%s23678_s6 + $0xa8] sm:$0xff]   ;;  %16433 = vmatpush3.bf16.msra.mxu1 %v20677_v37  ;;  %v20750_v44 = vpop.f32.mrf.mxu1 }
 0x208   : > { %v7674_v32 = vshll.u32 %v20699_v50, 16  ;;  %v20739_v0 = vadd.f32 %v4987_v39, %v20554_v55  ;;  %16392 = vmatprep.subr.bf16.mxu0 %v17193_v18  ;;  %23935 = vst [vmem:[#allocation35_spill] sm:$0xff] %v20741_v1  ;;  %4399 = vst [vmem:[#allocation3 + $0x58] sm:$0xf] %v4309_v56  ;;  %v7666_v34 = vrot.slane %v7664_v16, 5  ;;  %v20748_v45 = vadd.f32 %v16096_v19, %v20575_v21  ;;  %v17204_v37 = vld [vmem:[%s23678_s6 + $0xc0] sm:$0xff]  }
 0x209   : > { %4402 = vst [vmem:[#allocation3 + $0x5c] sm:$0x1] %v4401_v43  ;;  %v7662_v12 = vrot.slane %v7661_v14, 4  ;;  %v7727_v55 = vshrl.u32 %v7576_v49, 16  ;;  %16434 = vmatprep.subr.bf16.mxu1 %v17201_v42  ;;  %v5000_v5 = vpop.f32.mrf.mxu0  ;;  %v7730_v26 = vshll.u32 %v7576_v49, 16  ;;  %v14471_v20 = vcombine.low %v7576_v49, %v20720_v11  ;;  %v20766_v56 = vpop.f32.mrf.mxu1  ;;  %v17199_v19 = vld [vmem:[%s23678_s6 + $0xa0] sm:$0xff]  }
 0x20a   : > { %v7676_v8 = vrot.slane %v7674_v32, 5  ;;  %v7671_v21 = vor.u32 %v7670_v9, %v7666_v34  ;;  %v20760_v39 = vadd.f32 %v5000_v5, %v20599_v52  ;;  %v20764_v16 = vld [vmem:[#allocation3 + $0x4c] sm:$0xf]  ;;  %v7685_v49 = vor.u32 %v20605_v38, %v20603_v53  ;;  %v20775_v9 = vld [vmem:[#allocation3 + $0x38] sm:$0x1] }
 0x20b   : > { %v7667_v63 = vsel %vm17618_vm13, %v7662_v12, %v7666_v34  ;;  %16393 = vmatpush3.bf16.msra.mxu0 %v17193_v18  ;;  %v20762_v14 = vrot.slane %v7727_v55, 4  ;;  %23936 = vst [vmem:[#allocation36_spill] sm:$0xff] %v20764_v16  ;;  %v20768_v43 = vrot.slane %v7730_v26, 5  ;;  %16383 = vmatmul.mubr.bf16.gmra.mxu1 %v14471_v20  ;;  %v7688_v32 = vshll.u32 %v20581_v36, 16  ;;  %v16097_v52 = vpop.f32.mrf.mxu0  ;;  %v20781_v26 = vld [vmem:[#allocation3 + $0x54] sm:$0xf]  ;;  %v20783_v53 = vpop.f32.mrf.mxu1 }
 0x20c   : > { %v7694_v18 = vrot.slane %v7692_v24, 4  ;;  %16394 = vmatprep.subr.bf16.mxu0 %v17197_v33  ;;  %v7672_v12 = vrot.slane %v7671_v21, 4  ;;  %v7698_v34 = vshll.u32 %v20741_v1, 16  ;;  %v7751_v55 = vshrl.u32 %v7578_v60, 16  ;;  %16435 = vmatpush3.bf16.msra.mxu1 %v17201_v42  ;;  %v20790_v21 = vld [vmem:[%s23678_s6 + $0x178] sm:$0xff]  }
 0x20d   : > { %v7754_v5 = vshll.u32 %v7578_v60, 16  ;;  %v7686_v38 = vrot.slane %v7685_v49, 4  ;;  %v7690_v24 = vrot.slane %v7688_v32, 5  ;;  %v14472_v15 = vcombine.low %v7578_v60, %v20764_v16  ;;  %v5003_v61 = vpop.f32.mrf.mxu0  ;;  %16436 = vmatprep.subr.bf16.mxu1 %v17204_v37  ;;  %v20798_v49 = vpop.f32.mrf.mxu1 }
 0x20e   : > { %v7677_v25 = vsel %vm17618_vm13, %v7672_v12, %v7676_v8  ;;  %v7700_v58 = vrot.slane %v7698_v34, 5  ;;  %v20794_v42 = vrot.slane %v7751_v55, 4  ;;  %v20803_v7 = vadd.f32 %v16097_v52, %v20633_v57  ;;  %v17202_v8 = vld [vmem:[%s23678_s6 + $0x98] sm:$0xff]  }
 0x20f   : > { %v20796_v6 = vrot.slane %v7754_v5, 5  ;;  %16395 = vmatpush3.bf16.msra.mxu0 %v17197_v33  ;;  %v14452_v32 = vcombine.low %v7667_v63, %v7677_v25  ;;  %v7691_v60 = vsel %vm17618_vm13, %v7686_v38, %v7690_v24  ;;  %v7695_v20 = vor.u32 %v7694_v18, %v7690_v24  ;;  %16386 = vmatprep.mubr.bf16.mxu1 %v14472_v15  ;;  %v16100_v1 = vpop.f32.mrf.mxu0  ;;  %v20814_v15 = vld [vmem:[#allocation3 + $0x58] sm:$0xf]  ;;  %v20816_v57 = vpop.f32.mrf.mxu1  ;;  %v20825_v5 = vld [vmem:[#allocation3 + $0x44] sm:$0x1] }
 0x210   : > { %v7709_v12 = vor.u32 %v20718_v22, %v20716_v23  ;;  %v7712_v33 = vshll.u32 %v20690_v2, 16  ;;  %v23937_v25 = vshrl.u32 %v20690_v2, 16  ;;  %v7722_v34 = vshll.u32 %v20775_v9, 16  ;;  %16396 = vmatprep.subr.bf16.mxu0 %v17199_v19  ;;  %16437 = vmatpush3.bf16.msra.mxu1 %v17204_v37 }
 0x211   : > { %16346 = vmatprep.mubr.bf16.mxu0 %v14452_v32  ;;  %v7696_v18 = vrot.slane %v7695_v20, 4  ;;  %v20819_v52 = vadd.f32 %v5003_v61, %v20653_v35  ;;  %v20822_v23 = vadd.f32 %v16100_v1, %v20669_v48  ;;  %v5016_v22 = vpop.f32.mrf.mxu0  ;;  %v7775_v55 = vshrl.u32 %v20781_v26, 16  ;;  %16486 = vmatprep.subr.bf16.mxu1 %v20790_v21  ;;  %v20831_v20 = vpop.f32.mrf.mxu1 }
 0x212   : > { %v7718_v63 = vrot.slane %v23937_v25, 4  ;;  %v7710_v38 = vrot.slane %v7709_v12, 4  ;;  %v7714_v24 = vrot.slane %v7712_v33, 5  ;;  %v7724_v37 = vrot.slane %v7722_v34, 5 }
 0x213   : > { %23938 = vst [vmem:[#allocation37_spill] sm:$0xff] %v20819_v52  ;;  %23939 = vst [vmem:[#allocation40_spill] sm:$0xff] %v20822_v23  ;;  %16397 = vmatpush3.bf16.msra.mxu0 %v17199_v19  ;;  %v20829_v32 = vadd.f32 %v5016_v22, %v20683_v31  ;;  %v7701_v35 = vsel %vm17618_vm13, %v7696_v18, %v7700_v58  ;;  %v20835_v48 = vrot.slane %v7775_v55, 4  ;;  %v7778_v61 = vshll.u32 %v20781_v26, 16  ;;  %v16101_v25 = vpop.f32.mrf.mxu0  ;;  %v17205_v58 = vld [vmem:[%s23678_s6 + $0x90] sm:$0xff]   ;;  %v20846_v34 = vpop.f32.mrf.mxu1 }
 0x214   : > { %v7788_v1 = vshrl.u32 %v20814_v15, 16  ;;  %16398 = vmatprep.subr.bf16.mxu0 %v17202_v8  ;;  %v14453_v12 = vcombine.low %v7691_v60, %v7701_v35  ;;  %v7715_v19 = vsel %vm17618_vm13, %v7710_v38, %v7714_v24  ;;  %v7719_v33 = vor.u32 %v7718_v63, %v7714_v24  ;;  %v17203_v38 = vld [vmem:[#allocation3 + $0xc] sm:$0xff]  }
 0x215   : > { %23940 = vst [vmem:[#allocation22_spill] sm:$0xff] %v20829_v32  ;;  %v14473_v31 = vcombine.low %v20781_v26, %v20814_v15  ;;  %v7780_v18 = vrot.slane %v7778_v61, 5  ;;  %v7733_v22 = vor.u32 %v20768_v43, %v20762_v14  ;;  %v7736_v55 = vshll.u32 %v20720_v11, 16  ;;  %v20853_v63 = vld [vmem:[#allocation3 + $0x50] sm:$0x1]  ;;  %v5019_v24 = vpop.f32.mrf.mxu0  ;;  %v20861_v43 = vpop.f32.mrf.mxu1 }
 0x216   : > { %v23941_v60 = vshrl.u32 %v20720_v11, 16  ;;  %23942 = vst [vmem:[#allocation14_spill] sm:$0xff] %v20853_v63  ;;  %16347 = vmatmul.mubr.bf16.gmra.mxu0 %v14453_v12  ;;  %v7720_v26 = vrot.slane %v7719_v33, 4  ;;  %v7746_v32 = vshll.u32 %v20825_v5, 16  ;;  %v20857_v23 = vadd.f32 %v16101_v25, %v20697_v29 }
 0x217   : > { %16387 = vmatmul.mubr.bf16.gmra.mxu1 %v14473_v31  ;;  %v7757_v14 = vor.u32 %v20796_v6, %v20794_v42  ;;  %v7734_v61 = vrot.slane %v7733_v22, 4  ;;  %v7738_v11 = vrot.slane %v7736_v55, 5  ;;  %v23943_v52 = vshrl.u32 %v20764_v16, 16  ;;  %16399 = vmatpush3.bf16.msra.mxu0 %v17202_v8  ;;  %v17208_v6 = vld [vmem:[%s23678_s6 + $0x88] sm:$0xff]   ;;  %v20872_v42 = vpop.f32.mrf.mxu1 }
 0x218   : > { %v7742_v35 = vrot.slane %v23941_v60, 4  ;;  %16438 = vmatprep.mubr.bf16.mxu1 %v17203_v38  ;;  %v7760_v60 = vshll.u32 %v20764_v16, 16  ;;  %v7725_v33 = vsel %vm17618_vm13, %v7720_v26, %v7724_v37  ;;  %v7748_v31 = vrot.slane %v7746_v32, 5  ;;  %16400 = vmatprep.subr.bf16.mxu0 %v17205_v58  ;;  %v16152_v38 = vpop.f32.mrf.mxu0 }
 0x219   : > { %v7766_v12 = vrot.slane %v23943_v52, 4  ;;  %v7758_v29 = vrot.slane %v7757_v14, 4  ;;  %v7770_v25 = vshll.u32 %v20853_v63, 16  ;;  %v14454_v22 = vcombine.low %v7715_v19, %v7725_v33  ;;  %v20883_v14 = vld [vmem:[#allocation3 + $0x5c] sm:$0x1]  ;;  %v20885_v63 = vpop.f32.mrf.mxu1 }
 0x21a   : > { %v7739_v55 = vsel %vm17618_vm13, %v7734_v61, %v7738_v11  ;;  %v7743_v52 = vor.u32 %v7742_v35, %v7738_v11  ;;  %v7762_v8 = vrot.slane %v7760_v60, 5  ;;  %v20877_v37 = vadd.f32 %v5019_v24, %v20714_v17  ;;  %v5482_v61 = vpop.f32.mrf.mxu0  ;;  %v17206_v17 = vld [vmem:[#allocation3 + $0x18] sm:$0xff]  }
 0x21b   : > { %v7772_v16 = vrot.slane %v7770_v25, 5  ;;  %v5306_v32 = vadd.f32 %v20731_v51, %v20645_v10  ;;  %v5304_v26 = vadd.f32 %v20750_v44, %v20657_v27  ;;  %16350 = vmatprep.mubr.bf16.mxu0 %v14454_v22  ;;  %16401 = vmatpush3.bf16.msra.mxu0 %v17205_v58  ;;  %v7781_v24 = vor.u32 %v7780_v18, %v20835_v48  ;;  %v17210_v10 = vld [vmem:[%s23678_s6 + $0x170] sm:$0xff]   ;;  %v20898_v33 = vpop.f32.mrf.mxu1  ;;  %v17209_v18 = vld [vmem:[#allocation3 + $0x24] sm:$0xff]   ;;  %v8185_v22 = vld [vmem:[#allocation3] sm:$0xe] }
 0x21c   : > { %v7744_v19 = vrot.slane %v7743_v52, 4  ;;  %v7763_v11 = vsel %vm17618_vm13, %v7758_v29, %v7762_v8  ;;  %v7767_v35 = vor.u32 %v7766_v12, %v7762_v8  ;;  %v7784_v44 = vshll.u32 %v20814_v15, 16  ;;  %16402 = vmatprep.subr.bf16.mxu0 %v17208_v6  ;;  %v16153_v25 = vpop.f32.mrf.mxu0 }
 0x21d   : > { %v20893_v27 = vadd.f32 %v16152_v38, %v5306_v32  ;;  %v20895_v51 = vadd.f32 %v5482_v61, %v5304_v26  ;;  %v7790_v60 = vrot.slane %v7788_v1, 4  ;;  %v7782_v29 = vrot.slane %v7781_v24, 4  ;;  %v20910_v32 = vpop.f32.mrf.mxu1 }
 0x21e   : > { %v7749_v58 = vsel %vm17618_vm13, %v7744_v19, %v7748_v31  ;;  %v7768_v12 = vrot.slane %v7767_v35, 4  ;;  %v7794_v48 = vshll.u32 %v20883_v14, 16  ;;  %v7786_v8 = vrot.slane %v7784_v44, 5  ;;  %v17211_v31 = vld [vmem:[%s23678_s6 + $0x80] sm:$0xff]  }
 0x21f   : > { %v14455_v52 = vcombine.low %v7739_v55, %v7749_v58  ;;  %16439 = vmatmul.mubr.bf16.vlgmr.msra.gmra.mxu1 %v17206_v17  ;;  %v5307_v38 = vadd.f32 %v20766_v56, %v20663_v46  ;;  %v5305_v1 = vadd.f32 %v20783_v53, %v20672_v3  ;;  %v5485_v55 = vpop.f32.mrf.mxu0  ;;  %v5310_v46 = vadd.f32 %v20798_v49, %v20686_v40  ;;  %v8186_v56 = vld [vmem:[#allocation3 + $0xc] sm:$0xe]  ;;  %v20926_v24 = vpop.f32.mrf.mxu1 }
 0x220   : > { %v7773_v26 = vsel %vm17618_vm13, %v7768_v12, %v7772_v16  ;;  %v7796_v19 = vrot.slane %v7794_v48, 5  ;;  %16442 = vmatprep.mubr.bf16.mxu1 %v17209_v18  ;;  %16487 = vmatpush3.bf16.msra.mxu1 %v20790_v21  ;;  %v5308_v3 = vadd.f32 %v20816_v57, %v20695_v47  ;;  %v7787_v35 = vsel %vm17618_vm13, %v7782_v29, %v7786_v8  ;;  %v17213_v16 = vld [vmem:[%s23678_s6 + $0x168] sm:$0xff]   ;;  %v8187_v21 = vld [vmem:[#allocation3 + $0x18] sm:$0xe] }
 0x221   : > { %16351 = vmatmul.mubr.bf16.gmra.mxu0 %v14455_v52  ;;  %v14456_v53 = vcombine.low %v7763_v11, %v7773_v26  ;;  %v7791_v61 = vor.u32 %v7790_v60, %v7786_v8  ;;  %v20921_v17 = vadd.f32 %v16153_v25, %v5307_v38  ;;  %v20928_v40 = vadd.f32 %v5485_v55, %v5305_v1  ;;  %v16156_v47 = vpop.f32.mrf.mxu0  ;;  %v20940_v29 = vpop.f32.mrf.mxu1  ;;  %v17212_v52 = vld [vmem:[#allocation3 + $0x30] sm:$0xff]   ;;  %v17216_v38 = vld [vmem:[%s23678_s6 + $0x160] sm:$0xff]  }
 0x222   : > { %16403 = vmatpush3.bf16.msra.mxu0 %v17208_v6  ;;  %16488 = vmatprep.subr.bf16.mxu1 %v17210_v10  ;;  %v14482_v49 = vrot.slane %v8185_v22, 9  ;;  %v8211_v57 = vrot.slane %v20519_v4, 5  ;;  %v8214_v11 = vrot.slane %v20635_v13, 5  ;;  %v20932_v60 = vadd.f32 %v16156_v47, %v5310_v46  ;;  %v20938_v6 = vld [vmem:[%s23678_s6 + $0x138] sm:$0xff]  }
 0x223   : > { %16354 = vmatprep.mubr.bf16.mxu0 %v14456_v53  ;;  %v7792_v44 = vrot.slane %v7791_v61, 4  ;;  %16404 = vmatprep.subr.bf16.mxu0 %v17211_v31  ;;  %v14483_v58 = vrot.slane %v8186_v56, 9  ;;  %v8218_v12 = vrot.slane %v20541_v54, 5  ;;  %v5498_v48 = vpop.f32.mrf.mxu0  ;;  %v8221_v18 = vrot.slane %v20616_v41, 5  ;;  %v20958_v41 = vpop.f32.mrf.mxu1  ;;  %v8188_v46 = vld [vmem:[#allocation3 + $0x24] sm:$0xe] }
 0x224   : > { %16489 = vmatpush3.bf16.msra.mxu1 %v17210_v10  ;;  %v8212_v4 = vsel %vm17647_vm14, %v14482_v49, %v8211_v57  ;;  %v8213_v13 = vrot.slane %v8211_v57, 4  ;;  %v5311_v25 = vadd.f32 %v20831_v20, %v20723_v30  ;;  %v20949_v22 = vadd.f32 %v5498_v48, %v5308_v3  ;;  %v17214_v20 = vld [vmem:[#allocation3 + $0x3c] sm:$0xff]  }
 0x225   : > { %v7797_v54 = vsel %vm17618_vm13, %v7792_v44, %v7796_v19  ;;  %16490 = vmatprep.subr.bf16.mxu1 %v17213_v16  ;;  %v20953_v10 = vsel %vm17647_vm14, %v14483_v58, %v8218_v12  ;;  %v8220_v8 = vrot.slane %v8218_v12, 4  ;;  %v16157_v26 = vpop.f32.mrf.mxu0  ;;  %v14484_v19 = vrot.slane %v8187_v21, 9  ;;  %v8189_v58 = vld [vmem:[#allocation3 + $0x30] sm:$0xe] }
 0x226   : > { %v14457_v1 = vcombine.low %v7787_v35, %v7797_v54  ;;  %16405 = vmatpush3.bf16.msra.mxu0 %v17211_v31  ;;  %v8215_v30 = vsel %vm17647_vm14, %v8213_v13, %v8214_v11  ;;  %v8225_v55 = vrot.slane %v20549_v62, 5  ;;  %v20968_v53 = vadd.f32 %v16157_v26, %v5311_v25  ;;  %v20971_v35 = vpop.f32.mrf.mxu1  ;;  %v8190_v25 = vld [vmem:[#allocation3 + $0x3c] sm:$0xe]  ;;  %v21005_v54 = vld [vmem:[#allocation3 + $0x10] sm:$0xf] }
 0x227   : > { %v14506_v3 = vcombine.low %v8212_v4, %v8215_v30  ;;  %16443 = vmatmul.mubr.bf16.gmra.mxu1 %v17212_v52  ;;  %v20965_v56 = vsel %vm17647_vm14, %v8220_v8, %v8221_v18  ;;  %16454 = vmatprep.subr.bf16.mxu0 %v20938_v6  ;;  %v8228_v31 = vrot.slane %v20699_v50, 5  ;;  %v5309_v47 = vadd.f32 %v20846_v34, %v20739_v0  ;;  %v5501_v49 = vpop.f32.mrf.mxu0  ;;  %v23945_v30 = vld [vmem:[#allocation37_spill] sm:$0xff]  ;;  %v17222_v26 = vld [vmem:[%s23678_s6 + $0x150] sm:$0xff]  }
 0x228   : > { %v14507_v61 = vcombine.low %v20953_v10, %v20965_v56  ;;  %16446 = vmatprep.mubr.bf16.mxu1 %v17214_v20  ;;  %16491 = vmatpush3.bf16.msra.mxu1 %v17213_v16  ;;  %v20977_v62 = vsel %vm17647_vm14, %v14484_v19, %v8225_v55  ;;  %v8227_v21 = vrot.slane %v8225_v55, 4  ;;  %v5314_v50 = vadd.f32 %v20861_v43, %v20748_v45  ;;  %v17219_v16 = vld [vmem:[%s23678_s6 + $0x158] sm:$0xff]   ;;  %v20989_v12 = vpop.f32.mrf.mxu1  ;;  %v23944_v43 = vld [vmem:[#allocation35_spill] sm:$0xff]  ;;  %v17218_v55 = vld [vmem:[#allocation3 + $0x48] sm:$0xff]  }
 0x229   : > { %16355 = vmatmul.mubr.bf16.gmra.mxu0 %v14457_v1  ;;  %16492 = vmatprep.subr.bf16.mxu1 %v17216_v38  ;;  %v5312_v57 = vadd.f32 %v20872_v42, %v20760_v39  ;;  %v14485_v11 = vrot.slane %v8188_v46, 9  ;;  %v8232_v44 = vrot.slane %v20581_v36, 5  ;;  %v20993_v34 = vadd.f32 %v5501_v49, %v5309_v47  ;;  %v16160_v45 = vpop.f32.mrf.mxu0  ;;  %v9143_v42 = vld [vmem:[#allocation3 + $0xc] sm:$0xe]  ;;  %v23946_v46 = vld [vmem:[#allocation40_spill] sm:$0xff] }
 0x22a   : > { %16406 = vmatprep.mubr.bf16.mxu0 %v14506_v3  ;;  %v8229_v0 = vsel %vm17647_vm14, %v8227_v21, %v8228_v31  ;;  %v8235_v48 = vrot.slane %v23944_v43, 5  ;;  %v5315_v39 = vadd.f32 %v20885_v63, %v20803_v7  ;;  %v20999_v13 = vadd.f32 %v16160_v45, %v5314_v50  ;;  %v21007_v52 = vpop.f32.mrf.mxu1  ;;  %v17220_v21 = vld [vmem:[#allocation3 + $0x54] sm:$0xff]  }
 0x22b   : > { %v14508_v4 = vcombine.low %v20977_v62, %v8229_v0  ;;  %v21003_v36 = vsel %vm17647_vm14, %v14485_v11, %v8232_v44  ;;  %v8234_v18 = vrot.slane %v8232_v44, 4  ;;  %v5514_v8 = vpop.f32.mrf.mxu0  ;;  %v14486_v1 = vrot.slane %v8189_v58, 9  ;;  %v23948_v44 = vld [vmem:[#allocation33_spill] sm:$0xff] }
 0x22c   : > { %16493 = vmatpush3.bf16.msra.mxu1 %v17216_v38  ;;  %v8239_v7 = vrot.slane %v20690_v2, 5  ;;  %v8242_v63 = vrot.slane %v20775_v9, 5  ;;  %v5313_v20 = vadd.f32 %v20898_v33, %v23945_v30  ;;  %v21016_v19 = vadd.f32 %v5514_v8, %v5312_v57  ;;  %v23947_v9 = vld [vmem:[#allocation22_spill] sm:$0xff]  ;;  %v21030_v33 = vld [vmem:[#allocation3 + $0x14] sm:$0x1]  ;;  %v21032_v31 = vpop.f32.mrf.mxu1 }
 0x22d   : > { %16494 = vmatprep.subr.bf16.mxu1 %v17219_v16  ;;  %v21020_v38 = vsel %vm17647_vm14, %v8234_v18, %v8235_v48  ;;  %v21024_v2 = vadd.f32 %v20910_v32, %v23946_v46  ;;  %v21028_v3 = vadd.f32 %v20926_v24, %v23947_v9  ;;  %v16161_v47 = vpop.f32.mrf.mxu0  ;;  %v14487_v32 = vrot.slane %v8190_v25, 9  ;;  %v8191_v57 = vld [vmem:[#allocation3 + $0x48] sm:$0xe]  ;;  %v17217_v24 = vld [vmem:[%s23678_s6 + $0x130] sm:$0xff]   ;;  %v8192_v46 = vld [vmem:[#allocation3 + $0x54] sm:$0xe] }
 0x22e   : > { %v14509_v62 = vcombine.low %v21003_v36, %v21020_v38  ;;  %v21038_v49 = vsel %vm17647_vm14, %v14486_v1, %v8239_v7  ;;  %v8241_v50 = vrot.slane %v8239_v7, 4  ;;  %v21043_v11 = vadd.f32 %v16161_v47, %v5315_v39  ;;  %v21047_v43 = vpop.f32.mrf.mxu1  ;;  %v21059_v1 = vld [vmem:[#allocation3 + $0x1c] sm:$0xf]  ;;  %v21075_v7 = vld [vmem:[#allocation3 + $0x20] sm:$0x1]  ;;  %v17221_v9 = vld [vmem:[%s23678_s6 + $0x128] sm:$0xff]  }
 0x22f   : > { %16447 = vmatmul.mubr.bf16.gmra.mxu1 %v17218_v55  ;;  %v8246_v58 = vrot.slane %v23948_v44, 5  ;;  %v8249_v0 = vrot.slane %v20825_v5, 5  ;;  %v14586_v45 = vrot.slane %v9143_v42, 9  ;;  %v5517_v18 = vpop.f32.mrf.mxu0  ;;  %v9177_v25 = vrot.slane %v21005_v54, 5  ;;  %v17225_v42 = vld [vmem:[%s23678_s6 + $0x148] sm:$0xff]   ;;  %v17226_v36 = vld [vmem:[%s23678_s6 + $0x118] sm:$0xff]  }
 0x230   : > { %16450 = vmatprep.mubr.bf16.mxu1 %v17220_v21  ;;  %16495 = vmatpush3.bf16.msra.mxu1 %v17219_v16  ;;  %v21051_v48 = vsel %vm17647_vm14, %v8241_v50, %v8242_v63  ;;  %v9180_v8 = vrot.slane %v21030_v33, 5  ;;  %v21057_v39 = vadd.f32 %v20940_v29, %v20857_v23  ;;  %v21066_v16 = vadd.f32 %v5517_v18, %v5313_v20  ;;  %v9144_v63 = vld [vmem:[#allocation3 + $0x18] sm:$0xe]  ;;  %v21077_v10 = vpop.f32.mrf.mxu1 }
 0x231   : > { %16407 = vmatmul.mubr.bf16.vlgmr.msra.gmra.mxu0 %v14507_v61  ;;  %v14510_v5 = vcombine.low %v21038_v49, %v21051_v48  ;;  %16496 = vmatprep.subr.bf16.mxu1 %v17222_v26  ;;  %v21073_v23 = vsel %vm17647_vm14, %v14487_v32, %v8246_v58  ;;  %v8248_v29 = vrot.slane %v8246_v58, 4  ;;  %v9178_v56 = vsel %vm17647_vm14, %v14586_v45, %v9177_v25  ;;  %v23949_v20 = vld [vmem:[#allocation36_spill] sm:$0xff]  ;;  %v21099_v32 = vld [vmem:[#allocation3 + $0x28] sm:$0xf]  ;;  %v21111_v45 = vld [vmem:[#allocation3 + $0x2c] sm:$0x1] }
 0x232   : > { %16410 = vmatprep.mubr.bf16.mxu0 %v14508_v4  ;;  %16455 = vmatpush3.bf16.msra.mxu0 %v20938_v6  ;;  %v9179_v61 = vrot.slane %v9177_v25, 4  ;;  %v14488_v30 = vrot.slane %v8191_v57, 9  ;;  %v8253_v55 = vrot.slane %v23949_v20, 5  ;;  %v23950_v4 = vld [vmem:[#allocation14_spill] sm:$0xff]  ;;  %v21093_v6 = vadd.f32 %v20958_v41, %v20877_v37  ;;  %v9145_v57 = vld [vmem:[#allocation3 + $0x24] sm:$0xe]  ;;  %v21101_v44 = vpop.f32.mrf.mxu1 }
 0x233   : > { %16456 = vmatprep.subr.bf16.mxu0 %v17217_v24  ;;  %v21088_v21 = vsel %vm17647_vm14, %v8248_v29, %v8249_v0  ;;  %v8256_v47 = vrot.slane %v23950_v4, 5  ;;  %v21097_v50 = vadd.f32 %v20971_v35, %v20893_v27  ;;  %v17224_v27 = vld [vmem:[#allocation3 + $0x60] sm:$0xff]   ;;  %v21118_v18 = vadd.f32 %v20989_v12, %v20895_v51  ;;  %v8717_v29 = vld [vmem:[#allocation3 + $0xc] sm:$0xf] }
 0x234   : > { %16497 = vmatpush3.bf16.msra.mxu1 %v17222_v26  ;;  %v14511_v58 = vcombine.low %v21073_v23, %v21088_v21  ;;  %v9181_v0 = vsel %vm17647_vm14, %v9179_v61, %v9180_v8  ;;  %v21109_v37 = vsel %vm17647_vm14, %v14488_v30, %v8253_v55  ;;  %v8255_v41 = vrot.slane %v8253_v55, 4  ;;  %v17227_v26 = vld [vmem:[%s23678_s6 + $0x140] sm:$0xff]   ;;  %v21121_v61 = vpop.f32.mrf.mxu1 }
 0x235   : > { %16498 = vmatprep.subr.bf16.mxu1 %v17225_v42  ;;  %v14610_v35 = vcombine.low %v9178_v56, %v9181_v0  ;;  %v14587_v25 = vrot.slane %v9144_v63, 9  ;;  %v9184_v8 = vrot.slane %v21059_v1, 5  ;;  %v9187_v56 = vrot.slane %v21075_v7, 5  ;;  %v17223_v51 = vld [vmem:[%s23678_s6 + $0x120] sm:$0xff]  }
 0x236   : > { %16457 = vmatpush3.bf16.msra.mxu0 %v17217_v24  ;;  %v21125_v30 = vsel %vm17647_vm14, %v8255_v41, %v8256_v47  ;;  %v14489_v20 = vrot.slane %v8192_v46, 9  ;;  %v8260_v55 = vrot.slane %v20814_v15, 5  ;;  %v8263_v4 = vrot.slane %v20883_v14, 5  ;;  %v21137_v47 = vpop.f32.mrf.mxu1 }
 0x237   : > { %16458 = vmatprep.subr.bf16.mxu0 %v17221_v9  ;;  %16451 = vmatmul.mubr.bf16.gmra.mxu1 %v17224_v27  ;;  %v14512_v12 = vcombine.low %v21109_v37, %v21125_v30  ;;  %v9185_v24 = vsel %vm17647_vm14, %v14587_v25, %v9184_v8  ;;  %v9186_v63 = vrot.slane %v9184_v8, 4  ;;  %v14588_v0 = vrot.slane %v9145_v57, 9 }
 0x238   : > { %16499 = vmatpush3.bf16.msra.mxu1 %v17225_v42  ;;  %16502 = vmatprep.mubr.bf16.mxu1 %v14610_v35  ;;  %v21141_v15 = vsel %vm17647_vm14, %v14489_v20, %v8260_v55  ;;  %v8262_v46 = vrot.slane %v8260_v55, 4  ;;  %v9191_v41 = vrot.slane %v21099_v32, 5  ;;  %v17229_v42 = vld [vmem:[%s23678_s6 + $0x1f8] sm:$0xff]   ;;  %v9194_v27 = vrot.slane %v21111_v45, 5  ;;  %v21157_v25 = vpop.f32.mrf.mxu1 }
 0x239   : > { %16411 = vmatmul.mubr.bf16.gmra.mxu0 %v14509_v62  ;;  %16500 = vmatprep.subr.bf16.mxu1 %v17227_v26  ;;  %v9188_v14 = vsel %vm17647_vm14, %v9186_v63, %v9187_v56  ;;  %v21155_v35 = vadd.f32 %v21007_v52, %v20921_v17  ;;  %v8742_v57 = vshrl.u32 %v8717_v29, 16  ;;  %v8745_v48 = vshll.u32 %v8717_v29, 16  ;;  %v9146_v56 = vld [vmem:[#allocation3 + $0x30] sm:$0xe]  ;;  %v21187_v29 = vld [vmem:[#allocation3 + $0x34] sm:$0xf] }
 0x23a   : > { %16414 = vmatprep.mubr.bf16.mxu0 %v14510_v5  ;;  %16459 = vmatpush3.bf16.msra.mxu0 %v17221_v9  ;;  %v14611_v38 = vcombine.low %v9185_v24, %v9188_v14  ;;  %v21167_v62 = vsel %vm17647_vm14, %v8262_v46, %v8263_v4  ;;  %v9192_v17 = vsel %vm17647_vm14, %v14588_v0, %v9191_v41  ;;  %v9193_v52 = vrot.slane %v9191_v41, 4  ;;  %v21177_v9 = vld [vmem:[%s23678_s6 + $0x1f0] sm:$0xff]  }
 0x23b   : > { %16460 = vmatprep.subr.bf16.mxu0 %v17223_v51  ;;  %v14513_v8 = vcombine.low %v21141_v15, %v21167_v62  ;;  %v8744_v49 = vrot.slane %v8742_v57, 4  ;;  %v8751_v5 = vshll.u32 %v21005_v54, 16  ;;  %v8755_v55 = vshrl.u32 %v21005_v54, 16  ;;  %v21189_v4 = vld [vmem:[#allocation3 + $0x38] sm:$0x1]  ;;  %v21195_v54 = vpop.f32.mrf.mxu1 }
 0x23c   : > { %16501 = vmatpush3.bf16.msra.mxu1 %v17227_v26  ;;  %v9195_v20 = vsel %vm17647_vm14, %v9193_v52, %v9194_v27  ;;  %v8761_v24 = vshll.u32 %v21030_v33, 16  ;;  %v21185_v63 = vadd.f32 %v21032_v31, %v20928_v40  ;;  %v8747_v0 = vrot.slane %v8745_v48, 5  ;;  %v8720_v14 = vld [vmem:[#allocation3 + $0x18] sm:$0xf]  ;;  %v16164_v33 = vpop.f32.mrf.mxu0 }
 0x23d   : > { %16550 = vmatprep.subr.bf16.mxu1 %v17229_v42  ;;  %v14612_v46 = vcombine.low %v9192_v17, %v9195_v20  ;;  %v8753_v41 = vrot.slane %v8751_v5, 5  ;;  %v21193_v26 = vadd.f32 %v21047_v43, %v20932_v60  ;;  %v17228_v40 = vld [vmem:[%s23678_s6 + $0x110] sm:$0xff]   ;;  %v8757_v31 = vrot.slane %v8755_v55, 4  ;;  %v21222_v55 = vld [vmem:[#allocation3 + $0x40] sm:$0xf] }
 0x23e   : > { %16461 = vmatpush3.bf16.msra.mxu0 %v17223_v51  ;;  %v8763_v27 = vrot.slane %v8761_v24, 5  ;;  %v21202_v57 = vadd.f32 %v21077_v10, %v20949_v22  ;;  %v14589_v17 = vrot.slane %v9146_v56, 9  ;;  %v21205_v52 = vadd.f32 %v16164_v33, %v21024_v2  ;;  %v5530_v48 = vpop.f32.mrf.mxu0  ;;  %v17233_v22 = vld [vmem:[%s23678_s6 + $0x1e8] sm:$0xff]   ;;  %v21224_v24 = vld [vmem:[#allocation3 + $0x44] sm:$0x1] }
 0x23f   : > { %16462 = vmatprep.subr.bf16.mxu0 %v17226_v36  ;;  %16503 = vmatmul.mubr.bf16.vlgmr.msra.gmra.mxu1 %v14611_v38  ;;  %v8748_v60 = vor.u32 %v8747_v0, %v8744_v49  ;;  %v9198_v43 = vrot.slane %v21187_v29, 5  ;;  %v9201_v51 = vrot.slane %v21189_v4, 5  ;;  %v8758_v5 = vor.u32 %v8757_v31, %v8753_v41  ;;  %v21226_v0 = vpop.f32.mrf.mxu1  ;;  %v8723_v33 = vld [vmem:[#allocation3 + $0x24] sm:$0xf] }
 0x240   : > { %16506 = vmatprep.mubr.bf16.mxu1 %v14612_v46  ;;  %16551 = vmatpush3.bf16.msra.mxu1 %v17229_v42  ;;  %v8766_v10 = vshrl.u32 %v8720_v14, 16  ;;  %v8769_v56 = vshll.u32 %v8720_v14, 16  ;;  %v8775_v2 = vshll.u32 %v21059_v1, 16  ;;  %v21214_v20 = vadd.f32 %v5530_v48, %v21028_v3  ;;  %v9147_v46 = vld [vmem:[#allocation3 + $0x3c] sm:$0xe]  ;;  %v16165_v3 = vpop.f32.mrf.mxu0 }
 0x241   : > { %16415 = vmatmul.mubr.bf16.gmra.mxu0 %v14511_v58  ;;  %v8749_v38 = vrot.slane %v8748_v60, 4  ;;  %16552 = vmatprep.subr.bf16.mxu1 %v21177_v9  ;;  %v9199_v42 = vsel %vm17647_vm14, %v14589_v17, %v9198_v43  ;;  %v9200_v49 = vrot.slane %v9198_v43, 4  ;;  %v8759_v23 = vrot.slane %v8758_v5, 4  ;;  %v17230_v17 = vld [vmem:[%s23678_s6 + $0x108] sm:$0xff]  }
 0x242   : > { %16418 = vmatprep.mubr.bf16.mxu0 %v14512_v12  ;;  %16463 = vmatpush3.bf16.msra.mxu0 %v17226_v36  ;;  %v8768_v21 = vrot.slane %v8766_v10, 4  ;;  %v8771_v58 = vrot.slane %v8769_v56, 5  ;;  %v21231_v14 = vrot.slane %v8775_v2, 5  ;;  %v21234_v31 = vadd.f32 %v16165_v3, %v21057_v39  ;;  %v5533_v12 = vpop.f32.mrf.mxu0 }
 0x243   : > { %16464 = vmatprep.subr.bf16.mxu0 %v17228_v40  ;;  %v8754_v60 = vsel %vm17618_vm13, %v8749_v38, %v8753_v41  ;;  %v9202_v37 = vsel %vm17647_vm14, %v9200_v49, %v9201_v51  ;;  %v8779_v30 = vshrl.u32 %v21059_v1, 16  ;;  %v8764_v36 = vsel %vm17618_vm13, %v8759_v23, %v8763_v27  ;;  %v17235_v1 = vld [vmem:[%s23678_s6 + $0x1e0] sm:$0xff]   ;;  %v21254_v51 = vpop.f32.mrf.mxu1 }
 0x244   : > { %16553 = vmatpush3.bf16.msra.mxu1 %v21177_v9  ;;  %v14613_v39 = vcombine.low %v9199_v42, %v9202_v37  ;;  %v8772_v43 = vor.u32 %v8771_v58, %v8768_v21  ;;  %v8785_v48 = vshll.u32 %v21075_v7, 16  ;;  %v21249_v5 = vadd.f32 %v5533_v12, %v21093_v6  ;;  %v16216_v38 = vpop.f32.mrf.mxu0  ;;  %v17232_v6 = vld [vmem:[%s23678_s6 + $0x100] sm:$0xff]  }
 0x245   : > { %v14570_v10 = vcombine.low %v8754_v60, %v8764_v36  ;;  %16554 = vmatprep.subr.bf16.mxu1 %v17233_v22  ;;  %v8781_v41 = vrot.slane %v8779_v30, 4  ;;  %v14590_v56 = vrot.slane %v9147_v46, 9  ;;  %v9205_v2 = vrot.slane %v21222_v55, 5  ;;  %v21266_v3 = vpop.f32.mrf.mxu1 }
 0x246   : > { %16465 = vmatpush3.bf16.msra.mxu0 %v17228_v40  ;;  %v8773_v27 = vrot.slane %v8772_v43, 4  ;;  %v8787_v9 = vrot.slane %v8785_v48, 5  ;;  %v9208_v7 = vrot.slane %v21224_v24, 5  ;;  %v21264_v49 = vadd.f32 %v21101_v44, %v20968_v53  ;;  %v17237_v53 = vld [vmem:[%s23678_s6 + $0x1d8] sm:$0xff]   ;;  %v6204_v44 = vpop.f32.mrf.mxu0 }
 0x247   : > { %16466 = vmatprep.subr.bf16.mxu0 %v17230_v17  ;;  %16507 = vmatmul.mubr.bf16.gmra.mxu1 %v14613_v39  ;;  %v8782_v42 = vor.u32 %v8781_v41, %v21231_v14  ;;  %v8790_v40 = vshrl.u32 %v8723_v33, 16  ;;  %v8793_v46 = vshll.u32 %v8723_v33, 16  ;;  %v21269_v23 = vadd.f32 %v16216_v38, %v21097_v50  ;;  %v21285_v12 = vpop.f32.mrf.mxu1  ;;  %v9148_v41 = vld [vmem:[#allocation3 + $0x48] sm:$0xe] }
 0x248   : > { %v8778_v21 = vsel %vm17618_vm13, %v8773_v27, %v21231_v14  ;;  %v9206_v58 = vsel %vm17647_vm14, %v14590_v56, %v9205_v2  ;;  %v9207_v60 = vrot.slane %v9205_v2, 4  ;;  %16555 = vmatpush3.bf16.msra.mxu1 %v17233_v22  ;;  %v8799_v30 = vshll.u32 %v21099_v32, 16  ;;  %v21283_v14 = vld [vmem:[#allocation3 + $0x4c] sm:$0xf]  ;;  %v16217_v39 = vpop.f32.mrf.mxu0  ;;  %v8726_v56 = vld [vmem:[#allocation3 + $0x30] sm:$0xf] }
 0x249   : > { %16419 = vmatmul.mubr.bf16.gmra.mxu0 %v14513_v8  ;;  %v8783_v50 = vrot.slane %v8782_v42, 4  ;;  %v8792_v33 = vrot.slane %v8790_v40, 4  ;;  %v8795_v37 = vrot.slane %v8793_v46, 5  ;;  %16556 = vmatprep.subr.bf16.mxu1 %v17235_v1  ;;  %v21288_v22 = vadd.f32 %v6204_v44, %v21118_v18  ;;  %v21294_v8 = vld [vmem:[#allocation3 + $0x50] sm:$0x1]  ;;  %v17234_v18 = vld [vmem:[%s23678_s6 + $0x1b8] sm:$0xff]   ;;  %v21301_v27 = vpop.f32.mrf.mxu1 }
 0x24a   : > { %16467 = vmatpush3.bf16.msra.mxu0 %v17230_v17  ;;  %16470 = vmatprep.mubr.bf16.mxu0 %v14570_v10  ;;  %v9209_v36 = vsel %vm17647_vm14, %v9207_v60, %v9208_v7  ;;  %v8803_v15 = vshrl.u32 %v21099_v32, 16  ;;  %v8809_v62 = vshll.u32 %v21111_v45, 16  ;;  %v8801_v10 = vrot.slane %v8799_v30, 5  ;;  %v6207_v38 = vpop.f32.mrf.mxu0  ;;  %v21333_v44 = vld [vmem:[#allocation3 + $0x58] sm:$0xf] }
 0x24b   : > { %16468 = vmatprep.subr.bf16.mxu0 %v17232_v6  ;;  %v8788_v43 = vsel %vm17618_vm13, %v8783_v50, %v8787_v9  ;;  %v14614_v48 = vcombine.low %v9206_v58, %v9209_v36  ;;  %v8796_v17 = vor.u32 %v8795_v37, %v8792_v33  ;;  %v21304_v32 = vadd.f32 %v16217_v39, %v21155_v35  ;;  %v17239_v35 = vld [vmem:[%s23678_s6 + $0x1d0] sm:$0xff]  }
 0x24c   : > { %v14571_v45 = vcombine.low %v8778_v21, %v8788_v43  ;;  %v8805_v2 = vrot.slane %v8803_v15, 4  ;;  %v8811_v7 = vrot.slane %v8809_v62, 5  ;;  %16557 = vmatpush3.bf16.msra.mxu1 %v17235_v1  ;;  %v21308_v42 = vadd.f32 %v21121_v61, %v20993_v34  ;;  %v21321_v1 = vpop.f32.mrf.mxu1  ;;  %v21340_v15 = vld [vmem:[#allocation3 + $0x5c] sm:$0x1] }
 0x24d   : > { %16510 = vmatprep.mubr.bf16.mxu1 %v14614_v48  ;;  %v8797_v9 = vrot.slane %v8796_v17, 4  ;;  %v21312_v40 = vadd.f32 %v21137_v47, %v20999_v13  ;;  %v21316_v46 = vadd.f32 %v21157_v25, %v21016_v19  ;;  %16558 = vmatprep.subr.bf16.mxu1 %v17237_v53  ;;  %v21324_v21 = vadd.f32 %v6207_v38, %v21185_v63  ;;  %v17236_v47 = vld [vmem:[%s23678_s6 + $0x1b0] sm:$0xff]   ;;  %v9149_v63 = vld [vmem:[#allocation3 + $0x54] sm:$0xe]  ;;  %v16220_v50 = vpop.f32.mrf.mxu0 }
 0x24e   : > { %16469 = vmatpush3.bf16.msra.mxu0 %v17232_v6  ;;  %v8806_v34 = vor.u32 %v8805_v2, %v8801_v10  ;;  %v14591_v61 = vrot.slane %v9148_v41, 9  ;;  %v9212_v13 = vrot.slane %v21283_v14, 5  ;;  %v9215_v25 = vrot.slane %v21294_v8, 5  ;;  %v21335_v6 = vpop.f32.mrf.mxu1  ;;  %v21349_v17 = vld [vmem:[%s23678_s6 + $0x1a8] sm:$0xff]   ;;  %v8729_v2 = vld [vmem:[#allocation3 + $0x3c] sm:$0xf] }
 0x24f   : > { %16518 = vmatprep.subr.bf16.mxu0 %v17234_v18  ;;  %v8802_v19 = vsel %vm17618_vm13, %v8797_v9, %v8801_v10  ;;  %v8814_v58 = vshrl.u32 %v8726_v56, 16  ;;  %v8817_v60 = vshll.u32 %v8726_v56, 16  ;;  %v8823_v36 = vshll.u32 %v21187_v29, 16  ;;  %v17241_v10 = vld [vmem:[%s23678_s6 + $0x1c8] sm:$0xff]  }
 0x250   : > { %v8807_v33 = vrot.slane %v8806_v34, 4  ;;  %v9213_v37 = vsel %vm17647_vm14, %v14591_v61, %v9212_v13  ;;  %v9214_v30 = vrot.slane %v9212_v13, 4  ;;  %16559 = vmatpush3.bf16.msra.mxu1 %v17237_v53  ;;  %v21343_v62 = vadd.f32 %v16220_v50, %v21193_v26  ;;  %v21354_v41 = vpop.f32.mrf.mxu1  ;;  %v6220_v53 = vpop.f32.mrf.mxu0 }
 0x251   : > { %16471 = vmatmul.mubr.bf16.vlgmr.msra.gmra.mxu0 %v14571_v45  ;;  %v8816_v39 = vrot.slane %v8814_v58, 4  ;;  %v8819_v43 = vrot.slane %v8817_v60, 5  ;;  %v8827_v48 = vshrl.u32 %v21187_v29, 16  ;;  %16560 = vmatprep.subr.bf16.mxu1 %v17239_v35  ;;  %v8825_v56 = vrot.slane %v8823_v36, 5 }
 0x252   : > { %v8812_v26 = vsel %vm17618_vm13, %v8807_v33, %v8811_v7  ;;  %16519 = vmatpush3.bf16.msra.mxu0 %v17234_v18  ;;  %v9216_v29 = vsel %vm17647_vm14, %v9214_v30, %v9215_v25  ;;  %v8833_v45 = vshll.u32 %v21189_v4, 16  ;;  %v21362_v38 = vadd.f32 %v6220_v53, %v21202_v57  ;;  %v21364_v13 = vpop.f32.mrf.mxu1  ;;  %v16221_v58 = vpop.f32.mrf.mxu0  ;;  %v17243_v33 = vld [vmem:[%s23678_s6 + $0x1c0] sm:$0xff]  }
 0x253   : > { %v14572_v9 = vcombine.low %v8802_v19, %v8812_v26  ;;  %16520 = vmatprep.subr.bf16.mxu0 %v17236_v47  ;;  %v14615_v34 = vcombine.low %v9213_v37, %v9216_v29  ;;  %v8820_v61 = vor.u32 %v8819_v43, %v8816_v39  ;;  %v8829_v60 = vrot.slane %v8827_v48, 4 }
 0x254   : > { %v8835_v7 = vrot.slane %v8833_v45, 5  ;;  %v14592_v18 = vrot.slane %v9149_v63, 9  ;;  %v9219_v50 = vrot.slane %v21333_v44, 5  ;;  %16561 = vmatpush3.bf16.msra.mxu1 %v17239_v35  ;;  %v21368_v25 = vadd.f32 %v16221_v58, %v21264_v49  ;;  %v21376_v37 = vpop.f32.mrf.mxu1  ;;  %v6223_v63 = vpop.f32.mrf.mxu0 }
 0x255   : > { %16474 = vmatprep.mubr.bf16.mxu0 %v14572_v9  ;;  %16511 = vmatmul.mubr.bf16.gmra.mxu1 %v14615_v34  ;;  %v8821_v4 = vrot.slane %v8820_v61, 4  ;;  %v9222_v57 = vrot.slane %v21340_v15, 5  ;;  %v5981_v19 = vadd.f32 %v21195_v54, %v21043_v11  ;;  %v8830_v35 = vor.u32 %v8829_v60, %v8825_v56  ;;  %v21397_v9 = vld [vmem:[#allocation3 + $0x68] sm:$0x1]  ;;  %v21402_v34 = vld [vmem:[%s23679_s7 + $0x38] sm:$0xff]  }
 0x256   : > { %16521 = vmatpush3.bf16.msra.mxu0 %v17236_v47  ;;  %v9220_v49 = vsel %vm17647_vm14, %v14592_v18, %v9219_v50  ;;  %v9221_v30 = vrot.slane %v9219_v50, 4  ;;  %v8838_v36 = vshrl.u32 %v8729_v2, 16  ;;  %16562 = vmatprep.subr.bf16.mxu1 %v17241_v10  ;;  %v21381_v39 = vadd.f32 %v6223_v63, %v21308_v42  ;;  %v17240_v47 = vld [vmem:[%s23678_s6 + $0x1a0] sm:$0xff]   ;;  %v21390_v48 = vpop.f32.mrf.mxu1  ;;  %v16224_v53 = vpop.f32.mrf.mxu0 }
 0x257   : > { %v8826_v11 = vsel %vm17618_vm13, %v8821_v4, %v8825_v56  ;;  %16522 = vmatprep.subr.bf16.mxu0 %v21349_v17  ;;  %v8841_v54 = vshll.u32 %v8729_v2, 16  ;;  %v8847_v43 = vshll.u32 %v21222_v55, 16  ;;  %v8831_v26 = vrot.slane %v8830_v35, 4  ;;  %v21395_v56 = vld [vmem:[#allocation3 + $0x64] sm:$0xf] }
 0x258   : > { %v9223_v42 = vsel %vm17647_vm14, %v9221_v30, %v9222_v57  ;;  %v8840_v29 = vrot.slane %v8838_v36, 4  ;;  %v8851_v45 = vshrl.u32 %v21222_v55, 16  ;;  %v9150_v2 = vld [vmem:[#allocation3 + $0x60] sm:$0xe]  ;;  %16563 = vmatpush3.bf16.msra.mxu1 %v17241_v10  ;;  %v21405_v61 = vadd.f32 %v16224_v53, %v21312_v40  ;;  %v21407_v50 = vpop.f32.mrf.mxu1  ;;  %v6236_v55 = vpop.f32.mrf.mxu0  ;;  %v8732_v36 = vld [vmem:[#allocation3 + $0x48] sm:$0xf] }
 0x259   : > { %v14616_v58 = vcombine.low %v9220_v49, %v9223_v42  ;;  %v8843_v60 = vrot.slane %v8841_v54, 5  ;;  %v8849_v18 = vrot.slane %v8847_v43, 5  ;;  %16564 = vmatprep.subr.bf16.mxu1 %v17243_v33  ;;  %v8836_v4 = vsel %vm17618_vm13, %v8831_v26, %v8835_v7  ;;  %v17242_v7 = vld [vmem:[%s23678_s6 + $0x198] sm:$0xff]  }
 0x25a   : > { %v8853_v57 = vrot.slane %v8851_v45, 4  ;;  %v8857_v10 = vshll.u32 %v21224_v24, 16  ;;  %16523 = vmatpush3.bf16.msra.mxu0 %v21349_v17  ;;  %v5979_v63 = vadd.f32 %v21226_v0, %v21066_v16  ;;  %v21416_v40 = vadd.f32 %v6236_v55, %v21316_v46  ;;  %v21421_v54 = vpop.f32.mrf.mxu1  ;;  %v16225_v24 = vpop.f32.mrf.mxu0 }
 0x25b   : > { %v14573_v35 = vcombine.low %v8826_v11, %v8836_v4  ;;  %16514 = vmatprep.mubr.bf16.mxu1 %v14616_v58  ;;  %v8844_v49 = vor.u32 %v8843_v60, %v8840_v29  ;;  %16524 = vmatprep.subr.bf16.mxu0 %v17240_v47  ;;  %v14593_v30 = vrot.slane %v9150_v2, 9  ;;  %v5984_v16 = vadd.f32 %v21254_v51, %v21205_v52  ;;  %v9685_v58 = vld [vmem:[#allocation3 + $0x18] sm:$0xf]  ;;  %v9686_v60 = vld [vmem:[#allocation3 + $0x1c] sm:$0xf] }
 0x25c   : > { %v8854_v17 = vor.u32 %v8853_v57, %v8849_v18  ;;  %v8859_v43 = vrot.slane %v8857_v10, 5  ;;  %v5982_v0 = vadd.f32 %v21266_v3, %v21214_v20  ;;  %16565 = vmatpush3.bf16.msra.mxu1 %v17243_v33  ;;  %v21427_v46 = vadd.f32 %v16225_v24, %v5981_v19  ;;  %v21432_v42 = vpop.f32.mrf.mxu1  ;;  %v6239_v45 = vpop.f32.mrf.mxu0 }
 0x25d   : > { %16475 = vmatmul.mubr.bf16.gmra.mxu0 %v14573_v35  ;;  %v8845_v11 = vrot.slane %v8844_v49, 4  ;;  %v9226_v53 = vrot.slane %v21395_v56, 5  ;;  %v9229_v26 = vrot.slane %v21397_v9, 5  ;;  %16614 = vmatprep.subr.bf16.mxu1 %v21402_v34  ;;  %v8862_v52 = vshrl.u32 %v8732_v36, 16 }
 0x25e   : > { %v8855_v29 = vrot.slane %v8854_v17, 4  ;;  %16525 = vmatpush3.bf16.msra.mxu0 %v17240_v47  ;;  %v8865_v51 = vshll.u32 %v8732_v36, 16  ;;  %v8871_v20 = vshll.u32 %v21283_v14, 16  ;;  %v21437_v19 = vadd.f32 %v6239_v45, %v5979_v63  ;;  %v17244_v47 = vld [vmem:[%s23678_s6 + $0x190] sm:$0xff]   ;;  %v21444_v55 = vpop.f32.mrf.mxu1  ;;  %v16228_v57 = vpop.f32.mrf.mxu0 }
 0x25f   : > { %v8850_v3 = vsel %vm17618_vm13, %v8845_v11, %v8849_v18  ;;  %v9227_v33 = vsel %vm17647_vm14, %v14593_v30, %v9226_v53  ;;  %v9228_v2 = vrot.slane %v9226_v53, 4  ;;  %16526 = vmatprep.subr.bf16.mxu0 %v17242_v7  ;;  %v8864_v18 = vrot.slane %v8862_v52, 4 }
 0x260   : > { %v8860_v4 = vsel %vm17618_vm13, %v8855_v29, %v8859_v43  ;;  %v8867_v10 = vrot.slane %v8865_v51, 5  ;;  %v8873_v63 = vrot.slane %v8871_v20, 5  ;;  %v21448_v49 = vadd.f32 %v16228_v57, %v5984_v16  ;;  %v21453_v24 = vpop.f32.mrf.mxu1  ;;  %v6252_v17 = vpop.f32.mrf.mxu0  ;;  %v9687_v43 = vld [vmem:[#allocation3 + $0x20] sm:$0x1] }
 0x261   : > { %v14574_v35 = vcombine.low %v8850_v3, %v8860_v4  ;;  %v9230_v30 = vsel %vm17647_vm14, %v9228_v2, %v9229_v26  ;;  %v8875_v36 = vshrl.u32 %v21283_v14, 16  ;;  %v8881_v45 = vshll.u32 %v21294_v8, 16  ;;  %v8735_v3 = vld [vmem:[#allocation3 + $0x54] sm:$0xf] }
 0x262   : > { %v14617_v11 = vcombine.low %v9227_v33, %v9230_v30  ;;  %v8868_v53 = vor.u32 %v8867_v10, %v8864_v18  ;;  %v9710_v29 = vshrl.u32 %v9685_v58, 16  ;;  %16527 = vmatpush3.bf16.msra.mxu0 %v17242_v7  ;;  %v21456_v52 = vadd.f32 %v6252_v17, %v5982_v0  ;;  %v17245_v14 = vld [vmem:[%s23678_s6 + $0x188] sm:$0xff]   ;;  %v21461_v26 = vpop.f32.mrf.mxu1  ;;  %v16229_v7 = vpop.f32.mrf.mxu0 }
 0x263   : > { %16478 = vmatprep.mubr.bf16.mxu0 %v14574_v35  ;;  %v8877_v16 = vrot.slane %v8875_v36, 4  ;;  %v9713_v51 = vshll.u32 %v9685_v58, 16  ;;  %v9719_v20 = vshll.u32 %v9686_v60, 16  ;;  %16528 = vmatprep.subr.bf16.mxu0 %v17244_v47  ;;  %v8883_v8 = vrot.slane %v8881_v45, 5 }
 0x264   : > { %16515 = vmatmul.mubr.bf16.gmra.mxu1 %v14617_v11  ;;  %v8869_v33 = vrot.slane %v8868_v53, 4  ;;  %v9712_v2 = vrot.slane %v9710_v29, 4  ;;  %v9723_v4 = vshrl.u32 %v9686_v60, 16  ;;  %v9729_v10 = vshll.u32 %v9687_v43, 16  ;;  %v21463_v58 = vpop.f32.mrf.mxu1  ;;  %v6255_v11 = vpop.f32.mrf.mxu0  ;;  %v17247_v43 = vld [vmem:[%s23678_s6 + $0x180] sm:$0xff]  }
 0x265   : > { %v8878_v57 = vor.u32 %v8877_v16, %v8873_v63  ;;  %v9715_v0 = vrot.slane %v9713_v51, 5  ;;  %v9721_v18 = vrot.slane %v9719_v20, 5  ;;  %v5985_v36 = vadd.f32 %v21285_v12, %v21234_v31  ;;  %v464_v12 = vld [vmem:[#allocation3 + $0x78] sm:$0x1] }
 0x266   : > { %v8874_v35 = vsel %vm17618_vm13, %v8869_v33, %v8873_v63  ;;  %v9725_v30 = vrot.slane %v9723_v4, 4  ;;  %v8886_v17 = vshrl.u32 %v8735_v3, 16  ;;  %16529 = vmatpush3.bf16.msra.mxu0 %v17244_v47  ;;  %v9731_v60 = vrot.slane %v9729_v10, 5  ;;  %v21472_v16 = vpop.f32.mrf.mxu1  ;;  %v16280_v4 = vpop.f32.mrf.mxu0 }
 0x267   : > { %v8879_v53 = vrot.slane %v8878_v57, 4  ;;  %v9716_v45 = vor.u32 %v9715_v0, %v9712_v2  ;;  %v8889_v29 = vshll.u32 %v8735_v3, 16  ;;  %16530 = vmatprep.subr.bf16.mxu0 %v17245_v14  ;;  %23951 = vst [vmem:[#allocation24_spill] sm:$0xff] %v21472_v16  ;;  %v21474_v63 = vadd.f32 %v16229_v7, %v5985_v36  ;;  %v461_v57 = vld [vmem:[#allocation3 + $0x6c] sm:$0x1] }
 0x268   : > { %v9726_v51 = vor.u32 %v9725_v30, %v9721_v18  ;;  %v8888_v20 = vrot.slane %v8886_v17, 4  ;;  %v8895_v31 = vshll.u32 %v21333_v44, 16  ;;  %v8899_v3 = vshrl.u32 %v21333_v44, 16  ;;  %v9688_v0 = vld [vmem:[#allocation3 + $0x24] sm:$0xf]  ;;  %v21480_v10 = vpop.f32.mrf.mxu1 }
 0x269   : > { %23952 = vst [vmem:[#allocation41_spill] sm:$0xff] %v21474_v63  ;;  %v8884_v47 = vsel %vm17618_vm13, %v8879_v53, %v8883_v8  ;;  %v9717_v33 = vrot.slane %v9716_v45, 4  ;;  %v8891_v2 = vrot.slane %v8889_v29, 5  ;;  %23953 = vst [vmem:[#allocation9_spill] sm:$0xff] %v21480_v10  ;;  %v8905_v36 = vshll.u32 %v21340_v15, 16  ;;  %v21490_v44 = vld [vmem:[%s23678_s6 + $0x238] sm:$0xff]  }
 0x26a   : > { %v14575_v59 = vcombine.low %v8874_v35, %v8884_v47  ;;  %v9727_v30 = vrot.slane %v9726_v51, 4  ;;  %v8897_v7 = vrot.slane %v8895_v31, 5  ;;  %16531 = vmatpush3.bf16.msra.mxu0 %v17245_v14  ;;  %v8901_v8 = vrot.slane %v8899_v3, 4  ;;  %v21492_v35 = vpop.f32.mrf.mxu1  ;;  %v6874_v47 = vpop.f32.mrf.mxu0 }
 0x26b   : > { %v9722_v17 = vsel %vm17618_vm13, %v9717_v33, %v9721_v18  ;;  %v8892_v63 = vor.u32 %v8891_v2, %v8888_v20  ;;  %v5983_v53 = vadd.f32 %v21301_v27, %v21249_v5  ;;  %16532 = vmatprep.subr.bf16.mxu0 %v17247_v43  ;;  %23954 = vst [vmem:[#allocation13_spill] sm:$0xff] %v21492_v35  ;;  %v8907_v14 = vrot.slane %v8905_v36, 5  ;;  %v9689_v5 = vld [vmem:[#allocation3 + $0x28] sm:$0xf] }
 0x26c   : > { %16479 = vmatmul.mubr.bf16.gmra.mxu0 %v14575_v59  ;;  %v9732_v15 = vsel %vm17618_vm13, %v9727_v30, %v9731_v60  ;;  %v465_v18 = vsel %vm17519_vm2, 0, %v464_v12  ;;  %v6514_v29 = vadd.f32 %v21321_v1, %v21269_v23  ;;  %v8902_v20 = vor.u32 %v8901_v8, %v8897_v7  ;;  %v16312_v33 = vpop.f32.mrf.mxu1  ;;  %v9690_v12 = vld [vmem:[#allocation3 + $0x2c] sm:$0x1] }
 0x26d   : > { %v14674_v27 = vcombine.low %v9722_v17, %v9732_v15  ;;  %v8893_v51 = vrot.slane %v8892_v63, 4  ;;  %v21500_v31 = vadd.f32 %v6255_v11, %v5983_v53  ;;  %466 = vst [vmem:[#allocation3 + $0x78] sm:$0x1] %v465_v18  ;;  %v462_v60 = vsel %vm17519_vm2, 0, %v461_v57  ;;  %v8738_v17 = vld [vmem:[#allocation3 + $0x60] sm:$0xf] }
 0x26e   : > { %v6939_v59 = vadd.f32 %v16280_v4, %v6514_v29  ;;  %v6512_v2 = vadd.f32 %v21335_v6, %v21288_v22  ;;  %v9734_v3 = vshrl.u32 %v9688_v0, 16  ;;  %16533 = vmatpush3.bf16.msra.mxu0 %v17247_v43  ;;  %v8903_v1 = vrot.slane %v8902_v20, 4  ;;  %463 = vst [vmem:[#allocation3 + $0x6c] sm:$0x1] %v462_v60  ;;  %v7171_v6 = vpop.f32.mrf.mxu1 }
 0x26f   : > { %23956 = vst [vmem:[#allocation38_spill] sm:$0xff] %v21500_v31  ;;  %16566 = vmatprep.mubr.bf16.mxu1 %v14674_v27  ;;  %v8898_v23 = vsel %vm17618_vm13, %v8893_v51, %v8897_v7  ;;  %v9737_v11 = vshll.u32 %v9688_v0, 16  ;;  %v9743_v63 = vshll.u32 %v9689_v5, 16  ;;  %16582 = vmatprep.subr.bf16.mxu0 %v21490_v44  ;;  %v9747_v57 = vshrl.u32 %v9689_v5, 16  ;;  %v21514_v0 = vld [vmem:[%s23676_s4] ss:$0 sm:$0xff] }
 0x270   : > { %v7236_v4 = vadd.f32 %v16312_v33, %v6939_v59  ;;  %v6937_v30 = vadd.f32 %v6874_v47, %v6512_v2  ;;  %v9736_v36 = vrot.slane %v9734_v3, 4  ;;  %v8908_v22 = vsel %vm17618_vm13, %v8903_v1, %v8907_v14  ;;  %v21520_v14 = vld [vmem:[%s23677_s5] ss:$0 sm:$0xff]  ;;  %v9691_v2 = vld [vmem:[#allocation3 + $0x30] sm:$0xf] }
 0x271   : > { %v9739_v43 = vrot.slane %v9737_v11, 5  ;;  %v9745_v8 = vrot.slane %v9743_v63, 5  ;;  %v9753_v53 = vshll.u32 %v9690_v12, 16  ;;  %v14576_v15 = vcombine.low %v8898_v23, %v8908_v22  ;;  %v21526_v11 = vpop.f32.mrf.mxu0 }
 0x272   : > { %v7252_v7 = vmul.f32 %v21514_v0, %v7236_v4  ;;  %v7234_v18 = vadd.f32 %v7171_v6, %v6937_v30  ;;  %v9749_v29 = vrot.slane %v9747_v57, 4  ;;  %v8910_v51 = vshrl.u32 %v8738_v17, 16  ;;  %v9692_v57 = vld [vmem:[#allocation3 + $0x34] sm:$0xf] }
 0x273   : > { %v9740_v27 = vor.u32 %v9739_v43, %v9736_v36  ;;  %v9755_v5 = vrot.slane %v9753_v53, 5  ;;  %v8913_v20 = vshll.u32 %v8738_v17, 16  ;;  %16482 = vmatprep.mubr.bf16.mxu0 %v14576_v15  ;;  %v8919_v60 = vshll.u32 %v21395_v56, 16  ;;  %v17257_v53 = vld [vmem:[%s23679_s7 + $0x30] sm:$0xff]  }
 0x274   : > { %v7268_v47 = vadd.f32 %v21520_v14, %v7252_v7  ;;  %v7250_v33 = vmul.f32 %v21514_v0, %v7234_v18  ;;  %v9750_v59 = vor.u32 %v9749_v29, %v9745_v8  ;;  %v8912_v3 = vrot.slane %v8910_v51, 4  ;;  %v9693_v18 = vld [vmem:[#allocation3 + $0x38] sm:$0x1] }
 0x275   : > { %v9741_v12 = vrot.slane %v9740_v27, 4  ;;  %v8915_v23 = vrot.slane %v8913_v20, 5  ;;  %v8923_v1 = vshrl.u32 %v21395_v56, 16  ;;  %v8921_v36 = vrot.slane %v8919_v60, 5 }
 0x276   : > { %v7284_v63 = vmax.f32 %v7268_v47, 0.0  ;;  %v7266_v4 = vadd.f32 %v21520_v14, %v7250_v33  ;;  %v9751_v30 = vrot.slane %v9750_v59, 4  ;;  %v8929_v43 = vshll.u32 %v21397_v9, 16 }
 0x277   : > { %v9746_v17 = vsel %vm17618_vm13, %v9741_v12, %v9745_v8  ;;  %v8916_v22 = vor.u32 %v8915_v23, %v8912_v3  ;;  %v8925_v6 = vrot.slane %v8923_v1, 4  ;;  %v9758_v29 = vshrl.u32 %v9691_v2, 16  ;;  %v21537_v8 = vpop.f32.mrf.mxu0  ;;  %v518_v12 = vld [vmem:[#allocation3 + $0x80] sm:$0x1]  ;;  %v7515_v3 = vld [vmem:[#allocation3 + $0x78] sm:$0xf] }
 0x278   : > { %v15128_v56 = vpack.c.bf16 %v7284_v63, %v7284_v63  ;;  %v7282_v15 = vmax.f32 %v7266_v4, 0.0  ;;  %v9756_v7 = vsel %vm17618_vm13, %v9751_v30, %v9755_v5  ;;  %v8931_v47 = vrot.slane %v8929_v43, 5  ;;  %v16313_v43 = vpop.f32.mrf.mxu1 }
 0x279   : > { %v14675_v27 = vcombine.low %v9746_v17, %v9756_v7  ;;  %v8917_v51 = vrot.slane %v8916_v22, 4  ;;  %v8926_v20 = vor.u32 %v8925_v6, %v8921_v36  ;;  %v9760_v60 = vrot.slane %v9758_v29, 4  ;;  %v515_v6 = vld [vmem:[#allocation3 + $0x74] sm:$0x1] }
 0x27a   : > { %v7364_v33 = vshrl.u32 %v15128_v56, 16  ;;  %v7367_v59 = vshll.u32 %v15128_v56, 16  ;;  %v15126_v9 = vpack.c.bf16 %v7282_v15, %v7282_v15  ;;  %v9761_v5 = vshll.u32 %v9691_v2, 16  ;;  %v7508_v56 = vld [vmem:[#allocation3 + $0x6c] sm:$0xf]  ;;  %v17261_v2 = vld [vmem:[%s23679_s7 + $0x28] sm:$0xff]  }
 0x27b   : > { %16567 = vmatmul.mubr.bf16.vlgmr.msra.gmra.mxu1 %v14675_v27  ;;  %v8922_v23 = vsel %vm17618_vm13, %v8917_v51, %v8921_v36  ;;  %v8927_v1 = vrot.slane %v8926_v20, 4  ;;  %v9767_v63 = vshll.u32 %v9692_v57, 16  ;;  %v9771_v22 = vshrl.u32 %v9692_v57, 16  ;;  %v16284_v36 = vpop.f32.mrf.mxu0 }
 0x27c   : > { %v21541_v4 = vrot.slane %v7364_v33, 7  ;;  %v7347_v30 = vshrl.u32 %v15126_v9, 16  ;;  %v7350_v17 = vshll.u32 %v15126_v9, 16  ;;  %16615 = vmatpush3.bf16.msra.mxu1 %v21402_v34  ;;  %v9763_v7 = vrot.slane %v9761_v5, 5  ;;  %v470_v33 = vld [vmem:[#allocation3 + $0x90] sm:$0x1] }
 0x27d   : > { %v8932_v15 = vsel %vm17618_vm13, %v8927_v1, %v8931_v47  ;;  %v9769_v29 = vrot.slane %v9767_v63, 5  ;;  %v9777_v27 = vshll.u32 %v9693_v18, 16  ;;  %16616 = vmatprep.subr.bf16.mxu1 %v17257_v53  ;;  %v9773_v35 = vrot.slane %v9771_v22, 4  ;;  %v17246_v5 = vld [vmem:[#allocation3 + $0x18] sm:$0xff]  }
 0x27e   : > { %v7369_v51 = vor.u32 %v7367_v59, %v21541_v4  ;;  %v7370_v57 = vrot.slane %v21541_v4, 4  ;;  %v21551_v20 = vrot.slane %v7347_v30, 7  ;;  %v14577_v34 = vcombine.low %v8922_v23, %v8932_v15  ;;  %v9694_v63 = vld [vmem:[#allocation3 + $0x3c] sm:$0xf]  ;;  %v7174_v30 = vpop.f32.mrf.mxu1 }
 0x27f   : > { %v9764_v9 = vor.u32 %v9763_v7, %v9760_v60  ;;  %v9779_v47 = vrot.slane %v9777_v27, 5  ;;  %v519_v18 = vsel %vm17551_vm6, 0, %v518_v12  ;;  %v6515_v23 = vadd.f32 %v21354_v41, %v21304_v32  ;;  %v9695_v60 = vld [vmem:[#allocation3 + $0x40] sm:$0xf]  ;;  %v17263_v7 = vld [vmem:[%s23679_s7 + $0x20] sm:$0xff]  }
 0x280   : > { %v7516_v10 = vsel %vm17597_vm11, %v7369_v51, %v7515_v3  ;;  %v7352_v16 = vor.u32 %v7350_v17, %v21551_v20  ;;  %v7353_v59 = vrot.slane %v21551_v20, 4  ;;  %16483 = vmatmul.mubr.bf16.gmra.mxu0 %v14577_v34  ;;  %520 = vst [vmem:[#allocation3 + $0x80] sm:$0x1] %v519_v18  ;;  %16617 = vmatpush3.bf16.msra.mxu1 %v17257_v53  ;;  %v516_v15 = vsel %vm17551_vm6, 0, %v515_v6  ;;  %v6890_v17 = vpop.f32.mrf.mxu0 }
 0x281   : > { %7517 = vst [vmem:[#allocation3 + $0x78] sm:$0xf] %v7516_v10  ;;  %v9765_v22 = vrot.slane %v9764_v9, 4  ;;  %v9774_v12 = vor.u32 %v9773_v35, %v9769_v29  ;;  %16534 = vmatprep.mubr.bf16.mxu0 %v17246_v5  ;;  %v6513_v3 = vadd.f32 %v21364_v13, %v21324_v21  ;;  %16618 = vmatprep.subr.bf16.mxu1 %v17261_v2  ;;  %517 = vst [vmem:[#allocation3 + $0x74] sm:$0x1] %v516_v15 }
 0x282   : > { %v7509_v32 = vsel %vm17597_vm11, %v7352_v16, %v7508_v56  ;;  %v6940_v41 = vadd.f32 %v21526_v11, %v6515_v23  ;;  %v6518_v10 = vadd.f32 %v21376_v37, %v21343_v62  ;;  %v6516_v35 = vadd.f32 %v21390_v48, %v21362_v38  ;;  %v16316_v16 = vpop.f32.mrf.mxu1  ;;  %v9696_v56 = vld [vmem:[#allocation3 + $0x44] sm:$0x1] }
 0x283   : > { %7510 = vst [vmem:[#allocation3 + $0x6c] sm:$0xf] %v7509_v32  ;;  %v9770_v21 = vsel %vm17618_vm13, %v9765_v22, %v9769_v29  ;;  %v9775_v13 = vrot.slane %v9774_v12, 4  ;;  %v6938_v53 = vadd.f32 %v21537_v8, %v6513_v3  ;;  %v471_v6 = vsel %vm17519_vm2, 0, %v470_v33  ;;  %v17248_v37 = vld [vmem:[#allocation3 + $0x24] sm:$0xff]  }
 0x284   : > { %v7237_v11 = vadd.f32 %v16313_v43, %v6940_v41  ;;  %v6943_v27 = vadd.f32 %v16284_v36, %v6518_v10  ;;  %v21580_v51 = vadd.f32 %v6890_v17, %v6516_v35  ;;  %472 = vst [vmem:[#allocation3 + $0x90] sm:$0x1] %v471_v6  ;;  %v9782_v62 = vshrl.u32 %v9694_v63, 16  ;;  %16619 = vmatpush3.bf16.msra.mxu1 %v17261_v2  ;;  %v9697_v8 = vld [vmem:[#allocation3 + $0x48] sm:$0xf]  ;;  %v17251_v36 = vld [vmem:[%s23678_s6 + $0x230] sm:$0xff]   ;;  %v21596_v17 = vpop.f32.mrf.mxu1 }
 0x285   : > { %v9780_v38 = vsel %vm17618_vm13, %v9775_v13, %v9779_v47  ;;  %v7235_v48 = vadd.f32 %v7174_v30, %v6938_v53  ;;  %v9785_v29 = vshll.u32 %v9694_v63, 16  ;;  %v9791_v34 = vshll.u32 %v9695_v60, 16  ;;  %16620 = vmatprep.subr.bf16.mxu1 %v17263_v7  ;;  %v17249_v30 = vld [vmem:[#allocation3 + $0x30] sm:$0xff]   ;;  %v17266_v63 = vld [vmem:[%s23679_s7 + $0x18] sm:$0xff]  }
 0x286   : > { %v14676_v9 = vcombine.low %v9770_v21, %v9780_v38  ;;  %v7253_v33 = vmul.f32 %v21514_v0, %v7237_v11  ;;  %v7240_v18 = vadd.f32 %v16316_v16, %v6943_v27  ;;  %v9784_v43 = vrot.slane %v9782_v62, 4  ;;  %v17254_v16 = vld [vmem:[%s23678_s6 + $0x228] sm:$0xff]  }
 0x287   : > { %v7251_v5 = vmul.f32 %v21514_v0, %v7235_v48  ;;  %v9787_v2 = vrot.slane %v9785_v29, 5  ;;  %v21589_v23 = vrot.slane %v9791_v34, 5  ;;  %v9795_v47 = vshrl.u32 %v9695_v60, 16  ;;  %v21599_v60 = vld [vmem:[#allocation3 + $0x4c] sm:$0xf]  ;;  %v21612_v34 = vpop.f32.mrf.mxu0 }
 0x288   : > { %16570 = vmatprep.mubr.bf16.mxu1 %v14676_v9  ;;  %v7269_v22 = vadd.f32 %v21520_v14, %v7253_v33  ;;  %v7256_v12 = vmul.f32 %v21514_v0, %v7240_v18  ;;  %v9801_v15 = vshll.u32 %v9696_v56, 16  ;;  %16535 = vmatmul.mubr.bf16.vlgmr.msra.gmra.mxu0 %v17248_v37  ;;  %v9806_v3 = vshrl.u32 %v9697_v8, 16  ;;  %v21619_v18 = vld [vmem:[#allocation3 + $0x50] sm:$0x1] }
 0x289   : > { %v7267_v32 = vadd.f32 %v21520_v14, %v7251_v5  ;;  %v9788_v41 = vor.u32 %v9787_v2, %v9784_v43  ;;  %v9797_v10 = vrot.slane %v9795_v47, 4  ;;  %v9809_v35 = vshll.u32 %v9697_v8, 16  ;;  %16538 = vmatprep.mubr.bf16.mxu0 %v17249_v30  ;;  %16583 = vmatpush3.bf16.msra.mxu0 %v21490_v44  ;;  %v17268_v44 = vld [vmem:[%s23679_s7 + $0x10] sm:$0xff]   ;;  %v21614_v8 = vpop.f32.mrf.mxu1 }
 0x28a   : > { %v7285_v21 = vmax.f32 %v7269_v22, 0.0  ;;  %v7272_v13 = vadd.f32 %v21520_v14, %v7256_v12  ;;  %v9803_v53 = vrot.slane %v9801_v15, 5  ;;  %v9808_v6 = vrot.slane %v9806_v3, 4  ;;  %16584 = vmatprep.subr.bf16.mxu0 %v17251_v36  ;;  %16621 = vmatpush3.bf16.msra.mxu1 %v17263_v7  ;;  %v17252_v5 = vld [vmem:[#allocation3 + $0x3c] sm:$0xff]   ;;  %v17256_v12 = vld [vmem:[%s23678_s6 + $0x220] sm:$0xff]  }
 0x28b   : > { %v7283_v56 = vmax.f32 %v7267_v32, 0.0  ;;  %v9789_v11 = vrot.slane %v9788_v41, 4  ;;  %v9798_v27 = vor.u32 %v9797_v10, %v21589_v23  ;;  %v9811_v62 = vrot.slane %v9809_v35, 5  ;;  %16622 = vmatprep.subr.bf16.mxu1 %v17266_v63  ;;  %v7519_v15 = vld [vmem:[#allocation3 + $0x80] sm:$0x1] }
 0x28c   : > { %v15129_v37 = vpack.c.bf16 %v7285_v21, %v7285_v21  ;;  %v7288_v38 = vmax.f32 %v7272_v13, 0.0  ;;  %v9815_v48 = vshll.u32 %v21599_v60, 16  ;;  %v9819_v29 = vshrl.u32 %v21599_v60, 16  ;;  %v7512_v35 = vld [vmem:[#allocation3 + $0x74] sm:$0x1] }
 0x28d   : > { %v15127_v7 = vpack.c.bf16 %v7283_v56, %v7283_v56  ;;  %v9794_v9 = vsel %vm17618_vm13, %v9789_v11, %v21589_v23  ;;  %v9799_v33 = vrot.slane %v9798_v27, 4  ;;  %v9812_v43 = vor.u32 %v9811_v62, %v9808_v6  ;;  %16585 = vmatpush3.bf16.msra.mxu0 %v17251_v36  ;;  %v17253_v36 = vld [vmem:[#allocation3 + $0x48] sm:$0xff]   ;;  %v21630_v56 = vpop.f32.mrf.mxu0  ;;  %v21632_v11 = vpop.f32.mrf.mxu1 }
 0x28e   : > { %v7372_v2 = vshrl.u32 %v15129_v37, 16  ;;  %v7375_v47 = vshll.u32 %v15129_v37, 16  ;;  %v15132_v30 = vpack.c.bf16 %v7288_v38, %v7288_v38  ;;  %v21621_v22 = vrot.slane %v9815_v48, 5  ;;  %16586 = vmatprep.subr.bf16.mxu0 %v17254_v16  ;;  %16623 = vmatpush3.bf16.msra.mxu1 %v17266_v63  ;;  %v17269_v63 = vld [vmem:[%s23679_s7 + $0x8] sm:$0xff]   ;;  %v467_v38 = vld [vmem:[#allocation3 + $0x84] sm:$0x1] }
 0x28f   : > { %v7355_v3 = vshrl.u32 %v15127_v7, 16  ;;  %v7358_v23 = vshll.u32 %v15127_v7, 16  ;;  %v9804_v32 = vsel %vm17618_vm13, %v9799_v33, %v9803_v53  ;;  %v21628_v41 = vrot.slane %v9812_v43, 4  ;;  %16624 = vmatprep.subr.bf16.mxu1 %v17268_v44  ;;  %v21645_v48 = vld [vmem:[%s23678_s6 + $0x218] sm:$0xff]   ;;  %v7529_v43 = vld [vmem:[#allocation3 + $0x90] sm:$0xf] }
 0x290   : > { %v7374_v10 = vrot.slane %v7372_v2, 7  ;;  %v7398_v21 = vshrl.u32 %v15132_v30, 16  ;;  %v7401_v13 = vshll.u32 %v15132_v30, 16  ;;  %v14677_v6 = vcombine.low %v9794_v9, %v9804_v32  ;;  %16539 = vmatmul.mubr.bf16.gmra.mxu0 %v17252_v5  ;;  %v521_v32 = vld [vmem:[#allocation3 + $0x8c] sm:$0x1] }
 0x291   : > { %v7357_v27 = vrot.slane %v7355_v3, 7  ;;  %v9818_v53 = vsel %vm17618_vm13, %v21628_v41, %v21621_v22  ;;  %v9821_v62 = vrot.slane %v9819_v29, 4  ;;  %v9825_v37 = vshll.u32 %v21619_v18, 16  ;;  %16542 = vmatprep.mubr.bf16.mxu0 %v17253_v36  ;;  %16587 = vmatpush3.bf16.msra.mxu0 %v17254_v16  ;;  %v524_v29 = vld [vmem:[#allocation3 + $0x98] sm:$0x1] }
 0x292   : > { %v7377_v7 = vor.u32 %v7375_v47, %v7374_v10  ;;  %v7379_v9 = vrot.slane %v7374_v10, 4  ;;  %v21647_v33 = vrot.slane %v7398_v21, 7  ;;  %16571 = vmatmul.mubr.bf16.gmra.mxu1 %v14677_v6  ;;  %v6519_v5 = vadd.f32 %v21407_v50, %v21368_v25  ;;  %16588 = vmatprep.subr.bf16.mxu0 %v17256_v12  ;;  %v16288_v50 = vpop.f32.mrf.mxu0  ;;  %v16320_v21 = vpop.f32.mrf.mxu1  ;;  %v17258_v6 = vld [vmem:[#allocation3 + $0x54] sm:$0xff]  }
 0x293   : > { %v7360_v2 = vor.u32 %v7358_v23, %v7357_v27  ;;  %v7362_v30 = vrot.slane %v7357_v27, 4  ;;  %v9822_v16 = vor.u32 %v9821_v62, %v21621_v22  ;;  %v9827_v3 = vrot.slane %v9825_v37, 5  ;;  %16625 = vmatpush3.bf16.msra.mxu1 %v17268_v44  ;;  %v476_v23 = vld [vmem:[#allocation3 + $0xa8] sm:$0x1]  ;;  %v21678_v62 = vld [vmem:[#allocation3 + $0x58] sm:$0xf] }
 0x294   : > { %v7378_v41 = vsel %vm17608_vm12, %v7370_v57, %v7377_v7  ;;  %v7520_v36 = vsel %vm17519_vm2, %v7379_v9, %v7519_v15  ;;  %v7403_v10 = vor.u32 %v7401_v13, %v21647_v33  ;;  %v7404_v25 = vrot.slane %v21647_v33, 4  ;;  %16626 = vmatprep.subr.bf16.mxu1 %v17269_v63  ;;  %v17271_v44 = vld [vmem:[%s23679_s7] sm:$0xff]   ;;  %v9700_v13 = vld [vmem:[#allocation3 + $0x54] sm:$0xf]  ;;  %v17401_v47 = vld [vmem:[#allocation3 + $0x38] sm:$0x1] }
 0x295   : > { %7518 = vst [vmem:[#allocation3 + $0x7c] sm:$0xf] %v7378_v41  ;;  %7521 = vst [vmem:[#allocation3 + $0x80] sm:$0x1] %v7520_v36  ;;  %v7361_v4 = vsel %vm17608_vm12, %v7353_v59, %v7360_v2  ;;  %v7513_v57 = vsel %vm17519_vm2, %v7362_v30, %v7512_v35  ;;  %v9823_v22 = vrot.slane %v9822_v16, 4  ;;  %v6944_v15 = vadd.f32 %v21612_v34, %v6519_v5  ;;  %v17262_v34 = vld [vmem:[%s23678_s6 + $0x210] sm:$0xff]   ;;  %v21695_v5 = vpop.f32.mrf.mxu1 }
 0x296   : > { %16589 = vmatpush3.bf16.msra.mxu0 %v17256_v12  ;;  %7511 = vst [vmem:[#allocation3 + $0x70] sm:$0xf] %v7361_v4  ;;  %7514 = vst [vmem:[#allocation3 + $0x74] sm:$0x1] %v7513_v57  ;;  %v7530_v27 = vsel %vm17597_vm11, %v7403_v10, %v7529_v43  ;;  %v468_v20 = vsel %vm17519_vm2, 0, %v467_v38  ;;  %v7238_v59 = vadd.f32 %v21596_v17, %v21580_v51  ;;  %v525_v37 = vsel %vm17551_vm6, 0, %v524_v29  ;;  %v6906_v43 = vpop.f32.mrf.mxu0 }
 0x297   : > { %v6517_v35 = vadd.f32 %v21421_v54, %v21381_v39  ;;  %16590 = vmatprep.subr.bf16.mxu0 %v21645_v48  ;;  %7531 = vst [vmem:[#allocation3 + $0x90] sm:$0xf] %v7530_v27  ;;  %v9828_v12 = vsel %vm17618_vm13, %v9823_v22, %v9827_v3  ;;  %469 = vst [vmem:[#allocation3 + $0x84] sm:$0x1] %v468_v20  ;;  %v7241_v51 = vadd.f32 %v21614_v8, %v6944_v15  ;;  %v17259_v54 = vld [vmem:[#allocation3 + $0x60] sm:$0xff]   ;;  %v17265_v29 = vld [vmem:[%s23678_s6 + $0x208] sm:$0xff]  }
 0x298   : > { %v6522_v39 = vadd.f32 %v21432_v42, %v21405_v61  ;;  %16627 = vmatpush3.bf16.msra.mxu1 %v17269_v63  ;;  %v14678_v17 = vcombine.low %v9818_v53, %v9828_v12  ;;  %v7254_v38 = vmul.f32 %v21514_v0, %v7238_v59  ;;  %526 = vst [vmem:[#allocation3 + $0x98] sm:$0x1] %v525_v37  ;;  %v522_v9 = vsel %vm17551_vm6, 0, %v521_v32  ;;  %v21700_v61 = vld [vmem:[%s23678_s6 + $0x38] sm:$0xff]   ;;  %v21707_v53 = vld [vmem:[#allocation3 + $0x5c] sm:$0x1] }
 0x299   : > { %v6942_v7 = vadd.f32 %v21630_v56, %v6517_v35  ;;  %16543 = vmatmul.mubr.bf16.gmra.mxu0 %v17258_v6  ;;  %16628 = vmatprep.subr.bf16.mxu1 %v17271_v44  ;;  %v7257_v42 = vmul.f32 %v21514_v0, %v7241_v51  ;;  %523 = vst [vmem:[#allocation3 + $0x8c] sm:$0x1] %v522_v9  ;;  %v477_v63 = vsel %vm17519_vm2, 0, %v476_v23  ;;  %v9830_v16 = vshrl.u32 %v9700_v13, 16  ;;  %v21720_v23 = vld [vmem:[#allocation3 + $0x60] sm:$0xf]  ;;  %v21736_v51 = vpop.f32.mrf.mxu0 }
 0x29a   : > { %v6947_v8 = vadd.f32 %v16288_v50, %v6522_v39  ;;  %v6520_v56 = vadd.f32 %v21444_v55, %v21416_v40  ;;  %16546 = vmatprep.mubr.bf16.mxu0 %v17259_v54  ;;  %16591 = vmatpush3.bf16.msra.mxu0 %v21645_v48  ;;  %v7270_v2 = vadd.f32 %v21520_v14, %v7254_v38  ;;  %v9833_v40 = vshll.u32 %v9700_v13, 16  ;;  %v17267_v20 = vld [vmem:[%s23678_s6 + $0x200] sm:$0xff]  }
 0x29b   : > { %16574 = vmatprep.mubr.bf16.mxu1 %v14678_v17  ;;  %v7239_v30 = vadd.f32 %v21632_v11, %v6942_v7  ;;  %478 = vst [vmem:[#allocation3 + $0xa8] sm:$0x1] %v477_v63  ;;  %16592 = vmatprep.subr.bf16.mxu0 %v17262_v34  ;;  %v7273_v55 = vadd.f32 %v21520_v14, %v7257_v42  ;;  %v9839_v48 = vshll.u32 %v21678_v62, 16  ;;  %v9832_v10 = vrot.slane %v9830_v16, 4  ;;  %v21722_v11 = vpop.f32.mrf.mxu1 }
 0x29c   : > { %v21716_v3 = vadd.f32 %v6906_v43, %v6520_v56  ;;  %v7244_v32 = vadd.f32 %v16320_v21, %v6947_v8  ;;  %16629 = vmatpush3.bf16.msra.mxu1 %v17271_v44  ;;  %v7286_v41 = vmax.f32 %v7270_v2, 0.0  ;;  %v9835_v50 = vrot.slane %v9833_v40, 5 }
 0x29d   : > { %v7255_v36 = vmul.f32 %v21514_v0, %v7239_v30  ;;  %16678 = vmatprep.subr.bf16.mxu1 %v21700_v61  ;;  %v7289_v4 = vmax.f32 %v7273_v55, 0.0  ;;  %v21726_v22 = vrot.slane %v9839_v48, 5  ;;  %v9843_v21 = vshrl.u32 %v21678_v62, 16  ;;  %v17264_v44 = vld [vmem:[#allocation3 + $0x6c] sm:$0xff]   ;;  %v21738_v38 = vpop.f32.mrf.mxu1  ;;  %v21747_v30 = vld [vmem:[%s23678_s6 + $0x78] sm:$0xff]  }
 0x29e   : > { %v7260_v57 = vmul.f32 %v21514_v0, %v7244_v32  ;;  %16593 = vmatpush3.bf16.msra.mxu0 %v17262_v34  ;;  %v15130_v15 = vpack.c.bf16 %v7286_v41, %v7286_v41  ;;  %v9836_v6 = vor.u32 %v9835_v50, %v9832_v10  ;;  %v9849_v27 = vshll.u32 %v21707_v53, 16  ;;  %v7522_v16 = vld [vmem:[#allocation3 + $0x84] sm:$0xf]  ;;  %v21751_v41 = vpop.f32.mrf.mxu0 }
 0x29f   : > { %v7271_v13 = vadd.f32 %v21520_v14, %v7255_v36  ;;  %16594 = vmatprep.subr.bf16.mxu0 %v17265_v29  ;;  %v15133_v59 = vpack.c.bf16 %v7289_v4, %v7289_v4  ;;  %v9845_v12 = vrot.slane %v9843_v21, 4  ;;  %v9854_v37 = vshrl.u32 %v21720_v23, 16  ;;  %v21749_v48 = vld [vmem:[#allocation3 + $0x64] sm:$0xf]  ;;  %v7533_v50 = vld [vmem:[#allocation3 + $0x98] sm:$0x1]  ;;  %v21755_v21 = vpop.f32.mrf.mxu1 }
 0x2a0   : > { %v7276_v35 = vadd.f32 %v21520_v14, %v7260_v57  ;;  %v7381_v34 = vshrl.u32 %v15130_v15, 16  ;;  %v7384_v39 = vshll.u32 %v15130_v15, 16  ;;  %v9837_v17 = vrot.slane %v9836_v6, 4 }
 0x2a1   : > { %v7287_v54 = vmax.f32 %v7271_v13, 0.0  ;;  %16547 = vmatmul.mubr.bf16.gmra.mxu0 %v17264_v44  ;;  %v7406_v7 = vshrl.u32 %v15133_v59, 16  ;;  %v7409_v9 = vshll.u32 %v15133_v59, 16  ;;  %v9846_v42 = vor.u32 %v9845_v12, %v21726_v22  ;;  %v7526_v13 = vld [vmem:[#allocation3 + $0x8c] sm:$0x1]  ;;  %v7219_v33 = vpop.f32.mrf.mxu1 }
 0x2a2   : > { %v7292_v43 = vmax.f32 %v7276_v35, 0.0  ;;  %16595 = vmatpush3.bf16.msra.mxu0 %v17265_v29  ;;  %v7383_v8 = vrot.slane %v7381_v34, 7  ;;  %v9842_v63 = vsel %vm17618_vm13, %v9837_v17, %v21726_v22  ;;  %v9851_v2 = vrot.slane %v9849_v27, 5  ;;  %v21753_v22 = vld [vmem:[#allocation3 + $0x68] sm:$0x1] }
 0x2a3   : > { %v15131_v56 = vpack.c.bf16 %v7287_v54, %v7287_v54  ;;  %16596 = vmatprep.subr.bf16.mxu0 %v17267_v20  ;;  %v7408_v40 = vrot.slane %v7406_v7, 7  ;;  %v9847_v32 = vrot.slane %v9846_v42, 4  ;;  %v9856_v29 = vrot.slane %v9854_v37, 4  ;;  %v7543_v12 = vld [vmem:[#allocation3 + $0xa8] sm:$0xf] }
 0x2a4   : > { %v15136_v55 = vpack.c.bf16 %v7292_v43, %v7292_v43  ;;  %v7386_v36 = vor.u32 %v7384_v39, %v7383_v8  ;;  %v7387_v10 = vrot.slane %v7383_v8, 4  ;;  %v9857_v34 = vshll.u32 %v21720_v23, 16  ;;  %v473_v7 = vld [vmem:[#allocation3 + $0x9c] sm:$0x1] }
 0x2a5   : > { %v7389_v4 = vshrl.u32 %v15131_v56, 16  ;;  %v7392_v57 = vshll.u32 %v15131_v56, 16  ;;  %v7411_v44 = vor.u32 %v7409_v9, %v7408_v40  ;;  %v7413_v15 = vrot.slane %v7408_v40, 4  ;;  %v16292_v9 = vpop.f32.mrf.mxu0  ;;  %v530_v56 = vld [vmem:[#allocation3 + $0xb0] sm:$0x1] }
 0x2a6   : > { %v7432_v6 = vshrl.u32 %v15136_v55, 16  ;;  %v7435_v27 = vshll.u32 %v15136_v55, 16  ;;  %16597 = vmatpush3.bf16.msra.mxu0 %v17267_v20  ;;  %v7523_v59 = vsel %vm17597_vm11, %v7386_v36, %v7522_v16  ;;  %v9852_v37 = vsel %vm17618_vm13, %v9847_v32, %v9851_v2  ;;  %v527_v40 = vld [vmem:[#allocation3 + $0xa4] sm:$0x1] }
 0x2a7   : > { %v7391_v35 = vrot.slane %v7389_v4, 7  ;;  %16646 = vmatprep.subr.bf16.mxu0 %v21747_v30  ;;  %7524 = vst [vmem:[#allocation3 + $0x84] sm:$0xf] %v7523_v59  ;;  %v7412_v39 = vsel %vm17608_vm12, %v7404_v25, %v7411_v44  ;;  %v7534_v20 = vsel %vm17519_vm2, %v7413_v15, %v7533_v50  ;;  %v14679_v17 = vcombine.low %v9842_v63, %v9852_v37 }
 0x2a8   : > { %v21769_v54 = vrot.slane %v7432_v6, 7  ;;  %7532 = vst [vmem:[#allocation3 + $0x94] sm:$0xf] %v7412_v39  ;;  %7535 = vst [vmem:[#allocation3 + $0x98] sm:$0x1] %v7534_v20  ;;  %v9859_v42 = vrot.slane %v9857_v34, 5  ;;  %v6523_v15 = vadd.f32 %v21453_v24, %v21427_v46  ;;  %v6922_v6 = vpop.f32.mrf.mxu0  ;;  %v6526_v24 = vadd.f32 %v21463_v58, %v21448_v49 }
 0x2a9   : > { %v7394_v43 = vor.u32 %v7392_v57, %v7391_v35  ;;  %v7396_v23 = vrot.slane %v7391_v35, 4  ;;  %v9863_v8 = vshll.u32 %v21749_v48, 16  ;;  %16575 = vmatmul.mubr.bf16.gmra.mxu1 %v14679_v17  ;;  %v9867_v16 = vshrl.u32 %v21749_v48, 16  ;;  %v16325_v35 = vpop.f32.mrf.mxu1  ;;  %v23960_v20 = vld [vmem:[#allocation24_spill] sm:$0xff]  ;;  %v479_v58 = vld [vmem:[#allocation3 + $0xb4] sm:$0x1] }
 0x2aa   : > { %v7437_v2 = vor.u32 %v7435_v27, %v21769_v54  ;;  %v7438_v25 = vrot.slane %v21769_v54, 4  ;;  %v9873_v63 = vshll.u32 %v21753_v22, 16  ;;  %v9860_v36 = vor.u32 %v9859_v42, %v9856_v29  ;;  %v482_v27 = vld [vmem:[#allocation3 + $0xc0] sm:$0x1]  ;;  %v16293_v49 = vpop.f32.mrf.mxu0 }
 0x2ab   : > { %v7395_v55 = vsel %vm17608_vm12, %v7387_v10, %v7394_v43  ;;  %v7527_v32 = vsel %vm17519_vm2, %v7396_v23, %v7526_v13  ;;  %v9865_v50 = vrot.slane %v9863_v8, 5  ;;  %v9869_v57 = vrot.slane %v9867_v16, 4  ;;  %v23961_v23 = vld [vmem:[#allocation41_spill] sm:$0xff]  ;;  %v536_v16 = vld [vmem:[#allocation3 + $0xc8] sm:$0x1] }
 0x2ac   : > { %7525 = vst [vmem:[#allocation3 + $0x88] sm:$0xf] %v7395_v55  ;;  %7528 = vst [vmem:[#allocation3 + $0x8c] sm:$0x1] %v7527_v32  ;;  %v7544_v4 = vsel %vm17597_vm11, %v7437_v2, %v7543_v12  ;;  %v9875_v44 = vrot.slane %v9873_v63, 5  ;;  %v9861_v59 = vrot.slane %v9860_v36, 4  ;;  %v7242_v29 = vadd.f32 %v21695_v5, %v21716_v3 }
 0x2ad   : > { %7545 = vst [vmem:[#allocation3 + $0xa8] sm:$0xf] %v7544_v4  ;;  %v474_v10 = vsel %vm17519_vm2, 0, %v473_v7  ;;  %v6521_v13 = vadd.f32 %v21461_v26, %v21437_v19  ;;  %v9870_v12 = vor.u32 %v9869_v57, %v9865_v50  ;;  %v6948_v37 = vadd.f32 %v21736_v51, %v6523_v15  ;;  %v23962_v42 = vld [vmem:[#allocation9_spill] sm:$0xff] }
 0x2ae   : > { %475 = vst [vmem:[#allocation3 + $0x9c] sm:$0x1] %v474_v10  ;;  %v531_v46 = vsel %vm17551_vm6, 0, %v530_v56  ;;  %v9866_v34 = vsel %vm17618_vm13, %v9861_v59, %v9865_v50  ;;  %v7258_v39 = vmul.f32 %v21514_v0, %v7242_v29  ;;  %v528_v19 = vsel %vm17551_vm6, 0, %v527_v40  ;;  %v7222_v56 = vpop.f32.mrf.mxu1 }
 0x2af   : > { %v6946_v5 = vadd.f32 %v21751_v41, %v6521_v13  ;;  %532 = vst [vmem:[#allocation3 + $0xb0] sm:$0x1] %v531_v46  ;;  %v9871_v26 = vrot.slane %v9870_v12, 4  ;;  %v7245_v3 = vadd.f32 %v21722_v11, %v6948_v37  ;;  %v6951_v51 = vadd.f32 %v16292_v9, %v6526_v24  ;;  %529 = vst [vmem:[#allocation3 + $0xa4] sm:$0x1] %v528_v19 }
 0x2b0   : > { %v6524_v17 = vadd.f32 %v23960_v20, %v21456_v52  ;;  %v7274_v7 = vadd.f32 %v21520_v14, %v7258_v39  ;;  %v483_v41 = vsel %vm17519_vm2, 0, %v482_v27  ;;  %v6527_v8 = vadd.f32 %v23962_v42, %v23961_v23  ;;  %v23964_v27 = vld [vmem:[#allocation13_spill] sm:$0xff]  ;;  %v533_v46 = vld [vmem:[#allocation3 + $0xbc] sm:$0x1]  ;;  %v17393_v20 = vld [vmem:[%s23676_s4] ss:$0 sm:$0xff] }
 0x2b1   : > { %v7243_v43 = vadd.f32 %v21738_v38, %v6946_v5  ;;  %v9876_v11 = vsel %vm17618_vm13, %v9871_v26, %v9875_v44  ;;  %v7261_v9 = vmul.f32 %v21514_v0, %v7245_v3  ;;  %484 = vst [vmem:[#allocation3 + $0xc0] sm:$0x1] %v483_v41  ;;  %v7248_v52 = vadd.f32 %v21755_v21, %v6951_v51  ;;  %v21815_v32 = vpop.f32.mrf.mxu1  ;;  %v6925_v44 = vpop.f32.mrf.mxu0 }
 0x2b2   : > { %v6949_v2 = vadd.f32 %v6922_v6, %v6524_v17  ;;  %v14680_v63 = vcombine.low %v9866_v34, %v9876_v11  ;;  %v7290_v40 = vmax.f32 %v7274_v7, 0.0  ;;  %v6952_v55 = vadd.f32 %v16293_v49, %v6527_v8  ;;  %v23963_v6 = vld [vmem:[#allocation38_spill] sm:$0xff] }
 0x2b3   : > { %v7259_v38 = vmul.f32 %v21514_v0, %v7243_v43  ;;  %v7277_v36 = vadd.f32 %v21520_v14, %v7261_v9  ;;  %v7264_v50 = vmul.f32 %v21514_v0, %v7248_v52  ;;  %v480_v4 = vsel %vm17519_vm2, 0, %v479_v58  ;;  %v21826_v29 = vpop.f32.mrf.mxu1 }
 0x2b4   : > { %v7246_v57 = vadd.f32 %v7219_v33, %v6949_v2  ;;  %16578 = vmatprep.mubr.bf16.mxu1 %v14680_v63  ;;  %v15134_v15 = vpack.c.bf16 %v7290_v40, %v7290_v40  ;;  %481 = vst [vmem:[#allocation3 + $0xb4] sm:$0x1] %v480_v4  ;;  %v6525_v59 = vadd.f32 %v23964_v27, %v23963_v6  ;;  %v537_v10 = vsel %vm17551_vm6, 0, %v536_v16  ;;  %v10111_v4 = vld [vmem:[#allocation3 + $0x18] sm:$0xe] }
 0x2b5   : > { %v7275_v21 = vadd.f32 %v21520_v14, %v7259_v38  ;;  %v7293_v13 = vmax.f32 %v7277_v36, 0.0  ;;  %v7280_v12 = vadd.f32 %v21520_v14, %v7264_v50  ;;  %538 = vst [vmem:[#allocation3 + $0xc8] sm:$0x1] %v537_v10  ;;  %v7249_v33 = vadd.f32 %v16325_v35, %v6952_v55  ;;  %v21830_v19 = vpop.f32.mrf.mxu1  ;;  %v7536_v43 = vld [vmem:[#allocation3 + $0x9c] sm:$0xf] }
 0x2b6   : > { %v7262_v37 = vmul.f32 %v21514_v0, %v7246_v57  ;;  %v7415_v24 = vshrl.u32 %v15134_v15, 16  ;;  %v7418_v34 = vshll.u32 %v15134_v15, 16  ;;  %v6950_v5 = vadd.f32 %v6925_v44, %v6525_v59  ;;  %v7547_v38 = vld [vmem:[#allocation3 + $0xb0] sm:$0x1]  ;;  %v17394_v55 = vld [vmem:[%s23677_s5] ss:$0 sm:$0xff] }
 0x2b7   : > { %v7291_v39 = vmax.f32 %v7275_v21, 0.0  ;;  %v15137_v26 = vpack.c.bf16 %v7293_v13, %v7293_v13  ;;  %v7296_v3 = vmax.f32 %v7280_v12, 0.0  ;;  %v7265_v17 = vmul.f32 %v17393_v20, %v7249_v33  ;;  %v21838_v7 = vpop.f32.mrf.mxu1  ;;  %v7540_v21 = vld [vmem:[#allocation3 + $0xa4] sm:$0x1] }
 0x2b8   : > { %v7278_v51 = vadd.f32 %v21520_v14, %v7262_v37  ;;  %v7417_v49 = vrot.slane %v7415_v24, 7  ;;  %v534_v35 = vsel %vm17551_vm6, 0, %v533_v46  ;;  %v7247_v58 = vadd.f32 %v7222_v56, %v6950_v5  ;;  %23965 = vst [vmem:[#allocation43_spill] sm:$0xff] %v21838_v7  ;;  %v7557_v12 = vld [vmem:[#allocation3 + $0xc0] sm:$0xf] }
 0x2b9   : > { %v15135_v0 = vpack.c.bf16 %v7291_v39, %v7291_v39  ;;  %v7440_v41 = vshrl.u32 %v15137_v26, 16  ;;  %v15140_v23 = vpack.c.bf16 %v7296_v3, %v7296_v3  ;;  %535 = vst [vmem:[#allocation3 + $0xbc] sm:$0x1] %v534_v35  ;;  %v7443_v14 = vshll.u32 %v15137_v26, 16  ;;  %v21845_v57 = vpop.f32.mrf.mxu1  ;;  %v10112_v39 = vld [vmem:[#allocation3 + $0x24] sm:$0xe] }
 0x2ba   : > { %v7294_v42 = vmax.f32 %v7278_v51, 0.0  ;;  %v7420_v8 = vor.u32 %v7418_v34, %v7417_v49  ;;  %v7281_v36 = vadd.f32 %v17394_v55, %v7265_v17  ;;  %v7263_v50 = vmul.f32 %v17393_v20, %v7247_v58 }
 0x2bb   : > { %v7423_v11 = vshrl.u32 %v15135_v0, 16  ;;  %v7426_v9 = vshll.u32 %v15135_v0, 16  ;;  %v7442_v2 = vrot.slane %v7440_v41, 7  ;;  %v7466_v52 = vshrl.u32 %v15140_v23, 16  ;;  %v7550_v54 = vld [vmem:[#allocation3 + $0xb4] sm:$0xf] }
 0x2bc   : > { %v7469_v16 = vshll.u32 %v15140_v23, 16  ;;  %v15138_v63 = vpack.c.bf16 %v7294_v42, %v7294_v42  ;;  %v7537_v40 = vsel %vm17597_vm11, %v7420_v8, %v7536_v43  ;;  %v7421_v59 = vrot.slane %v7417_v49, 4  ;;  %v17395_v0 = vld [vmem:[#allocation3 + $0x1c] sm:$0xf]  ;;  %v9706_v42 = vld [vmem:[#allocation3 + $0x6c] sm:$0xf] }
 0x2bd   : > { %v7425_v56 = vrot.slane %v7423_v11, 7  ;;  %7538 = vst [vmem:[#allocation3 + $0x9c] sm:$0xf] %v7537_v40  ;;  %v7445_v44 = vor.u32 %v7443_v14, %v7442_v2  ;;  %v7447_v15 = vrot.slane %v7442_v2, 4  ;;  %v21847_v6 = vrot.slane %v7466_v52, 7 }
 0x2be   : > { %v7449_v27 = vshrl.u32 %v15138_v63, 16  ;;  %v7297_v37 = vmax.f32 %v7281_v36, 0.0  ;;  %v7452_v34 = vshll.u32 %v15138_v63, 16  ;;  %v7279_v17 = vadd.f32 %v17394_v55, %v7263_v50  ;;  %v17396_v2 = vld [vmem:[#allocation3 + $0x20] sm:$0x1] }
 0x2bf   : > { %v7428_v10 = vor.u32 %v7426_v9, %v7425_v56  ;;  %v7430_v13 = vrot.slane %v7425_v56, 4  ;;  %v7446_v33 = vsel %vm17608_vm12, %v7438_v25, %v7445_v44  ;;  %v7548_v46 = vsel %vm17519_vm2, %v7447_v15, %v7547_v38  ;;  %v21862_v25 = vpop.f32.mrf.mxu1  ;;  %v17397_v38 = vld [vmem:[#allocation3 + $0x28] sm:$0xf]  ;;  %v21872_v55 = vld [vmem:[#allocation3 + $0x70] sm:$0xf] }
 0x2c0   : > { %v7471_v24 = vor.u32 %v7469_v16, %v21847_v6  ;;  %7546 = vst [vmem:[#allocation3 + $0xac] sm:$0xf] %v7446_v33  ;;  %7549 = vst [vmem:[#allocation3 + $0xb0] sm:$0x1] %v7548_v46  ;;  %v21860_v3 = vrot.slane %v7449_v27, 7  ;;  %v15141_v51 = vpack.c.bf16 %v7297_v37, %v7297_v37  ;;  %v14690_v49 = vrot.slane %v10111_v4, 9 }
 0x2c1   : > { %v7429_v5 = vsel %vm17608_vm12, %v7421_v59, %v7428_v10  ;;  %v7541_v26 = vsel %vm17519_vm2, %v7430_v13, %v7540_v21  ;;  %23966 = vst [vmem:[#allocation46_spill] sm:$0xff] %v21862_v25  ;;  %v10145_v35 = vrot.slane %v17395_v0, 5  ;;  %v7472_v58 = vrot.slane %v21847_v6, 4  ;;  %v21874_v36 = vpop.f32.mrf.mxu1  ;;  %v7561_v50 = vld [vmem:[#allocation3 + $0xc8] sm:$0x1] }
 0x2c2   : > { %7539 = vst [vmem:[#allocation3 + $0xa0] sm:$0xf] %v7429_v5  ;;  %7542 = vst [vmem:[#allocation3 + $0xa4] sm:$0x1] %v7541_v26  ;;  %v7558_v20 = vsel %vm17597_vm11, %v7471_v24, %v7557_v12  ;;  %v7454_v43 = vor.u32 %v7452_v34, %v21860_v3  ;;  %v7474_v41 = vshrl.u32 %v15141_v51, 16  ;;  %v7477_v23 = vshll.u32 %v15141_v51, 16 }
 0x2c3   : > { %7559 = vst [vmem:[#allocation3 + $0xc0] sm:$0xf] %v7558_v20  ;;  %v7295_v8 = vmax.f32 %v7279_v17, 0.0  ;;  %v10146_v11 = vsel %vm17647_vm14, %v14690_v49, %v10145_v35  ;;  %v10147_v9 = vrot.slane %v10145_v35, 4  ;;  %v10148_v52 = vrot.slane %v17396_v2, 5  ;;  %23968 = vst [vmem:[#allocation34_spill] sm:$0xff] %v21874_v36  ;;  %v21889_v20 = vpop.f32.mrf.mxu1 }
 0x2c4   : > { %v7551_v16 = vsel %vm17597_vm11, %v7454_v43, %v7550_v54  ;;  %v7476_v63 = vrot.slane %v7474_v41, 7  ;;  %v14691_v40 = vrot.slane %v10112_v39, 9  ;;  %v10152_v56 = vrot.slane %v17397_v38, 5  ;;  %v17398_v15 = vld [vmem:[#allocation3 + $0x2c] sm:$0x1]  ;;  %23969 = vst [vmem:[#allocation18_spill] sm:$0xff] %v21889_v20 }
 0x2c5   : > { %7552 = vst [vmem:[#allocation3 + $0xb4] sm:$0xf] %v7551_v16  ;;  %v15139_v4 = vpack.c.bf16 %v7295_v8, %v7295_v8  ;;  %v10149_v44 = vsel %vm17647_vm14, %v10147_v9, %v10148_v52  ;;  %v10155_v21 = vrot.slane %v17398_v15, 5  ;;  %v9878_v6 = vshrl.u32 %v9706_v42, 16  ;;  %v21880_v13 = vld [vmem:[#allocation3 + $0x74] sm:$0x1] }
 0x2c6   : > { %v7479_v27 = vor.u32 %v7477_v23, %v7476_v63  ;;  %v7481_v31 = vrot.slane %v7476_v63, 4  ;;  %v14714_v59 = vcombine.low %v10146_v11, %v10149_v44  ;;  %v10153_v10 = vsel %vm17647_vm14, %v14691_v40, %v10152_v56  ;;  %v21882_v24 = vpop.f32.mrf.mxu0  ;;  %v10113_v54 = vld [vmem:[#allocation3 + $0x30] sm:$0xe]  ;;  %v10114_v51 = vld [vmem:[#allocation3 + $0x3c] sm:$0xe] }
 0x2c7   : > { %v7457_v12 = vshrl.u32 %v15139_v4, 16  ;;  %v7460_v37 = vshll.u32 %v15139_v4, 16  ;;  %v10154_v33 = vrot.slane %v10152_v56, 4  ;;  %v9880_v46 = vrot.slane %v9878_v6, 4  ;;  %v7554_v49 = vld [vmem:[#allocation3 + $0xbc] sm:$0x1] }
 0x2c8   : > { %v7480_v34 = vsel %vm17608_vm12, %v7472_v58, %v7479_v27  ;;  %v7562_v39 = vsel %vm17519_vm2, %v7481_v31, %v7561_v50  ;;  %16598 = vmatprep.mubr.bf16.mxu0 %v14714_v59  ;;  %v9881_v5 = vshll.u32 %v9706_v42, 16  ;;  %v9887_v26 = vshll.u32 %v21872_v55, 16  ;;  %v17272_v8 = vld [vmem:[%s23678_s6 + $0x70] sm:$0xff]   ;;  %v21899_v16 = vpop.f32.mrf.mxu0  ;;  %v17399_v38 = vld [vmem:[#allocation3 + $0x34] sm:$0xf]  ;;  %v21902_v50 = vld [vmem:[%s17512_s12] sm:$0xff] }
 0x2c9   : > { %7560 = vst [vmem:[#allocation3 + $0xc4] sm:$0xf] %v7480_v34  ;;  %7563 = vst [vmem:[#allocation3 + $0xc8] sm:$0x1] %v7562_v39  ;;  %v7459_v17 = vrot.slane %v7457_v12, 7  ;;  %v10156_v0 = vsel %vm17647_vm14, %v10154_v33, %v10155_v21  ;;  %v9891_v35 = vshrl.u32 %v21872_v55, 16 }
 0x2ca   : > { %v9897_v58 = vshll.u32 %v21880_v13, 16  ;;  %v7455_v43 = vrot.slane %v21860_v3, 4  ;;  %v14715_v41 = vcombine.low %v10153_v10, %v10156_v0  ;;  %v9883_v23 = vrot.slane %v9881_v5, 5  ;;  %v21905_v4 = vld [vmem:[%s17512_s12 + $0x8] sm:$0xff]  ;;  %v17400_v27 = vld [vmem:[#allocation3 + $0x40] sm:$0xf] }
 0x2cb   : > { %v9889_v42 = vrot.slane %v9887_v26, 5  ;;  %v7462_v11 = vor.u32 %v7460_v37, %v7459_v17  ;;  %v7464_v9 = vrot.slane %v7459_v17, 4  ;;  %v9893_v2 = vrot.slane %v9891_v35, 4  ;;  %v21907_v44 = vpop.f32.mrf.mxu1  ;;  %v17273_v59 = vld [vmem:[%s23678_s6 + $0x68] sm:$0xff]   ;;  %v10115_v10 = vld [vmem:[#allocation3 + $0x48] sm:$0xe]  ;;  %v21926_v17 = vpop.f32.mrf.mxu0 }
 0x2cc   : > { %v14692_v52 = vrot.slane %v10113_v54, 9  ;;  %16599 = vmatmul.mubr.bf16.vlgmr.msra.gmra.mxu0 %v14715_v41  ;;  %v9884_v63 = vor.u32 %v9883_v23, %v9880_v46  ;;  %v9899_v40 = vrot.slane %v9897_v58, 5  ;;  %v10159_v3 = vrot.slane %v17399_v38, 5  ;;  %v17402_v46 = vld [vmem:[#allocation3 + $0x44] sm:$0x1] }
 0x2cd   : > { %v14693_v56 = vrot.slane %v10114_v51, 9  ;;  %v7463_v15 = vsel %vm17608_vm12, %v7455_v43, %v7462_v11  ;;  %v7555_v21 = vsel %vm17519_vm2, %v7464_v9, %v7554_v49  ;;  %v9894_v6 = vor.u32 %v9893_v2, %v9889_v42  ;;  %16647 = vmatpush3.bf16.msra.mxu0 %v21747_v30  ;;  %v21917_v39 = vpop.f32.mrf.mxu1  ;;  %v21924_v51 = vld [vmem:[%s17512_s12 + $0x10] sm:$0xff]  ;;  %v21936_v43 = vld [vmem:[%s17512_s12 + $0x18] sm:$0xff]  ;;  %v10116_v41 = vld [vmem:[#allocation3 + $0x54] sm:$0xe] }
 0x2ce   : > { %v10166_v31 = vrot.slane %v17400_v27, 5  ;;  %7553 = vst [vmem:[#allocation3 + $0xb8] sm:$0xf] %v7463_v15  ;;  %7556 = vst [vmem:[#allocation3 + $0xbc] sm:$0x1] %v7555_v21  ;;  %v9885_v12 = vrot.slane %v9884_v63, 4  ;;  %16648 = vmatprep.subr.bf16.mxu0 %v17272_v8  ;;  %v10160_v5 = vsel %vm17647_vm14, %v14692_v52, %v10159_v3  ;;  %v10425_v35 = vpack.c.bf16 %v21905_v4, %v21902_v50 }
 0x2cf   : > { %v10161_v37 = vrot.slane %v10159_v3, 4  ;;  %v10162_v33 = vrot.slane %v17401_v47, 5  ;;  %v10169_v34 = vrot.slane %v17402_v46, 5  ;;  %v9895_v30 = vrot.slane %v9894_v6, 4  ;;  %v21938_v23 = vpop.f32.mrf.mxu1  ;;  %v21958_v15 = vld [vmem:[%s17512_s12 + $0x30] sm:$0xff]  ;;  %v21961_v21 = vld [vmem:[%s17512_s12 + $0x38] sm:$0xff] }
 0x2d0   : > { %v10167_v26 = vsel %vm17647_vm14, %v14693_v56, %v10166_v31  ;;  %v10168_v54 = vrot.slane %v10166_v31, 4  ;;  %v9890_v49 = vsel %vm17618_vm13, %v9885_v12, %v9889_v42  ;;  %v10173_v58 = vrot.slane %v21599_v60, 5  ;;  %23970 = vst [vmem:[#allocation39_spill] sm:$0xff] %v21938_v23  ;;  %v17275_v60 = vld [vmem:[%s23678_s6 + $0x60] sm:$0xff]   ;;  %v21963_v6 = vld [vmem:[#allocation3 + $0x60] sm:$0xf] }
 0x2d1   : > { %v10163_v0 = vsel %vm17647_vm14, %v10161_v37, %v10162_v33  ;;  %v9900_v11 = vsel %vm17618_vm13, %v9895_v30, %v9899_v40  ;;  %16649 = vmatpush3.bf16.msra.mxu0 %v17272_v8  ;;  %v14694_v2 = vrot.slane %v10115_v10, 9  ;;  %v10176_v3 = vrot.slane %v21619_v18, 5  ;;  %v21949_v56 = vld [vmem:[%s17512_s12 + $0x20] sm:$0xff]  ;;  %v21952_v40 = vld [vmem:[%s17512_s12 + $0x28] sm:$0xff]  ;;  %v10117_v8 = vld [vmem:[#allocation3 + $0x60] sm:$0xe]  ;;  %v21965_v18 = vpop.f32.mrf.mxu0  ;;  %v21967_v27 = vpop.f32.mrf.mxu1 }
 0x2d2   : > { %v14716_v9 = vcombine.low %v10160_v5, %v10163_v0  ;;  %v10170_v42 = vsel %vm17647_vm14, %v10168_v54, %v10169_v34  ;;  %v14681_v52 = vcombine.low %v9890_v49, %v9900_v11  ;;  %16650 = vmatprep.subr.bf16.mxu0 %v17273_v59  ;;  %v10175_v38 = vrot.slane %v10173_v58, 4  ;;  %23971 = vst [vmem:[#allocation15_spill] sm:$0xff] %v21965_v18  ;;  %v21976_v12 = vld [vmem:[%s23678_s6 + $0x58] sm:$0xff]   ;;  %v21980_v47 = vld [vmem:[%s17512_s12 + $0x40] sm:$0xff]  ;;  %v21983_v33 = vld [vmem:[%s17512_s12 + $0x48] sm:$0xff] }
 0x2d3   : > { %v14717_v63 = vcombine.low %v10167_v26, %v10170_v42  ;;  %v10174_v50 = vsel %vm17647_vm14, %v14694_v2, %v10173_v58  ;;  %v10180_v4 = vrot.slane %v21678_v62, 5  ;;  %23972 = vst [vmem:[#allocation42_spill] sm:$0xff] %v21967_v27  ;;  %v10426_v10 = vpack.c.bf16 %v21936_v43, %v21924_v51  ;;  %v10118_v26 = vld [vmem:[#allocation3 + $0x6c] sm:$0xe]  ;;  %v21987_v54 = vld [vmem:[%s17512_s12 + $0x50] sm:$0xff]  ;;  %v17281_v27 = vld [vmem:[%s23678_s6 + $0x48] sm:$0xff]  }
 0x2d4   : > { %16602 = vmatprep.mubr.bf16.mxu0 %v14716_v9  ;;  %16579 = vmatmul.mubr.bf16.gmra.mxu1 %v14681_v52  ;;  %v10177_v31 = vsel %vm17647_vm14, %v10175_v38, %v10176_v3  ;;  %v14695_v62 = vrot.slane %v10116_v41, 9  ;;  %v10187_v37 = vrot.slane %v21749_v48, 5  ;;  %v10183_v30 = vrot.slane %v21707_v53, 5  ;;  %v22004_v41 = vld [vmem:[%s17512_s12 + $0x58] sm:$0xff]  ;;  %v22006_v11 = vld [vmem:[#allocation3 + $0x68] sm:$0x1] }
 0x2d5   : > { %16603 = vmatmul.mubr.bf16.gmra.mxu0 %v14717_v63  ;;  %16630 = vmatprep.mubr.bf16.mxu1 %v10425_v35  ;;  %v14718_v46 = vcombine.low %v10174_v50, %v10177_v31  ;;  %v10182_v34 = vrot.slane %v10180_v4, 4  ;;  %v14696_v5 = vrot.slane %v10117_v8, 9  ;;  %v10427_v48 = vpack.c.bf16 %v21952_v40, %v21949_v56  ;;  %v21994_v35 = vld [vmem:[#allocation3 + $0x64] sm:$0xf]  ;;  %v22016_v38 = vld [vmem:[#allocation3 + $0x6c] sm:$0xf] }
 0x2d6   : > { %16651 = vmatpush3.bf16.msra.mxu0 %v17273_v59  ;;  %v10181_v51 = vsel %vm17647_vm14, %v14695_v62, %v10180_v4  ;;  %v10189_v49 = vrot.slane %v10187_v37, 4  ;;  %v10190_v0 = vrot.slane %v21753_v22, 5  ;;  %v10194_v43 = vrot.slane %v21872_v55, 5  ;;  %v22008_v22 = vpop.f32.mrf.mxu0  ;;  %v17276_v55 = vld [vmem:[%s23678_s6 + $0x30] sm:$0xff]   ;;  %v22025_v50 = vld [vmem:[%s17512_s12 + $0x60] sm:$0xff] }
 0x2d7   : > { %16652 = vmatprep.subr.bf16.mxu0 %v17275_v60  ;;  %16606 = vmatprep.mubr.bf16.mxu0 %v14718_v46  ;;  %v10184_v53 = vsel %vm17647_vm14, %v10182_v34, %v10183_v30  ;;  %v10188_v59 = vsel %vm17647_vm14, %v14696_v5, %v10187_v37  ;;  %v22010_v9 = vpop.f32.mrf.mxu1  ;;  %v14697_v2 = vrot.slane %v10118_v26, 9  ;;  %v10197_v52 = vrot.slane %v21880_v13, 5  ;;  %v22027_v13 = vld [vmem:[#allocation3 + $0x70] sm:$0xf]  ;;  %v22039_v34 = vld [vmem:[#allocation3 + $0x74] sm:$0x1] }
 0x2d8   : > { %23973 = vst [vmem:[#allocation48_spill] sm:$0xff] %v22010_v9  ;;  %v10191_v42 = vsel %vm17647_vm14, %v10189_v49, %v10190_v0  ;;  %v10670_v63 = vshrl.u32 %v21963_v6, 16  ;;  %v14719_v3 = vcombine.low %v10181_v51, %v10184_v53  ;;  %v10196_v56 = vrot.slane %v10194_v43, 4  ;;  %v22029_v4 = vpop.f32.mrf.mxu0  ;;  %v22037_v46 = vld [vmem:[%s17512_s12 + $0x68] sm:$0xff]  ;;  %v22041_v30 = vld [vmem:[#allocation3 + $0x78] sm:$0xf] }
 0x2d9   : > { %v10673_v8 = vshll.u32 %v21963_v6, 16  ;;  %v10683_v37 = vshrl.u32 %v21994_v35, 16  ;;  %v22043_v5 = vpop.f32.mrf.mxu1  ;;  %v14720_v26 = vcombine.low %v10188_v59, %v10191_v42  ;;  %v22047_v51 = vsel %vm17647_vm14, %v14697_v2, %v10194_v43  ;;  %v22086_v58 = vld [vmem:[%s23678_s6 + $0x20] sm:$0xff]   ;;  %v13173_v28 = vld [vmem:[#allocation3 + $0xc0] sm:$0xe] }
 0x2da   : > { %16653 = vmatpush3.bf16.msra.mxu0 %v17275_v60  ;;  %v10672_v62 = vrot.slane %v10670_v63, 4  ;;  %v10679_v60 = vshll.u32 %v21994_v35, 16  ;;  %23974 = vst [vmem:[#allocation16_spill] sm:$0xff] %v22043_v5  ;;  %v10694_v0 = vshrl.u32 %v22016_v38, 16  ;;  %v22050_v53 = vpop.f32.mrf.mxu0  ;;  %v17279_v63 = vld [vmem:[%s23678_s6 + $0x50] sm:$0xff]   ;;  %v10198_v31 = vsel %vm17647_vm14, %v10196_v56, %v10197_v52  ;;  %v17278_v52 = vld [vmem:[%s23678_s6 + $0x28] sm:$0xff]  }
 0x2db   : > { %16654 = vmatprep.subr.bf16.mxu0 %v21976_v12  ;;  %v10675_v49 = vrot.slane %v10673_v8, 5  ;;  %23975 = vst [vmem:[#allocation11_spill] sm:$0xff] %v22050_v53  ;;  %v10685_v59 = vrot.slane %v10683_v37, 4  ;;  %v10689_v43 = vshll.u32 %v22006_v11, 16  ;;  %v22075_v37 = vpop.f32.mrf.mxu1  ;;  %v14721_v7 = vcombine.low %v22047_v51, %v10198_v31 }
 0x2dc   : > { %16631 = vmatmul.mubr.bf16.vlgmr.msra.gmra.mxu1 %v10426_v10  ;;  %v22057_v40 = vrot.slane %v10679_v60, 5  ;;  %v10696_v2 = vrot.slane %v10694_v0, 4  ;;  %v10697_v10 = vshll.u32 %v22016_v38, 16  ;;  %v22063_v8 = vpop.f32.mrf.mxu0  ;;  %v22073_v60 = vld [vmem:[#allocation3 + $0x7c] sm:$0xf]  ;;  %23977 = vst [vmem:[#allocation45_spill] sm:$0xff] %v22075_v37  ;;  %v23986_v23 = vpack.c.bf16 %v22004_v41, %v21987_v54 }
 0x2dd   : > { %16607 = vmatmul.mubr.bf16.gmra.mxu0 %v14719_v3  ;;  %16679 = vmatpush3.bf16.msra.mxu1 %v21700_v61  ;;  %v10676_v42 = vor.u32 %v10675_v49, %v10672_v62  ;;  %v10703_v3 = vshll.u32 %v22027_v13, 16  ;;  %23976 = vst [vmem:[#allocation23_spill] sm:$0xff] %v22063_v8  ;;  %v10713_v62 = vshll.u32 %v22039_v34, 16  ;;  %v10718_v61 = vshrl.u32 %v22041_v30, 16  ;;  %v22106_v37 = vld [vmem:[#allocation3 + $0x84] sm:$0xf] }
 0x2de   : > { %16634 = vmatprep.mubr.bf16.mxu1 %v10427_v48  ;;  %16680 = vmatprep.subr.bf16.mxu1 %v17276_v55  ;;  %v10686_v56 = vor.u32 %v10685_v59, %v22057_v40  ;;  %v10707_v48 = vshrl.u32 %v22027_v13, 16  ;;  %v10699_v0 = vrot.slane %v10697_v10, 5  ;;  %v22080_v59 = vld [vmem:[#allocation3 + $0x80] sm:$0x1]  ;;  %v22092_v10 = vld [vmem:[%s17512_s12 + $0x70] sm:$0xff]  ;;  %v10721_v8 = vshll.u32 %v22041_v30, 16 }
 0x2df   : > { %16610 = vmatprep.mubr.bf16.mxu0 %v14720_v26  ;;  %16655 = vmatpush3.bf16.msra.mxu0 %v21976_v12  ;;  %v10677_v49 = vrot.slane %v10676_v42, 4  ;;  %v22078_v26 = vrot.slane %v10703_v3, 5  ;;  %v10691_v12 = vrot.slane %v10689_v43, 5  ;;  %v22095_v3 = vld [vmem:[%s17512_s12 + $0x78] sm:$0xff]  ;;  %v10720_v1 = vrot.slane %v10718_v61, 4  ;;  %v17285_v41 = vld [vmem:[%s23678_s6 + $0x8] sm:$0xff]  }
 0x2e0   : > { %16656 = vmatprep.subr.bf16.mxu0 %v17279_v63  ;;  %v10687_v20 = vrot.slane %v10686_v56, 4  ;;  %v10709_v42 = vrot.slane %v10707_v48, 4  ;;  %v10700_v18 = vor.u32 %v10699_v0, %v10696_v2  ;;  %v10727_v45 = vshll.u32 %v22073_v60, 16  ;;  %v22115_v0 = vld [vmem:[#allocation3 + $0x88] sm:$0xf] }
 0x2e1   : > { %16681 = vmatpush3.bf16.msra.mxu1 %v17276_v55  ;;  %v22100_v36 = vpop.f32.mrf.mxu0  ;;  %v10723_v48 = vrot.slane %v10721_v8, 5  ;;  %v10731_v53 = vshrl.u32 %v22073_v60, 16  ;;  %v22108_v55 = vpop.f32.mrf.mxu1  ;;  %v10682_v31 = vsel %vm17618_vm13, %v10677_v49, %v22057_v40  ;;  %v10715_v2 = vrot.slane %v10713_v62, 5  ;;  %v22207_v54 = vld [vmem:[#allocation3 + $0xa8] sm:$0xf] }
 0x2e2   : > { %16682 = vmatprep.subr.bf16.mxu1 %v17278_v52  ;;  %v10692_v43 = vsel %vm17618_vm13, %v10687_v20, %v10691_v12  ;;  %v10710_v56 = vor.u32 %v10709_v42, %v22078_v26  ;;  %23978 = vst [vmem:[#allocation49_spill] sm:$0xff] %v22108_v55  ;;  %v10701_v51 = vrot.slane %v10700_v18, 4  ;;  %v22113_v61 = vrot.slane %v10727_v45, 5  ;;  %v17283_v18 = vld [vmem:[%s23678_s6 + $0x40] sm:$0xff]   ;;  %v22131_v12 = vld [vmem:[#allocation3 + $0x90] sm:$0xf] }
 0x2e3   : > { %16657 = vmatpush3.bf16.msra.mxu0 %v17279_v63  ;;  %v22117_v20 = vpop.f32.mrf.mxu0  ;;  %v23979_v8 = vpack.c.bf16 %v21961_v21, %v21958_v15  ;;  %v22125_v63 = vld [vmem:[%s23678_s6 + $0x18] sm:$0xff]   ;;  %v10724_v40 = vor.u32 %v10723_v48, %v10720_v1  ;;  %v10733_v62 = vrot.slane %v10731_v53, 4  ;;  %v10737_v49 = vshll.u32 %v22080_v59, 16  ;;  %v22138_v42 = vld [vmem:[#allocation3 + $0x8c] sm:$0x1] }
 0x2e4   : > { %v10711_v45 = vrot.slane %v10710_v56, 4  ;;  %v14754_v15 = vcombine.low %v10682_v31, %v10692_v43  ;;  %v10745_v1 = vshll.u32 %v22106_v37, 16  ;;  %v22142_v53 = vld [vmem:[#allocation3 + $0x94] sm:$0xf]  ;;  %16658 = vmatprep.subr.bf16.mxu0 %v17281_v27  ;;  %v10751_v48 = vshll.u32 %v22115_v0, 16  ;;  %v22157_v31 = vpop.f32.mrf.mxu1 }
 0x2e5   : > { %16635 = vmatmul.mubr.bf16.gmra.mxu1 %v23979_v8  ;;  %16611 = vmatmul.mubr.bf16.gmra.mxu0 %v14721_v7  ;;  %v23980_v7 = vpack.c.bf16 %v21983_v33, %v21980_v47  ;;  %v10742_v8 = vshrl.u32 %v22106_v37, 16  ;;  %v22144_v56 = vpop.f32.mrf.mxu0  ;;  %v10706_v47 = vsel %vm17618_vm13, %v10701_v51, %v22078_v26  ;;  %v10734_v43 = vor.u32 %v10733_v62, %v22113_v61 }
 0x2e6   : > { %16683 = vmatpush3.bf16.msra.mxu1 %v17278_v52  ;;  %23981 = vst [vmem:[#allocation17_spill] sm:$0xff] %v22144_v56  ;;  %v10716_v33 = vsel %vm17618_vm13, %v10711_v45, %v10715_v2  ;;  %v17286_v52 = vld [vmem:[%s23678_s6 + $0xb8] sm:$0xff]   ;;  %23982 = vst [vmem:[#allocation19_spill] sm:$0xff] %v22157_v31  ;;  %16662 = vmatprep.mubr.bf16.mxu0 %v14754_v15  ;;  %v10747_v55 = vrot.slane %v10745_v1, 5  ;;  %v10755_v26 = vshrl.u32 %v22115_v0, 16  ;;  %v10739_v45 = vrot.slane %v10737_v49, 5 }
 0x2e7   : > { %16638 = vmatprep.mubr.bf16.mxu1 %v23980_v7  ;;  %16684 = vmatprep.subr.bf16.mxu1 %v22086_v58  ;;  %v10725_v7 = vrot.slane %v10724_v40, 4  ;;  %v10744_v21 = vrot.slane %v10742_v8, 4  ;;  %v22160_v51 = vpop.f32.mrf.mxu0  ;;  %v10735_v2 = vrot.slane %v10734_v43, 4  ;;  %v22162_v5 = vrot.slane %v10751_v48, 5  ;;  %v17284_v49 = vld [vmem:[%s23678_s6 + $0x10] sm:$0xff]  }
 0x2e8   : > { %16659 = vmatpush3.bf16.msra.mxu0 %v17281_v27  ;;  %23983 = vst [vmem:[#allocation20_spill] sm:$0xff] %v22160_v51  ;;  %v10761_v62 = vshll.u32 %v22138_v42, 16  ;;  %v10757_v31 = vrot.slane %v10755_v26, 4  ;;  %v22166_v27 = vld [vmem:[#allocation3 + $0x98] sm:$0x1]  ;;  %v10766_v40 = vshrl.u32 %v22131_v12, 16  ;;  %v14755_v1 = vcombine.low %v10706_v47, %v10716_v33  ;;  %v22187_v26 = vpop.f32.mrf.mxu1 }
 0x2e9   : > { %16660 = vmatprep.subr.bf16.mxu0 %v17283_v18  ;;  %v10748_v9 = vor.u32 %v10747_v55, %v10744_v21  ;;  %v10769_v15 = vshll.u32 %v22131_v12, 16  ;;  %v22170_v8 = vpop.f32.mrf.mxu0  ;;  %v22181_v55 = vld [vmem:[%s23678_s6 + $0xb0] sm:$0xff]   ;;  %v10775_v21 = vshll.u32 %v22142_v53, 16  ;;  %v10779_v43 = vshrl.u32 %v22142_v53, 16  ;;  %23985 = vst [vmem:[#allocation21_spill] sm:$0xff] %v22187_v26 }
 0x2ea   : > { %16685 = vmatpush3.bf16.msra.mxu1 %v22086_v58  ;;  %23984 = vst [vmem:[#allocation27_spill] sm:$0xff] %v22170_v8  ;;  %v10740_v58 = vsel %vm17618_vm13, %v10735_v2, %v10739_v45  ;;  %v22185_v48 = vld [vmem:[#allocation3 + $0x9c] sm:$0xf]  ;;  %v10730_v47 = vsel %vm17618_vm13, %v10725_v7, %v22113_v61  ;;  %v10758_v2 = vor.u32 %v10757_v31, %v22162_v5  ;;  %v10768_v45 = vrot.slane %v10766_v40, 4  ;;  %v22193_v51 = vld [vmem:[#allocation3 + $0xa0] sm:$0xf] }
 0x2eb   : > { %16686 = vmatprep.subr.bf16.mxu1 %v22125_v63  ;;  %v10749_v33 = vrot.slane %v10748_v9, 4  ;;  %v22195_v8 = vpop.f32.mrf.mxu0  ;;  %v10771_v56 = vrot.slane %v10769_v15, 5  ;;  %v10777_v26 = vrot.slane %v10775_v21, 5  ;;  %v10785_v25 = vshll.u32 %v22166_v27, 16  ;;  %v22217_v15 = vld [vmem:[#allocation3 + $0xa4] sm:$0x1] }
 0x2ec   : > { %16661 = vmatpush3.bf16.msra.mxu0 %v17283_v18  ;;  %v10781_v18 = vrot.slane %v10779_v43, 4  ;;  %v23987_v9 = vpack.c.bf16 %v22037_v46, %v22025_v50  ;;  %v14756_v61 = vcombine.low %v10730_v47, %v10740_v58  ;;  %v14770_v31 = vcombine.low %v21963_v6, %v21994_v35  ;;  %v22225_v47 = vld [vmem:[#allocation3 + $0xac] sm:$0xf] }
 0x2ed   : > { %16639 = vmatmul.mubr.bf16.gmra.mxu1 %v23986_v23  ;;  %16710 = vmatprep.subr.bf16.mxu0 %v17286_v52  ;;  %v10759_v7 = vrot.slane %v10758_v2, 4  ;;  %v10763_v40 = vrot.slane %v10761_v62, 5  ;;  %v22209_v23 = vpop.f32.mrf.mxu0  ;;  %v10754_v50 = vsel %vm17618_vm13, %v10749_v33, %v22162_v5  ;;  %v10772_v46 = vor.u32 %v10771_v56, %v10768_v45  ;;  %v22220_v62 = vpop.f32.mrf.mxu1  ;;  %v17288_v56 = vld [vmem:[%s23678_s6] sm:$0xff]   ;;  %v24076_v14 = vld [vmem:[#allocation19_spill] sm:$0xff] }
 0x2ee   : > { %16687 = vmatpush3.bf16.msra.mxu1 %v22125_v63  ;;  %16642 = vmatprep.mubr.bf16.mxu1 %v23987_v9  ;;  %23988 = vst [vmem:[#allocation30_spill] sm:$0xff] %v22209_v23  ;;  %v10782_v63 = vor.u32 %v10781_v18, %v10777_v26  ;;  %v10790_v6 = vshrl.u32 %v22185_v48, 16  ;;  %23989 = vst [vmem:[#allocation26_spill] sm:$0xff] %v22220_v62  ;;  %v10787_v58 = vrot.slane %v10785_v25, 5  ;;  %v10799_v21 = vshll.u32 %v22193_v51, 16  ;;  %v17290_v25 = vld [vmem:[%s23678_s6 + $0xa8] sm:$0xff]  }
 0x2ef   : > { %16688 = vmatprep.subr.bf16.mxu1 %v17284_v49  ;;  %16663 = vmatmul.mubr.bf16.vlgmr.msra.gmra.mxu0 %v14755_v1  ;;  %v10793_v1 = vshll.u32 %v22185_v48, 16  ;;  %v10803_v43 = vshrl.u32 %v22193_v51, 16  ;;  %v22227_v5 = vpop.f32.mrf.mxu0  ;;  %v10773_v33 = vrot.slane %v10772_v46, 4  ;;  %v22238_v18 = vld [vmem:[#allocation3 + $0xb0] sm:$0x1]  ;;  %v10809_v62 = vshll.u32 %v22217_v15, 16 }
 0x2f0   : > { %16666 = vmatprep.mubr.bf16.mxu0 %v14756_v61  ;;  %16711 = vmatpush3.bf16.msra.mxu0 %v17286_v52  ;;  %23990 = vst [vmem:[#allocation29_spill] sm:$0xff] %v22227_v5  ;;  %v10764_v52 = vsel %vm17618_vm13, %v10759_v7, %v10763_v40  ;;  %v10783_v2 = vrot.slane %v10782_v63, 4  ;;  %v10792_v45 = vrot.slane %v10790_v6, 4  ;;  %23991 = vst [vmem:[#allocation51_spill] sm:$0xff] %v22238_v18  ;;  %v22240_v61 = vrot.slane %v10799_v21, 5  ;;  %v17294_v46 = vld [vmem:[%s23678_s6 + $0xa0] sm:$0xff]   ;;  %v22254_v6 = vpop.f32.mrf.mxu1 }
 0x2f1   : > { %16712 = vmatprep.subr.bf16.mxu0 %v22181_v55  ;;  %v10795_v9 = vrot.slane %v10793_v1, 5  ;;  %v10805_v5 = vrot.slane %v10803_v43, 4  ;;  %v22243_v23 = vpop.f32.mrf.mxu0  ;;  %v10778_v7 = vsel %vm17618_vm13, %v10773_v33, %v10777_v26  ;;  %v10817_v63 = vshll.u32 %v22207_v54, 16  ;;  %23993 = vst [vmem:[#allocation10_spill] sm:$0xff] %v22254_v6  ;;  %v22258_v33 = vld [vmem:[#allocation3 + $0xb4] sm:$0xf] }
 0x2f2   : > { %16689 = vmatpush3.bf16.msra.mxu1 %v17284_v49  ;;  %23992 = vst [vmem:[#allocation12_spill] sm:$0xff] %v22243_v23  ;;  %v10788_v40 = vsel %vm17618_vm13, %v10783_v2, %v10787_v58  ;;  %v10814_v49 = vshrl.u32 %v22207_v54, 16  ;;  %v14757_v1 = vcombine.low %v10754_v50, %v10764_v52  ;;  %v23995_v2 = vpack.c.bf16 %v22095_v3, %v22092_v10  ;;  %v17291_v6 = vld [vmem:[%s23678_s6 + $0xf8] sm:$0xff]  }
 0x2f3   : > { %16690 = vmatprep.subr.bf16.mxu1 %v17285_v41  ;;  %v14758_v21 = vcombine.low %v10778_v7, %v10788_v40  ;;  %v10796_v43 = vor.u32 %v10795_v9, %v10792_v45  ;;  %v10806_v26 = vor.u32 %v10805_v5, %v22240_v61  ;;  %v22260_v58 = vpop.f32.mrf.mxu0  ;;  %v10823_v50 = vshll.u32 %v22225_v47, 16  ;;  %v22270_v5 = vld [vmem:[#allocation3 + $0xb8] sm:$0xf] }
 0x2f4   : > { %16713 = vmatpush3.bf16.msra.mxu0 %v22181_v55  ;;  %23994 = vst [vmem:[#allocation44_spill] sm:$0xff] %v22260_v58  ;;  %v10816_v23 = vrot.slane %v10814_v49, 4  ;;  %v10819_v55 = vrot.slane %v10817_v63, 5  ;;  %v10827_v52 = vshrl.u32 %v22225_v47, 16  ;;  %v10811_v7 = vrot.slane %v10809_v62, 5 }
 0x2f5   : > { %16643 = vmatmul.mubr.bf16.gmra.mxu1 %v23995_v2  ;;  %16714 = vmatprep.subr.bf16.mxu0 %v17290_v25  ;;  %v10797_v45 = vrot.slane %v10796_v43, 4  ;;  %v10807_v9 = vrot.slane %v10806_v26, 4  ;;  %v10833_v10 = vshll.u32 %v22238_v18, 16  ;;  %v22273_v3 = vpop.f32.mrf.mxu0  ;;  %v10825_v49 = vrot.slane %v10823_v50, 5  ;;  %v22275_v2 = vpop.f32.mrf.mxu1 }
 0x2f6   : > { %16691 = vmatpush3.bf16.msra.mxu1 %v17285_v41  ;;  %16694 = vmatprep.mubr.bf16.mxu1 %v14770_v31  ;;  %23996 = vst [vmem:[#allocation47_spill] sm:$0xff] %v22273_v3  ;;  %v10820_v40 = vor.u32 %v10819_v55, %v10816_v23  ;;  %v10829_v63 = vrot.slane %v10827_v52, 4  ;;  %23997 = vst [vmem:[#allocation25_spill] sm:$0xff] %v22275_v2  ;;  %v14771_v58 = vcombine.low %v22016_v38, %v22027_v13  ;;  %v17296_v31 = vld [vmem:[%s23678_s6 + $0x98] sm:$0xff]   ;;  %v22282_v41 = vld [vmem:[#allocation3 + $0xbc] sm:$0x1] }
 0x2f7   : > { %16692 = vmatprep.subr.bf16.mxu1 %v17288_v56  ;;  %16667 = vmatmul.mubr.bf16.gmra.mxu0 %v14757_v1  ;;  %v10838_v62 = vshrl.u32 %v22258_v33, 16  ;;  %v22285_v43 = vpop.f32.mrf.mxu0  ;;  %v10812_v23 = vsel %vm17618_vm13, %v10807_v9, %v10811_v7  ;;  %v10841_v26 = vshll.u32 %v22258_v33, 16  ;;  %v14772_v38 = vcombine.low %v22041_v30, %v22073_v60  ;;  %v17295_v9 = vld [vmem:[%s23678_s6 + $0xf0] sm:$0xff]   ;;  %v22302_v30 = vpop.f32.mrf.mxu1 }
 0x2f8   : > { %16670 = vmatprep.mubr.bf16.mxu0 %v14758_v21  ;;  %16715 = vmatpush3.bf16.msra.mxu0 %v17290_v25  ;;  %23998 = vst [vmem:[#allocation28_spill] sm:$0xff] %v22285_v43  ;;  %v10821_v1 = vrot.slane %v10820_v40, 4  ;;  %v10830_v21 = vor.u32 %v10829_v63, %v10825_v49  ;;  %v10847_v55 = vshll.u32 %v22270_v5, 16  ;;  %v10851_v50 = vshrl.u32 %v22270_v5, 16  ;;  %24000 = vst [vmem:[#allocation31_spill] sm:$0xff] %v22302_v30  ;;  %v22590_v30 = vld [vmem:[%s23678_s6 + $0x110] sm:$0xff]  }
 0x2f9   : > { %16716 = vmatprep.subr.bf16.mxu0 %v17294_v46  ;;  %v10840_v25 = vrot.slane %v10838_v62, 4  ;;  %v22294_v52 = vpop.f32.mrf.mxu0  ;;  %v10802_v7 = vsel %vm17618_vm13, %v10797_v45, %v22240_v61  ;;  %v10835_v40 = vrot.slane %v10833_v10, 5  ;;  %v10843_v63 = vrot.slane %v10841_v26, 5  ;;  %v17300_v45 = vld [vmem:[%s23678_s6 + $0x90] sm:$0xff]   ;;  %v11247_v26 = vld [vmem:[#allocation3 + $0x60] sm:$0xe] }
 0x2fa   : > { %16693 = vmatpush3.bf16.msra.mxu1 %v17288_v56  ;;  %23999 = vst [vmem:[#allocation50_spill] sm:$0xff] %v22294_v52  ;;  %v10831_v56 = vrot.slane %v10830_v21, 4  ;;  %v14759_v62 = vcombine.low %v10802_v7, %v10812_v23  ;;  %v10849_v2 = vrot.slane %v10847_v55, 5  ;;  %v10853_v43 = vrot.slane %v10851_v50, 4  ;;  %v22320_v55 = vpop.f32.mrf.mxu1 }
 0x2fb   : > { %16742 = vmatprep.subr.bf16.mxu1 %v17291_v6  ;;  %v10857_v52 = vshll.u32 %v22282_v41, 16  ;;  %v22305_v3 = vpop.f32.mrf.mxu0  ;;  %v10826_v18 = vsel %vm17618_vm13, %v10821_v1, %v10825_v49  ;;  %v11273_v10 = vrot.slane %v21994_v35, 5  ;;  %v17297_v49 = vld [vmem:[%s23678_s6 + $0xe8] sm:$0xff]   ;;  %24001 = vst [vmem:[#allocation32_spill] sm:$0xff] %v22320_v55  ;;  %v11276_v50 = vrot.slane %v22006_v11, 5 }
 0x2fc   : > { %16717 = vmatpush3.bf16.msra.mxu0 %v17294_v46  ;;  %v10836_v61 = vsel %vm17618_vm13, %v10831_v56, %v10835_v40  ;;  %v10844_v46 = vor.u32 %v10843_v63, %v10840_v25  ;;  %v10854_v21 = vor.u32 %v10853_v43, %v10849_v2  ;;  %v14773_v7 = vcombine.low %v22106_v37, %v22115_v0 }
 0x2fd   : > { %16695 = vmatmul.mubr.bf16.vlgmr.msra.gmra.mxu1 %v14771_v58  ;;  %16718 = vmatprep.subr.bf16.mxu0 %v17296_v31  ;;  %v14760_v23 = vcombine.low %v10826_v18, %v10836_v61  ;;  %v22315_v58 = vpop.f32.mrf.mxu0  ;;  %v11275_v1 = vrot.slane %v11273_v10, 4  ;;  %v11280_v18 = vrot.slane %v22027_v13, 5  ;;  %v17301_v13 = vld [vmem:[%s23678_s6 + $0xe0] sm:$0xff]   ;;  %v11287_v11 = vrot.slane %v22073_v60, 5 }
 0x2fe   : > { %16743 = vmatpush3.bf16.msra.mxu1 %v17291_v6  ;;  %16698 = vmatprep.mubr.bf16.mxu1 %v14772_v38  ;;  %v10845_v25 = vrot.slane %v10844_v46, 4  ;;  %v10855_v35 = vrot.slane %v10854_v21, 4  ;;  %v10859_v6 = vrot.slane %v10857_v52, 5  ;;  %v17302_v38 = vld [vmem:[%s23678_s6 + $0x88] sm:$0xff]   ;;  %v14786_v52 = vrot.slane %v11247_v26, 9  ;;  %v17306_v60 = vld [vmem:[%s23678_s6 + $0x80] sm:$0xff]  }
 0x2ff   : > { %16744 = vmatprep.subr.bf16.mxu1 %v17295_v9  ;;  %16671 = vmatmul.mubr.bf16.gmra.mxu0 %v14759_v62  ;;  %v22323_v43 = vpop.f32.mrf.mxu0  ;;  %v11277_v40 = vsel %vm17647_vm14, %v11275_v1, %v11276_v50  ;;  %v11282_v63 = vrot.slane %v11280_v18, 4  ;;  %v14774_v37 = vcombine.low %v22131_v12, %v22142_v53  ;;  %v11248_v61 = vld [vmem:[#allocation3 + $0x6c] sm:$0xe]  ;;  %v11283_v26 = vrot.slane %v22039_v34, 5  ;;  %v11249_v12 = vld [vmem:[#allocation3 + $0x78] sm:$0xe] }
 0x300   : > { %16674 = vmatprep.mubr.bf16.mxu0 %v14760_v23  ;;  %16719 = vmatpush3.bf16.msra.mxu0 %v17296_v31  ;;  %24002 = vst [vmem:[#allocation35_spill] sm:$0xff] %v22323_v43  ;;  %v10860_v31 = vsel %vm17618_vm13, %v10855_v35, %v10859_v6  ;;  %v10850_v62 = vsel %vm17618_vm13, %v10845_v25, %v10849_v2  ;;  %v17303_v2 = vld [vmem:[%s23678_s6 + $0xd8] sm:$0xff]   ;;  %v11301_v6 = vrot.slane %v22142_v53, 5  ;;  %v14787_v50 = vrot.slane %v11248_v61, 9 }
 0x301   : > { %16720 = vmatprep.subr.bf16.mxu0 %v17300_v45  ;;  %v22333_v56 = vpop.f32.mrf.mxu0  ;;  %v14761_v23 = vcombine.low %v10850_v62, %v10860_v31  ;;  %v11274_v21 = vsel %vm17647_vm14, %v14786_v52, %v11273_v10  ;;  %v14775_v1 = vcombine.low %v22185_v48, %v22193_v51  ;;  %v14776_v10 = vcombine.low %v22207_v54, %v22225_v47  ;;  %v11250_v35 = vld [vmem:[#allocation3 + $0x84] sm:$0xe]  ;;  %v11251_v31 = vld [vmem:[#allocation3 + $0x90] sm:$0xe] }
 0x302   : > { %16745 = vmatpush3.bf16.msra.mxu1 %v17295_v9  ;;  %v22341_v9 = vpop.f32.mrf.mxu1  ;;  %v14810_v25 = vcombine.low %v11274_v21, %v11277_v40  ;;  %v22375_v48 = vld [vmem:[%s23678_s6 + $0x138] sm:$0xff]   ;;  %v11289_v54 = vrot.slane %v11287_v11, 4  ;;  %v22381_v52 = vadd.f32 %v21826_v29, %v21899_v16  ;;  %v11290_v40 = vrot.slane %v22080_v59, 5  ;;  %v22396_v16 = vld [vmem:[#allocation3 + $0x9c] sm:$0xe] }
 0x303   : > { %16746 = vmatprep.subr.bf16.mxu1 %v17297_v49  ;;  %24003 = vst [vmem:[#allocation37_spill] sm:$0xff] %v22341_v9  ;;  %v22347_v46 = vpop.f32.mrf.mxu0  ;;  %v11303_v62 = vrot.slane %v11301_v6, 4  ;;  %v22394_v29 = vadd.f32 %v21907_v44, %v22100_v36  ;;  %v17307_v59 = vld [vmem:[%s23678_s6 + $0xd0] sm:$0xff]   ;;  %v14789_v21 = vrot.slane %v11250_v35, 9  ;;  %v11297_v44 = vrot.slane %v22138_v42, 5  ;;  %v24008_v35 = vld [vmem:[#allocation17_spill] sm:$0xff] }
 0x304   : > { %16721 = vmatpush3.bf16.msra.mxu0 %v17300_v45  ;;  %v11294_v45 = vrot.slane %v22115_v0, 5  ;;  %v22377_v53 = vpop.f32.mrf.mxu1  ;;  %v11291_v36 = vsel %vm17647_vm14, %v11289_v54, %v11290_v40  ;;  %v24010_v54 = vld [vmem:[#allocation27_spill] sm:$0xff] }
 0x305   : > { %16699 = vmatmul.mubr.bf16.gmra.mxu1 %v14773_v7  ;;  %16722 = vmatprep.subr.bf16.mxu0 %v17302_v38  ;;  %v22364_v34 = vpop.f32.mrf.mxu0  ;;  %v11284_v7 = vsel %vm17647_vm14, %v11282_v63, %v11283_v26  ;;  %24004 = vst [vmem:[#allocation40_spill] sm:$0xff] %v22377_v53  ;;  %v22471_v0 = vld [vmem:[%s23678_s6 + $0x128] sm:$0xff]  }
 0x306   : > { %16747 = vmatpush3.bf16.msra.mxu1 %v17297_v49  ;;  %16702 = vmatprep.mubr.bf16.mxu1 %v14774_v37  ;;  %v22368_v49 = vadd.f32 %v21815_v32, %v21882_v24  ;;  %v14788_v24 = vrot.slane %v11249_v12, 9  ;;  %v11281_v37 = vsel %vm17647_vm14, %v14787_v50, %v11280_v18  ;;  %v22407_v18 = vadd.f32 %v21845_v57, %v22008_v22  ;;  %v24009_v50 = vld [vmem:[#allocation39_spill] sm:$0xff] }
 0x307   : > { %16748 = vmatprep.subr.bf16.mxu1 %v17301_v13  ;;  %16675 = vmatmul.mubr.bf16.gmra.mxu0 %v14761_v23  ;;  %v22386_v63 = vpop.f32.mrf.mxu0  ;;  %v14811_v61 = vcombine.low %v11281_v37, %v11284_v7  ;;  %v22403_v23 = vadd.f32 %v21830_v19, %v21926_v17  ;;  %v22417_v12 = vadd.f32 %v21917_v39, %v22117_v20  ;;  %v22419_v19 = vpop.f32.mrf.mxu1  ;;  %v24007_v17 = vld [vmem:[#allocation46_spill] sm:$0xff]  ;;  %v17313_v39 = vld [vmem:[%s23678_s6 + $0x130] sm:$0xff]  }
 0x308   : > { %16723 = vmatpush3.bf16.msra.mxu0 %v17302_v38  ;;  %16726 = vmatprep.mubr.bf16.mxu0 %v14810_v25  ;;  %24005 = vst [vmem:[#allocation22_spill] sm:$0xff] %v22386_v63  ;;  %v11296_v38 = vrot.slane %v11294_v45, 4  ;;  %24006 = vst [vmem:[#allocation33_spill] sm:$0xff] %v22419_v19  ;;  %v11288_v57 = vsel %vm17647_vm14, %v14788_v24, %v11287_v11  ;;  %v22425_v22 = vadd.f32 %v24007_v17, %v22029_v4  ;;  %v17308_v24 = vld [vmem:[%s23678_s6 + $0xc8] sm:$0xff]   ;;  %v22527_v19 = vld [vmem:[#allocation3 + $0x84] sm:$0xf] }
 0x309   : > { %16724 = vmatprep.subr.bf16.mxu0 %v17306_v60  ;;  %v22409_v26 = vpop.f32.mrf.mxu0  ;;  %v14790_v25 = vrot.slane %v11251_v31, 9  ;;  %v22429_v42 = vadd.f32 %v24009_v50, %v24008_v35  ;;  %v11308_v11 = vrot.slane %v22193_v51, 5  ;;  %v24011_v31 = vld [vmem:[#allocation48_spill] sm:$0xff]  ;;  %v14812_v40 = vcombine.low %v11288_v57, %v11291_v36 }
 0x30a   : > { %16749 = vmatpush3.bf16.msra.mxu1 %v17301_v13  ;;  %v11304_v13 = vrot.slane %v22166_v27, 5  ;;  %v11777_v27 = vld [vmem:[#allocation3 + $0x6c] sm:$0xf]  ;;  %v22439_v20 = vsel %vm17647_vm14, %v11296_v38, %v11297_v44  ;;  %v22457_v37 = vsel %vm17647_vm14, %v14789_v21, %v11294_v45  ;;  %v14791_v38 = vrot.slane %v22396_v16, 9  ;;  %v11780_v36 = vld [vmem:[#allocation3 + $0x78] sm:$0xf]  ;;  %v22479_v44 = vpop.f32.mrf.mxu1 }
 0x30b   : > { %16750 = vmatprep.subr.bf16.mxu1 %v17303_v2  ;;  %v22431_v7 = vpop.f32.mrf.mxu0  ;;  %v22461_v51 = vsel %vm17647_vm14, %v14790_v25, %v11301_v6  ;;  %v11311_v45 = vrot.slane %v22217_v15, 5  ;;  %v24012_v6 = vld [vmem:[#allocation16_spill] sm:$0xff]  ;;  %v11802_v16 = vshrl.u32 %v11777_v27, 16  ;;  %24013 = vst [vmem:[#allocation36_spill] sm:$0xff] %v22479_v44  ;;  %v11805_v57 = vshll.u32 %v11777_v27, 16  ;;  %v24018_v25 = vld [vmem:[#allocation51_spill] sm:$0xff] }
 0x30c   : > { %16725 = vmatpush3.bf16.msra.mxu0 %v17306_v60  ;;  %v22443_v4 = vsel %vm17647_vm14, %v11303_v62, %v11304_v13  ;;  %v11253_v60 = vld [vmem:[#allocation3 + $0xa8] sm:$0xe]  ;;  %v22464_v62 = vld [vmem:[#allocation3 + $0x70] sm:$0xf]  ;;  %v22477_v21 = vadd.f32 %v24012_v6, %v22195_v8  ;;  %v11310_v17 = vrot.slane %v11308_v11, 4  ;;  %v22500_v27 = vsel %vm17647_vm14, %v14791_v38, %v11308_v11  ;;  %v24024_v63 = vld [vmem:[#allocation44_spill] sm:$0xff] }
 0x30d   : > { %16703 = vmatmul.mubr.bf16.gmra.mxu1 %v14775_v1  ;;  %16774 = vmatprep.subr.bf16.mxu0 %v22375_v48  ;;  %v22448_v1 = vadd.f32 %v24011_v31, %v24010_v54  ;;  %v14814_v13 = vcombine.low %v22461_v51, %v22443_v4  ;;  %v14792_v15 = vrot.slane %v11253_v60, 9  ;;  %v22491_v8 = vld [vmem:[%s23678_s6 + $0xc0] sm:$0xff]   ;;  %v11811_v35 = vshll.u32 %v22464_v62, 16  ;;  %v24016_v31 = vld [vmem:[#allocation45_spill] sm:$0xff] }
 0x30e   : > { %16751 = vmatpush3.bf16.msra.mxu1 %v17303_v2  ;;  %16706 = vmatprep.mubr.bf16.mxu1 %v14776_v10  ;;  %v22466_v2 = vpop.f32.mrf.mxu0  ;;  %v11315_v10 = vrot.slane %v22225_v47, 5  ;;  %v11815_v50 = vshrl.u32 %v22464_v62, 16  ;;  %v11804_v4 = vrot.slane %v11802_v16, 4  ;;  %v11807_v60 = vrot.slane %v11805_v57, 5  ;;  %v24015_v54 = vld [vmem:[#allocation30_spill] sm:$0xff]  ;;  %v22517_v16 = vpop.f32.mrf.mxu1 }
 0x30f   : > { %16752 = vmatprep.subr.bf16.mxu1 %v17307_v59  ;;  %16727 = vmatmul.mubr.bf16.vlgmr.msra.gmra.mxu0 %v14811_v61  ;;  %v14813_v61 = vcombine.low %v22457_v37, %v22439_v20  ;;  %v17311_v20 = vld [vmem:[#allocation3 + $0x6c] sm:$0xff]   ;;  %v22506_v37 = vld [vmem:[#allocation3 + $0x7c] sm:$0xf]  ;;  %v11318_v32 = vrot.slane %v24018_v25, 5  ;;  %v22515_v38 = vld [vmem:[#allocation3 + $0x80] sm:$0x1] }
 0x310   : > { %16730 = vmatprep.mubr.bf16.mxu0 %v14812_v40  ;;  %16775 = vmatpush3.bf16.msra.mxu0 %v22375_v48  ;;  %v22486_v47 = vpop.f32.mrf.mxu0  ;;  %v22494_v48 = vld [vmem:[#allocation3 + $0x74] sm:$0x1]  ;;  %v22504_v40 = vadd.f32 %v24016_v31, %v24015_v54  ;;  %v11317_v6 = vrot.slane %v11315_v10, 4  ;;  %v11817_v11 = vrot.slane %v11815_v50, 4  ;;  %24019 = vst [vmem:[#allocation7_spill] sm:$0xff] %v22517_v16  ;;  %v22521_v57 = vsel %vm17647_vm14, %v14792_v15, %v11315_v10  ;;  %v24020_v54 = vld [vmem:[#allocation12_spill] sm:$0xff] }
 0x311   : > { %24014 = vst [vmem:[#allocation14_spill] sm:$0xff] %v22486_v47  ;;  %16776 = vmatprep.subr.bf16.mxu0 %v17313_v39  ;;  %v22513_v47 = vrot.slane %v11811_v35, 5  ;;  %v22525_v31 = vadd.f32 %v24020_v54, %v22368_v49  ;;  %v11826_v44 = vshrl.u32 %v11780_v36, 16  ;;  %v11829_v25 = vshll.u32 %v11780_v36, 16 }
 0x312   : > { %16753 = vmatpush3.bf16.msra.mxu1 %v17307_v59  ;;  %v22508_v51 = vpop.f32.mrf.mxu0  ;;  %v22511_v59 = vld [vmem:[#allocation3 + $0xb4] sm:$0xe]  ;;  %v24021_v35 = vcombine.low %v22258_v33, %v22270_v5  ;;  %v22538_v10 = vsel %vm17647_vm14, %v11310_v17, %v11311_v45  ;;  %v24022_v49 = vrot.slane %v22270_v5, 5  ;;  %v11835_v36 = vshll.u32 %v22506_v37, 16  ;;  %v22552_v17 = vld [vmem:[#allocation3 + $0x88] sm:$0xf] }
 0x313   : > { %24017 = vst [vmem:[#allocation6_spill] sm:$0xff] %v22508_v51  ;;  %16754 = vmatprep.subr.bf16.mxu1 %v17308_v24  ;;  %v11839_v50 = vshrl.u32 %v22506_v37, 16  ;;  %v11808_v33 = vor.u32 %v11807_v60, %v11804_v4  ;;  %v11821_v16 = vshll.u32 %v22494_v48, 16  ;;  %v22550_v45 = vadd.f32 %v24024_v63, %v22381_v52  ;;  %v17320_v52 = vld [vmem:[%s23678_s6 + $0x118] sm:$0xff]   ;;  %v11786_v51 = vld [vmem:[#allocation3 + $0x90] sm:$0xf] }
 0x314   : > { %16777 = vmatpush3.bf16.msra.mxu0 %v17313_v39  ;;  %v17318_v39 = vld [vmem:[%s23678_s6 + $0x120] sm:$0xff]   ;;  %v11324_v15 = vrot.slane %v24022_v49, 4  ;;  %v22544_v54 = vpop.f32.mrf.mxu0  ;;  %v17315_v49 = vld [vmem:[%s23678_s6 + $0x178] sm:$0xff]   ;;  %v22558_v4 = vrot.slane %v11835_v36, 5  ;;  %v11319_v63 = vsel %vm17647_vm14, %v11317_v6, %v11318_v32  ;;  %v17316_v32 = vld [vmem:[#allocation3 + $0x78] sm:$0xff]  }
 0x315   : > { %16707 = vmatmul.mubr.bf16.gmra.mxu1 %v24021_v35  ;;  %16778 = vmatprep.subr.bf16.mxu0 %v22471_v0  ;;  %24023 = vst [vmem:[#allocation24_spill] sm:$0xff] %v22544_v54  ;;  %v11818_v35 = vor.u32 %v11817_v11, %v22513_v47  ;;  %24025 = vst [vmem:[#allocation41_spill] sm:$0xff] %v22550_v45  ;;  %v11841_v60 = vrot.slane %v11839_v50, 4  ;;  %v22560_v11 = vpop.f32.mrf.mxu1  ;;  %v22571_v36 = vld [vmem:[#allocation3 + $0x8c] sm:$0x1]  ;;  %v11859_v50 = vshll.u32 %v22552_v17, 16 }
 0x316   : > { %16755 = vmatpush3.bf16.msra.mxu1 %v17308_v24  ;;  %16758 = vmatprep.mubr.bf16.mxu1 %v17311_v20  ;;  %v11828_v24 = vrot.slane %v11826_v44, 4  ;;  %v11831_v20 = vrot.slane %v11829_v25, 5  ;;  %24026 = vst [vmem:[#allocation9_spill] sm:$0xff] %v22560_v11  ;;  %v11325_v44 = vrot.slane %v22282_v41, 5  ;;  %v11845_v25 = vshll.u32 %v22515_v38, 16  ;;  %v22577_v53 = vpop.f32.mrf.mxu0  ;;  %v17317_v6 = vld [vmem:[#allocation3 + $0x84] sm:$0xff]  }
 0x317   : > { %16756 = vmatprep.subr.bf16.mxu1 %v22491_v8  ;;  %16731 = vmatmul.mubr.bf16.gmra.mxu0 %v14813_v61  ;;  %v14793_v61 = vrot.slane %v22511_v59, 9  ;;  %v11863_v11 = vshrl.u32 %v22552_v17, 16  ;;  %24027 = vst [vmem:[#allocation38_spill] sm:$0xff] %v22577_v53  ;;  %v17319_v41 = vld [vmem:[%s23678_s6 + $0x170] sm:$0xff]   ;;  %v11809_v9 = vrot.slane %v11808_v33, 4  ;;  %v11823_v55 = vrot.slane %v11821_v16, 5 }
 0x318   : > { %16734 = vmatprep.mubr.bf16.mxu0 %v14814_v13  ;;  %16779 = vmatpush3.bf16.msra.mxu0 %v22471_v0  ;;  %v11850_v13 = vshrl.u32 %v22527_v19, 16  ;;  %v11853_v0 = vshll.u32 %v22527_v19, 16  ;;  %v22585_v59 = vsel %vm17647_vm14, %v11324_v15, %v11325_v44  ;;  %v11819_v19 = vrot.slane %v11818_v35, 4  ;;  %v22595_v45 = vld [vmem:[#allocation3 + $0x6c] sm:$0xe]  ;;  %v22597_v15 = vpop.f32.mrf.mxu1 }
 0x319   : > { %16780 = vmatprep.subr.bf16.mxu0 %v17318_v39  ;;  %v11842_v43 = vor.u32 %v11841_v60, %v22558_v4  ;;  %v22593_v53 = vrot.slane %v11859_v50, 5  ;;  %v11865_v54 = vrot.slane %v11863_v11, 4  ;;  %24028 = vst [vmem:[#allocation13_spill] sm:$0xff] %v22597_v15  ;;  %v14815_v16 = vcombine.low %v22500_v27, %v22538_v10  ;;  %v22613_v27 = vpop.f32.mrf.mxu0  ;;  %v11789_v50 = vld [vmem:[#allocation3 + $0x9c] sm:$0xf] }
 0x31a   : > { %16757 = vmatpush3.bf16.msra.mxu1 %v22491_v8  ;;  %v11832_v8 = vor.u32 %v11831_v20, %v11828_v24  ;;  %v24029_v33 = vrot.slane %v22270_v5, 5  ;;  %v22607_v24 = vrot.slane %v11845_v25, 5  ;;  %v11869_v20 = vshll.u32 %v22571_v36, 16  ;;  %v17321_v5 = vld [vmem:[%s23678_s6 + $0x168] sm:$0xff]  }
 0x31b   : > { %16806 = vmatprep.subr.bf16.mxu1 %v17315_v49  ;;  %v14816_v60 = vcombine.low %v22521_v57, %v11319_v63  ;;  %v11852_v11 = vrot.slane %v11850_v13, 4  ;;  %v11855_v44 = vrot.slane %v11853_v0, 5  ;;  %v11814_v10 = vsel %vm17618_vm13, %v11809_v9, %v22513_v47  ;;  %v22625_v25 = vld [vmem:[#allocation3 + $0x94] sm:$0xf]  ;;  %v24031_v47 = vld [vmem:[#allocation50_spill] sm:$0xff] }
 0x31c   : > { %16781 = vmatpush3.bf16.msra.mxu0 %v17318_v39  ;;  %v22605_v35 = vsel %vm17647_vm14, %v14793_v61, %v24029_v33  ;;  %v11824_v57 = vsel %vm17618_vm13, %v11819_v19, %v11823_v55  ;;  %v11866_v63 = vor.u32 %v11865_v54, %v22593_v53  ;;  %v23711_v61 = vrot.slane %v22464_v62, 5  ;;  %v24030_v9 = vld [vmem:[#allocation47_spill] sm:$0xff] }
 0x31d   : > { %16759 = vmatmul.mubr.bf16.vlgmr.msra.gmra.mxu1 %v17316_v32  ;;  %16782 = vmatprep.subr.bf16.mxu0 %v17320_v52  ;;  %v22632_v13 = vrot.slane %v11832_v8, 4  ;;  %v22634_v0 = vrot.slane %v11842_v43, 4  ;;  %v22638_v55 = vadd.f32 %v24030_v9, %v22403_v23  ;;  %v22642_v54 = vadd.f32 %v24031_v47, %v22407_v18  ;;  %v22644_v32 = vpop.f32.mrf.mxu1  ;;  %v22654_v47 = vpop.f32.mrf.mxu0  ;;  %v17322_v39 = vld [vmem:[#allocation3 + $0x90] sm:$0xff]  }
 0x31e   : > { %16807 = vmatpush3.bf16.msra.mxu1 %v17315_v49  ;;  %16762 = vmatprep.mubr.bf16.mxu1 %v17317_v6  ;;  %v22630_v49 = vld [vmem:[%s23678_s6 + $0x108] sm:$0xff]   ;;  %24032 = vst [vmem:[#allocation8_spill] sm:$0xff] %v22644_v32  ;;  %v22646_v6 = vrot.slane %v11869_v20, 5  ;;  %v11874_v8 = vshrl.u32 %v11786_v51, 16  ;;  %v11877_v43 = vshll.u32 %v11786_v51, 16  ;;  %v14874_v23 = vcombine.low %v11814_v10, %v11824_v57  ;;  %24033 = vst [vmem:[#allocation46_spill] sm:$0xff] %v22654_v47 }
 0x31f   : > { %16808 = vmatprep.subr.bf16.mxu1 %v17319_v41  ;;  %16735 = vmatmul.mubr.bf16.gmra.mxu0 %v14815_v16  ;;  %v22649_v16 = vld [vmem:[#allocation3 + $0xa0] sm:$0xf]  ;;  %v11856_v33 = vor.u32 %v11855_v44, %v11852_v11  ;;  %v11883_v18 = vshll.u32 %v22625_v25, 16  ;;  %v11887_v9 = vshrl.u32 %v22625_v25, 16  ;;  %v12238_v20 = vrot.slane %v23711_v61, 4  ;;  %v17325_v11 = vld [vmem:[%s23678_s6 + $0x160] sm:$0xff]  }
 0x320   : > { %16738 = vmatprep.mubr.bf16.mxu0 %v14816_v60  ;;  %16783 = vmatpush3.bf16.msra.mxu0 %v17320_v52  ;;  %v11867_v52 = vrot.slane %v11866_v63, 4  ;;  %v22658_v60 = vld [vmem:[#allocation3 + $0x98] sm:$0x1]  ;;  %v11876_v51 = vrot.slane %v11874_v8, 4  ;;  %v11879_v19 = vrot.slane %v11877_v43, 5  ;;  %v11898_v57 = vshrl.u32 %v11789_v50, 16  ;;  %v22669_v63 = vpop.f32.mrf.mxu1 }
 0x321   : > { %16784 = vmatprep.subr.bf16.mxu0 %v22590_v30  ;;  %v22663_v44 = vrot.slane %v11883_v18, 5  ;;  %v11889_v10 = vrot.slane %v11887_v9, 4  ;;  %24034 = vst [vmem:[#allocation17_spill] sm:$0xff] %v22669_v63  ;;  %v17323_v61 = vld [vmem:[#allocation3 + $0x9c] sm:$0xff]   ;;  %v12239_v8 = vrot.slane %v22494_v48, 5  ;;  %v11901_v32 = vshll.u32 %v11789_v50, 16  ;;  %v22683_v48 = vpop.f32.mrf.mxu0 }
 0x322   : > { %16809 = vmatpush3.bf16.msra.mxu1 %v17319_v41  ;;  %v22667_v41 = vadd.f32 %v22305_v3, %v22425_v22  ;;  %v11880_v43 = vor.u32 %v11879_v19, %v11876_v51  ;;  %v11907_v15 = vshll.u32 %v22649_v16, 16  ;;  %v17330_v3 = vld [vmem:[%s23678_s6 + $0x100] sm:$0xff]   ;;  %v11857_v22 = vrot.slane %v11856_v33, 4  ;;  %v22680_v63 = vld [vmem:[#allocation3 + $0xa4] sm:$0x1]  ;;  %24035 = vst [vmem:[#allocation39_spill] sm:$0xff] %v22683_v48  ;;  %v22708_v47 = vpop.f32.mrf.mxu1 }
 0x323   : > { %16810 = vmatprep.subr.bf16.mxu1 %v17321_v5  ;;  %v11890_v18 = vor.u32 %v11889_v10, %v22663_v44  ;;  %v11893_v9 = vshll.u32 %v22658_v60, 16  ;;  %v11848_v50 = vsel %vm17618_vm13, %v22634_v0, %v22607_v24  ;;  %v11872_v19 = vsel %vm17618_vm13, %v11867_v52, %v22646_v6  ;;  %v22706_v0 = vld [vmem:[#allocation3 + $0x78] sm:$0xe]  ;;  %v24037_v6 = vld [vmem:[#allocation11_spill] sm:$0xff]  ;;  %v24038_v52 = vld [vmem:[#allocation34_spill] sm:$0xff] }
 0x324   : > { %16785 = vmatpush3.bf16.msra.mxu0 %v22590_v30  ;;  %v11911_v30 = vshrl.u32 %v22649_v16, 16  ;;  %v22697_v33 = vsel %vm17647_vm14, %v12238_v20, %v12239_v8  ;;  %v22699_v51 = vrot.slane %v11898_v57, 4  ;;  %v11903_v10 = vrot.slane %v11901_v32, 5  ;;  %v17333_v32 = vld [vmem:[%s23678_s6 + $0x1b8] sm:$0xff]  }
 0x325   : > { %16763 = vmatmul.mubr.bf16.gmra.mxu1 %v17322_v39  ;;  %16786 = vmatprep.subr.bf16.mxu0 %v22630_v49  ;;  %v17327_v39 = vld [vmem:[%s23678_s6 + $0x158] sm:$0xff]   ;;  %v22704_v48 = vrot.slane %v11907_v15, 5  ;;  %v8150_v20 = vadd.f32 %v24038_v52, %v24037_v6  ;;  %v11917_v15 = vshll.u32 %v22680_v63, 16  ;;  %v11862_v57 = vsel %vm17618_vm13, %v11857_v22, %v22593_v53  ;;  %v17328_v22 = vld [vmem:[#allocation3 + $0xa8] sm:$0xff]  }
 0x326   : > { %16811 = vmatpush3.bf16.msra.mxu1 %v17321_v5  ;;  %16766 = vmatprep.mubr.bf16.mxu1 %v17323_v61  ;;  %v24036_v5 = vcombine.low %v22605_v35, %v22585_v59  ;;  %v11891_v61 = vrot.slane %v11890_v18, 4  ;;  %v11913_v24 = vrot.slane %v11911_v30, 4  ;;  %v11838_v59 = vsel %vm17618_vm13, %v22632_v13, %v22558_v4  ;;  %v22735_v18 = vpop.f32.mrf.mxu0 }
 0x327   : > { %16812 = vmatprep.subr.bf16.mxu1 %v17325_v11  ;;  %v11881_v35 = vrot.slane %v11880_v43, 4  ;;  %v11895_v4 = vrot.slane %v11893_v9, 5  ;;  %v23712_v13 = vrot.slane %v22506_v37, 5  ;;  %v22733_v43 = vld [vmem:[#allocation3 + $0x84] sm:$0xe]  ;;  %24041 = vst [vmem:[#allocation27_spill] sm:$0xff] %v22735_v18  ;;  %v14875_v30 = vcombine.low %v11838_v59, %v11848_v50  ;;  %v22752_v59 = vpop.f32.mrf.mxu1 }
 0x328   : > { %16739 = vmatmul.mubr.bf16.gmra.mxu0 %v24036_v5  ;;  %v14876_v5 = vcombine.low %v11862_v57, %v11872_v19  ;;  %v17331_v9 = vld [vmem:[%s23678_s6 + $0x150] sm:$0xff]   ;;  %v11904_v52 = vor.u32 %v11903_v10, %v22699_v51  ;;  %v22748_v50 = vadd.f32 %v22315_v58, %v8150_v20  ;;  %v22750_v19 = vld [vmem:[#allocation3 + $0xac] sm:$0xf]  ;;  %v22761_v10 = vld [vmem:[#allocation3 + $0xb0] sm:$0x1]  ;;  %v22788_v53 = vadd.f32 %v22347_v46, %v22417_v12 }
 0x329   : > { %16787 = vmatpush3.bf16.msra.mxu0 %v22630_v49  ;;  %16790 = vmatprep.mubr.bf16.mxu0 %v14874_v23  ;;  %v24039_v49 = vrot.slane %v22464_v62, 5  ;;  %v24040_v23 = vrot.slane %v22595_v45, 9  ;;  %v11792_v45 = vld [vmem:[#allocation3 + $0xa8] sm:$0xf]  ;;  %v11896_v6 = vsel %vm17618_vm13, %v11891_v61, %v11895_v4  ;;  %v17329_v57 = vld [vmem:[#allocation3 + $0xb4] sm:$0xff]   ;;  %v12246_v61 = vrot.slane %v22515_v38, 5 }
 0x32a   : > { %16788 = vmatprep.subr.bf16.mxu0 %v17330_v3  ;;  %16813 = vmatpush3.bf16.msra.mxu1 %v17325_v11  ;;  %v11914_v11 = vor.u32 %v11913_v24, %v22704_v48  ;;  %v17336_v58 = vld [vmem:[%s23678_s6 + $0x1b0] sm:$0xff]   ;;  %v11922_v24 = vshrl.u32 %v11792_v45, 16  ;;  %v11925_v20 = vshll.u32 %v11792_v45, 16  ;;  %v11795_v38 = vld [vmem:[#allocation3 + $0xb4] sm:$0xf]  ;;  %v23713_v4 = vrot.slane %v22552_v17, 5 }
 0x32b   : > { %v22730_v8 = vsel %vm17647_vm14, %v24040_v23, %v24039_v49  ;;  %16814 = vmatprep.subr.bf16.mxu1 %v17327_v39  ;;  %v11886_v49 = vsel %vm17618_vm13, %v11881_v35, %v22663_v44  ;;  %v22757_v23 = vrot.slane %v11917_v15, 5  ;;  %v22770_v44 = vadd.f32 %v22333_v56, %v22394_v29  ;;  %v22772_v35 = vpop.f32.mrf.mxu0  ;;  %v22777_v62 = vld [vmem:[#allocation3 + $0xb8] sm:$0xf]  ;;  %v17332_v56 = vld [vmem:[%s23678_s6 + $0x148] sm:$0xff]   ;;  %24044 = vst [vmem:[#allocation30_spill] sm:$0xff] %v22788_v53 }
 0x32c   : > { %24043 = vst [vmem:[#allocation16_spill] sm:$0xff] %v22772_v35  ;;  %v14877_v15 = vcombine.low %v11886_v49, %v11896_v6  ;;  %v11935_v51 = vshrl.u32 %v22750_v19, 16  ;;  %v11905_v29 = vrot.slane %v11904_v52, 4  ;;  %v11915_v45 = vrot.slane %v11914_v11, 4  ;;  %v17337_v52 = vld [vmem:[%s23678_s6 + $0x1a8] sm:$0xff]  }
 0x32d   : > { %16789 = vmatpush3.bf16.msra.mxu0 %v17330_v3  ;;  %16767 = vmatmul.mubr.bf16.gmra.mxu1 %v17328_v22  ;;  %v12245_v3 = vrot.slane %v23712_v13, 4  ;;  %24042 = vst [vmem:[#allocation48_spill] sm:$0xff] %v22770_v44  ;;  %v11931_v22 = vshll.u32 %v22750_v19, 16  ;;  %v11924_v13 = vrot.slane %v11922_v24, 4  ;;  %v11941_v24 = vshll.u32 %v22761_v10, 16 }
 0x32e   : > { %16838 = vmatprep.subr.bf16.mxu0 %v17333_v32  ;;  %16815 = vmatpush3.bf16.msra.mxu1 %v17327_v39  ;;  %v11927_v39 = vrot.slane %v11925_v20, 5  ;;  %v11937_v49 = vrot.slane %v11935_v51, 4  ;;  %v11949_v20 = vshll.u32 %v11795_v38, 16  ;;  %v12252_v51 = vrot.slane %v23713_v4, 4  ;;  %v22800_v12 = vld [vmem:[#allocation3 + $0xbc] sm:$0x1] }
 0x32f   : > { %16770 = vmatprep.mubr.bf16.mxu1 %v17329_v57  ;;  %16816 = vmatprep.subr.bf16.mxu1 %v17331_v9  ;;  %v22782_v57 = vpop.f32.mrf.mxu1  ;;  %v22784_v6 = vrot.slane %v11931_v22, 5  ;;  %v11959_v53 = vshrl.u32 %v22777_v62, 16  ;;  %v12247_v44 = vsel %vm17647_vm14, %v12245_v3, %v12246_v61 }
 0x330   : > { %16791 = vmatmul.mubr.bf16.vlgmr.msra.gmra.mxu0 %v14875_v30  ;;  %v11946_v30 = vshrl.u32 %v11795_v38, 16  ;;  %v11928_v11 = vor.u32 %v11927_v39, %v11924_v13  ;;  %v17334_v13 = vld [vmem:[#allocation3 + $0xc0] sm:$0xff]   ;;  %v17335_v38 = vld [vmem:[%s23678_s6 + $0x140] sm:$0xff]   ;;  %v12253_v39 = vrot.slane %v22571_v36, 5  ;;  %v11951_v4 = vrot.slane %v11949_v20, 5 }
 0x331   : > { %16794 = vmatprep.mubr.bf16.mxu0 %v14876_v5  ;;  %16839 = vmatpush3.bf16.msra.mxu0 %v17333_v32  ;;  %v11955_v5 = vshll.u32 %v22777_v62, 16  ;;  %v22795_v32 = vpop.f32.mrf.mxu0  ;;  %v11938_v46 = vor.u32 %v11937_v49, %v22784_v6  ;;  %v22812_v49 = vpop.f32.mrf.mxu1  ;;  %v11961_v18 = vrot.slane %v11959_v53, 4  ;;  %v17339_v36 = vld [vmem:[%s23678_s6 + $0x1a0] sm:$0xff]  }
 0x332   : > { %16840 = vmatprep.subr.bf16.mxu0 %v17336_v58  ;;  %24045 = vst [vmem:[#allocation45_spill] sm:$0xff] %v22795_v32  ;;  %16817 = vmatpush3.bf16.msra.mxu1 %v17331_v9  ;;  %v11948_v22 = vrot.slane %v11946_v30, 4  ;;  %v11920_v9 = vsel %vm17618_vm13, %v11915_v45, %v22757_v23  ;;  %v11910_v30 = vsel %vm17618_vm13, %v11905_v29, %v22704_v48  ;;  %v11929_v23 = vrot.slane %v11928_v11, 4 }
 0x333   : > { %16818 = vmatprep.subr.bf16.mxu1 %v17332_v56  ;;  %v22810_v32 = vrot.slane %v11955_v5, 5  ;;  %v11939_v35 = vrot.slane %v11938_v46, 4  ;;  %v11943_v45 = vrot.slane %v11941_v24, 5  ;;  %v22823_v5 = vpop.f32.mrf.mxu0  ;;  %v24046_v48 = vcombine.low %v22730_v8, %v22697_v33  ;;  %v22849_v46 = vpop.f32.mrf.mxu1 }
 0x334   : > { %v11952_v20 = vor.u32 %v11951_v4, %v11948_v22  ;;  %v14878_v61 = vcombine.low %v11910_v30, %v11920_v9  ;;  %v12254_v53 = vsel %vm17647_vm14, %v12252_v51, %v12253_v39  ;;  %v12257_v29 = vrot.slane %v22625_v25, 5  ;;  %v17338_v4 = vld [vmem:[%s23678_s6 + $0x1f8] sm:$0xff]   ;;  %v22933_v25 = vld [vmem:[#allocation3 + $0x7c] sm:$0xf] }
 0x335   : > { %16841 = vmatpush3.bf16.msra.mxu0 %v17336_v58  ;;  %16771 = vmatmul.mubr.bf16.gmra.mxu1 %v17334_v13  ;;  %v11965_v58 = vshll.u32 %v22800_v12, 16  ;;  %v11962_v3 = vor.u32 %v11961_v18, %v22810_v32  ;;  %v24048_v11 = vrot.slane %v22706_v0, 9  ;;  %v24049_v8 = vrot.slane %v22552_v17, 5  ;;  %v11798_v51 = vld [vmem:[#allocation3 + $0xc0] sm:$0xf]  ;;  %v22864_v30 = vpop.f32.mrf.mxu0 }
 0x336   : > { %16842 = vmatprep.subr.bf16.mxu0 %v17337_v52  ;;  %16819 = vmatpush3.bf16.msra.mxu1 %v17332_v56  ;;  %v24047_v56 = vrot.slane %v22506_v37, 5  ;;  %v24050_v24 = vrot.slane %v22733_v43, 9  ;;  %v11953_v37 = vrot.slane %v11952_v20, 4  ;;  %v12264_v22 = vrot.slane %v22649_v16, 5  ;;  %v22856_v43 = vld [vmem:[#allocation3 + $0xc4] sm:$0xf] }
 0x337   : > { %16822 = vmatprep.mubr.bf16.mxu1 %v24046_v48  ;;  %16820 = vmatprep.subr.bf16.mxu1 %v17335_v38  ;;  %v11963_v0 = vrot.slane %v11962_v3, 4  ;;  %v22854_v17 = vadd.f32 %v22364_v34, %v22429_v42  ;;  %v11967_v39 = vrot.slane %v11965_v58, 5  ;;  %24051 = vst [vmem:[#allocation51_spill] sm:$0xff] %v22864_v30  ;;  %v12259_v34 = vrot.slane %v12257_v29, 4  ;;  %v12205_v58 = vld [vmem:[#allocation3 + $0x90] sm:$0xe] }
 0x338   : > { %16795 = vmatmul.mubr.bf16.gmra.mxu0 %v14877_v15  ;;  %v12244_v33 = vsel %vm17647_vm14, %v24048_v11, %v24047_v56  ;;  %v12251_v18 = vsel %vm17647_vm14, %v24050_v24, %v24049_v8  ;;  %v11944_v15 = vsel %vm17618_vm13, %v11939_v35, %v11943_v45  ;;  %v11934_v35 = vsel %vm17618_vm13, %v11929_v23, %v22784_v6  ;;  %v17340_v6 = vld [vmem:[%s23678_s6 + $0x1f0] sm:$0xff]  }
 0x339   : > { %16798 = vmatprep.mubr.bf16.mxu0 %v14878_v61  ;;  %16843 = vmatpush3.bf16.msra.mxu0 %v17337_v52  ;;  %v14915_v13 = vcombine.low %v12244_v33, %v12247_v44  ;;  %v14916_v9 = vcombine.low %v12251_v18, %v12254_v53  ;;  %v17341_v52 = vld [vmem:[%s23678_s6 + $0x198] sm:$0xff]   ;;  %v22870_v42 = vadd.f32 %v22409_v26, %v22448_v1  ;;  %v22872_v44 = vld [vmem:[#allocation3 + $0xc8] sm:$0x1]  ;;  %v11970_v45 = vshrl.u32 %v11798_v51, 16  ;;  %v22881_v26 = vpop.f32.mrf.mxu1  ;;  %v12206_v53 = vld [vmem:[#allocation3 + $0x9c] sm:$0xe] }
 0x33a   : > { %16844 = vmatprep.subr.bf16.mxu0 %v17339_v36  ;;  %16821 = vmatpush3.bf16.msra.mxu1 %v17335_v38  ;;  %v11973_v20 = vshll.u32 %v11798_v51, 16  ;;  %v14879_v23 = vcombine.low %v11934_v35, %v11944_v15  ;;  %v11968_v38 = vsel %vm17618_vm13, %v11963_v0, %v11967_v39  ;;  %v11979_v48 = vshll.u32 %v22856_v43, 16  ;;  %v17343_v33 = vld [vmem:[%s23678_s6 + $0x190] sm:$0xff]   ;;  %v17342_v0 = vld [vmem:[%s23678_s6 + $0x1e8] sm:$0xff]  }
 0x33b   : > { %24052 = vst [vmem:[#allocation12_spill] sm:$0xff] %v22870_v42  ;;  %16870 = vmatprep.subr.bf16.mxu1 %v17338_v4  ;;  %v11983_v61 = vshrl.u32 %v22856_v43, 16  ;;  %v11958_v1 = vsel %vm17618_vm13, %v11953_v37, %v22810_v32  ;;  %v12266_v3 = vrot.slane %v12264_v22, 4  ;;  %v11972_v56 = vrot.slane %v11970_v45, 4  ;;  %v22896_v32 = vpop.f32.mrf.mxu0 }
 0x33c   : > { %v11975_v11 = vrot.slane %v11973_v20, 5  ;;  %v11981_v8 = vrot.slane %v11979_v48, 5  ;;  %v22894_v18 = vadd.f32 %v22431_v7, %v22477_v21  ;;  %24054 = vst [vmem:[#allocation47_spill] sm:$0xff] %v22896_v32  ;;  %v14880_v15 = vcombine.low %v11958_v1, %v11968_v38  ;;  %v22903_v21 = vpop.f32.mrf.mxu1  ;;  %v17345_v38 = vld [vmem:[%s23678_s6 + $0x188] sm:$0xff]   ;;  %v12207_v48 = vld [vmem:[#allocation3 + $0xa8] sm:$0xe] }
 0x33d   : > { %16845 = vmatpush3.bf16.msra.mxu0 %v17339_v36  ;;  %16823 = vmatmul.mubr.bf16.vlgmr.msra.gmra.mxu1 %v14915_v13  ;;  %v11985_v24 = vrot.slane %v11983_v61, 4  ;;  %v11989_v36 = vshll.u32 %v22872_v44, 16  ;;  %v12260_v51 = vrot.slane %v22658_v60, 5  ;;  %v14893_v13 = vrot.slane %v12205_v58, 9 }
 0x33e   : > { %16846 = vmatprep.subr.bf16.mxu0 %v17341_v52  ;;  %24053 = vst [vmem:[#allocation44_spill] sm:$0xff] %v22894_v18  ;;  %16871 = vmatpush3.bf16.msra.mxu1 %v17338_v4  ;;  %v11976_v37 = vor.u32 %v11975_v11, %v11972_v56  ;;  %v14894_v35 = vrot.slane %v12206_v53, 9  ;;  %v12267_v39 = vrot.slane %v22680_v63, 5  ;;  %v22910_v45 = vadd.f32 %v22466_v2, %v22504_v40  ;;  %v12742_v40 = vld [vmem:[#allocation3 + $0x78] sm:$0xf]  ;;  %v22935_v61 = vpop.f32.mrf.mxu1  ;;  %v17346_v56 = vld [vmem:[%s23678_s6 + $0x1d8] sm:$0xff]  }
 0x33f   : > { %16826 = vmatprep.mubr.bf16.mxu1 %v14916_v9  ;;  %16872 = vmatprep.subr.bf16.mxu1 %v17340_v6  ;;  %v11986_v7 = vor.u32 %v11985_v24, %v11981_v8  ;;  %v12261_v4 = vsel %vm17647_vm14, %v12259_v34, %v12260_v51  ;;  %v12271_v9 = vrot.slane %v22750_v19, 5  ;;  %v12278_v34 = vrot.slane %v22777_v62, 5  ;;  %v17344_v62 = vld [vmem:[%s23678_s6 + $0x1e0] sm:$0xff]   ;;  %v17347_v53 = vld [vmem:[#allocation3 + $0x78] sm:$0xff]   ;;  %v12208_v11 = vld [vmem:[#allocation3 + $0xb4] sm:$0xe] }
 0x340   : > { %16799 = vmatmul.mubr.bf16.gmra.mxu0 %v14879_v23  ;;  %v11977_v60 = vrot.slane %v11976_v37, 4  ;;  %24055 = vst [vmem:[#allocation50_spill] sm:$0xff] %v22910_v45  ;;  %v12268_v20 = vsel %vm17647_vm14, %v12266_v3, %v12267_v39  ;;  %v11991_v23 = vrot.slane %v11989_v36, 5  ;;  %v12258_v2 = vsel %vm17647_vm14, %v14893_v13, %v12257_v29  ;;  %v17348_v36 = vld [vmem:[%s23678_s6 + $0x180] sm:$0xff]   ;;  %v22950_v13 = vld [vmem:[#allocation3 + $0x80] sm:$0x1] }
 0x341   : > { %16802 = vmatprep.mubr.bf16.mxu0 %v14880_v15  ;;  %16847 = vmatpush3.bf16.msra.mxu0 %v17341_v52  ;;  %v11987_v63 = vrot.slane %v11986_v7, 4  ;;  %v22918_v52 = vpop.f32.mrf.mxu0  ;;  %v14917_v19 = vcombine.low %v12258_v2, %v12261_v4  ;;  %v12265_v58 = vsel %vm17647_vm14, %v14894_v35, %v12264_v22  ;;  %v12273_v22 = vrot.slane %v12271_v9, 4  ;;  %v23034_v45 = vld [vmem:[#allocation3 + $0xa0] sm:$0xf]  ;;  %v23049_v18 = vld [vmem:[#allocation3 + $0xac] sm:$0xf] }
 0x342   : > { %16848 = vmatprep.subr.bf16.mxu0 %v17343_v33  ;;  %24056 = vst [vmem:[#allocation11_spill] sm:$0xff] %v22918_v52  ;;  %16873 = vmatpush3.bf16.msra.mxu1 %v17340_v6  ;;  %v14918_v1 = vcombine.low %v12265_v58, %v12268_v20  ;;  %v11982_v16 = vsel %vm17618_vm13, %v11977_v60, %v11981_v8  ;;  %v12280_v24 = vrot.slane %v12278_v34, 4  ;;  %v12767_v15 = vshrl.u32 %v12742_v40, 16  ;;  %v17352_v58 = vld [vmem:[%s23678_s6 + $0x238] sm:$0xff]   ;;  %v485_v52 = vld [vmem:[#allocation3 + $0xcc] sm:$0x1] }
 0x343   : > { %16874 = vmatprep.subr.bf16.mxu1 %v17342_v0  ;;  %v11992_v6 = vsel %vm17618_vm13, %v11987_v63, %v11991_v23  ;;  %v22937_v29 = vpop.f32.mrf.mxu0  ;;  %v14895_v8 = vrot.slane %v12207_v48, 9  ;;  %v12274_v37 = vrot.slane %v22761_v10, 5  ;;  %v12776_v35 = vshll.u32 %v22933_v25, 16  ;;  %v22956_v63 = vpop.f32.mrf.mxu1  ;;  %v22969_v48 = vld [vmem:[#allocation3 + $0x88] sm:$0xf] }
 0x344   : > { %24057 = vst [vmem:[#allocation34_spill] sm:$0xff] %v22937_v29  ;;  %v14881_v3 = vcombine.low %v11982_v16, %v11992_v6  ;;  %v12780_v39 = vshrl.u32 %v22933_v25, 16  ;;  %v12281_v7 = vrot.slane %v22800_v12, 5  ;;  %v23714_v4 = vrot.slane %v22856_v43, 5  ;;  %24059 = vst [vmem:[#allocation53_spill] sm:$0xff] %v22956_v63 }
 0x345   : > { %16849 = vmatpush3.bf16.msra.mxu0 %v17343_v33  ;;  %16827 = vmatmul.mubr.bf16.gmra.mxu1 %v14917_v19  ;;  %v12770_v33 = vshll.u32 %v12742_v40, 16  ;;  %v22947_v51 = vpop.f32.mrf.mxu0  ;;  %v12769_v60 = vrot.slane %v12767_v15, 4  ;;  %v12275_v10 = vsel %vm17647_vm14, %v12273_v22, %v12274_v37  ;;  %v14896_v23 = vrot.slane %v12208_v11, 9  ;;  %v12209_v6 = vld [vmem:[#allocation3 + $0xc0] sm:$0xe]  ;;  %v22982_v15 = vpop.f32.mrf.mxu1 }
 0x346   : > { %16850 = vmatprep.subr.bf16.mxu0 %v17345_v38  ;;  %24058 = vst [vmem:[#allocation52_spill] sm:$0xff] %v22947_v51  ;;  %16875 = vmatpush3.bf16.msra.mxu1 %v17342_v0  ;;  %v12745_v0 = vld [vmem:[#allocation3 + $0x84] sm:$0xf]  ;;  %v22960_v2 = vrot.slane %v12776_v35, 5  ;;  %v12782_v40 = vrot.slane %v12780_v39, 4  ;;  %v12272_v19 = vsel %vm17647_vm14, %v14895_v8, %v12271_v9  ;;  %v12282_v12 = vsel %vm17647_vm14, %v12280_v24, %v12281_v7  ;;  %v17355_v35 = vld [vmem:[%s23678_s6 + $0x230] sm:$0xff]  }
 0x347   : > { %16830 = vmatprep.mubr.bf16.mxu1 %v14918_v1  ;;  %16876 = vmatprep.subr.bf16.mxu1 %v17344_v62  ;;  %v12772_v20 = vrot.slane %v12770_v33, 5  ;;  %v12279_v1 = vsel %vm17647_vm14, %v14896_v23, %v12278_v34  ;;  %v12786_v9 = vshll.u32 %v22950_v13, 16  ;;  %v12791_v22 = vshrl.u32 %v12745_v0, 16  ;;  %24061 = vst [vmem:[#allocation55_spill] sm:$0xff] %v22982_v15  ;;  %v12748_v33 = vld [vmem:[#allocation3 + $0x90] sm:$0xf] }
 0x348   : > { %16803 = vmatmul.mubr.bf16.gmra.mxu0 %v14881_v3  ;;  %v12783_v16 = vor.u32 %v12782_v40, %v22960_v2  ;;  %v17349_v3 = vld [vmem:[%s23678_s6 + $0x1d0] sm:$0xff]   ;;  %v12287_v11 = vrot.slane %v23714_v4, 4  ;;  %v14920_v34 = vcombine.low %v12279_v1, %v12282_v12  ;;  %v17350_v8 = vld [vmem:[#allocation3 + $0x84] sm:$0xff]   ;;  %v14897_v37 = vrot.slane %v12209_v6, 9  ;;  %v22990_v23 = vld [vmem:[#allocation3 + $0x94] sm:$0xf] }
 0x349   : > { %16851 = vmatpush3.bf16.msra.mxu0 %v17345_v38  ;;  %16854 = vmatprep.mubr.bf16.mxu0 %v17347_v53  ;;  %v22971_v38 = vpop.f32.mrf.mxu0  ;;  %v14919_v53 = vcombine.low %v12272_v19, %v12275_v10  ;;  %v12773_v24 = vor.u32 %v12772_v20, %v12769_v60  ;;  %v12793_v39 = vrot.slane %v12791_v22, 4  ;;  %v12800_v7 = vshll.u32 %v22969_v48, 16  ;;  %v17351_v40 = vld [vmem:[%s23678_s6 + $0x1c8] sm:$0xff]   ;;  %v23005_v4 = vld [vmem:[#allocation3 + $0x98] sm:$0x1] }
 0x34a   : > { %16852 = vmatprep.subr.bf16.mxu0 %v17348_v36  ;;  %24060 = vst [vmem:[#allocation54_spill] sm:$0xff] %v22971_v38  ;;  %16877 = vmatpush3.bf16.msra.mxu1 %v17344_v62  ;;  %v12794_v62 = vshll.u32 %v12745_v0, 16  ;;  %v12288_v10 = vrot.slane %v22872_v44, 5  ;;  %v12784_v60 = vrot.slane %v12783_v16, 4  ;;  %v12804_v0 = vshrl.u32 %v22969_v48, 16  ;;  %v17353_v19 = vld [vmem:[#allocation3 + $0x90] sm:$0xff]  }
 0x34b   : > { %16878 = vmatprep.subr.bf16.mxu1 %v17346_v56  ;;  %v12788_v12 = vrot.slane %v12786_v9, 5  ;;  %v22997_v6 = vrot.slane %v12800_v7, 5  ;;  %v12815_v1 = vshrl.u32 %v12748_v33, 16  ;;  %v12818_v44 = vshll.u32 %v12748_v33, 16 }
 0x34c   : > { %v12796_v20 = vrot.slane %v12794_v62, 5  ;;  %v12289_v16 = vsel %vm17647_vm14, %v12287_v11, %v12288_v10  ;;  %v12774_v22 = vrot.slane %v12773_v24, 4  ;;  %v12806_v62 = vrot.slane %v12804_v0, 4 }
 0x34d   : > { %16853 = vmatpush3.bf16.msra.mxu0 %v17348_v36  ;;  %16831 = vmatmul.mubr.bf16.gmra.mxu1 %v14919_v53  ;;  %v22992_v36 = vpop.f32.mrf.mxu0  ;;  %v23001_v53 = vld [vmem:[#allocation3 + $0x8c] sm:$0x1]  ;;  %v12817_v9 = vrot.slane %v12815_v1, 4  ;;  %v12820_v7 = vrot.slane %v12818_v44, 5  ;;  %v12824_v33 = vshll.u32 %v22990_v23, 16  ;;  %v24063_v38 = vrot.slane %v22856_v43, 5 }
 0x34e   : > { %16902 = vmatprep.subr.bf16.mxu0 %v17352_v58  ;;  %16879 = vmatpush3.bf16.msra.mxu1 %v17346_v56  ;;  %v12797_v56 = vor.u32 %v12796_v20, %v12793_v39  ;;  %v12789_v24 = vsel %vm17618_vm13, %v12784_v60, %v12788_v12  ;;  %v17357_v39 = vld [vmem:[%s23678_s6 + $0x228] sm:$0xff]   ;;  %v12810_v20 = vshll.u32 %v23001_v53, 16  ;;  %v17354_v12 = vld [vmem:[%s23678_s6 + $0x1c0] sm:$0xff]  }
 0x34f   : > { %16834 = vmatprep.mubr.bf16.mxu1 %v14920_v34  ;;  %16880 = vmatprep.subr.bf16.mxu1 %v17349_v3  ;;  %v23003_v34 = vpop.f32.mrf.mxu1  ;;  %v12286_v11 = vsel %vm17647_vm14, %v14897_v37, %v24063_v38  ;;  %v23019_v10 = vpop.f32.mrf.mxu0  ;;  %v23022_v0 = vrot.slane %v12824_v33, 5  ;;  %v12834_v38 = vshll.u32 %v23005_v4, 16  ;;  %v12751_v37 = vld [vmem:[#allocation3 + $0x9c] sm:$0xf]  ;;  %v12821_v1 = vor.u32 %v12820_v7, %v12817_v9 }
 0x350   : > { %16855 = vmatmul.mubr.bf16.vlgmr.msra.gmra.mxu0 %v17350_v8  ;;  %24062 = vst [vmem:[#allocation56_spill] sm:$0xff] %v23003_v34  ;;  %v12828_v8 = vshrl.u32 %v22990_v23, 16  ;;  %v14921_v60 = vcombine.low %v12286_v11, %v12289_v16  ;;  %v12798_v33 = vrot.slane %v12797_v56, 4  ;;  %v17360_v16 = vld [vmem:[%s23678_s6 + $0x220] sm:$0xff]   ;;  %v12842_v9 = vshll.u32 %v12751_v37, 16 }
 0x351   : > { %16858 = vmatprep.mubr.bf16.mxu0 %v17353_v19  ;;  %16903 = vmatpush3.bf16.msra.mxu0 %v17352_v58  ;;  %v12807_v58 = vor.u32 %v12806_v62, %v22997_v6  ;;  %v12779_v19 = vsel %vm17618_vm13, %v12774_v22, %v22960_v2  ;;  %v17356_v62 = vld [vmem:[#allocation3 + $0x9c] sm:$0xff]   ;;  %v12839_v22 = vshrl.u32 %v12751_v37, 16  ;;  %v23042_v7 = vpop.f32.mrf.mxu0  ;;  %v17359_v56 = vld [vmem:[#allocation3 + $0xa8] sm:$0xff]   ;;  %v12812_v11 = vrot.slane %v12810_v20, 5 }
 0x352   : > { %16904 = vmatprep.subr.bf16.mxu0 %v17355_v35  ;;  %16881 = vmatpush3.bf16.msra.mxu1 %v17349_v3  ;;  %v12830_v43 = vrot.slane %v12828_v8, 4  ;;  %v23031_v3 = vpop.f32.mrf.mxu1  ;;  %v14978_v44 = vcombine.low %v12779_v19, %v12789_v24  ;;  %v17358_v2 = vld [vmem:[%s23679_s7 + $0x38] sm:$0xff]   ;;  %v12848_v37 = vshll.u32 %v23034_v45, 16  ;;  %v12852_v20 = vshrl.u32 %v23034_v45, 16 }
 0x353   : > { %16882 = vmatprep.subr.bf16.mxu1 %v17351_v40  ;;  %24064 = vst [vmem:[#allocation57_spill] sm:$0xff] %v23031_v3  ;;  %v12808_v8 = vrot.slane %v12807_v58, 4  ;;  %v12836_v58 = vrot.slane %v12834_v38, 5  ;;  %v12841_v29 = vrot.slane %v12839_v22, 4  ;;  %v12844_v3 = vrot.slane %v12842_v9, 5 }
 0x354   : > { %v12831_v51 = vor.u32 %v12830_v43, %v23022_v0  ;;  %v23044_v43 = vld [vmem:[#allocation3 + $0xa4] sm:$0x1]  ;;  %v23046_v19 = vpop.f32.mrf.mxu1  ;;  %v12850_v22 = vrot.slane %v12848_v37, 5 }
 0x355   : > { %16905 = vmatpush3.bf16.msra.mxu0 %v17355_v35  ;;  %16835 = vmatmul.mubr.bf16.gmra.mxu1 %v14921_v60  ;;  %v12754_v35 = vld [vmem:[#allocation3 + $0xa8] sm:$0xf]  ;;  %v12822_v60 = vrot.slane %v12821_v1, 4  ;;  %24065 = vst [vmem:[#allocation58_spill] sm:$0xff] %v23046_v19 }
 0x356   : > { %16906 = vmatprep.subr.bf16.mxu0 %v17357_v39  ;;  %16883 = vmatpush3.bf16.msra.mxu1 %v17351_v40  ;;  %v12832_v24 = vrot.slane %v12831_v51, 4  ;;  %v12803_v40 = vsel %vm17618_vm13, %v12798_v33, %v22997_v6  ;;  %v12813_v51 = vsel %vm17618_vm13, %v12808_v8, %v12812_v11  ;;  %v12863_v38 = vshrl.u32 %v12754_v35, 16  ;;  %v23065_v33 = vld [vmem:[#allocation3 + $0xb0] sm:$0x1] }
 0x357   : > { %16886 = vmatprep.mubr.bf16.mxu1 %v14978_v44  ;;  %16884 = vmatprep.subr.bf16.mxu1 %v17354_v12  ;;  %v17363_v44 = vld [vmem:[%s23678_s6 + $0x218] sm:$0xff]   ;;  %v12866_v9 = vshll.u32 %v12754_v35, 16  ;;  %v12854_v6 = vrot.slane %v12852_v20, 4  ;;  %v12872_v11 = vshll.u32 %v23049_v18, 16  ;;  %v12876_v35 = vshrl.u32 %v23049_v18, 16 }
 0x358   : > { %16859 = vmatmul.mubr.bf16.gmra.mxu0 %v17356_v62  ;;  %v12837_v1 = vsel %vm17618_vm13, %v12832_v24, %v12836_v58  ;;  %v12845_v62 = vor.u32 %v12844_v3, %v12841_v29  ;;  %v12865_v8 = vrot.slane %v12863_v38, 4  ;;  %v14979_v24 = vcombine.low %v12803_v40, %v12813_v51  ;;  %v17361_v29 = vld [vmem:[%s23679_s7 + $0x30] sm:$0xff]   ;;  %v23074_v3 = vpop.f32.mrf.mxu1 }
 0x359   : > { %16862 = vmatprep.mubr.bf16.mxu0 %v17359_v56  ;;  %16907 = vmatpush3.bf16.msra.mxu0 %v17357_v39  ;;  %v23062_v56 = vpop.f32.mrf.mxu0  ;;  %v12858_v39 = vshll.u32 %v23044_v43, 16  ;;  %v12827_v58 = vsel %vm17618_vm13, %v12822_v60, %v23022_v0  ;;  %24066 = vst [vmem:[#allocation59_spill] sm:$0xff] %v23074_v3  ;;  %v12855_v38 = vor.u32 %v12854_v6, %v12850_v22  ;;  %v12874_v19 = vrot.slane %v12872_v11, 5  ;;  %v17362_v40 = vld [vmem:[#allocation3 + $0xb4] sm:$0xff]  }
 0x35a   : > { %16908 = vmatprep.subr.bf16.mxu0 %v17360_v16  ;;  %16885 = vmatpush3.bf16.msra.mxu1 %v17354_v12  ;;  %v12868_v12 = vrot.slane %v12866_v9, 5  ;;  %v14980_v37 = vcombine.low %v12827_v58, %v12837_v1  ;;  %v12846_v20 = vrot.slane %v12845_v62, 4  ;;  %v12878_v0 = vrot.slane %v12876_v35, 4  ;;  %v17366_v3 = vld [vmem:[%s23678_s6 + $0x210] sm:$0xff]   ;;  %v12757_v9 = vld [vmem:[#allocation3 + $0xb4] sm:$0xf] }
 0x35b   : > { %16934 = vmatprep.subr.bf16.mxu1 %v17358_v2  ;;  %v12882_v60 = vshll.u32 %v23065_v33, 16  ;;  %v23081_v34 = vpop.f32.mrf.mxu0  ;;  %v12856_v1 = vrot.slane %v12855_v38, 4  ;;  %v12860_v62 = vrot.slane %v12858_v39, 5  ;;  %v17364_v6 = vld [vmem:[%s23679_s7 + $0x28] sm:$0xff]   ;;  %v23090_v35 = vld [vmem:[#allocation3 + $0xb8] sm:$0xf] }
 0x35c   : > { %v12869_v51 = vor.u32 %v12868_v12, %v12865_v8  ;;  %v23086_v8 = vpop.f32.mrf.mxu1  ;;  %v486_v12 = vsel %vm17519_vm2, 0, %v485_v52  ;;  %v12887_v38 = vshrl.u32 %v12757_v9, 16  ;;  %v17369_v52 = vld [vmem:[%s23678_s6 + $0x208] sm:$0xff]  }
 0x35d   : > { %16909 = vmatpush3.bf16.msra.mxu0 %v17360_v16  ;;  %16887 = vmatmul.mubr.bf16.vlgmr.msra.gmra.mxu1 %v14979_v24  ;;  %v17365_v16 = vld [vmem:[#allocation3 + $0xc0] sm:$0xff]   ;;  %24067 = vst [vmem:[#allocation60_spill] sm:$0xff] %v23086_v8  ;;  %v12879_v24 = vor.u32 %v12878_v0, %v12874_v19  ;;  %v12861_v39 = vsel %vm17618_vm13, %v12856_v1, %v12860_v62  ;;  %487 = vst [vmem:[#allocation3 + $0xcc] sm:$0x1] %v486_v12  ;;  %v12884_v8 = vrot.slane %v12882_v60, 5 }
 0x35e   : > { %16910 = vmatprep.subr.bf16.mxu0 %v17363_v44  ;;  %16935 = vmatpush3.bf16.msra.mxu1 %v17358_v2  ;;  %v12870_v11 = vrot.slane %v12869_v51, 4  ;;  %v12851_v2 = vsel %vm17618_vm13, %v12846_v20, %v12850_v22  ;;  %v12889_v22 = vrot.slane %v12887_v38, 4  ;;  %v12900_v1 = vshrl.u32 %v23090_v35, 16  ;;  %v13167_v62 = vld [vmem:[#allocation3 + $0x78] sm:$0xe] }
 0x35f   : > { %16890 = vmatprep.mubr.bf16.mxu1 %v14980_v37  ;;  %16936 = vmatprep.subr.bf16.mxu1 %v17361_v29  ;;  %v23096_v37 = vld [vmem:[#allocation3 + $0xbc] sm:$0x1]  ;;  %v14981_v51 = vcombine.low %v12851_v2, %v12861_v39  ;;  %v12880_v0 = vrot.slane %v12879_v24, 4  ;;  %v23109_v24 = vpop.f32.mrf.mxu1  ;;  %v13201_v12 = vrot.slane %v22933_v25, 5  ;;  %v12760_v2 = vld [vmem:[#allocation3 + $0xc0] sm:$0xf] }
 0x360   : > { %16863 = vmatmul.mubr.bf16.gmra.mxu0 %v17362_v40  ;;  %v12890_v40 = vshll.u32 %v12757_v9, 16  ;;  %v12875_v9 = vsel %vm17618_vm13, %v12870_v11, %v12874_v19  ;;  %24069 = vst [vmem:[#allocation4_spill] sm:$0xff] %v23109_v24  ;;  %v12906_v58 = vshll.u32 %v23096_v37, 16  ;;  %v12902_v42 = vrot.slane %v12900_v1, 4  ;;  %v23116_v19 = vld [vmem:[#allocation3 + $0xc4] sm:$0xf] }
 0x361   : > { %16866 = vmatprep.mubr.bf16.mxu0 %v17365_v16  ;;  %16911 = vmatpush3.bf16.msra.mxu0 %v17363_v44  ;;  %v23101_v16 = vpop.f32.mrf.mxu0  ;;  %v12896_v44 = vshll.u32 %v23090_v35, 16  ;;  %v12885_v60 = vsel %vm17618_vm13, %v12880_v0, %v12884_v8  ;;  %v14994_v8 = vrot.slane %v13167_v62, 9  ;;  %v13203_v11 = vrot.slane %v13201_v12, 4  ;;  %v17371_v24 = vld [vmem:[%s23678_s6 + $0x200] sm:$0xff]  }
 0x362   : > { %16912 = vmatprep.subr.bf16.mxu0 %v17366_v3  ;;  %16937 = vmatpush3.bf16.msra.mxu1 %v17361_v29  ;;  %v12892_v20 = vrot.slane %v12890_v40, 5  ;;  %v17367_v29 = vld [vmem:[%s23679_s7 + $0x20] sm:$0xff]   ;;  %v14982_v39 = vcombine.low %v12875_v9, %v12885_v60  ;;  %v13204_v0 = vrot.slane %v22950_v13, 5  ;;  %v17370_v13 = vld [vmem:[%s23679_s7 + $0x18] sm:$0xff]   ;;  %v12924_v9 = vshrl.u32 %v23116_v19, 16 }
 0x363   : > { %16938 = vmatprep.subr.bf16.mxu1 %v17364_v6  ;;  %v12898_v40 = vrot.slane %v12896_v44, 5  ;;  %v23122_v15 = vpop.f32.mrf.mxu0  ;;  %v12914_v44 = vshll.u32 %v12760_v2, 16  ;;  %v13202_v62 = vsel %vm17647_vm14, %v14994_v8, %v13201_v12 }
 0x364   : > { %v12893_v38 = vor.u32 %v12892_v20, %v12889_v22  ;;  %24070 = vst [vmem:[#allocation61_spill] sm:$0xff] %v23122_v15  ;;  %v23124_v22 = vld [vmem:[#allocation3 + $0xc8] sm:$0x1]  ;;  %v12911_v20 = vshrl.u32 %v12760_v2, 16  ;;  %v17368_v1 = vld [vmem:[#allocation3 + $0xcc] sm:$0xff]   ;;  %v12908_v2 = vrot.slane %v12906_v58, 5 }
 0x365   : > { %16913 = vmatpush3.bf16.msra.mxu0 %v17366_v3  ;;  %16891 = vmatmul.mubr.bf16.gmra.mxu1 %v14981_v51  ;;  %v12903_v3 = vor.u32 %v12902_v42, %v12898_v40  ;;  %v23126_v51 = vpop.f32.mrf.mxu1  ;;  %v12920_v42 = vshll.u32 %v23116_v19, 16  ;;  %v12916_v32 = vrot.slane %v12914_v44, 5  ;;  %v12926_v30 = vrot.slane %v12924_v9, 4  ;;  %v23138_v12 = vpop.f32.mrf.mxu0  ;;  %v17372_v44 = vld [vmem:[%s23679_s7 + $0x10] sm:$0xff]   ;;  %v23150_v9 = vld [vmem:[#allocation3 + $0xd0] sm:$0xf] }
 0x366   : > { %16914 = vmatprep.subr.bf16.mxu0 %v17369_v52  ;;  %16939 = vmatpush3.bf16.msra.mxu1 %v17364_v6  ;;  %v12894_v25 = vrot.slane %v12893_v38, 4  ;;  %v13205_v6 = vsel %vm17647_vm14, %v13203_v11, %v13204_v0  ;;  %v12913_v38 = vrot.slane %v12911_v20, 4  ;;  %v12930_v15 = vshll.u32 %v23124_v22, 16 }
 0x367   : > { %16894 = vmatprep.mubr.bf16.mxu1 %v14982_v39  ;;  %16940 = vmatprep.subr.bf16.mxu1 %v17367_v29  ;;  %v12904_v60 = vrot.slane %v12903_v3, 4  ;;  %v15018_v39 = vcombine.low %v13202_v62, %v13205_v6  ;;  %v12922_v63 = vrot.slane %v12920_v42, 5  ;;  %v23144_v58 = vpop.f32.mrf.mxu1 }
 0x368   : > { %16867 = vmatmul.mubr.bf16.gmra.mxu0 %v17368_v1  ;;  %v12899_v8 = vsel %vm17618_vm13, %v12894_v25, %v12898_v40  ;;  %v12917_v3 = vor.u32 %v12916_v32, %v12913_v38  ;;  %v539_v1 = vld [vmem:[#allocation3 + $0xd4] sm:$0x1]  ;;  %v13208_v40 = vrot.slane %v22969_v48, 5  ;;  %v12932_v6 = vrot.slane %v12930_v15, 5 }
 0x369   : > { %16915 = vmatpush3.bf16.msra.mxu0 %v17369_v52  ;;  %v12909_v11 = vsel %vm17618_vm13, %v12904_v60, %v12908_v2  ;;  %16918 = vmatprep.mubr.bf16.mxu0 %v15018_v39  ;;  %v13168_v52 = vld [vmem:[#allocation3 + $0x84] sm:$0xe]  ;;  %v12927_v20 = vor.u32 %v12926_v30, %v12922_v63  ;;  %v23152_v60 = vpop.f32.mrf.mxu0  ;;  %v13211_v32 = vrot.slane %v23001_v53, 5  ;;  %v540_v39 = vsel %vm17551_vm6, 0, %v539_v1  ;;  %v17373_v53 = vld [vmem:[%s23679_s7 + $0x8] sm:$0xff]  }
 0x36a   : > { %16916 = vmatprep.subr.bf16.mxu0 %v17371_v24  ;;  %16941 = vmatpush3.bf16.msra.mxu1 %v17367_v29  ;;  %v14983_v0 = vcombine.low %v12899_v8, %v12909_v11  ;;  %v12763_v29 = vld [vmem:[#allocation3 + $0xcc] sm:$0xf]  ;;  %v12918_v25 = vrot.slane %v12917_v3, 4  ;;  %v14995_v42 = vrot.slane %v13168_v52, 9  ;;  %v13210_v30 = vrot.slane %v13208_v40, 4 }
 0x36b   : > { %16942 = vmatprep.subr.bf16.mxu1 %v17370_v13  ;;  %v12928_v62 = vrot.slane %v12927_v20, 4  ;;  %v12935_v38 = vshrl.u32 %v12763_v29, 16  ;;  %541 = vst [vmem:[#allocation3 + $0xd4] sm:$0x1] %v540_v39  ;;  %v12948_v1 = vshrl.u32 %v23150_v9, 16 }
 0x36c   : > { %v12923_v48 = vsel %vm17618_vm13, %v12918_v25, %v12922_v63  ;;  %v13209_v8 = vsel %vm17647_vm14, %v14995_v42, %v13208_v40  ;;  %v13212_v52 = vsel %vm17647_vm14, %v13210_v30, %v13211_v32  ;;  %v12944_v63 = vshll.u32 %v23150_v9, 16  ;;  %v13169_v25 = vld [vmem:[#allocation3 + $0x90] sm:$0xe]  ;;  %v17374_v32 = vld [vmem:[%s23679_s7] sm:$0xff]  }
 0x36d   : > { %16917 = vmatpush3.bf16.msra.mxu0 %v17371_v24  ;;  %16895 = vmatmul.mubr.bf16.gmra.mxu1 %v14983_v0  ;;  %v23157_v24 = vpop.f32.mrf.mxu1  ;;  %v12933_v15 = vsel %vm17618_vm13, %v12928_v62, %v12932_v6  ;;  %v12937_v0 = vrot.slane %v12935_v38, 4  ;;  %v15019_v3 = vcombine.low %v13209_v8, %v13212_v52  ;;  %v23172_v62 = vpop.f32.mrf.mxu0  ;;  %v13215_v6 = vrot.slane %v22990_v23, 5 }
 0x36e   : > { %16943 = vmatpush3.bf16.msra.mxu1 %v17370_v13  ;;  %v12938_v13 = vshll.u32 %v12763_v29, 16  ;;  %v14984_v11 = vcombine.low %v12923_v48, %v12933_v15  ;;  %v12946_v40 = vrot.slane %v12944_v63, 5  ;;  %v12950_v30 = vrot.slane %v12948_v1, 4  ;;  %v13170_v15 = vld [vmem:[#allocation3 + $0x9c] sm:$0xe]  ;;  %v15035_v1 = vld [vmem:[%s17512_s12 + $0x88] sm:$0xff] }
 0x36f   : > { %16944 = vmatprep.subr.bf16.mxu1 %v17372_v44  ;;  %v23175_v29 = vpop.f32.mrf.mxu1  ;;  %v14996_v2 = vrot.slane %v13169_v25, 9  ;;  %v13217_v39 = vrot.slane %v13215_v6, 4  ;;  %v13218_v38 = vrot.slane %v23005_v4, 5  ;;  %v23181_v23 = vpop.f32.mrf.mxu0  ;;  %v13222_v52 = vrot.slane %v23034_v45, 5  ;;  %v13171_v25 = vld [vmem:[#allocation3 + $0xa8] sm:$0xe] }
 0x370   : > { %v12940_v20 = vrot.slane %v12938_v13, 5  ;;  %16898 = vmatprep.mubr.bf16.mxu1 %v14984_v11  ;;  %16919 = vmatmul.mubr.bf16.vlgmr.msra.gmra.mxu0 %v15019_v3  ;;  %v12951_v48 = vor.u32 %v12950_v30, %v12946_v40  ;;  %v13229_v45 = vrot.slane %v23049_v18, 5 }
 0x371   : > { %v13216_v13 = vsel %vm17647_vm14, %v14996_v2, %v13215_v6  ;;  %v13219_v11 = vsel %vm17647_vm14, %v13217_v39, %v13218_v38  ;;  %v13224_v30 = vrot.slane %v13222_v52, 4  ;;  %v13225_v6 = vrot.slane %v23044_v43, 5  ;;  %v23199_v39 = vpop.f32.mrf.mxu0 }
 0x372   : > { %16945 = vmatpush3.bf16.msra.mxu1 %v17372_v44  ;;  %v12941_v42 = vor.u32 %v12940_v20, %v12937_v0  ;;  %v23183_v8 = vld [vmem:[#allocation3 + $0xd4] sm:$0x1]  ;;  %v23190_v0 = vpop.f32.mrf.mxu1  ;;  %v12952_v4 = vrot.slane %v12951_v48, 4  ;;  %v15020_v3 = vcombine.low %v13216_v13, %v13219_v11  ;;  %v15034_v20 = vld [vmem:[%s17512_s12 + $0x80] sm:$0xff]  ;;  %v14998_v13 = vrot.slane %v13171_v25, 9  ;;  %v15036_v25 = vld [vmem:[%s17512_s12 + $0x90] sm:$0xff] }
 0x373   : > { %16946 = vmatprep.subr.bf16.mxu1 %v17373_v53  ;;  %v12954_v63 = vshll.u32 %v23183_v8, 16  ;;  %v13226_v48 = vsel %vm17647_vm14, %v13224_v30, %v13225_v6 }
 0x374   : > { %v12942_v44 = vrot.slane %v12941_v42, 4  ;;  %v14997_v42 = vrot.slane %v13170_v15, 9  ;;  %16922 = vmatprep.mubr.bf16.mxu0 %v15020_v3  ;;  %v13480_v15 = vpack.c.bf16 %v15035_v1, %v15034_v20  ;;  %v23205_v43 = vpop.f32.mrf.mxu1  ;;  %v13172_v3 = vld [vmem:[#allocation3 + $0xb4] sm:$0xe]  ;;  %v13236_v20 = vrot.slane %v23090_v35, 5  ;;  %v23215_v1 = vpop.f32.mrf.mxu0 }
 0x375   : > { %v14999_v35 = vrot.slane %v13172_v3, 9 }
 0x376   : > { %16947 = vmatpush3.bf16.msra.mxu1 %v17373_v53  ;;  %v12947_v2 = vsel %vm17618_vm13, %v12942_v44, %v12946_v40  ;;  %v12956_v53 = vrot.slane %v12954_v63, 5  ;;  %v13223_v38 = vsel %vm17647_vm14, %v14997_v42, %v13222_v52  ;;  %v13231_v44 = vrot.slane %v13229_v45, 4  ;;  %v15037_v42 = vld [vmem:[%s17512_s12 + $0x98] sm:$0xff]  ;;  %v23220_v30 = vpop.f32.mrf.mxu1 }
 0x377   : > { %16948 = vmatprep.subr.bf16.mxu1 %v17374_v32  ;;  %v15021_v18 = vcombine.low %v13223_v38, %v13226_v48  ;;  %v13230_v52 = vsel %vm17647_vm14, %v14998_v13, %v13229_v45  ;;  %v13238_v6 = vrot.slane %v13236_v20, 4  ;;  %v13243_v45 = vrot.slane %v23116_v19, 5  ;;  %v13174_v38 = vld [vmem:[#allocation3 + $0xcc] sm:$0xe] }
 0x378   : > { %v12957_v40 = vsel %vm17618_vm13, %v12952_v4, %v12956_v53  ;;  %v15039_v53 = vld [vmem:[%s17512_s12 + $0xa8] sm:$0xff]  ;;  %v15000_v48 = vrot.slane %v13173_v28, 9  ;;  %v13481_v13 = vpack.c.bf16 %v15037_v42, %v15036_v25  ;;  %v13253_v28 = vrot.slane %v23183_v8, 5  ;;  %v15042_v8 = vld [vmem:[%s17512_s12 + $0xc0] sm:$0xff] }
 0x379   : > { %v14985_v11 = vcombine.low %v12947_v2, %v12957_v40  ;;  %16923 = vmatmul.mubr.bf16.gmra.mxu0 %v15021_v18  ;;  %v13239_v2 = vrot.slane %v23096_v37, 5  ;;  %v13245_v18 = vrot.slane %v13243_v45, 4 }
 0x37a   : > { %16949 = vmatpush3.bf16.msra.mxu1 %v17374_v32  ;;  %v13232_v32 = vrot.slane %v23065_v33, 5  ;;  %v15038_v33 = vld [vmem:[%s17512_s12 + $0xa0] sm:$0xff]  ;;  %v13244_v19 = vsel %vm17647_vm14, %v15000_v48, %v13243_v45 }
 0x37b   : > { %16899 = vmatmul.mubr.bf16.gmra.mxu1 %v14985_v11  ;;  %v13240_v40 = vsel %vm17647_vm14, %v13238_v6, %v13239_v2  ;;  %v13482_v37 = vpack.c.bf16 %v15039_v53, %v15038_v33  ;;  %v15001_v11 = vrot.slane %v13174_v38, 9  ;;  %v15040_v6 = vld [vmem:[%s17512_s12 + $0xb0] sm:$0xff]  ;;  %v15041_v2 = vld [vmem:[%s17512_s12 + $0xb8] sm:$0xff]  ;;  %v15043_v53 = vld [vmem:[%s17512_s12 + $0xc8] sm:$0xff] }
 0x37c   : > { %v13233_v63 = vsel %vm17647_vm14, %v13231_v44, %v13232_v32  ;;  %16950 = vmatprep.mubr.bf16.mxu1 %v13480_v15  ;;  %v13246_v44 = vrot.slane %v23124_v22, 5  ;;  %v23228_v32 = vpop.f32.mrf.mxu0  ;;  %v13237_v15 = vsel %vm17647_vm14, %v14999_v35, %v13236_v20  ;;  %v13250_v22 = vrot.slane %v23150_v9, 5 }
 0x37d   : > { %v15022_v4 = vcombine.low %v13230_v52, %v13233_v63  ;;  %v23234_v52 = vpop.f32.mrf.mxu1  ;;  %v15023_v63 = vcombine.low %v13237_v15, %v13240_v40  ;;  %v13483_v35 = vpack.c.bf16 %v15041_v2, %v15040_v6  ;;  %v24080_v6 = vld [vmem:[#allocation21_spill] sm:$0xff] }
 0x37e   : > { %v13247_v3 = vsel %vm17647_vm14, %v13245_v18, %v13246_v44  ;;  %v23240_v25 = vpop.f32.mrf.mxu0  ;;  %v13251_v42 = vsel %vm17647_vm14, %v15001_v11, %v13250_v22  ;;  %v24074_v18 = vld [vmem:[#allocation15_spill] sm:$0xff]  ;;  %v15044_v11 = vld [vmem:[%s17512_s12 + $0xd0] sm:$0xff] }
 0x37f   : > { %16926 = vmatprep.mubr.bf16.mxu0 %v15022_v4  ;;  %v15024_v20 = vcombine.low %v13244_v19, %v13247_v3  ;;  %v13252_v4 = vrot.slane %v13250_v22, 4  ;;  %24072 = vst [vmem:[#allocation5_spill] sm:$0xff] %v23240_v25  ;;  %v23244_v33 = vpop.f32.mrf.mxu1  ;;  %v24075_v44 = vld [vmem:[#allocation43_spill] sm:$0xff]  ;;  %v24077_v22 = vld [vmem:[#allocation28_spill] sm:$0xff]  ;;  %v24086_v25 = vld [vmem:[#allocation18_spill] sm:$0xff] }
 0x380   : > { %v23252_v38 = vpop.f32.mrf.mxu0  ;;  %v8126_v15 = vadd.f32 %v24075_v44, %v24074_v18 }
 0x381   : > { %16927 = vmatmul.mubr.bf16.gmra.mxu0 %v15023_v63  ;;  %v13254_v9 = vsel %vm17647_vm14, %v13252_v4, %v13253_v28  ;;  %24073 = vst [vmem:[#allocation62_spill] sm:$0xff] %v23252_v38  ;;  %v23254_v48 = vpop.f32.mrf.mxu1  ;;  %v15045_v63 = vld [vmem:[%s17512_s12 + $0xd8] sm:$0xff]  ;;  %v24085_v38 = vld [vmem:[#allocation23_spill] sm:$0xff] }
 0x382   : > { %16930 = vmatprep.mubr.bf16.mxu0 %v15024_v20  ;;  %v15025_v45 = vcombine.low %v13251_v42, %v13254_v9  ;;  %v8460_v28 = vadd.f32 %v24077_v22, %v8126_v15  ;;  %v24078_v20 = vld [vmem:[#allocation6_spill] sm:$0xff]  ;;  %v24079_v42 = vld [vmem:[#allocation41_spill] sm:$0xff] }
 0x383   : > { %16951 = vmatmul.mubr.bf16.vlgmr.msra.gmra.mxu1 %v13481_v13  ;;  %v13484_v13 = vpack.c.bf16 %v15043_v53, %v15042_v8  ;;  %v23260_v19 = vpop.f32.mrf.mxu1  ;;  %v8701_v2 = vadd.f32 %v24080_v6, %v24079_v42  ;;  %v15046_v9 = vld [vmem:[%s17512_s12 + $0xe0] sm:$0xff]  ;;  %v15047_v8 = vld [vmem:[%s17512_s12 + $0xe8] sm:$0xff] }
 0x384   : > { %16954 = vmatprep.mubr.bf16.mxu1 %v13482_v37  ;;  %v8703_v37 = vadd.f32 %v24076_v14, %v22525_v31  ;;  %v13486_v14 = vpack.c.bf16 %v15047_v8, %v15046_v9 }
 0x385   : > { %v23275_v44 = vpop.f32.mrf.mxu1 }
 0x386   : > { %v9129_v4 = vadd.f32 %v24078_v20, %v8703_v37  ;;  %v24083_v37 = vld [vmem:[#allocation38_spill] sm:$0xff] }
 0x387   : > { %v24084_v20 = vld [vmem:[#allocation10_spill] sm:$0xff] }
 0x388   : > { %v8702_v42 = vadd.f32 %v24084_v20, %v8460_v28  ;;  %v9427_v6 = vadd.f32 %v22708_v47, %v9129_v4  ;;  %v24088_v28 = vld [vmem:[#allocation35_spill] sm:$0xff] }
 0x389   : > { %16931 = vmatmul.mubr.bf16.gmra.mxu0 %v15025_v45  ;;  %v24081_v45 = vld [vmem:[#allocation24_spill] sm:$0xff]  ;;  %v24089_v47 = vld [vmem:[#allocation31_spill] sm:$0xff] }
 0x38a   : > { %v9127_v31 = vadd.f32 %v24081_v45, %v8701_v2  ;;  %v8142_v2 = vadd.f32 %v24086_v25, %v24085_v38  ;;  %v9671_v8 = vadd.f32 %v22992_v36, %v9427_v6  ;;  %v8705_v4 = vadd.f32 %v24089_v47, %v22667_v41  ;;  %v15048_v25 = vld [vmem:[%s17512_s12 + $0xf0] sm:$0xff]  ;;  %v15049_v38 = vld [vmem:[%s17512_s12 + $0xf8] sm:$0xff] }
 0x38b   : > { %16955 = vmatmul.mubr.bf16.gmra.mxu1 %v13483_v35  ;;  %v24082_v35 = vld [vmem:[#allocation26_spill] sm:$0xff] }
 0x38c   : > { %v16600_v40 = vpop.f32.mrf.mxu0  ;;  %16958 = vmatprep.mubr.bf16.mxu1 %v13484_v13  ;;  %v8704_v18 = vadd.f32 %v24082_v35, %v22638_v55  ;;  %v13485_v13 = vpack.c.bf16 %v15045_v63, %v15044_v11  ;;  %v9128_v11 = vadd.f32 %v22613_v27, %v8702_v42  ;;  %v24087_v63 = vld [vmem:[#allocation25_spill] sm:$0xff]  ;;  %v9425_v35 = vadd.f32 %v22752_v59, %v9127_v31  ;;  %v24090_v27 = vld [vmem:[#allocation46_spill] sm:$0xff]  ;;  %v24091_v59 = vld [vmem:[#allocation39_spill] sm:$0xff] }
 0x38d   : > { %v8707_v9 = vadd.f32 %v24087_v63, %v22642_v54  ;;  %v9131_v31 = vadd.f32 %v24091_v59, %v8705_v4 }
 0x38e   : > { %v10330_v3 = vpop.f32.mrf.mxu0  ;;  %v9130_v22 = vadd.f32 %v24083_v37, %v8704_v18  ;;  %v8464_v18 = vadd.f32 %v24088_v28, %v8142_v2  ;;  %v9669_v54 = vadd.f32 %v23019_v10, %v9425_v35  ;;  %v9426_v63 = vadd.f32 %v22812_v49, %v9128_v11  ;;  %v24093_v10 = vld [vmem:[#allocation27_spill] sm:$0xff]  ;;  %v24096_v49 = vld [vmem:[#allocation42_spill] sm:$0xff] }
 0x38f   : > { %v9133_v42 = vadd.f32 %v24090_v27, %v8707_v9  ;;  %v10097_v9 = vadd.f32 %v23126_v51, %v9671_v8  ;;  %v13487_v28 = vpack.c.bf16 %v15049_v38, %v15048_v25  ;;  %v24097_v51 = vld [vmem:[#allocation16_spill] sm:$0xff] }
 0x390   : > { %v23270_v53 = vpop.f32.mrf.mxu0  ;;  %v9428_v36 = vadd.f32 %v22782_v57, %v9130_v22  ;;  %v24094_v57 = vld [vmem:[#allocation37_spill] sm:$0xff]  ;;  %v24098_v25 = vld [vmem:[#allocation48_spill] sm:$0xff] }
 0x391   : > { %v8706_v22 = vadd.f32 %v24094_v57, %v8464_v18  ;;  %v9431_v27 = vadd.f32 %v22849_v46, %v9133_v42  ;;  %v10395_v59 = vadd.f32 %v16600_v40, %v10097_v9  ;;  %v24099_v38 = vld [vmem:[#allocation40_spill] sm:$0xff]  ;;  %v9429_v18 = vadd.f32 %v22881_v26, %v9131_v31  ;;  %v24101_v26 = vld [vmem:[#allocation45_spill] sm:$0xff]  ;;  %v24102_v9 = vld [vmem:[#allocation30_spill] sm:$0xff] }
 0x392   : > { %v23277_v15 = vpop.f32.mrf.mxu0 }
 0x393   : > { %16959 = vmatmul.mubr.bf16.gmra.mxu1 %v13485_v13  ;;  %v24092_v13 = vld [vmem:[#allocation32_spill] sm:$0xff]  ;;  %v9132_v8 = vadd.f32 %v24097_v51, %v8706_v22  ;;  %v9673_v22 = vadd.f32 %v23101_v16, %v9429_v18  ;;  %v24105_v51 = vld [vmem:[#allocation61_spill] sm:$0xff] }
 0x394   : > { %v23284_v45 = vpop.f32.mrf.mxu1  ;;  %16962 = vmatprep.mubr.bf16.mxu1 %v13486_v14  ;;  %v8708_v6 = vadd.f32 %v24092_v13, %v22748_v50  ;;  %v9672_v14 = vadd.f32 %v23042_v7, %v9428_v36  ;;  %v9670_v50 = vadd.f32 %v23062_v56, %v9426_v63  ;;  %v10095_v7 = vadd.f32 %v23144_v58, %v9669_v54  ;;  %v24095_v36 = vld [vmem:[#allocation20_spill] sm:$0xff] }
 0x395   : > { %v23286_v55 = vpop.f32.mrf.mxu0  ;;  %v8158_v11 = vadd.f32 %v24096_v49, %v24095_v36  ;;  %v8711_v13 = vadd.f32 %v24099_v38, %v24098_v25  ;;  %v9675_v58 = vadd.f32 %v23081_v34, %v9431_v27  ;;  %v24104_v27 = vld [vmem:[#allocation36_spill] sm:$0xff] }
 0x396   : > { %v23298_v37 = vpop.f32.mrf.mxu1  ;;  %v9134_v35 = vadd.f32 %v24093_v10, %v8708_v6  ;;  %v10393_v40 = vadd.f32 %v10330_v3, %v10095_v7  ;;  %v10098_v42 = vadd.f32 %v23157_v24, %v9672_v14  ;;  %v24100_v6 = vld [vmem:[#allocation22_spill] sm:$0xff]  ;;  %v24103_v10 = vld [vmem:[#allocation33_spill] sm:$0xff]  ;;  %v10096_v24 = vadd.f32 %v23175_v29, %v9670_v50 }
 0x397   : > { %v23300_v20 = vpop.f32.mrf.mxu0  ;;  %v8468_v63 = vadd.f32 %v24100_v6, %v8158_v11  ;;  %v9137_v31 = vadd.f32 %v24101_v26, %v8711_v13  ;;  %v8709_v57 = vadd.f32 %v24103_v10, %v24102_v9  ;;  %v9430_v7 = vadd.f32 %v22935_v61, %v9132_v8  ;;  %v24108_v13 = vld [vmem:[#allocation53_spill] sm:$0xff] }
 0x398   : > { %v23308_v2 = vpop.f32.mrf.mxu1  ;;  %v9432_v34 = vadd.f32 %v22903_v21, %v9134_v35  ;;  %v10396_v3 = vadd.f32 %v23270_v53, %v10098_v42  ;;  %v10394_v21 = vadd.f32 %v23277_v15, %v10096_v24  ;;  %v10101_v53 = vadd.f32 %v23190_v0, %v9675_v58  ;;  %v24106_v35 = vld [vmem:[#allocation51_spill] sm:$0xff]  ;;  %v24111_v9 = vld [vmem:[#allocation29_spill] sm:$0xff] }
 0x399   : > { %v23310_v41 = vpop.f32.mrf.mxu0  ;;  %v9435_v18 = vadd.f32 %v24108_v13, %v9137_v31  ;;  %v10099_v15 = vadd.f32 %v23205_v43, %v9673_v22  ;;  %v24109_v58 = vld [vmem:[#allocation47_spill] sm:$0xff]  ;;  %v24112_v43 = vld [vmem:[#allocation49_spill] sm:$0xff]  ;;  %v24123_v13 = vld [vmem:[#allocation8_spill] sm:$0xff] }
 0x39a   : > { %v23317_v47 = vpop.f32.mrf.mxu1  ;;  %v9676_v25 = vadd.f32 %v24105_v51, %v9432_v34  ;;  %v24110_v42 = vld [vmem:[#allocation55_spill] sm:$0xff]  ;;  %v8174_v10 = vadd.f32 %v24112_v43, %v24111_v9  ;;  %v24114_v22 = vld [vmem:[#allocation9_spill] sm:$0xff]  ;;  %v24118_v51 = vld [vmem:[#allocation44_spill] sm:$0xff] }
 0x39b   : > { %v23319_v4 = vpop.f32.mrf.mxu0  ;;  %16963 = vmatmul.mubr.bf16.gmra.mxu1 %v13487_v28  ;;  %v9135_v28 = vadd.f32 %v22823_v5, %v8709_v57  ;;  %v24107_v5 = vld [vmem:[#allocation7_spill] sm:$0xff]  ;;  %v10397_v26 = vadd.f32 %v23300_v20, %v10099_v15  ;;  %v24113_v57 = vld [vmem:[#allocation12_spill] sm:$0xff]  ;;  %v24127_v9 = vld [vmem:[#allocation54_spill] sm:$0xff] }
 0x39c   : > { %v16632_v46 = vpop.f32.mrf.mxu1  ;;  %v8710_v38 = vadd.f32 %v24107_v5, %v8468_v63  ;;  %v10102_v31 = vadd.f32 %v23220_v30, %v9676_v25  ;;  %v24119_v25 = vld [vmem:[#allocation13_spill] sm:$0xff] }
 0x39d   : > { %v23337_v56 = vpop.f32.mrf.mxu0  ;;  %v10596_v54 = vadd.f32 %v16632_v46, %v10395_v59  ;;  %v8712_v59 = vadd.f32 %v24104_v27, %v22854_v17  ;;  %v9674_v17 = vadd.f32 %v23138_v12, %v9430_v7  ;;  %v10399_v46 = vadd.f32 %v23286_v55, %v10101_v53  ;;  %v24116_v27 = vld [vmem:[#allocation14_spill] sm:$0xff]  ;;  %v24117_v7 = vld [vmem:[#allocation11_spill] sm:$0xff] }
 0x39e   : > { %v10531_v36 = vpop.f32.mrf.mxu1  ;;  %v9679_v12 = vadd.f32 %v23152_v60, %v9435_v18  ;;  %v10400_v20 = vadd.f32 %v23310_v41, %v10102_v31 }
 0x39f   : > { %v23346_v49 = vpop.f32.mrf.mxu0  ;;  %10613 = vst [vmem:[%s23335_s20 + $0x10] sm:$0xff] %v10596_v54  ;;  %v10594_v14 = vadd.f32 %v10531_v36, %v10393_v40  ;;  %v9138_v50 = vadd.f32 %v24106_v35, %v8712_v59  ;;  %v9136_v40 = vadd.f32 %v24109_v58, %v8710_v38  ;;  %v9433_v54 = vadd.f32 %v24110_v42, %v9135_v28  ;;  %v24121_v38 = vld [vmem:[#allocation34_spill] sm:$0xff]  ;;  %v24125_v42 = vld [vmem:[#allocation17_spill] sm:$0xff] }
 0x3a0   : > { %v16633_v16 = vpop.f32.mrf.mxu1  ;;  %v8715_v36 = vadd.f32 %v24114_v22, %v24113_v57  ;;  %v10100_v30 = vadd.f32 %v23234_v52, %v9674_v17  ;;  %v8472_v59 = vadd.f32 %v24116_v27, %v8174_v10  ;;  %v10105_v52 = vadd.f32 %v23244_v33, %v9679_v12  ;;  %v24128_v57 = vld [vmem:[#allocation59_spill] sm:$0xff]  ;;  %v24130_v27 = vld [vmem:[#allocation4_spill] sm:$0xff] }
 0x3a1   : > { %v23356_v11 = vpop.f32.mrf.mxu0  ;;  %10611 = vst [vmem:[%s23335_s20] sm:$0xff] %v10594_v14  ;;  %v10597_v29 = vadd.f32 %v16633_v16, %v10396_v3  ;;  %v9677_v34 = vadd.f32 %v23172_v62, %v9433_v54  ;;  %v24115_v14 = vld [vmem:[#allocation56_spill] sm:$0xff]  ;;  %v24120_v62 = vld [vmem:[#allocation57_spill] sm:$0xff] }
 0x3a2   : > { %v10534_v61 = vpop.f32.mrf.mxu1  ;;  %v9436_v60 = vadd.f32 %v24115_v14, %v9138_v50  ;;  %v9141_v16 = vadd.f32 %v24117_v7, %v8715_v36  ;;  %v9434_v53 = vadd.f32 %v24120_v62, %v9136_v40  ;;  %v10398_v41 = vadd.f32 %v23319_v4, %v10100_v30  ;;  %v24124_v40 = vld [vmem:[#allocation52_spill] sm:$0xff]  ;;  %v24131_v7 = vld [vmem:[#allocation5_spill] sm:$0xff] }
 0x3a3   : > { %v23365_v8 = vpop.f32.mrf.mxu0  ;;  %10614 = vst [vmem:[%s23335_s20 + $0x18] sm:$0xff] %v10597_v29  ;;  %v10595_v0 = vadd.f32 %v10534_v61, %v10394_v21  ;;  %v8713_v21 = vadd.f32 %v24119_v25, %v24118_v51  ;;  %v24122_v61 = vld [vmem:[#allocation50_spill] sm:$0xff]  ;;  %v10403_v58 = vadd.f32 %v23337_v56, %v10105_v52  ;;  %v8714_v54 = vadd.f32 %v24125_v42, %v8472_v59 }
 0x3a4   : > { %v9680_v50 = vadd.f32 %v23181_v23, %v9436_v60  ;;  %v8716_v18 = vadd.f32 %v24123_v13, %v24122_v61  ;;  %v10103_v23 = vadd.f32 %v23254_v48, %v9677_v34 }
 0x3a5   : > { %v16636_v6 = vpop.f32.mrf.mxu1  ;;  %v23373_v63 = vpop.f32.mrf.mxu0  ;;  %10612 = vst [vmem:[%s23335_s20 + $0x8] sm:$0xff] %v10595_v0  ;;  %v9139_v17 = vadd.f32 %v24121_v38, %v8713_v21  ;;  %v9678_v0 = vadd.f32 %v23199_v39, %v9434_v53  ;;  %v9140_v56 = vadd.f32 %v24127_v9, %v8714_v54 }
 0x3a6   : > { %v10600_v55 = vadd.f32 %v16636_v6, %v10399_v46  ;;  %v9142_v33 = vadd.f32 %v24124_v40, %v8716_v18  ;;  %v24126_v6 = vld [vmem:[#allocation58_spill] sm:$0xff]  ;;  %v10401_v31 = vadd.f32 %v23346_v49, %v10103_v23 }
 0x3a7   : > { %v10547_v3 = vpop.f32.mrf.mxu1  ;;  %v23384_v24 = vpop.f32.mrf.mxu0  ;;  %v9439_v12 = vadd.f32 %v24126_v6, %v9141_v16  ;;  %v9437_v22 = vadd.f32 %v24128_v57, %v9139_v17  ;;  %v10104_v34 = vadd.f32 %v23275_v44, %v9678_v0 }
 0x3a8   : > { %10617 = vst [vmem:[%s23335_s20 + $0x30] sm:$0xff] %v10600_v55  ;;  %v10598_v28 = vadd.f32 %v10547_v3, %v10397_v26  ;;  %v10106_v55 = vadd.f32 %v23260_v19, %v9680_v50  ;;  %v24129_v3 = vld [vmem:[#allocation60_spill] sm:$0xff] }
 0x3a9   : > { %v16637_v29 = vpop.f32.mrf.mxu1  ;;  %v16613_v35 = vpop.f32.mrf.mxu0  ;;  %v9683_v48 = vadd.f32 %v23215_v1, %v9439_v12  ;;  %v9440_v19 = vadd.f32 %v24129_v3, %v9142_v33  ;;  %v10402_v1 = vadd.f32 %v23365_v8, %v10104_v34  ;;  %v24132_v8 = vld [vmem:[#allocation62_spill] sm:$0xff] }
 0x3aa   : > { %10615 = vst [vmem:[%s23335_s20 + $0x20] sm:$0xff] %v10598_v28  ;;  %v10601_v5 = vadd.f32 %v16637_v29, %v10400_v20  ;;  %v10404_v36 = vadd.f32 %v23356_v11, %v10106_v55  ;;  %v9681_v20 = vadd.f32 %v23228_v32, %v9437_v22  ;;  %v9438_v11 = vadd.f32 %v24130_v27, %v9140_v56 }
 0x3ab   : > { %v10550_v46 = vpop.f32.mrf.mxu1  ;;  %v10381_v15 = vpop.f32.mrf.mxu0  ;;  %v10109_v30 = vadd.f32 %v23284_v45, %v9683_v48  ;;  %v9684_v16 = vadd.f32 %v24131_v7, %v9440_v19 }
 0x3ac   : > { %10618 = vst [vmem:[%s23335_s20 + $0x38] sm:$0xff] %v10601_v5  ;;  %v10599_v4 = vadd.f32 %v10550_v46, %v10398_v41  ;;  %v10107_v51 = vadd.f32 %v23298_v37, %v9681_v20  ;;  %v9682_v62 = vadd.f32 %v24132_v8, %v9438_v11 }
 0x3ad   : > { %v16640_v26 = vpop.f32.mrf.mxu1  ;;  %v10407_v25 = vadd.f32 %v23373_v63, %v10109_v30  ;;  %v10110_v53 = vadd.f32 %v23308_v2, %v9684_v16 }
 0x3ae   : > { %10616 = vst [vmem:[%s23335_s20 + $0x28] sm:$0xff] %v10599_v4  ;;  %v10604_v39 = vadd.f32 %v16640_v26, %v10403_v58  ;;  %v10405_v29 = vadd.f32 %v23384_v24, %v10107_v51  ;;  %v10108_v37 = vadd.f32 %v23317_v47, %v9682_v62 }
 0x3af   : > { %v10563_v43 = vpop.f32.mrf.mxu1  ;;  %v16664_v10 = vpop.f32.mrf.mxu0  ;;  %v10408_v63 = vadd.f32 %v16613_v35, %v10110_v53 }
 0x3b0   : > { %10621 = vst [vmem:[%s23335_s20 + $0x50] sm:$0xff] %v10604_v39  ;;  %v10602_v49 = vadd.f32 %v10563_v43, %v10401_v31  ;;  %v10406_v61 = vadd.f32 %v10381_v15, %v10108_v37 }
 0x3b1   : > { %v16641_v14 = vpop.f32.mrf.mxu1  ;;  %v10991_v60 = vpop.f32.mrf.mxu0 }
 0x3b2   : > { %10619 = vst [vmem:[%s23335_s20 + $0x40] sm:$0xff] %v10602_v49  ;;  %v10605_v28 = vadd.f32 %v16641_v14, %v10404_v36 }
 0x3b3   : > { %v10566_v59 = vpop.f32.mrf.mxu1  ;;  %v16665_v44 = vpop.f32.mrf.mxu0 }
 0x3b4   : > { %10622 = vst [vmem:[%s23335_s20 + $0x58] sm:$0xff] %v10605_v28  ;;  %v10603_v32 = vadd.f32 %v10566_v59, %v10402_v1 }
 0x3b5   : > { %v16644_v21 = vpop.f32.mrf.mxu1  ;;  %v10994_v45 = vpop.f32.mrf.mxu0 }
 0x3b6   : > { %10620 = vst [vmem:[%s23335_s20 + $0x48] sm:$0xff] %v10603_v32  ;;  %v10608_v50 = vadd.f32 %v16644_v21, %v10407_v25 }
 0x3b7   : > { %v10579_v41 = vpop.f32.mrf.mxu1  ;;  %v16668_v52 = vpop.f32.mrf.mxu0 }
 0x3b8   : > { %10625 = vst [vmem:[%s23335_s20 + $0x70] sm:$0xff] %v10608_v50  ;;  %v10606_v5 = vadd.f32 %v10579_v41, %v10405_v29 }
 0x3b9   : > { %v16645_v38 = vpop.f32.mrf.mxu1  ;;  %v11007_v17 = vpop.f32.mrf.mxu0 }
 0x3ba   : > { %10623 = vst [vmem:[%s23335_s20 + $0x60] sm:$0xff] %v10606_v5  ;;  %v10609_v13 = vadd.f32 %v16645_v38, %v10408_v63 }
 0x3bb   : > { %v10582_v18 = vpop.f32.mrf.mxu1  ;;  %v16669_v2 = vpop.f32.mrf.mxu0 }
 0x3bc   : > { %10626 = vst [vmem:[%s23335_s20 + $0x78] sm:$0xff] %v10609_v13  ;;  %v10607_v24 = vadd.f32 %v10582_v18, %v10406_v61 }
 0x3bd   : > { %v16696_v46 = vpop.f32.mrf.mxu1  ;;  %v11010_v0 = vpop.f32.mrf.mxu0 }
 0x3be   : > { %10624 = vst [vmem:[%s23335_s20 + $0x68] sm:$0xff] %v10607_v24  ;;  %v11193_v58 = vadd.f32 %v16696_v46, %v16664_v10 }
 0x3bf   : > { %v11184_v23 = vpop.f32.mrf.mxu1  ;;  %v16672_v4 = vpop.f32.mrf.mxu0 }
 0x3c0   : > { %v11185_v40 = vadd.f32 %v11184_v23, %v10991_v60 }
 0x3c1   : > { %v16697_v47 = vpop.f32.mrf.mxu1  ;;  %v11023_v35 = vpop.f32.mrf.mxu0 }
 0x3c2   : > { %v11196_v33 = vadd.f32 %v16697_v47, %v16665_v44 }
 0x3c3   : > { %v11187_v42 = vpop.f32.mrf.mxu1  ;;  %v16673_v54 = vpop.f32.mrf.mxu0 }
 0x3c4   : > { %v11188_v6 = vadd.f32 %v11187_v42, %v10994_v45 }
 0x3c5   : > { %v16700_v15 = vpop.f32.mrf.mxu1  ;;  %v11026_v12 = vpop.f32.mrf.mxu0 }
 0x3c6   : > { %v11209_v26 = vadd.f32 %v16700_v15, %v16668_v52 }
 0x3c7   : > { %v11200_v31 = vpop.f32.mrf.mxu1  ;;  %v16676_v55 = vpop.f32.mrf.mxu0 }
 0x3c8   : > { %v11201_v39 = vadd.f32 %v11200_v31, %v11007_v17 }
 0x3c9   : > { %v16701_v9 = vpop.f32.mrf.mxu1  ;;  %v11039_v56 = vpop.f32.mrf.mxu0 }
 0x3ca   : > { %v11212_v48 = vadd.f32 %v16701_v9, %v16669_v2 }
 0x3cb   : > { %v11203_v43 = vpop.f32.mrf.mxu1  ;;  %v16677_v10 = vpop.f32.mrf.mxu0 }
 0x3cc   : > { %v11204_v57 = vadd.f32 %v11203_v43, %v11010_v0 }
 0x3cd   : > { %v16704_v22 = vpop.f32.mrf.mxu1  ;;  %v11042_v36 = vpop.f32.mrf.mxu0 }
 0x3ce   : > { %v11225_v34 = vadd.f32 %v16704_v22, %v16672_v4 }
 0x3cf   : > { %v11216_v49 = vpop.f32.mrf.mxu1  ;;  %v16728_v3 = vpop.f32.mrf.mxu0 }
 0x3d0   : > { %v11217_v19 = vadd.f32 %v11216_v49, %v11023_v35  ;;  %v11522_v14 = vadd.f32 %v16728_v3, %v11193_v58 }
 0x3d1   : > { %v16705_v60 = vpop.f32.mrf.mxu1  ;;  %v11457_v20 = vpop.f32.mrf.mxu0 }
 0x3d2   : > { %v11228_v30 = vadd.f32 %v16705_v60, %v16673_v54  ;;  %v11520_v1 = vadd.f32 %v11457_v20, %v11185_v40 }
 0x3d3   : > { %v11219_v28 = vpop.f32.mrf.mxu1  ;;  %v16729_v27 = vpop.f32.mrf.mxu0 }
 0x3d4   : > { %v11220_v11 = vadd.f32 %v11219_v28, %v11026_v12  ;;  %v11523_v59 = vadd.f32 %v16729_v27, %v11196_v33 }
 0x3d5   : > { %v16708_v44 = vpop.f32.mrf.mxu1  ;;  %v11460_v7 = vpop.f32.mrf.mxu0 }
 0x3d6   : > { %v11241_v16 = vadd.f32 %v16708_v44, %v16676_v55  ;;  %v11521_v51 = vadd.f32 %v11460_v7, %v11188_v6 }
 0x3d7   : > { %v11232_v25 = vpop.f32.mrf.mxu1  ;;  %v16732_v32 = vpop.f32.mrf.mxu0 }
 0x3d8   : > { %v11233_v21 = vadd.f32 %v11232_v25, %v11039_v56  ;;  %v11526_v45 = vadd.f32 %v16732_v32, %v11209_v26 }
 0x3d9   : > { %v16709_v8 = vpop.f32.mrf.mxu1  ;;  %v11473_v62 = vpop.f32.mrf.mxu0 }
 0x3da   : > { %v11244_v53 = vadd.f32 %v16709_v8, %v16677_v10  ;;  %v11524_v29 = vadd.f32 %v11473_v62, %v11201_v39 }
 0x3db   : > { %v11235_v50 = vpop.f32.mrf.mxu1  ;;  %v16733_v41 = vpop.f32.mrf.mxu0 }
 0x3dc   : > { %v11236_v52 = vadd.f32 %v11235_v50, %v11042_v36  ;;  %v11527_v37 = vadd.f32 %v16733_v41, %v11212_v48 }
 0x3dd   : > { %v16760_v63 = vpop.f32.mrf.mxu1  ;;  %v11476_v5 = vpop.f32.mrf.mxu0 }
 0x3de   : > { %v23437_v38 = vadd.f32 %v16760_v63, %v11522_v14  ;;  %v11525_v17 = vadd.f32 %v11476_v5, %v11204_v57 }
 0x3df   : > { %v11698_v61 = vpop.f32.mrf.mxu1  ;;  %v16736_v13 = vpop.f32.mrf.mxu0 }
 0x3e0   : > { %v23439_v18 = vadd.f32 %v11698_v61, %v11520_v1  ;;  %v11530_v2 = vadd.f32 %v16736_v13, %v11225_v34 }
 0x3e1   : > { %v16761_v24 = vpop.f32.mrf.mxu1  ;;  %v11489_v46 = vpop.f32.mrf.mxu0 }
 0x3e2   : > { %v23441_v0 = vadd.f32 %v16761_v24, %v11523_v59  ;;  %v11528_v58 = vadd.f32 %v11489_v46, %v11217_v19 }
 0x3e3   : > { %v11701_v23 = vpop.f32.mrf.mxu1  ;;  %v16737_v4 = vpop.f32.mrf.mxu0 }
 0x3e4   : > { %v23443_v40 = vadd.f32 %v11701_v23, %v11521_v51  ;;  %v11531_v47 = vadd.f32 %v16737_v4, %v11228_v30 }
 0x3e5   : > { %v16764_v35 = vpop.f32.mrf.mxu1  ;;  %v11492_v33 = vpop.f32.mrf.mxu0 }
 0x3e6   : > { %v23445_v42 = vadd.f32 %v16764_v35, %v11526_v45  ;;  %v11529_v54 = vadd.f32 %v11492_v33, %v11220_v11 }
 0x3e7   : > { %v11714_v6 = vpop.f32.mrf.mxu1 }
 0x3e8   : > { %v16740_v15 = vpop.f32.mrf.mxu0  ;;  %v23447_v12 = vadd.f32 %v11714_v6, %v11524_v29 }
 0x3e9   : > { %v11534_v26 = vadd.f32 %v16740_v15, %v11241_v16  ;;  %v16765_v31 = vpop.f32.mrf.mxu1 }
 0x3ea   : > { %v11505_v55 = vpop.f32.mrf.mxu0  ;;  %v23449_v39 = vadd.f32 %v16765_v31, %v11527_v37 }
 0x3eb   : > { %v11532_v9 = vadd.f32 %v11505_v55, %v11233_v21  ;;  %v11717_v56 = vpop.f32.mrf.mxu1 }
 0x3ec   : > { %v16741_v48 = vpop.f32.mrf.mxu0  ;;  %v23451_v43 = vadd.f32 %v11717_v56, %v11525_v17 }
 0x3ed   : > { %v11535_v10 = vadd.f32 %v16741_v48, %v11244_v53  ;;  %v16768_v57 = vpop.f32.mrf.mxu1 }
 0x3ee   : > { %v11508_v22 = vpop.f32.mrf.mxu0  ;;  %v23453_v36 = vadd.f32 %v16768_v57, %v11530_v2 }
 0x3ef   : > { %v11533_v34 = vadd.f32 %v11508_v22, %v11236_v52  ;;  %v11730_v49 = vpop.f32.mrf.mxu1 }
 0x3f0   : > { %v23455_v3 = vpop.f32.mrf.mxu0  ;;  %v23457_v19 = vadd.f32 %v11730_v49, %v11528_v58 }
 0x3f1   : > { %v16769_v14 = vpop.f32.mrf.mxu1 }
 0x3f2   : > { %v23459_v60 = vpop.f32.mrf.mxu0  ;;  %v23461_v20 = vadd.f32 %v16769_v14, %v11531_v47 }
 0x3f3   : > { %v11733_v30 = vpop.f32.mrf.mxu1 }
 0x3f4   : > { %v23463_v1 = vpop.f32.mrf.mxu0  ;;  %v23465_v28 = vadd.f32 %v11733_v30, %v11529_v54 }
 0x3f5   : > { %v16772_v27 = vpop.f32.mrf.mxu1 }
 0x3f6   : > { %24133 = vst [vmem:[#allocation15_spill] sm:$0xff] %v23465_v28  ;;  %v23467_v11 = vpop.f32.mrf.mxu0  ;;  %v23469_v59 = vadd.f32 %v16772_v27, %v11534_v26 }
 0x3f7   : > { %v11746_v44 = vpop.f32.mrf.mxu1 }
 0x3f8   : > { %24134 = vst [vmem:[#allocation43_spill] sm:$0xff] %v23469_v59  ;;  %v23471_v7 = vpop.f32.mrf.mxu0  ;;  %v23473_v16 = vadd.f32 %v11746_v44, %v11532_v9 }
 0x3f9   : > { %v16773_v51 = vpop.f32.mrf.mxu1 }
 0x3fa   : > { %24135 = vst [vmem:[#allocation19_spill] sm:$0xff] %v23473_v16  ;;  %v23475_v25 = vpop.f32.mrf.mxu0  ;;  %v23477_v32 = vadd.f32 %v16773_v51, %v11535_v10 }
 0x3fb   : > { %v11749_v21 = vpop.f32.mrf.mxu1 }
 0x3fc   : > { %24136 = vst [vmem:[#allocation28_spill] sm:$0xff] %v23477_v32  ;;  %v23479_v45 = vpop.f32.mrf.mxu0  ;;  %v23481_v8 = vadd.f32 %v11749_v21, %v11533_v34 }
 0x3fd   : > { %v16824_v62 = vpop.f32.mrf.mxu1 }
 0x3fe   : > { %24137 = vst [vmem:[#allocation6_spill] sm:$0xff] %v23481_v8  ;;  %v23483_v53 = vpop.f32.mrf.mxu0 }
 0x3ff   : > { %v23485_v29 = vpop.f32.mrf.mxu1 }
 0x400   : > { %v23487_v50 = vpop.f32.mrf.mxu0 }
 0x401   : > { %v23489_v41 = vpop.f32.mrf.mxu1 }
 0x402   : > { %v23491_v52 = vpop.f32.mrf.mxu0 }
 0x403   : > { %v23493_v37 = vpop.f32.mrf.mxu1 }
 0x404   : > { %v23495_v63 = vpop.f32.mrf.mxu0 }
 0x405   : > { %v23497_v5 = vpop.f32.mrf.mxu1 }
 0x406   : > { %v23499_v17 = vpop.f32.mrf.mxu0 }
 0x407   : > { %24138 = vst [vmem:[#allocation41_spill] sm:$0xff] %v23499_v17  ;;  %v23501_v61 = vpop.f32.mrf.mxu1 }
 0x408   : > { %v23503_v13 = vpop.f32.mrf.mxu0 }
 0x409   : > { %24139 = vst [vmem:[#allocation21_spill] sm:$0xff] %v23503_v13  ;;  %v23505_v2 = vpop.f32.mrf.mxu1 }
 0x40a   : > { %v23507_v24 = vpop.f32.mrf.mxu0 }
 0x40b   : > { %24140 = vst [vmem:[#allocation24_spill] sm:$0xff] %v23507_v24  ;;  %v23509_v46 = vpop.f32.mrf.mxu1 }
 0x40c   : > { %v23511_v58 = vpop.f32.mrf.mxu0 }
 0x40d   : > { %24141 = vst [vmem:[#allocation26_spill] sm:$0xff] %v23511_v58  ;;  %v23513_v23 = vpop.f32.mrf.mxu1 }
 0x40e   : > { %v23515_v4 = vpop.f32.mrf.mxu0 }
 0x40f   : > { %24142 = vst [vmem:[#allocation38_spill] sm:$0xff] %v23515_v4  ;;  %v23517_v47 = vpop.f32.mrf.mxu1 }
 0x410   : > { %v16856_v35 = vpop.f32.mrf.mxu0 }
 0x411   : > { %v23519_v33 = vpop.f32.mrf.mxu1 }
 0x412   : > { %24143 = vst [vmem:[#allocation10_spill] sm:$0xff] %v23519_v33  ;;  %v12663_v54 = vpop.f32.mrf.mxu0 }
 0x413   : > { %v23521_v6 = vpop.f32.mrf.mxu1 }
 0x414   : > { %24144 = vst [vmem:[#allocation23_spill] sm:$0xff] %v23521_v6  ;;  %v16857_v15 = vpop.f32.mrf.mxu0 }
 0x415   : > { %v23523_v26 = vpop.f32.mrf.mxu1 }
 0x416   : > { %24145 = vst [vmem:[#allocation18_spill] sm:$0xff] %v23523_v26  ;;  %v12666_v31 = vpop.f32.mrf.mxu0 }
 0x417   : > { %v23525_v55 = vpop.f32.mrf.mxu1 }
 0x418   : > { %24146 = vst [vmem:[#allocation25_spill] sm:$0xff] %v23525_v55  ;;  %v23527_v9 = vpop.f32.mrf.mxu0 }
 0x419   : > { %v23529_v56 = vpop.f32.mrf.mxu1 }
 0x41a   : > { %24147 = vst [vmem:[#allocation35_spill] sm:$0xff] %v23529_v56  ;;  %v23531_v48 = vpop.f32.mrf.mxu0 }
 0x41b   : > { %v23533_v10 = vpop.f32.mrf.mxu1 }
 0x41c   : > { %24148 = vst [vmem:[#allocation31_spill] sm:$0xff] %v23533_v10  ;;  %v23535_v57 = vpop.f32.mrf.mxu0 }
 0x41d   : > { %v16888_v22 = vpop.f32.mrf.mxu1 }
 0x41e   : > { %v23537_v34 = vpop.f32.mrf.mxu0 }
 0x41f   : > { %v13088_v49 = vpop.f32.mrf.mxu1 }
 0x420   : > { %v23539_v14 = vpop.f32.mrf.mxu0 }
 0x421   : > { %v16889_v30 = vpop.f32.mrf.mxu1 }
 0x422   : > { %v23541_v27 = vpop.f32.mrf.mxu0 }
 0x423   : > { %24149 = vst [vmem:[#allocation46_spill] sm:$0xff] %v23541_v27  ;;  %v13091_v44 = vpop.f32.mrf.mxu1 }
 0x424   : > { %v23543_v51 = vpop.f32.mrf.mxu0 }
 0x425   : > { %24150 = vst [vmem:[#allocation39_spill] sm:$0xff] %v23543_v51  ;;  %v16892_v21 = vpop.f32.mrf.mxu1 }
 0x426   : > { %v23545_v56 = vpop.f32.mrf.mxu0 }
 0x427   : > { %24151 = vst [vmem:[#allocation32_spill] sm:$0xff] %v23545_v56  ;;  %v23547_v4 = vpop.f32.mrf.mxu1 }
 0x428   : > { %v23551_v8 = vpop.f32.mrf.mxu0 }
 0x429   : > { %v23549_v10 = vpop.f32.mrf.mxu1  ;;  %24152 = vst [vmem:[#allocation27_spill] sm:$0xff] %v23551_v8  ;;  %v12188_v8 = vadd.f32 %v23455_v3, %v23437_v38  ;;  %v12187_v38 = vadd.f32 %v23467_v11, %v23443_v40  ;;  %v12190_v40 = vadd.f32 %v23475_v25, %v23447_v12  ;;  %v12191_v25 = vadd.f32 %v23483_v53, %v23451_v43 }
 0x42a   : > { %v23555_v58 = vpop.f32.mrf.mxu0 }
 0x42b   : > { %v23553_v55 = vpop.f32.mrf.mxu1  ;;  %24154 = vst [vmem:[#allocation20_spill] sm:$0xff] %v23555_v58 }
 0x42c   : > { %24153 = vst [vmem:[#allocation37_spill] sm:$0xff] %v23553_v55  ;;  %v23557_v32 = vpop.f32.mrf.mxu0 }
 0x42d   : > { %24155 = vst [vmem:[#allocation42_spill] sm:$0xff] %v23557_v32  ;;  %v23559_v26 = vpop.f32.mrf.mxu1  ;;  %v12186_v32 = vadd.f32 %v23459_v60, %v23439_v18 }
 0x42e   : > { %24156 = vst [vmem:[#allocation16_spill] sm:$0xff] %v23559_v26  ;;  %v23561_v24 = vpop.f32.mrf.mxu0 }
 0x42f   : > { %24157 = vst [vmem:[#allocation48_spill] sm:$0xff] %v23561_v24  ;;  %v23563_v16 = vpop.f32.mrf.mxu1  ;;  %v12485_v24 = vadd.f32 %v16824_v62, %v12188_v8  ;;  %v12483_v17 = vadd.f32 %v23485_v29, %v12186_v32  ;;  %v12192_v8 = vadd.f32 %v23471_v7, %v23445_v42  ;;  %v12193_v7 = vadd.f32 %v23479_v45, %v23449_v39 }
 0x430   : > { %24158 = vst [vmem:[#allocation40_spill] sm:$0xff] %v23563_v16  ;;  %v16920_v51 = vpop.f32.mrf.mxu0 }
 0x431   : > { %v23565_v6 = vpop.f32.mrf.mxu1  ;;  %v12728_v28 = vadd.f32 %v16856_v35, %v12485_v24 }
 0x432   : > { %v13385_v56 = vpop.f32.mrf.mxu0  ;;  %24159 = vst [vmem:[#allocation22_spill] sm:$0xff] %v23565_v6  ;;  %v12189_v6 = vadd.f32 %v23463_v1, %v23441_v0  ;;  %v12484_v0 = vadd.f32 %v23493_v37, %v12187_v38  ;;  %v12487_v37 = vadd.f32 %v23501_v61, %v12190_v40  ;;  %v24168_v40 = vld [vmem:[#allocation43_spill] sm:$0xff] }
 0x433   : > { %v23567_v27 = vpop.f32.mrf.mxu1  ;;  %v13153_v18 = vadd.f32 %v16888_v22, %v12728_v28  ;;  %v12489_v28 = vadd.f32 %v23497_v5, %v12192_v8  ;;  %v12490_v5 = vadd.f32 %v23505_v2, %v12193_v7  ;;  %v24165_v8 = vld [vmem:[#allocation10_spill] sm:$0xff] }
 0x434   : > { %v16921_v13 = vpop.f32.mrf.mxu0  ;;  %24160 = vst [vmem:[#allocation45_spill] sm:$0xff] %v23567_v27  ;;  %v12486_v3 = vadd.f32 %v23489_v41, %v12189_v6  ;;  %v12727_v41 = vadd.f32 %v12666_v31, %v12484_v0 }
 0x435   : > { %v13450_v29 = vadd.f32 %v16920_v51, %v13153_v18  ;;  %v12732_v6 = vadd.f32 %v23527_v9, %v12489_v28  ;;  %v12196_v9 = vadd.f32 %v23487_v50, %v23453_v36  ;;  %v24163_v18 = vld [vmem:[#allocation15_spill] sm:$0xff]  ;;  %v24169_v28 = vld [vmem:[#allocation21_spill] sm:$0xff] }
 0x436   : > { %v13388_v59 = vpop.f32.mrf.mxu0  ;;  %v12729_v1 = vadd.f32 %v16857_v15, %v12486_v3  ;;  %v13152_v15 = vadd.f32 %v13091_v44, %v12727_v41  ;;  %v12733_v44 = vadd.f32 %v23535_v57, %v12490_v5 }
 0x437   : > { %v13157_v39 = vadd.f32 %v16892_v21, %v12732_v6 }
 0x438   : > { %v13449_v45 = vadd.f32 %v13388_v59, %v13152_v15  ;;  %v12194_v59 = vadd.f32 %v23491_v52, %v23457_v19  ;;  %v13158_v50 = vadd.f32 %v23549_v10, %v12733_v44  ;;  %v24162_v52 = vld [vmem:[#allocation37_spill] sm:$0xff]  ;;  %v24179_v44 = vld [vmem:[#allocation26_spill] sm:$0xff] }
 0x439   : > { %v16924_v58 = vpop.f32.mrf.mxu0  ;;  %v24164_v10 = vld [vmem:[#allocation41_spill] sm:$0xff] }
 0x43a   : > { %v13454_v53 = vadd.f32 %v16924_v58, %v13157_v39  ;;  %v12197_v58 = vadd.f32 %v23495_v63, %v23461_v20  ;;  %v24167_v63 = vld [vmem:[#allocation16_spill] sm:$0xff] }
 0x43b   : > { %v23571_v33 = vpop.f32.mrf.mxu1  ;;  %v13401_v26 = vpop.f32.mrf.mxu0 }
 0x43c   : > { %24161 = vst [vmem:[#allocation30_spill] sm:$0xff] %v23571_v33  ;;  %v12726_v33 = vadd.f32 %v12663_v54, %v12483_v17  ;;  %v13154_v17 = vadd.f32 %v16889_v30, %v12729_v1  ;;  %v12494_v0 = vadd.f32 %v24165_v8, %v12197_v58  ;;  %v24183_v58 = vld [vmem:[#allocation6_spill] sm:$0xff]  ;;  %v24188_v8 = vld [vmem:[#allocation31_spill] sm:$0xff] }
 0x43d   : > { %v23575_v16 = vpop.f32.mrf.mxu1  ;;  %v16925_v27 = vpop.f32.mrf.mxu0 }
 0x43e   : > { %v13151_v32 = vadd.f32 %v13088_v49, %v12726_v33  ;;  %v13451_v22 = vadd.f32 %v16921_v13, %v13154_v17  ;;  %v12488_v13 = vadd.f32 %v23509_v46, %v12191_v25  ;;  %v13455_v3 = vadd.f32 %v16925_v27, %v13158_v50  ;;  %v24175_v25 = vld [vmem:[#allocation18_spill] sm:$0xff] }
 0x43f   : > { %v23580_v55 = vpop.f32.mrf.mxu1  ;;  %v23585_v60 = vpop.f32.mrf.mxu0  ;;  %v12200_v27 = vadd.f32 %v24169_v28, %v24168_v40  ;;  %v24190_v40 = vld [vmem:[#allocation48_spill] sm:$0xff] }
 0x440   : > { %v13448_v35 = vadd.f32 %v13385_v56, %v13151_v32  ;;  %v12730_v56 = vadd.f32 %v23531_v48, %v12487_v37  ;;  %v12493_v48 = vadd.f32 %v23513_v23, %v12196_v9  ;;  %v12731_v36 = vadd.f32 %v23537_v34, %v12488_v13  ;;  %v24166_v32 = vld [vmem:[#allocation46_spill] sm:$0xff]  ;;  %v24172_v37 = vld [vmem:[#allocation40_spill] sm:$0xff] }
 0x441   : > { %v23589_v62 = vpop.f32.mrf.mxu1  ;;  %v23592_v24 = vpop.f32.mrf.mxu0  ;;  %v12497_v5 = vadd.f32 %v24175_v25, %v12200_v27 }
 0x442   : > { %v13155_v43 = vadd.f32 %v23547_v4, %v12730_v56  ;;  %v12491_v4 = vadd.f32 %v23517_v47, %v12194_v59  ;;  %v12736_v19 = vadd.f32 %v23539_v14, %v12493_v48  ;;  %v13156_v23 = vadd.f32 %v24162_v52, %v12731_v36  ;;  %v24176_v56 = vld [vmem:[#allocation32_spill] sm:$0xff]  ;;  %v24181_v48 = vld [vmem:[#allocation27_spill] sm:$0xff]  ;;  %v24182_v36 = vld [vmem:[#allocation45_spill] sm:$0xff] }
 0x443   : > { %v16952_v11 = vpop.f32.mrf.mxu1  ;;  %v13417_v54 = vpop.f32.mrf.mxu0 }
 0x444   : > { %v13651_v42 = vadd.f32 %v16952_v11, %v13450_v29  ;;  %v13452_v46 = vadd.f32 %v13401_v26, %v13155_v43  ;;  %v12195_v26 = vadd.f32 %v24164_v10, %v24163_v18  ;;  %v12734_v20 = vadd.f32 %v24166_v32, %v12491_v4  ;;  %v24170_v11 = vld [vmem:[#allocation23_spill] sm:$0xff]  ;;  %v24180_v43 = vld [vmem:[#allocation25_spill] sm:$0xff]  ;;  %v24189_v32 = vld [vmem:[#allocation42_spill] sm:$0xff] }
 0x445   : > { %v13586_v33 = vpop.f32.mrf.mxu1  ;;  %v16929_v30 = vpop.f32.mrf.mxu0  ;;  %v13161_v47 = vadd.f32 %v24167_v63, %v12736_v19  ;;  %v13453_v29 = vadd.f32 %v23585_v60, %v13156_v23  ;;  %v24174_v60 = vld [vmem:[#allocation24_spill] sm:$0xff] }
 0x446   : > { %15060 = vst [vmem:[%s23335_s20 + $0x90] sm:$0xff] %v13651_v42  ;;  %v13649_v12 = vadd.f32 %v13586_v33, %v13448_v35  ;;  %v12492_v41 = vadd.f32 %v24170_v11, %v12195_v26  ;;  %v24171_v42 = vld [vmem:[#allocation39_spill] sm:$0xff]  ;;  %v13159_v33 = vadd.f32 %v24172_v37, %v12734_v20  ;;  %v24186_v23 = vld [vmem:[#allocation20_spill] sm:$0xff] }
 0x447   : > { %v16953_v31 = vpop.f32.mrf.mxu1  ;;  %v13420_v38 = vpop.f32.mrf.mxu0  ;;  %v12737_v7 = vadd.f32 %v24171_v42, %v12494_v0  ;;  %v13458_v6 = vadd.f32 %v23592_v24, %v13161_v47 }
 0x448   : > { %15058 = vst [vmem:[%s23335_s20 + $0x80] sm:$0xff] %v13649_v12  ;;  %v13652_v61 = vadd.f32 %v16953_v31, %v13451_v22  ;;  %v24173_v22 = vld [vmem:[#allocation19_spill] sm:$0xff]  ;;  %v12735_v39 = vadd.f32 %v24176_v56, %v12492_v41  ;;  %v13456_v9 = vadd.f32 %v13417_v54, %v13159_v33  ;;  %v24184_v54 = vld [vmem:[#allocation38_spill] sm:$0xff] }
 0x449   : > { %v13589_v49 = vpop.f32.mrf.mxu1  ;;  %v16932_v35 = vpop.f32.mrf.mxu0  ;;  %v12198_v12 = vadd.f32 %v24174_v60, %v24173_v22  ;;  %v12199_v4 = vadd.f32 %v24184_v54, %v24183_v58 }
 0x44a   : > { %15061 = vst [vmem:[%s23335_s20 + $0x98] sm:$0xff] %v13652_v61  ;;  %v13650_v2 = vadd.f32 %v13589_v49, %v13449_v45  ;;  %v24177_v45 = vld [vmem:[#allocation22_spill] sm:$0xff]  ;;  %v24178_v49 = vld [vmem:[#allocation28_spill] sm:$0xff]  ;;  %v13160_v50 = vadd.f32 %v24182_v36, %v12735_v39 }
 0x44b   : > { %v16956_v51 = vpop.f32.mrf.mxu1  ;;  %v13162_v61 = vadd.f32 %v24177_v45, %v12737_v7  ;;  %v12201_v24 = vadd.f32 %v24179_v44, %v24178_v49  ;;  %v12496_v0 = vadd.f32 %v24188_v8, %v12199_v4 }
 0x44c   : > { %15059 = vst [vmem:[%s23335_s20 + $0x88] sm:$0xff] %v13650_v2  ;;  %v13655_v21 = vadd.f32 %v16956_v51, %v13454_v53  ;;  %v12495_v53 = vadd.f32 %v24180_v43, %v12198_v12  ;;  %v13433_v2 = vpop.f32.mrf.mxu0  ;;  %v12740_v51 = vadd.f32 %v24181_v48, %v12497_v5  ;;  %v13457_v10 = vadd.f32 %v13420_v38, %v13160_v50 }
 0x44d   : > { %v13602_v57 = vpop.f32.mrf.mxu1  ;;  %v12739_v28 = vadd.f32 %v24190_v40, %v12496_v0 }
 0x44e   : > { %15064 = vst [vmem:[%s23335_s20 + $0xb0] sm:$0xff] %v13655_v21  ;;  %v13653_v34 = vadd.f32 %v13602_v57, %v13452_v46  ;;  %v13459_v46 = vadd.f32 %v16929_v30, %v13162_v61  ;;  %v24185_v57 = vld [vmem:[#allocation35_spill] sm:$0xff]  ;;  %v16933_v30 = vpop.f32.mrf.mxu0 }
 0x44f   : > { %v16957_v1 = vpop.f32.mrf.mxu1  ;;  %v12498_v19 = vadd.f32 %v24185_v57, %v12201_v24  ;;  %v13164_v42 = vadd.f32 %v23589_v62, %v12739_v28 }
 0x450   : > { %15062 = vst [vmem:[%s23335_s20 + $0xa0] sm:$0xff] %v13653_v34  ;;  %v13656_v14 = vadd.f32 %v16957_v1, %v13455_v3  ;;  %v12738_v3 = vadd.f32 %v24186_v23, %v12495_v53  ;;  %v24187_v34 = vld [vmem:[#allocation30_spill] sm:$0xff]  ;;  %v13436_v41 = vpop.f32.mrf.mxu0 }
 0x451   : > { %v13605_v17 = vpop.f32.mrf.mxu1  ;;  %v13165_v18 = vadd.f32 %v24187_v34, %v12740_v51  ;;  %v12741_v20 = vadd.f32 %v24189_v32, %v12498_v19  ;;  %v13461_v37 = vadd.f32 %v13436_v41, %v13164_v42 }
 0x452   : > { %15065 = vst [vmem:[%s23335_s20 + $0xb8] sm:$0xff] %v13656_v14  ;;  %v13654_v15 = vadd.f32 %v13605_v17, %v13453_v29  ;;  %v13163_v63 = vadd.f32 %v23575_v16, %v12738_v3 }
 0x453   : > { %v16960_v31 = vpop.f32.mrf.mxu1  ;;  %v13462_v47 = vadd.f32 %v16932_v35, %v13165_v18  ;;  %v13166_v38 = vadd.f32 %v23580_v55, %v12741_v20 }
 0x454   : > { %15063 = vst [vmem:[%s23335_s20 + $0xa8] sm:$0xff] %v13654_v15  ;;  %v13659_v13 = vadd.f32 %v16960_v31, %v13458_v6  ;;  %v13460_v27 = vadd.f32 %v13433_v2, %v13163_v63 }
 0x455   : > { %v13618_v59 = vpop.f32.mrf.mxu1  ;;  %v13463_v7 = vadd.f32 %v16933_v30, %v13166_v38 }
 0x456   : > { %15068 = vst [vmem:[%s23335_s20 + $0xd0] sm:$0xff] %v13659_v13  ;;  %v13657_v21 = vadd.f32 %v13618_v59, %v13456_v9 }
 0x457   : > { %v16961_v52 = vpop.f32.mrf.mxu1 }
 0x458   : > { %15066 = vst [vmem:[%s23335_s20 + $0xc0] sm:$0xff] %v13657_v21  ;;  %v13660_v26 = vadd.f32 %v16961_v52, %v13459_v46 }
 0x459   : > { %v13621_v1 = vpop.f32.mrf.mxu1 }
 0x45a   : > { %15069 = vst [vmem:[%s23335_s20 + $0xd8] sm:$0xff] %v13660_v26  ;;  %v13658_v29 = vadd.f32 %v13621_v1, %v13457_v10 }
 0x45b   : > { %v16964_v14 = vpop.f32.mrf.mxu1 }
 0x45c   : > { %15067 = vst [vmem:[%s23335_s20 + $0xc8] sm:$0xff] %v13658_v29  ;;  %v13663_v11 = vadd.f32 %v16964_v14, %v13462_v47 }
 0x45d   : > { %v13634_v17 = vpop.f32.mrf.mxu1 }
 0x45e   : > { %15072 = vst [vmem:[%s23335_s20 + $0xf0] sm:$0xff] %v13663_v11  ;;  %v13661_v16 = vadd.f32 %v13634_v17, %v13460_v27 }
 0x45f   : > { %v16965_v35 = vpop.f32.mrf.mxu1 }
 0x460   : > { %15070 = vst [vmem:[%s23335_s20 + $0xe0] sm:$0xff] %v13661_v16  ;;  %v13664_v33 = vadd.f32 %v16965_v35, %v13463_v7 }
 0x461   : > { %v13637_v6 = vpop.f32.mrf.mxu1 }
 0x462   : > { %15073 = vst [vmem:[%s23335_s20 + $0xf8] sm:$0xff] %v13664_v33  ;;  %v13662_v15 = vadd.f32 %v13637_v6, %v13461_v37 }
 0x464   : > { %15071 = vst [vmem:[%s23335_s20 + $0xe8] sm:$0xff] %v13662_v15 }
 0x465 PF: > { %s18_s27 = sadd.s32 1, %s17409_s27  }
 0x466   : > { %p15_p4 = scmp.ge.s32.totalorder %s18_s27, 4  }
 0x468   :  { %17 = sbr.rel (!%p15_p4) target bundleno = 1 (0x1), region = 116 }

</bundles_post_ra>
